<compile_context>
chip_gen: v5e
topology: v5e:2x2
jax: 0.10.0
libtpu: 0.0.40
codegen_flags: <defaults>
</compile_context>

<pallas_src>
import functools

import numpy as np
import jax
import jax.numpy as jnp
from jax.experimental import pallas as pl
from jax.experimental.pallas import tpu as pltpu

# ---------------------------------------------------------------------------
# Scaled-down geometry (module defaults img=256, views=720, det=672 are too big
# for a demo; proportions kept consistent).
# ---------------------------------------------------------------------------
IMG_SIZE = 32
NUM_FULL_VIEWS = 16
DET_COUNT = 64
SOURCE_DISTANCE = 80.0
DET_SPACING = 1.0
POISSON_RATE = 1.0e6
GAUSSIAN_SIGMA = 0.01
SPARSE_VIEWS = 8


# ---------------------------------------------------------------------------
# Host-side geometry (mirrors torch-radon's fan-beam projector, deterministic)
# ---------------------------------------------------------------------------
def get_angles(num_views, start_degree=None, end_degree=None):
    start = start_degree / 180.0 * np.pi if start_degree is not None else 0.0
    end = end_degree / 180.0 * np.pi if end_degree is not None else 2.0 * np.pi
    return np.linspace(start, end, num_views, endpoint=False)


def build_fanbeam_matrix(angles, img_size, det_count, source_distance, det_spacing):
    """Pixel-driven fan-beam system matrix, (num_views*det_count, img_size^2)."""
    n = img_size
    c = (n - 1) / 2.0
    jj, ii = np.meshgrid(np.arange(n), np.arange(n))
    x = (jj - c).ravel().astype(np.float64)
    y = (c - ii).ravel().astype(np.float64)
    num_views = len(angles)
    a_mat = np.zeros((num_views * det_count, n * n), dtype=np.float32)
    dc = (det_count - 1) / 2.0
    pix = np.arange(n * n)
    for v, beta in enumerate(angles):
        cb, sb = np.cos(beta), np.sin(beta)
        t = x * cb + y * sb
        s = -x * sb + y * cb
        u = source_distance * t / (source_distance - s)
        f = u / det_spacing + dc
        i0 = np.floor(f).astype(np.int64)
        w = (f - i0).astype(np.float32)
        for idx, wt in ((i0, 1.0 - w), (i0 + 1, w)):
            valid = (idx >= 0) & (idx < det_count)
            rows = v * det_count + idx[valid]
            cols = pix[valid]
            np.add.at(a_mat, (rows, cols), wt[valid])
    return a_mat


def build_ramlak_matrix(det_count, det_spacing):
    """Spatial-domain Ram-Lak filter as a (det, det) Toeplitz matrix."""
    n = np.arange(-(det_count - 1), det_count)
    h = np.zeros_like(n, dtype=np.float64)
    h[n == 0] = 1.0 / (4.0 * det_spacing ** 2)
    odd = (n % 2) != 0
    h[odd] = -1.0 / (np.pi ** 2 * (n[odd].astype(np.float64) ** 2) * det_spacing ** 2)
    idx = np.arange(det_count)
    H = h[(idx[:, None] - idx[None, :]) + det_count - 1] * det_spacing
    return H.astype(np.float32)


def _round_up(x, m):
    return ((x + m - 1) // m) * m


def _pick_tile(dim_pad, max_tile):
    """Largest multiple-of-128 divisor of dim_pad that is <= max_tile."""
    units = dim_pad // 128
    cap = max(1, min(units, max_tile // 128))
    for d in range(cap, 0, -1):
        if units % d == 0:
            return d * 128
    return 128


# ---------------------------------------------------------------------------
# Pallas matmul: (M, Kp) bf16 @ (Kp, Np) bf16 -> (M, Np) f32
#   grid = (N-tiles [parallel], K-tiles [arbitrary, innermost])
#   x is VMEM-resident across the whole grid (tiny GEMV LHS); w streams by tile;
#   output block accumulated in place across K.
# ---------------------------------------------------------------------------
def matmul_kernel(tk, x_ref, w_ref, o_ref):
    jk = pl.program_id(1)

    @pl.when(jk == 0)
    def _():
        o_ref[...] = jnp.zeros_like(o_ref)

    k0 = pl.multiple_of(jk * tk, 128)
    o_ref[...] += jnp.dot(x_ref[:, pl.ds(k0, tk)], w_ref[...],
                          preferred_element_type=jnp.float32)


def pallas_matmul(x, w, *, tk_max=1024, tn_max=1024):
    m, kp = x.shape
    kp2, npad = w.shape
    assert kp == kp2 and kp % 128 == 0 and npad % 128 == 0
    tk = _pick_tile(kp, tk_max)
    tn = _pick_tile(npad, tn_max)
    # keep >= 2 tiles on the "parallel" N axis so v7x megacore can shard it
    if npad // tn < 2 and npad >= 256:
        tn = _pick_tile(npad, npad // 2)
    grid = (npad // tn, kp // tk)
    return pl.pallas_call(
        functools.partial(matmul_kernel, tk),
        out_shape=jax.ShapeDtypeStruct((m, npad), jnp.float32),
        grid_spec=pltpu.PrefetchScalarGridSpec(
            num_scalar_prefetch=0,
            grid=grid,
            in_specs=[pl.BlockSpec((m, kp), lambda jn, jk: (0, 0)),   # K-resident x
                      pl.BlockSpec((tk, tn), lambda jn, jk: (jk, jn))],
            out_specs=pl.BlockSpec((m, tn), lambda jn, jk: (0, jn))),
        compiler_params=pltpu.CompilerParams(
            dimension_semantics=("parallel", "arbitrary")),
    )(x, w)


# ---------------------------------------------------------------------------
# Noise kernels (noise streamed in; global clamp bounds as SMEM scalars).
# ---------------------------------------------------------------------------
def poisson_noise_kernel(rate, stat_ref, s_ref, n_ref, o_ref, pstat_ref):
    i = pl.program_id(0)
    r = jnp.float32(rate)
    smin = stat_ref[0]
    smax = stat_ref[1]
    safe_max = jnp.maximum(smax, jnp.float32(1e-8))     # guard all-zero sinogram
    s = s_ref[...]
    s_ct = r * jnp.exp(-s / safe_max)
    ct_min = r * jnp.exp(-smax / safe_max)               # == global min of s_ct
    # TODO(synk): torch.poisson has no Pallas equivalent; Gaussian(lam, sqrt(lam))
    # approximation is used (extremely accurate for rate ~ 1e6).
    noisy = jnp.maximum(s_ct + jnp.sqrt(s_ct) * n_ref[...], ct_min)
    out = jnp.clip(-safe_max * jnp.log(noisy / r), smin, smax)
    o_ref[...] = out
    # per-tile stats so the Gaussian stage needs no extra full-sinogram reduction
    pstat_ref[0, i] = jnp.min(out)
    pstat_ref[1, i] = jnp.max(out)


def gaussian_noise_kernel(sigma, stat_ref, s_ref, n_ref, o_ref):
    o_ref[...] = jnp.clip(s_ref[...] + jnp.float32(sigma) * n_ref[...],
                          stat_ref[0], stat_ref[1])


def _noise_view(total):
    """Pick a sublane/lane-dense (rows, cols) view of the flattened sinogram."""
    for c in (512, 256, 128):
        if total % c == 0 and (total // c) % 8 == 0:
            return total // c, c
    for c in (512, 256, 128):
        if total % c == 0:
            return total // c, c
    return None


def _pick_row_tile(rows, cols):
    max_rows = max(8, (1 << 18) // cols)          # ~1 MiB f32 tiles
    if rows <= max_rows:
        return rows
    if rows % 8 == 0:
        best = 8
        d = 8
        while d <= max_rows:
            if rows % d == 0:
                best = d
            d += 8
        return best
    return rows   # TODO(synk): odd row counts fall back to one full-array block


def _poisson_stage(s2d, noise, stat, rate, tr):
    rows, cols = s2d.shape
    n_tiles = rows // tr
    return pl.pallas_call(
        functools.partial(poisson_noise_kernel, float(rate)),
        out_shape=(jax.ShapeDtypeStruct((rows, cols), jnp.float32),
                   jax.ShapeDtypeStruct((2, n_tiles), jnp.float32)),
        grid=(n_tiles,),
        in_specs=[pl.BlockSpec(memory_space=pltpu.MemorySpace.SMEM),   # [smin, smax]
                  pl.BlockSpec((tr, cols), lambda i: (i, 0)),
                  pl.BlockSpec((tr, cols), lambda i: (i, 0))],
        out_specs=(pl.BlockSpec((tr, cols), lambda i: (i, 0)),
                   pl.BlockSpec(memory_space=pltpu.MemorySpace.SMEM)), # per-tile stats
        compiler_params=pltpu.CompilerParams(dimension_semantics=("arbitrary",)),
    )(stat, s2d, noise)


def _gaussian_stage(s2d, noise, stat, sigma, tr):
    rows, cols = s2d.shape
    return pl.pallas_call(
        functools.partial(gaussian_noise_kernel, float(sigma)),
        out_shape=jax.ShapeDtypeStruct((rows, cols), jnp.float32),
        grid=(rows // tr,),
        in_specs=[pl.BlockSpec(memory_space=pltpu.MemorySpace.SMEM),
                  pl.BlockSpec((tr, cols), lambda i: (i, 0)),
                  pl.BlockSpec((tr, cols), lambda i: (i, 0))],
        out_specs=pl.BlockSpec((tr, cols), lambda i: (i, 0)),
        compiler_params=pltpu.CompilerParams(dimension_semantics=("parallel",)),
    )(stat, s2d, noise)


def _apply_noise(sino_flat, rate, sigma, key_p, key_g):
    """Poisson (Gaussian-approx) then Gaussian noise with exact torch clamp rules."""
    b, n = sino_flat.shape
    total = b * n
    view = _noise_view(total)
    rows, cols = view if view is not None else (b, n)
    tr = _pick_row_tile(rows, cols)
    s2d = sino_flat.reshape(rows, cols).astype(jnp.float32)

    if rate > 0:
        smin = jnp.min(s2d)
        smax = jnp.max(s2d)
        stat = jnp.stack([smin, smax]).astype(jnp.float32)
        # TODO(synk): in-kernel pltpu PRNG would avoid this HBM noise array but has
        # no interpret/CPU lowering; noise is drawn with jax.random instead.
        noise_p = jax.random.normal(key_p, (rows, cols), jnp.float32)
        s2d, pstat = _poisson_stage(s2d, noise_p, stat, rate, tr)
        smin_g = jnp.min(pstat[0])
        smax_g = jnp.max(pstat[1])
    else:
        smin_g = jnp.min(s2d)
        smax_g = jnp.max(s2d)

    if sigma > 0:
        stat_g = jnp.stack([smin_g, smax_g]).astype(jnp.float32)
        noise_g = jax.random.normal(key_g, (rows, cols), jnp.float32)
        s2d = _gaussian_stage(s2d, noise_g, stat_g, sigma, tr)

    return s2d.reshape(b, n)


# ---------------------------------------------------------------------------
# Jitted end-to-end pipeline: fused fp -> noise -> fbp
# ---------------------------------------------------------------------------
@functools.partial(jax.jit, static_argnames=("geom",))
def _pipeline(mu_ct, key, a_fp_cat, a_bp_full, a_bp_in, geom):
    img_size, det, v_full, v_in, rate, sigma = geom
    b = mu_ct.shape[0]
    n2 = img_size * img_size
    n_full = v_full * det
    n_in = v_in * det

    x = mu_ct.reshape(b, n2).astype(jnp.bfloat16)
    kp = a_fp_cat.shape[0]
    if kp != n2:
        x = jnp.pad(x, ((0, 0), (0, kp - n2)))
    # one fused forward projection for both angle sets (shared x, one A stream)
    sino_cat = pallas_matmul(x, a_fp_cat)
    target_sino = sino_cat[:, :n_full]
    input_sino = sino_cat[:, n_full:n_full + n_in]

    k1, k2, k3, k4 = jax.random.split(key, 4)
    target_sino = _apply_noise(target_sino, rate, sigma, k1, k2)
    input_sino = _apply_noise(input_sino, rate, sigma, k3, k4)

    def _bp(sino, a_bp):
        s = sino.astype(jnp.bfloat16)
        kpb = a_bp.shape[0]
        if s.shape[1] != kpb:
            s = jnp.pad(s, ((0, 0), (0, kpb - s.shape[1])))
        rec = pallas_matmul(s, a_bp)[:, :n2]
        return rec.reshape(b, 1, img_size, img_size)

    target_mu = _bp(target_sino, a_bp_full)
    input_mu = _bp(input_sino, a_bp_in)
    return (input_mu, target_mu,
            input_sino.reshape(b, 1, v_in, det),
            target_sino.reshape(b, 1, v_full, det))


# ---------------------------------------------------------------------------
# BasicWrapper equivalent
# ---------------------------------------------------------------------------
class BasicWrapperPallas:
    def __init__(self, img_size=IMG_SIZE, num_full_views=NUM_FULL_VIEWS,
                 simul_poisson_rate=POISSON_RATE, simul_gaussian_rate=GAUSSIAN_SIGMA):
        self.img_size = img_size
        self.num_full_views = num_full_views
        self.det_count = DET_COUNT
        self.source_distance = SOURCE_DISTANCE
        self.simul_poisson_rate = simul_poisson_rate
        self.simul_gaussian_rate = simul_gaussian_rate
        self.full_angles = get_angles(num_full_views)
        self._H = build_ramlak_matrix(self.det_count, DET_SPACING)
        self._host_cache = {}
        self._op_cache = {}
        self._cat_cache = {}
        self._get_ops(num_full_views)   # build full-view operators eagerly

    # ---- host matrices (f32, built once per angle set) ---------------------
    def _host_mats(self, num_views):
        mats = self._host_cache.get(num_views)
        if mats is None:
            angles = get_angles(num_views)
            A = build_fanbeam_matrix(angles, self.img_size, self.det_count,
                                     self.source_distance, DET_SPACING)
            det = self.det_count
            # Fold the Ram-Lak filter (I_V (x) H) and pi/(2V) fbp scale into A_bp.
            A_bp = np.empty_like(A)
            for v in range(num_views):
                blk = slice(v * det, (v + 1) * det)
                A_bp[blk] = self._H @ A[blk]
            A_bp *= np.float32(np.pi / (2.0 * num_views))
            mats = (np.ascontiguousarray(A.T), A_bp)      # fp: (N^2, V*det); bp: (V*det, N^2)
            self._host_cache[num_views] = mats
        return mats

    @staticmethod
    def _pad_cast(mat):
        k, n = mat.shape
        kp, npad = _round_up(k, 128), _round_up(n, 128)
        if (kp, npad) != (k, n):
            buf = np.zeros((kp, npad), np.float32)
            buf[:k, :n] = mat
            mat = buf
        # TODO(synk): int8 (v5e/v6e) / fp8 (v7x) weight quantization would halve the
        # dominant HBM stream but needs accuracy validation vs the f32 reference.
        return jnp.asarray(mat, dtype=jnp.bfloat16)

    def _get_ops(self, num_views):
        ops = self._op_cache.get(num_views)
        if ops is None:
            A_fp, A_bp = self._host_mats(num_views)
            ops = {"A_fp": self._pad_cast(A_fp),
                   "A_bp": self._pad_cast(A_bp),
                   "n_sino": A_fp.shape[1]}
            self._op_cache[num_views] = ops
        return ops

    def _get_cat_fp(self, num_views):
        ent = self._cat_cache.get(num_views)
        if ent is None:
            A_full, _ = self._host_mats(self.num_full_views)
            A_in, _ = self._host_mats(num_views)
            cat = np.concatenate([A_full, A_in], axis=1)
            ent = (self._pad_cast(cat), A_full.shape[1], A_in.shape[1])
            self._cat_cache[num_views] = ent
        return ent

    # ---- radon forward / filtered backprojection ---------------------------
    def fp(self, ct_image, num_views=None):
        num_views = self.num_full_views if num_views is None else int(num_views)
        ops = self._get_ops(num_views)
        b = ct_image.shape[0]
        x = ct_image.reshape(b, -1).astype(jnp.bfloat16)
        kp = ops["A_fp"].shape[0]
        if x.shape[1] != kp:
            x = jnp.pad(x, ((0, 0), (0, kp - x.shape[1])))
        sino = pallas_matmul(x, ops["A_fp"])[:, :ops["n_sino"]]
        return sino.reshape(b, 1, num_views, self.det_count)

    def fbp(self, sinogram, num_views=None):
        b, _, v, d = sinogram.shape
        num_views = v if num_views is None else int(num_views)
        ops = self._get_ops(num_views)
        flat = sinogram.reshape(b, v * d).astype(jnp.bfloat16)
        kp = ops["A_bp"].shape[0]
        if flat.shape[1] != kp:
            flat = jnp.pad(flat, ((0, 0), (0, kp - flat.shape[1])))
        n2 = self.img_size * self.img_size
        rec = pallas_matmul(flat, ops["A_bp"])[:, :n2]
        return rec.reshape(b, 1, self.img_size, self.img_size)

    # ---- noise (convenience, eager) -----------------------------------------
    def add_poisson_noise_to_sinogram(self, sino, noise_rate, key):
        if noise_rate <= 0:
            return sino
        b, _, v, d = sino.shape
        out = _apply_noise(sino.reshape(b, v * d), float(noise_rate), 0.0, key, key)
        return out.reshape(b, 1, v, d)

    def add_gaussian_noise_to_sinogram(self, sino, sigma, key):
        if sigma <= 0:
            return sino
        b, _, v, d = sino.shape
        out = _apply_noise(sino.reshape(b, v * d), 0.0, float(sigma), key, key)
        return out.reshape(b, 1, v, d)

    # ---- sparse-view input/target generation (task='sparse_view') ----------
    def generate_input_target_mu(self, mu_ct, num_views, key, return_sinogram=False):
        num_views = int(num_views)
        a_fp_cat, _, _ = self._get_cat_fp(num_views)
        ops_full = self._get_ops(self.num_full_views)
        ops_in = self._get_ops(num_views)
        geom = (self.img_size, self.det_count, self.num_full_views, num_views,
                float(self.simul_poisson_rate), float(self.simul_gaussian_rate))
        input_mu, target_mu, input_sino, target_sino = _pipeline(
            mu_ct, key, a_fp_cat, ops_full["A_bp"], ops_in["A_bp"], geom=geom)
        if return_sinogram:
            return input_mu, target_mu, input_sino, target_sino
        return input_mu, target_mu


# ---------------------------------------------------------------------------
if __name__ == "__main__":
    key = jax.random.PRNGKey(0)
    k_img, k_noise = jax.random.split(key)
    # mu_ct: NCHW (B, 1, H, W), non-negative attenuation values
    mu_ct = jax.random.uniform(k_img, (2, 1, IMG_SIZE, IMG_SIZE), dtype=jnp.float32)

    wrapper = BasicWrapperPallas()
    input_mu, target_mu = wrapper.generate_input_target_mu(mu_ct, SPARSE_VIEWS, k_noise)

    jax.block_until_ready((input_mu, target_mu))
    assert input_mu.shape == (2, 1, IMG_SIZE, IMG_SIZE)
    assert target_mu.shape == (2, 1, IMG_SIZE, IMG_SIZE)
    assert bool(jnp.all(jnp.isfinite(input_mu))) and bool(jnp.all(jnp.isfinite(target_mu)))
    print("KERNEL_OK")
</pallas_src>

<mosaic_0001>
module attributes {stable_mosaic.version = 11 : i64} {
  func.func @matmul_kernel(%arg0: i32, %arg1: i32, %arg2: memref<2x1024xbf16, #tpu.memory_space<vmem>>, %arg3: memref<1024x768xbf16, #tpu.memory_space<vmem>>, %arg4: memref<2x768xf32, #tpu.memory_space<vmem>>) attributes {dimension_semantics = [#tpu.dimension_semantics<parallel>, #tpu.dimension_semantics<arbitrary>], iteration_bounds = array<i64: 2, 1>, scalar_prefetch = 0 : i64, scratch_operands = 0 : i64, tpu.core_type = #tpu.core_type<tc>, window_params = [{pipeline_mode = #tpu.pipeline_mode<synchronous>, transform_indices = @transform_0, window_bounds = array<i64: 2, 1024>}, {transform_indices = @transform_1, window_bounds = array<i64: 1024, 768>}, {transform_indices = @transform_2, window_bounds = array<i64: 2, 768>}]} {
    %c0_i32 = arith.constant 0 : i32
    %0 = arith.cmpi eq, %arg1, %c0_i32 : i32
    %1 = arith.extui %0 : i1 to i32
    %c0_i32_0 = arith.constant 0 : i32
    %2 = arith.cmpi ne, %1, %c0_i32_0 : i32
    scf.if %2 {
      %cst_7 = arith.constant 0.000000e+00 : f32
      %12 = vector.broadcast %cst_7 : f32 to vector<2x768xf32>
      %c0_8 = arith.constant 0 : index
      %c0_9 = arith.constant 0 : index
      %13 = vector.load %arg4[%c0_8, %c0_9] : memref<2x768xf32, #tpu.memory_space<vmem>>, vector<2x768xf32>
      tpu.vector_store %arg4[%c0_8, %c0_9], %12 {strides = array<i32>} : memref<2x768xf32, #tpu.memory_space<vmem>>, vector<2x768xf32>,
    } else {
    }
    %c1024_i32 = arith.constant 1024 : i32
    %3 = arith.muli %arg1, %c1024_i32 : i32
    %4 = tpu.assume_multiple %3, 128 : i32
    %c0 = arith.constant 0 : index
    %c0_1 = arith.constant 0 : index
    %5 = vector.load %arg4[%c0, %c0_1] : memref<2x768xf32, #tpu.memory_space<vmem>>, vector<2x768xf32>
    %c0_2 = arith.constant 0 : index
    %6 = arith.index_cast %4 : i32 to index
    %7 = vector.load %arg2[%c0_2, %6] : memref<2x1024xbf16, #tpu.memory_space<vmem>>, vector<2x1024xbf16>
    %c0_3 = arith.constant 0 : index
    %c0_4 = arith.constant 0 : index
    %8 = vector.load %arg3[%c0_3, %c0_4] : memref<1024x768xbf16, #tpu.memory_space<vmem>>, vector<1024x768xbf16>
    %cst = arith.constant dense<0.000000e+00> : vector<2x768xf32>
    %9 = tpu.matmul %7, %8, %cst {dimension_numbers = #tpu.dot_dimension_numbers<[1], [0], [0], [1], [0, 0, 1, 1], [], []>} : vector<2x1024xbf16>, vector<1024x768xbf16>, vector<2x768xf32> -> vector<2x768xf32>
    %10 = arith.addf %5, %9 : vector<2x768xf32>
    %c0_5 = arith.constant 0 : index
    %c0_6 = arith.constant 0 : index
    %11 = vector.load %arg4[%c0_5, %c0_6] : memref<2x768xf32, #tpu.memory_space<vmem>>, vector<2x768xf32>
    tpu.vector_store %arg4[%c0_5, %c0_6], %10 {strides = array<i32>} : memref<2x768xf32, #tpu.memory_space<vmem>>, vector<2x768xf32>,
    return
  }
  func.func @transform_0(%arg0: i32, %arg1: i32) -> (i32, i32) {
    %c0_i32 = arith.constant 0 : i32
    %c0_i32_0 = arith.constant 0 : i32
    %c0_i32_1 = arith.constant 0 : i32
    return %c0_i32, %c0_i32_0 : i32, i32
  }
  func.func @transform_1(%arg0: i32, %arg1: i32) -> (i32, i32) {
    %c0_i32 = arith.constant 0 : i32
    return %arg1, %arg0 : i32, i32
  }
  func.func @transform_2(%arg0: i32, %arg1: i32) -> (i32, i32) {
    %c0_i32 = arith.constant 0 : i32
    %c0_i32_0 = arith.constant 0 : i32
    return %c0_i32, %arg0 : i32, i32
  }
}

module attributes {stable_mosaic.version = 11 : i64} {
  func.func @poisson_noise_kernel(%arg0: i32, %arg1: memref<2xf32, #tpu.memory_space<smem>>, %arg2: memref<8x256xf32, #tpu.memory_space<vmem>>, %arg3: memref<8x256xf32, #tpu.memory_space<vmem>>, %arg4: memref<8x256xf32, #tpu.memory_space<vmem>>, %arg5: memref<2x1xf32, #tpu.memory_space<smem>>) attributes {dimension_semantics = [#tpu.dimension_semantics<arbitrary>], iteration_bounds = array<i64: 1>, scalar_prefetch = 0 : i64, scratch_operands = 0 : i64, tpu.core_type = #tpu.core_type<tc>, window_params = [{transform_indices = @transform_0, window_bounds = array<i64: 2>}, {transform_indices = @transform_1, window_bounds = array<i64: 8, 256>}, {transform_indices = @transform_2, window_bounds = array<i64: 8, 256>}, {transform_indices = @transform_3, window_bounds = array<i64: 8, 256>}, {transform_indices = @transform_4, window_bounds = array<i64: 2, 1>}]} {
    %c0 = arith.constant 0 : index
    %0 = memref.load %arg1[%c0] : memref<2xf32, #tpu.memory_space<smem>>
    %c1 = arith.constant 1 : index
    %1 = memref.load %arg1[%c1] : memref<2xf32, #tpu.memory_space<smem>>
    %cst = arith.constant 9.99999993E-9 : f32
    %2 = arith.maximumf %1, %cst : f32
    %c0_0 = arith.constant 0 : index
    %c0_1 = arith.constant 0 : index
    %3 = vector.load %arg2[%c0_0, %c0_1] : memref<8x256xf32, #tpu.memory_space<vmem>>, vector<8x256xf32>
    %cst_2 = arith.constant 0.000000e+00 : f32
    %4 = vector.broadcast %cst_2 : f32 to vector<8x256xf32>
    %5 = arith.subf %4, %3 : vector<8x256xf32>
    %6 = vector.broadcast %2 : f32 to vector<8x256xf32>
    %7 = arith.divf %5, %6 : vector<8x256xf32>
    %8 = math.exp %7 : vector<8x256xf32>
    %cst_3 = arith.constant 1.000000e+06 : f32
    %9 = vector.broadcast %cst_3 : f32 to vector<8x256xf32>
    %10 = arith.mulf %9, %8 : vector<8x256xf32>
    %cst_4 = arith.constant 0.000000e+00 : f32
    %11 = arith.subf %cst_4, %1 : f32
    %12 = arith.divf %11, %2 : f32
    %13 = math.exp %12 : f32
    %cst_5 = arith.constant 1.000000e+06 : f32
    %14 = arith.mulf %cst_5, %13 : f32
    %15 = math.sqrt %10 : vector<8x256xf32>
    %c0_6 = arith.constant 0 : index
    %c0_7 = arith.constant 0 : index
    %16 = vector.load %arg3[%c0_6, %c0_7] : memref<8x256xf32, #tpu.memory_space<vmem>>, vector<8x256xf32>
    %17 = arith.mulf %15, %16 : vector<8x256xf32>
    %18 = arith.addf %10, %17 : vector<8x256xf32>
    %19 = vector.broadcast %14 : f32 to vector<8x256xf32>
    %20 = arith.maximumf %18, %19 : vector<8x256xf32>
    %cst_8 = arith.constant 0.000000e+00 : f32
    %21 = arith.subf %cst_8, %2 : f32
    %cst_9 = arith.constant 1.000000e+06 : f32
    %22 = vector.broadcast %cst_9 : f32 to vector<8x256xf32>
    %23 = arith.divf %20, %22 : vector<8x256xf32>
    %24 = math.log %23 : vector<8x256xf32>
    %25 = vector.broadcast %21 : f32 to vector<8x256xf32>
    %26 = arith.mulf %25, %24 : vector<8x256xf32>
    %27 = vector.broadcast %0 : f32 to vector<8x256xf32>
    %28 = arith.maximumf %27, %26 : vector<8x256xf32>
    %29 = vector.broadcast %1 : f32 to vector<8x256xf32>
    %30 = arith.minimumf %29, %28 : vector<8x256xf32>
    %c0_10 = arith.constant 0 : index
    %c0_11 = arith.constant 0 : index
    %31 = vector.load %arg4[%c0_10, %c0_11] : memref<8x256xf32, #tpu.memory_space<vmem>>, vector<8x256xf32>
    tpu.vector_store %arg4[%c0_10, %c0_11], %30 {strides = array<i32>} : memref<8x256xf32, #tpu.memory_space<vmem>>, vector<8x256xf32>,
    %32 = vector.shape_cast %30 : vector<8x256xf32> to vector<1x8x256xf32>
    %cst_12 = arith.constant dense<0x7F800000> : vector<1xf32>
    %33 = vector.multi_reduction <minimumf>, %32, %cst_12 [1, 2] : vector<1x8x256xf32> to vector<1xf32>
    %34 = vector.shape_cast %33 : vector<1xf32> to vector<1x1x1xf32>
    %35 = vector.extract %34[0, 0, 0] : f32 from vector<1x1x1xf32>
    %c0_13 = arith.constant 0 : index
    %36 = arith.index_cast %arg0 : i32 to index
    %37 = memref.load %arg5[%c0_13, %36] : memref<2x1xf32, #tpu.memory_space<smem>>
    memref.store %35, %arg5[%c0_13, %36] : memref<2x1xf32, #tpu.memory_space<smem>>
    %38 = vector.shape_cast %30 : vector<8x256xf32> to vector<1x8x256xf32>
    %cst_14 = arith.constant dense<0xFF800000> : vector<1xf32>
    %39 = vector.multi_reduction <maximumf>, %38, %cst_14 [1, 2] : vector<1x8x256xf32> to vector<1xf32>
    %40 = vector.shape_cast %39 : vector<1xf32> to vector<1x1x1xf32>
    %41 = vector.extract %40[0, 0, 0] : f32 from vector<1x1x1xf32>
    %c1_15 = arith.constant 1 : index
    %42 = arith.index_cast %arg0 : i32 to index
    %43 = memref.load %arg5[%c1_15, %42] : memref<2x1xf32, #tpu.memory_space<smem>>
    memref.store %41, %arg5[%c1_15, %42] : memref<2x1xf32, #tpu.memory_space<smem>>
    return
  }
  func.func @transform_0(%arg0: i32) -> i32 {
    %c0_i32 = arith.constant 0 : i32
    %c0_i32_0 = arith.constant 0 : i32
    return %c0_i32 : i32
  }
  func.func @transform_1(%arg0: i32) -> (i32, i32) {
    %c0_i32 = arith.constant 0 : i32
    %c0_i32_0 = arith.constant 0 : i32
    return %arg0, %c0_i32 : i32, i32
  }
  func.func @transform_2(%arg0: i32) -> (i32, i32) {
    %c0_i32 = arith.constant 0 : i32
    %c0_i32_0 = arith.constant 0 : i32
    return %arg0, %c0_i32 : i32, i32
  }
  func.func @transform_3(%arg0: i32) -> (i32, i32) {
    %c0_i32 = arith.constant 0 : i32
    %c0_i32_0 = arith.constant 0 : i32
    return %arg0, %c0_i32 : i32, i32
  }
  func.func @transform_4(%arg0: i32) -> (i32, i32) {
    %c0_i32 = arith.constant 0 : i32
    %c0_i32_0 = arith.constant 0 : i32
    %c0_i32_1 = arith.constant 0 : i32
    return %c0_i32, %c0_i32_0 : i32, i32
  }
}

module attributes {stable_mosaic.version = 11 : i64} {
  func.func @gaussian_noise_kernel(%arg0: i32, %arg1: memref<2xf32, #tpu.memory_space<smem>>, %arg2: memref<8x256xf32, #tpu.memory_space<vmem>>, %arg3: memref<8x256xf32, #tpu.memory_space<vmem>>, %arg4: memref<8x256xf32, #tpu.memory_space<vmem>>) attributes {dimension_semantics = [#tpu.dimension_semantics<parallel>], iteration_bounds = array<i64: 1>, scalar_prefetch = 0 : i64, scratch_operands = 0 : i64, tpu.core_type = #tpu.core_type<tc>, window_params = [{transform_indices = @transform_0, window_bounds = array<i64: 2>}, {transform_indices = @transform_1, window_bounds = array<i64: 8, 256>}, {transform_indices = @transform_2, window_bounds = array<i64: 8, 256>}, {transform_indices = @transform_3, window_bounds = array<i64: 8, 256>}]} {
    %c0 = arith.constant 0 : index
    %c0_0 = arith.constant 0 : index
    %0 = vector.load %arg2[%c0, %c0_0] : memref<8x256xf32, #tpu.memory_space<vmem>>, vector<8x256xf32>
    %c0_1 = arith.constant 0 : index
    %c0_2 = arith.constant 0 : index
    %1 = vector.load %arg3[%c0_1, %c0_2] : memref<8x256xf32, #tpu.memory_space<vmem>>, vector<8x256xf32>
    %cst = arith.constant 0.00999999977 : f32
    %2 = vector.broadcast %cst : f32 to vector<8x256xf32>
    %3 = arith.mulf %2, %1 : vector<8x256xf32>
    %4 = arith.addf %0, %3 : vector<8x256xf32>
    %c0_3 = arith.constant 0 : index
    %5 = memref.load %arg1[%c0_3] : memref<2xf32, #tpu.memory_space<smem>>
    %c1 = arith.constant 1 : index
    %6 = memref.load %arg1[%c1] : memref<2xf32, #tpu.memory_space<smem>>
    %7 = vector.broadcast %5 : f32 to vector<8x256xf32>
    %8 = arith.maximumf %7, %4 : vector<8x256xf32>
    %9 = vector.broadcast %6 : f32 to vector<8x256xf32>
    %10 = arith.minimumf %9, %8 : vector<8x256xf32>
    %c0_4 = arith.constant 0 : index
    %c0_5 = arith.constant 0 : index
    %11 = vector.load %arg4[%c0_4, %c0_5] : memref<8x256xf32, #tpu.memory_space<vmem>>, vector<8x256xf32>
    tpu.vector_store %arg4[%c0_4, %c0_5], %10 {strides = array<i32>} : memref<8x256xf32, #tpu.memory_space<vmem>>, vector<8x256xf32>,
    return
  }
  func.func @transform_0(%arg0: i32) -> i32 {
    %c0_i32 = arith.constant 0 : i32
    %c0_i32_0 = arith.constant 0 : i32
    return %c0_i32 : i32
  }
  func.func @transform_1(%arg0: i32) -> (i32, i32) {
    %c0_i32 = arith.constant 0 : i32
    %c0_i32_0 = arith.constant 0 : i32
    return %arg0, %c0_i32 : i32, i32
  }
  func.func @transform_2(%arg0: i32) -> (i32, i32) {
    %c0_i32 = arith.constant 0 : i32
    %c0_i32_0 = arith.constant 0 : i32
    return %arg0, %c0_i32 : i32, i32
  }
  func.func @transform_3(%arg0: i32) -> (i32, i32) {
    %c0_i32 = arith.constant 0 : i32
    %c0_i32_0 = arith.constant 0 : i32
    return %arg0, %c0_i32 : i32, i32
  }
}

module attributes {stable_mosaic.version = 11 : i64} {
  func.func @matmul_kernel(%arg0: i32, %arg1: i32, %arg2: memref<2x1024xbf16, #tpu.memory_space<vmem>>, %arg3: memref<1024x512xbf16, #tpu.memory_space<vmem>>, %arg4: memref<2x512xf32, #tpu.memory_space<vmem>>) attributes {dimension_semantics = [#tpu.dimension_semantics<parallel>, #tpu.dimension_semantics<arbitrary>], iteration_bounds = array<i64: 2, 1>, scalar_prefetch = 0 : i64, scratch_operands = 0 : i64, tpu.core_type = #tpu.core_type<tc>, window_params = [{pipeline_mode = #tpu.pipeline_mode<synchronous>, transform_indices = @transform_0, window_bounds = array<i64: 2, 1024>}, {transform_indices = @transform_1, window_bounds = array<i64: 1024, 512>}, {transform_indices = @transform_2, window_bounds = array<i64: 2, 512>}]} {
    %c0_i32 = arith.constant 0 : i32
    %0 = arith.cmpi eq, %arg1, %c0_i32 : i32
    %1 = arith.extui %0 : i1 to i32
    %c0_i32_0 = arith.constant 0 : i32
    %2 = arith.cmpi ne, %1, %c0_i32_0 : i32
    scf.if %2 {
      %cst_7 = arith.constant 0.000000e+00 : f32
      %12 = vector.broadcast %cst_7 : f32 to vector<2x512xf32>
      %c0_8 = arith.constant 0 : index
      %c0_9 = arith.constant 0 : index
      %13 = vector.load %arg4[%c0_8, %c0_9] : memref<2x512xf32, #tpu.memory_space<vmem>>, vector<2x512xf32>
      tpu.vector_store %arg4[%c0_8, %c0_9], %12 {strides = array<i32>} : memref<2x512xf32, #tpu.memory_space<vmem>>, vector<2x512xf32>,
    } else {
    }
    %c1024_i32 = arith.constant 1024 : i32
    %3 = arith.muli %arg1, %c1024_i32 : i32
    %4 = tpu.assume_multiple %3, 128 : i32
    %c0 = arith.constant 0 : index
    %c0_1 = arith.constant 0 : index
    %5 = vector.load %arg4[%c0, %c0_1] : memref<2x512xf32, #tpu.memory_space<vmem>>, vector<2x512xf32>
    %c0_2 = arith.constant 0 : index
    %6 = arith.index_cast %4 : i32 to index
    %7 = vector.load %arg2[%c0_2, %6] : memref<2x1024xbf16, #tpu.memory_space<vmem>>, vector<2x1024xbf16>
    %c0_3 = arith.constant 0 : index
    %c0_4 = arith.constant 0 : index
    %8 = vector.load %arg3[%c0_3, %c0_4] : memref<1024x512xbf16, #tpu.memory_space<vmem>>, vector<1024x512xbf16>
    %cst = arith.constant dense<0.000000e+00> : vector<2x512xf32>
    %9 = tpu.matmul %7, %8, %cst {dimension_numbers = #tpu.dot_dimension_numbers<[1], [0], [0], [1], [0, 0, 1, 1], [], []>} : vector<2x1024xbf16>, vector<1024x512xbf16>, vector<2x512xf32> -> vector<2x512xf32>
    %10 = arith.addf %5, %9 : vector<2x512xf32>
    %c0_5 = arith.constant 0 : index
    %c0_6 = arith.constant 0 : index
    %11 = vector.load %arg4[%c0_5, %c0_6] : memref<2x512xf32, #tpu.memory_space<vmem>>, vector<2x512xf32>
    tpu.vector_store %arg4[%c0_5, %c0_6], %10 {strides = array<i32>} : memref<2x512xf32, #tpu.memory_space<vmem>>, vector<2x512xf32>,
    return
  }
  func.func @transform_0(%arg0: i32, %arg1: i32) -> (i32, i32) {
    %c0_i32 = arith.constant 0 : i32
    %c0_i32_0 = arith.constant 0 : i32
    %c0_i32_1 = arith.constant 0 : i32
    return %c0_i32, %c0_i32_0 : i32, i32
  }
  func.func @transform_1(%arg0: i32, %arg1: i32) -> (i32, i32) {
    %c0_i32 = arith.constant 0 : i32
    return %arg1, %arg0 : i32, i32
  }
  func.func @transform_2(%arg0: i32, %arg1: i32) -> (i32, i32) {
    %c0_i32 = arith.constant 0 : i32
    %c0_i32_0 = arith.constant 0 : i32
    return %c0_i32, %arg0 : i32, i32
  }
}

module attributes {stable_mosaic.version = 11 : i64} {
  func.func @poisson_noise_kernel(%arg0: i32, %arg1: memref<2xf32, #tpu.memory_space<smem>>, %arg2: memref<8x128xf32, #tpu.memory_space<vmem>>, %arg3: memref<8x128xf32, #tpu.memory_space<vmem>>, %arg4: memref<8x128xf32, #tpu.memory_space<vmem>>, %arg5: memref<2x1xf32, #tpu.memory_space<smem>>) attributes {dimension_semantics = [#tpu.dimension_semantics<arbitrary>], iteration_bounds = array<i64: 1>, scalar_prefetch = 0 : i64, scratch_operands = 0 : i64, tpu.core_type = #tpu.core_type<tc>, window_params = [{transform_indices = @transform_0, window_bounds = array<i64: 2>}, {transform_indices = @transform_1, window_bounds = array<i64: 8, 128>}, {transform_indices = @transform_2, window_bounds = array<i64: 8, 128>}, {transform_indices = @transform_3, window_bounds = array<i64: 8, 128>}, {transform_indices = @transform_4, window_bounds = array<i64: 2, 1>}]} {
    %c0 = arith.constant 0 : index
    %0 = memref.load %arg1[%c0] : memref<2xf32, #tpu.memory_space<smem>>
    %c1 = arith.constant 1 : index
    %1 = memref.load %arg1[%c1] : memref<2xf32, #tpu.memory_space<smem>>
    %cst = arith.constant 9.99999993E-9 : f32
    %2 = arith.maximumf %1, %cst : f32
    %c0_0 = arith.constant 0 : index
    %c0_1 = arith.constant 0 : index
    %3 = vector.load %arg2[%c0_0, %c0_1] : memref<8x128xf32, #tpu.memory_space<vmem>>, vector<8x128xf32>
    %cst_2 = arith.constant 0.000000e+00 : f32
    %4 = vector.broadcast %cst_2 : f32 to vector<8x128xf32>
    %5 = arith.subf %4, %3 : vector<8x128xf32>
    %6 = vector.broadcast %2 : f32 to vector<8x128xf32>
    %7 = arith.divf %5, %6 : vector<8x128xf32>
    %8 = math.exp %7 : vector<8x128xf32>
    %cst_3 = arith.constant 1.000000e+06 : f32
    %9 = vector.broadcast %cst_3 : f32 to vector<8x128xf32>
    %10 = arith.mulf %9, %8 : vector<8x128xf32>
    %cst_4 = arith.constant 0.000000e+00 : f32
    %11 = arith.subf %cst_4, %1 : f32
    %12 = arith.divf %11, %2 : f32
    %13 = math.exp %12 : f32
    %cst_5 = arith.constant 1.000000e+06 : f32
    %14 = arith.mulf %cst_5, %13 : f32
    %15 = math.sqrt %10 : vector<8x128xf32>
    %c0_6 = arith.constant 0 : index
    %c0_7 = arith.constant 0 : index
    %16 = vector.load %arg3[%c0_6, %c0_7] : memref<8x128xf32, #tpu.memory_space<vmem>>, vector<8x128xf32>
    %17 = arith.mulf %15, %16 : vector<8x128xf32>
    %18 = arith.addf %10, %17 : vector<8x128xf32>
    %19 = vector.broadcast %14 : f32 to vector<8x128xf32>
    %20 = arith.maximumf %18, %19 : vector<8x128xf32>
    %cst_8 = arith.constant 0.000000e+00 : f32
    %21 = arith.subf %cst_8, %2 : f32
    %cst_9 = arith.constant 1.000000e+06 : f32
    %22 = vector.broadcast %cst_9 : f32 to vector<8x128xf32>
    %23 = arith.divf %20, %22 : vector<8x128xf32>
    %24 = math.log %23 : vector<8x128xf32>
    %25 = vector.broadcast %21 : f32 to vector<8x128xf32>
    %26 = arith.mulf %25, %24 : vector<8x128xf32>
    %27 = vector.broadcast %0 : f32 to vector<8x128xf32>
    %28 = arith.maximumf %27, %26 : vector<8x128xf32>
    %29 = vector.broadcast %1 : f32 to vector<8x128xf32>
    %30 = arith.minimumf %29, %28 : vector<8x128xf32>
    %c0_10 = arith.constant 0 : index
    %c0_11 = arith.constant 0 : index
    %31 = vector.load %arg4[%c0_10, %c0_11] : memref<8x128xf32, #tpu.memory_space<vmem>>, vector<8x128xf32>
    tpu.vector_store %arg4[%c0_10, %c0_11], %30 {strides = array<i32>} : memref<8x128xf32, #tpu.memory_space<vmem>>, vector<8x128xf32>,
    %32 = vector.shape_cast %30 : vector<8x128xf32> to vector<1x8x128xf32>
    %cst_12 = arith.constant dense<0x7F800000> : vector<1xf32>
    %33 = vector.multi_reduction <minimumf>, %32, %cst_12 [1, 2] : vector<1x8x128xf32> to vector<1xf32>
    %34 = vector.shape_cast %33 : vector<1xf32> to vector<1x1x1xf32>
    %35 = vector.extract %34[0, 0, 0] : f32 from vector<1x1x1xf32>
    %c0_13 = arith.constant 0 : index
    %36 = arith.index_cast %arg0 : i32 to index
    %37 = memref.load %arg5[%c0_13, %36] : memref<2x1xf32, #tpu.memory_space<smem>>
    memref.store %35, %arg5[%c0_13, %36] : memref<2x1xf32, #tpu.memory_space<smem>>
    %38 = vector.shape_cast %30 : vector<8x128xf32> to vector<1x8x128xf32>
    %cst_14 = arith.constant dense<0xFF800000> : vector<1xf32>
    %39 = vector.multi_reduction <maximumf>, %38, %cst_14 [1, 2] : vector<1x8x128xf32> to vector<1xf32>
    %40 = vector.shape_cast %39 : vector<1xf32> to vector<1x1x1xf32>
    %41 = vector.extract %40[0, 0, 0] : f32 from vector<1x1x1xf32>
    %c1_15 = arith.constant 1 : index
    %42 = arith.index_cast %arg0 : i32 to index
    %43 = memref.load %arg5[%c1_15, %42] : memref<2x1xf32, #tpu.memory_space<smem>>
    memref.store %41, %arg5[%c1_15, %42] : memref<2x1xf32, #tpu.memory_space<smem>>
    return
  }
  func.func @transform_0(%arg0: i32) -> i32 {
    %c0_i32 = arith.constant 0 : i32
    %c0_i32_0 = arith.constant 0 : i32
    return %c0_i32 : i32
  }
  func.func @transform_1(%arg0: i32) -> (i32, i32) {
    %c0_i32 = arith.constant 0 : i32
    %c0_i32_0 = arith.constant 0 : i32
    return %arg0, %c0_i32 : i32, i32
  }
  func.func @transform_2(%arg0: i32) -> (i32, i32) {
    %c0_i32 = arith.constant 0 : i32
    %c0_i32_0 = arith.constant 0 : i32
    return %arg0, %c0_i32 : i32, i32
  }
  func.func @transform_3(%arg0: i32) -> (i32, i32) {
    %c0_i32 = arith.constant 0 : i32
    %c0_i32_0 = arith.constant 0 : i32
    return %arg0, %c0_i32 : i32, i32
  }
  func.func @transform_4(%arg0: i32) -> (i32, i32) {
    %c0_i32 = arith.constant 0 : i32
    %c0_i32_0 = arith.constant 0 : i32
    %c0_i32_1 = arith.constant 0 : i32
    return %c0_i32, %c0_i32_0 : i32, i32
  }
}

module attributes {stable_mosaic.version = 11 : i64} {
  func.func @gaussian_noise_kernel(%arg0: i32, %arg1: memref<2xf32, #tpu.memory_space<smem>>, %arg2: memref<8x128xf32, #tpu.memory_space<vmem>>, %arg3: memref<8x128xf32, #tpu.memory_space<vmem>>, %arg4: memref<8x128xf32, #tpu.memory_space<vmem>>) attributes {dimension_semantics = [#tpu.dimension_semantics<parallel>], iteration_bounds = array<i64: 1>, scalar_prefetch = 0 : i64, scratch_operands = 0 : i64, tpu.core_type = #tpu.core_type<tc>, window_params = [{transform_indices = @transform_0, window_bounds = array<i64: 2>}, {transform_indices = @transform_1, window_bounds = array<i64: 8, 128>}, {transform_indices = @transform_2, window_bounds = array<i64: 8, 128>}, {transform_indices = @transform_3, window_bounds = array<i64: 8, 128>}]} {
    %c0 = arith.constant 0 : index
    %c0_0 = arith.constant 0 : index
    %0 = vector.load %arg2[%c0, %c0_0] : memref<8x128xf32, #tpu.memory_space<vmem>>, vector<8x128xf32>
    %c0_1 = arith.constant 0 : index
    %c0_2 = arith.constant 0 : index
    %1 = vector.load %arg3[%c0_1, %c0_2] : memref<8x128xf32, #tpu.memory_space<vmem>>, vector<8x128xf32>
    %cst = arith.constant 0.00999999977 : f32
    %2 = vector.broadcast %cst : f32 to vector<8x128xf32>
    %3 = arith.mulf %2, %1 : vector<8x128xf32>
    %4 = arith.addf %0, %3 : vector<8x128xf32>
    %c0_3 = arith.constant 0 : index
    %5 = memref.load %arg1[%c0_3] : memref<2xf32, #tpu.memory_space<smem>>
    %c1 = arith.constant 1 : index
    %6 = memref.load %arg1[%c1] : memref<2xf32, #tpu.memory_space<smem>>
    %7 = vector.broadcast %5 : f32 to vector<8x128xf32>
    %8 = arith.maximumf %7, %4 : vector<8x128xf32>
    %9 = vector.broadcast %6 : f32 to vector<8x128xf32>
    %10 = arith.minimumf %9, %8 : vector<8x128xf32>
    %c0_4 = arith.constant 0 : index
    %c0_5 = arith.constant 0 : index
    %11 = vector.load %arg4[%c0_4, %c0_5] : memref<8x128xf32, #tpu.memory_space<vmem>>, vector<8x128xf32>
    tpu.vector_store %arg4[%c0_4, %c0_5], %10 {strides = array<i32>} : memref<8x128xf32, #tpu.memory_space<vmem>>, vector<8x128xf32>,
    return
  }
  func.func @transform_0(%arg0: i32) -> i32 {
    %c0_i32 = arith.constant 0 : i32
    %c0_i32_0 = arith.constant 0 : i32
    return %c0_i32 : i32
  }
  func.func @transform_1(%arg0: i32) -> (i32, i32) {
    %c0_i32 = arith.constant 0 : i32
    %c0_i32_0 = arith.constant 0 : i32
    return %arg0, %c0_i32 : i32, i32
  }
  func.func @transform_2(%arg0: i32) -> (i32, i32) {
    %c0_i32 = arith.constant 0 : i32
    %c0_i32_0 = arith.constant 0 : i32
    return %arg0, %c0_i32 : i32, i32
  }
  func.func @transform_3(%arg0: i32) -> (i32, i32) {
    %c0_i32 = arith.constant 0 : i32
    %c0_i32_0 = arith.constant 0 : i32
    return %arg0, %c0_i32 : i32, i32
  }
}

module attributes {stable_mosaic.version = 11 : i64} {
  func.func @matmul_kernel(%arg0: i32, %arg1: i32, %arg2: memref<2x512xbf16, #tpu.memory_space<vmem>>, %arg3: memref<512x512xbf16, #tpu.memory_space<vmem>>, %arg4: memref<2x512xf32, #tpu.memory_space<vmem>>) attributes {dimension_semantics = [#tpu.dimension_semantics<parallel>, #tpu.dimension_semantics<arbitrary>], iteration_bounds = array<i64: 2, 1>, scalar_prefetch = 0 : i64, scratch_operands = 0 : i64, tpu.core_type = #tpu.core_type<tc>, window_params = [{pipeline_mode = #tpu.pipeline_mode<synchronous>, transform_indices = @transform_0, window_bounds = array<i64: 2, 512>}, {transform_indices = @transform_1, window_bounds = array<i64: 512, 512>}, {transform_indices = @transform_2, window_bounds = array<i64: 2, 512>}]} {
    %c0_i32 = arith.constant 0 : i32
    %0 = arith.cmpi eq, %arg1, %c0_i32 : i32
    %1 = arith.extui %0 : i1 to i32
    %c0_i32_0 = arith.constant 0 : i32
    %2 = arith.cmpi ne, %1, %c0_i32_0 : i32
    scf.if %2 {
      %cst_7 = arith.constant 0.000000e+00 : f32
      %12 = vector.broadcast %cst_7 : f32 to vector<2x512xf32>
      %c0_8 = arith.constant 0 : index
      %c0_9 = arith.constant 0 : index
      %13 = vector.load %arg4[%c0_8, %c0_9] : memref<2x512xf32, #tpu.memory_space<vmem>>, vector<2x512xf32>
      tpu.vector_store %arg4[%c0_8, %c0_9], %12 {strides = array<i32>} : memref<2x512xf32, #tpu.memory_space<vmem>>, vector<2x512xf32>,
    } else {
    }
    %c512_i32 = arith.constant 512 : i32
    %3 = arith.muli %arg1, %c512_i32 : i32
    %4 = tpu.assume_multiple %3, 128 : i32
    %c0 = arith.constant 0 : index
    %c0_1 = arith.constant 0 : index
    %5 = vector.load %arg4[%c0, %c0_1] : memref<2x512xf32, #tpu.memory_space<vmem>>, vector<2x512xf32>
    %c0_2 = arith.constant 0 : index
    %6 = arith.index_cast %4 : i32 to index
    %7 = vector.load %arg2[%c0_2, %6] : memref<2x512xbf16, #tpu.memory_space<vmem>>, vector<2x512xbf16>
    %c0_3 = arith.constant 0 : index
    %c0_4 = arith.constant 0 : index
    %8 = vector.load %arg3[%c0_3, %c0_4] : memref<512x512xbf16, #tpu.memory_space<vmem>>, vector<512x512xbf16>
    %cst = arith.constant dense<0.000000e+00> : vector<2x512xf32>
    %9 = tpu.matmul %7, %8, %cst {dimension_numbers = #tpu.dot_dimension_numbers<[1], [0], [0], [1], [0, 0, 1, 1], [], []>} : vector<2x512xbf16>, vector<512x512xbf16>, vector<2x512xf32> -> vector<2x512xf32>
    %10 = arith.addf %5, %9 : vector<2x512xf32>
    %c0_5 = arith.constant 0 : index
    %c0_6 = arith.constant 0 : index
    %11 = vector.load %arg4[%c0_5, %c0_6] : memref<2x512xf32, #tpu.memory_space<vmem>>, vector<2x512xf32>
    tpu.vector_store %arg4[%c0_5, %c0_6], %10 {strides = array<i32>} : memref<2x512xf32, #tpu.memory_space<vmem>>, vector<2x512xf32>,
    return
  }
  func.func @transform_0(%arg0: i32, %arg1: i32) -> (i32, i32) {
    %c0_i32 = arith.constant 0 : i32
    %c0_i32_0 = arith.constant 0 : i32
    %c0_i32_1 = arith.constant 0 : i32
    return %c0_i32, %c0_i32_0 : i32, i32
  }
  func.func @transform_1(%arg0: i32, %arg1: i32) -> (i32, i32) {
    %c0_i32 = arith.constant 0 : i32
    return %arg1, %arg0 : i32, i32
  }
  func.func @transform_2(%arg0: i32, %arg1: i32) -> (i32, i32) {
    %c0_i32 = arith.constant 0 : i32
    %c0_i32_0 = arith.constant 0 : i32
    return %c0_i32, %arg0 : i32, i32
  }
}

</mosaic_0001>

<bundles_post_ra>
// kernel: _pipeline.14
= control target key start
LH: loop header
LB: loop body
LE: loop exit
PB: predicated region body
PF: predicated region fallthrough
CT: control target
= control target key end

     0   :  { %8 = vsyncpa [#allocation3], 0  ;;  %s66_s15 = smov [#allocation2]   ;;  %s108_s0 = inlined_call_operand.vmem [shape: f32[2], index: 0, kind: input, shape index: {}]   ;;  %s109_s1 = inlined_call_operand.vmem [shape: f32[8,256], index: 1, kind: input, shape index: {}]   ;;  %s110_s2 = inlined_call_operand.vmem [shape: f32[8,256], index: 2, kind: input, shape index: {}]   ;;  %s111_s3 = inlined_call_operand.vmem [shape: f32[8,256], index: 3, kind: output, shape index: {}]  }
   0x1   :  { %s14_s14 = sshll.u32 %s108_s0, 4  ;;  %s15_s14 = int_to_ptr.vmem [resolvable:$true] %s14_s14 }
   0x2   :  { %17 = dma.vmem_to_smem %s15_s14, 16, %s66_s15, [#allocation3]  }
   0x3   :  { %64 = dma.done.wait [#allocation3], 16  }
   0x4   :  { %65 = vsyncadd [#allocation3], 4294967280 }
   0x5   :  { %26 = sfence }
   0x6   :  { %v27_v0 = vld [vmem:[%s109_s1] sm:$0xff]  ;;  %s35_s20 = sld [smem:[#allocation2]]  ;;  %v28_v3 = vld [vmem:[%s109_s1 + $0x8] sm:$0xff] }
   0x7   :  { %v29_v1 = vld [vmem:[%s110_s2] sm:$0xff]  ;;  %s50_s21 = sld [smem:[#allocation2 + $0x1]]  ;;  %v30_v4 = vld [vmem:[%s110_s2 + $0x8] sm:$0xff] }
   0x8   :  { %v31_v2 = vmul.f32 0.01, %v29_v1  ;;  %v32_v5 = vmul.f32 0.01, %v30_v4 }
   0xa   :  { %v33_v6 = vadd.f32 %v31_v2, %v27_v0  ;;  %v34_v7 = vadd.f32 %v32_v5, %v28_v3 }
   0xc   :  { %v37_v8 = vstv %s35_s20 }
   0xd   :  { %v38_v9 = vmax.f32 %v37_v8, %v33_v6  ;;  %v40_v10 = vstv %s50_s21  ;;  %v39_v11 = vmax.f32 %v37_v8, %v34_v7 }
   0xf   :  { %v41_v12 = vmin.f32 %v40_v10, %v38_v9  ;;  %v42_v13 = vmin.f32 %v40_v10, %v39_v11 }
  0x11   :  { %43 = vst [vmem:[%s111_s3] sm:$0xff] %v41_v12 }
  0x12   :  { %44 = vst [vmem:[%s111_s3 + $0x8] sm:$0xff] %v42_v13 }
  0x13   :  { %49 = vsyncpa [#allocation3], 1 }

// kernel: _pipeline.13
= control target key start
LH: loop header
LB: loop body
LE: loop exit
PB: predicated region body
PF: predicated region fallthrough
CT: control target
= control target key end

     0   :  { %10 = vsyncpa [#allocation3], 0  ;;  %s310_s0 = inlined_call_operand.vmem [shape: f32[2], index: 0, kind: input, shape index: {}]   ;;  %s311_s1 = inlined_call_operand.vmem [shape: f32[8,256], index: 1, kind: input, shape index: {}]   ;;  %s312_s2 = inlined_call_operand.vmem [shape: f32[8,256], index: 2, kind: input, shape index: {}]   ;;  %s313_s3 = inlined_call_operand.vmem [shape: f32[8,256], index: 3, kind: output, shape index: {0}]   ;;  %s314_s4 = inlined_call_operand.vmem [shape: f32[2,1], index: 4, kind: output, shape index: {1}]  }
   0x1   :  { %11 = vsyncpa [#allocation4], 0  ;;  %s17_s17 = sshll.u32 %s310_s0, 4  ;;  %s248_s18 = smov [#allocation2]   ;;  %s18_s17 = int_to_ptr.vmem [resolvable:$true] %s17_s17 }
   0x2   :  { %20 = dma.vmem_to_smem %s18_s17, 16, %s248_s18, [#allocation3]  }
   0x3   :  { %244 = dma.done.wait [#allocation3], 16  }
   0x4   :  { %245 = vsyncadd [#allocation3], 4294967280 }
   0x5   :  { %29 = sfence }
   0x6   :  { %s280_s19 = sld [smem:[#allocation2 + $0x1]]  ;;  %s249_s20 = smov 1e-08   ;;  %v33_v11 = vld [vmem:[%s311_s1] sm:$0xff]  ;;  %v34_v12 = vld [vmem:[%s311_s1 + $0x8] sm:$0xff] }
   0x7   :  { %v35_v13 = vsub.f32 0.0, %v33_v11  ;;  %v36_v14 = vsub.f32 0.0, %v34_v12  ;;  %v250_v36 = vmov 1000000.0   ;;  %v107_v50 = vld [vmem:[%s312_s2] sm:$0xff]  ;;  %v108_v51 = vld [vmem:[%s312_s2 + $0x8] sm:$0xff] }
   0x8   :  { %s30_s7 = sld [smem:[#allocation2]]  ;;  %s175_s14 = sshll.u32 %s314_s4, 4  ;;  %s176_s14 = int_to_ptr.vmem [resolvable:$true] %s175_s14 }
   0x9   :  { %s251_s16 = smov [#allocation5]  }
   0xc   :  { %s283_s21 = smax.f32 %s249_s20, %s280_s19  ;;  %s60_s25 = ssub.f32 0.0, %s280_s19 }
   0xd   :  { %v37_v0 = vstv %s283_s21  ;;  %s116_s2 = ssub.f32 0.0, %s283_s21 }
   0xe   :  { %202 = vrcp.f32 %v37_v0  ;;  %v49_v3 = vand.u32 2147483648, %v37_v0  ;;  %vm43_vm0 = vweird.f32 %v37_v0  ;;  %v47_v5 = vand.u32 2147483647, %v37_v0 }
  0x10   :  { %v50_v7 = vor.u32 1.1754944e-38, %v49_v3  ;;  %vm48_vm3 = vcmp.eq.f32.partialorder %v47_v5, 8.507059e+37  ;;  %v133_v5 = vstv %s30_s7 }
  0x14   :  { %v203_v1 = vpop.eup %202 }
  0x15   :  { %v39_v2 = vmul.f32 %v203_v1, %v37_v0  ;;  %vm44_vm1 = vweird.f32 %v203_v1 }
  0x16   :  { %vm45_vm2 = vmor %vm43_vm0, %vm44_vm1 }
  0x17   :  { %v40_v4 = vsub.f32 1.0, %v39_v2 }
  0x19   :  { %v41_v6 = vmul.f32 %v203_v1, %v40_v4 }
  0x1b   :  { %v42_v8 = vadd.f32 %v203_v1, %v41_v6 }
  0x1d   :  { %v46_v9 = vsel %vm45_vm2, %v203_v1, %v42_v8  ;;  %v130_v1 = vstv %s116_s2  ;;  %v136_v8 = vstv %s280_s19 }
  0x1e   :  { %v51_v10 = vsel %vm48_vm3, %v50_v7, %v46_v9 }
  0x1f   :  { %190 = vpush %v51_v10  ;;  %v52_v15 = vmul.f32 %v51_v10, %v35_v13  ;;  %v53_v16 = vmul.f32 %v51_v10, %v36_v14 }
  0x21   :  { %v54_v17 = vmul.f32 1.442695, %v52_v15  ;;  %v56_v18 = vmul.f32 1.442695, %v53_v16 }
  0x23   :  { %204 = vpow2.f32 %v54_v17 }
  0x24   :  { %206 = vpow2.f32 %v56_v18 }
  0x29   :  { %v205_v21 = vpop.eup %204 }
  0x2a   :  { %v207_v22 = vpop.eup %206  ;;  %v58_v24 = vmul.f32 1000000.0, %v205_v21 }
  0x2b   :  { %v59_v25 = vmul.f32 1000000.0, %v207_v22 }
  0x2c   :  { %vm90_vm4 = vcmp.eq.f32.partialorder %v58_v24, inf  ;;  %v93_v43 = vand.u32 2147483648, %v58_v24  ;;  %vm92_vm6 = vcmp.eq.f32.partialorder %v58_v24, 0.0 }
  0x2d   :  { %vm102_vm5 = vcmp.eq.f32.partialorder %v59_v25, inf  ;;  %v105_v44 = vand.u32 2147483648, %v59_v25  ;;  %vm104_vm7 = vcmp.eq.f32.partialorder %v59_v25, 0.0 }
  0x50   :  { %s191_s26 = spop %190 }
  0x51   :  { %s77_s27 = smul.f32 %s191_s26, %s60_s25 }
  0x53   :  { %v78_v19 = vstv %s77_s27 }
  0x54   :  { %v79_v20 = vmul.f32 1.442695, %v78_v19 }
  0x56   :  { %208 = vpow2.f32 %v79_v20 }
  0x57   :  { %210 = vrsqrt.f32 %v58_v24 }
  0x58   :  { %212 = vrsqrt.f32 %v59_v25 }
  0x59   :  { %214 = vrcp.f32 %v250_v36 }
  0x5c   :  { %v209_v23 = vpop.eup %208 }
  0x5d   :  { %192 = vpush %v209_v23  ;;  %v211_v26 = vpop.eup %210 }
  0x5e   :  { %v213_v27 = vpop.eup %212  ;;  %v84_v28 = vmul.f32 %v211_v26, %v58_v24 }
  0x5f   :  { %v96_v29 = vmul.f32 %v213_v27, %v59_v25  ;;  %v215_v39 = vpop.eup %214 }
  0x60   :  { %v85_v30 = vmul.f32 %v211_v26, %v84_v28  ;;  %v118_v42 = vmul.f32 1000000.0, %v215_v39  ;;  %vm122_vm8 = vweird.f32 %v215_v39 }
  0x61   :  { %v97_v31 = vmul.f32 %v213_v27, %v96_v29 }
  0x62   :  { %v86_v32 = vmul.f32 0.5, %v85_v30  ;;  %v119_v47 = vsub.f32 1.0, %v118_v42 }
  0x63   :  { %v98_v33 = vmul.f32 0.5, %v97_v31 }
  0x64   :  { %v87_v34 = vsub.f32 1.5, %v86_v32  ;;  %v120_v52 = vmul.f32 %v215_v39, %v119_v47 }
  0x65   :  { %v99_v35 = vsub.f32 1.5, %v98_v33 }
  0x66   :  { %v88_v37 = vmul.f32 %v211_v26, %v87_v34  ;;  %v121_v55 = vadd.f32 %v215_v39, %v120_v52 }
  0x67   :  { %v100_v38 = vmul.f32 %v213_v27, %v99_v35 }
  0x68   :  { %v89_v40 = vmul.f32 %v88_v37, %v58_v24  ;;  %v123_v59 = vsel %vm122_vm8, %v215_v39, %v121_v55 }
  0x69   :  { %v101_v41 = vmul.f32 %v100_v38, %v59_v25 }
  0x6a   :  { %v91_v45 = vsel %vm90_vm4, %v58_v24, %v89_v40 }
  0x6b   :  { %v103_v46 = vsel %vm102_vm5, %v59_v25, %v101_v41  ;;  %v94_v48 = vsel %vm92_vm6, %v93_v43, %v91_v45 }
  0x6c   :  { %v106_v49 = vsel %vm104_vm7, %v105_v44, %v103_v46  ;;  %v109_v53 = vmul.f32 %v107_v50, %v94_v48 }
  0x6d   :  { %v110_v54 = vmul.f32 %v108_v51, %v106_v49 }
  0x6e   :  { %v111_v56 = vadd.f32 %v109_v53, %v58_v24 }
  0x6f   :  { %v112_v57 = vadd.f32 %v110_v54, %v59_v25 }
  0x8e   :  { %s193_s5 = spop %192 }
  0x8f   :  { %s82_s6 = smul.f32 1000000.0, %s193_s5 }
  0x91   :  { %v113_v58 = vstv %s82_s6 }
  0x92   :  { %v114_v60 = vmax.f32 %v111_v56, %v113_v58  ;;  %v115_v61 = vmax.f32 %v112_v57, %v113_v58 }
  0x94   :  { %v124_v62 = vmul.f32 %v123_v59, %v114_v60  ;;  %v125_v63 = vmul.f32 %v123_v59, %v115_v61 }
  0x96   :  { %216 = vlog2.f32 %v124_v62 }
  0x97   :  { %218 = vlog2.f32 %v125_v63 }
  0x9c   :  { %v217_v0 = vpop.eup %216 }
  0x9d   :  { %v219_v2 = vpop.eup %218  ;;  %v127_v3 = vmul.f32 0.6931472, %v217_v0 }
  0x9e   :  { %v129_v4 = vmul.f32 0.6931472, %v219_v2 }
  0x9f   :  { %v131_v6 = vmul.f32 %v130_v1, %v127_v3 }
  0xa0   :  { %v132_v7 = vmul.f32 %v130_v1, %v129_v4 }
  0xa1   :  { %v134_v9 = vmax.f32 %v133_v5, %v131_v6 }
  0xa2   :  { %v135_v10 = vmax.f32 %v133_v5, %v132_v7 }
  0xa3   :  { %v137_v11 = vmin.f32 %v136_v8, %v134_v9 }
  0xa4   :  { %v138_v12 = vmin.f32 %v136_v8, %v135_v10 }
  0xa5   :  { %139 = vst [vmem:[%s313_s3] sm:$0xff] %v137_v11 }
  0xa6   :  { %140 = vst [vmem:[%s313_s3 + $0x8] sm:$0xff] %v138_v12  ;;  %v141_v13 = vmin.f32 %v137_v11, %v138_v12  ;;  %v153_v14 = vmax.f32 %v137_v11, %v138_v12 }
  0xa8   :  { %142 = vmin.xlane.f32.xlu0 %v141_v13 }
  0xb0   :  { %154 = vmax.xlane.f32.xlu0 %v153_v14 }
 0x11b   :  { %v143_v15 = vpop.xlane.xlu0 %142 }
 0x11c   :  { %v144_v16 = vrot.slane %v143_v15, 4 }
 0x11e   :  { %v145_v17 = vmin.f32 %v143_v15, %v144_v16 }
 0x120   :  { %v146_v18 = vrot.slane %v145_v17, 2 }
 0x122   :  { %v147_v19 = vmin.f32 %v145_v17, %v146_v18 }
 0x123   :  { %v155_v20 = vpop.xlane.xlu0 %154 }
 0x124   :  { %v156_v21 = vrot.slane %v155_v20, 4  ;;  %v148_v22 = vrot.slane %v147_v19, 1 }
 0x126   :  { %v157_v23 = vmax.f32 %v155_v20, %v156_v21  ;;  %v149_v24 = vmin.f32 %v147_v19, %v148_v22 }
 0x128   :  { %v158_v25 = vrot.slane %v157_v23, 2  ;;  %194 = vpush %v149_v24 }
 0x12a   :  { %v159_v26 = vmax.f32 %v157_v23, %v158_v25 }
 0x12c   :  { %v160_v27 = vrot.slane %v159_v26, 1 }
 0x12e   :  { %v161_v28 = vmax.f32 %v159_v26, %v160_v27 }
 0x130   :  { %196 = vpush %v161_v28 }
 0x159   :  { %s195_s3 = spop %194 }
 0x15a   :  { %152 = sst [smem:[#allocation5]] %s195_s3 }
 0x161   :  { %s197_s15 = spop %196 }
 0x162   :  { %167 = sst [smem:[#allocation5 + $0x80]] %s197_s15 }
 0x163   :  { %178 = dma.smem_to_vmem %s251_s16, 32, %s176_s14, [#allocation4]  }
 0x164   :  { %246 = dma.done.wait [#allocation4], 32  }
 0x165   :  { %247 = vsyncadd [#allocation4], 4294967264 }
 0x166   :  { %185 = sfence }
 0x167   :  { %186 = vsyncpa [#allocation3], 1 }
 0x168   :  { %187 = vsyncpa [#allocation4], 1 }

// kernel: _pipeline.11
= control target key start
LH: loop header
LB: loop body
LE: loop exit
PB: predicated region body
PF: predicated region fallthrough
CT: control target
= control target key end

     0   :  { %8 = vsyncpa [#allocation3], 0  ;;  %s59_s15 = smov [#allocation2]   ;;  %s92_s0 = inlined_call_operand.vmem [shape: f32[2], index: 0, kind: input, shape index: {}]   ;;  %s93_s1 = inlined_call_operand.vmem [shape: f32[8,128], index: 1, kind: input, shape index: {}]   ;;  %s94_s2 = inlined_call_operand.vmem [shape: f32[8,128], index: 2, kind: input, shape index: {}]   ;;  %s95_s3 = inlined_call_operand.vmem [shape: f32[8,128], index: 3, kind: output, shape index: {}]  }
   0x1   :  { %s14_s14 = sshll.u32 %s92_s0, 4  ;;  %s15_s14 = int_to_ptr.vmem [resolvable:$true] %s14_s14 }
   0x2   :  { %17 = dma.vmem_to_smem %s15_s14, 16, %s59_s15, [#allocation3]  }
   0x3   :  { %57 = dma.done.wait [#allocation3], 16  }
   0x4   :  { %58 = vsyncadd [#allocation3], 4294967280 }
   0x5   :  { %26 = sfence }
   0x6   :  { %v27_v0 = vld [vmem:[%s93_s1] sm:$0xff]  ;;  %s31_s20 = sld [smem:[#allocation2]] }
   0x7   :  { %v28_v1 = vld [vmem:[%s94_s2] sm:$0xff]  ;;  %s43_s21 = sld [smem:[#allocation2 + $0x1]] }
   0x8   :  { %v29_v2 = vmul.f32 0.01, %v28_v1 }
   0xa   :  { %v30_v3 = vadd.f32 %v29_v2, %v27_v0 }
   0xc   :  { %v33_v4 = vstv %s31_s20 }
   0xd   :  { %v34_v5 = vmax.f32 %v33_v4, %v30_v3  ;;  %v35_v6 = vstv %s43_s21 }
   0xf   :  { %v36_v7 = vmin.f32 %v35_v6, %v34_v5 }
  0x11   :  { %37 = vst [vmem:[%s95_s3] sm:$0xff] %v36_v7 }
  0x12   :  { %42 = vsyncpa [#allocation3], 1 }

// kernel: _pipeline.10
= control target key start
LH: loop header
LB: loop body
LE: loop exit
PB: predicated region body
PF: predicated region fallthrough
CT: control target
= control target key end

     0   :  { %10 = vsyncpa [#allocation3], 0  ;;  %s264_s0 = inlined_call_operand.vmem [shape: f32[2], index: 0, kind: input, shape index: {}]   ;;  %s265_s1 = inlined_call_operand.vmem [shape: f32[8,128], index: 1, kind: input, shape index: {}]   ;;  %s266_s2 = inlined_call_operand.vmem [shape: f32[8,128], index: 2, kind: input, shape index: {}]   ;;  %s267_s3 = inlined_call_operand.vmem [shape: f32[8,128], index: 3, kind: output, shape index: {0}]   ;;  %s268_s4 = inlined_call_operand.vmem [shape: f32[2,1], index: 4, kind: output, shape index: {1}]  }
   0x1   :  { %11 = vsyncpa [#allocation4], 0  ;;  %s17_s17 = sshll.u32 %s264_s0, 4  ;;  %s211_s18 = smov [#allocation2]   ;;  %s18_s17 = int_to_ptr.vmem [resolvable:$true] %s17_s17 }
   0x2   :  { %20 = dma.vmem_to_smem %s18_s17, 16, %s211_s18, [#allocation3]  }
   0x3   :  { %207 = dma.done.wait [#allocation3], 16  }
   0x4   :  { %208 = vsyncadd [#allocation3], 4294967280 }
   0x5   :  { %29 = sfence }
   0x6   :  { %s243_s19 = sld [smem:[#allocation2 + $0x1]]  ;;  %s212_s20 = smov 1e-08   ;;  %v33_v11 = vld [vmem:[%s265_s1] sm:$0xff]  ;;  %v213_v25 = vmov 1000000.0  }
   0x7   :  { %v34_v12 = vsub.f32 0.0, %v33_v11  ;;  %v89_v34 = vld [vmem:[%s266_s2] sm:$0xff]  ;;  %s30_s29 = sld [smem:[#allocation2]]  ;;  %s144_s8 = sshll.u32 %s268_s4, 4  ;;  %s145_s8 = int_to_ptr.vmem [resolvable:$true] %s144_s8 }
   0x8   :  { %s214_s10 = smov [#allocation5]  }
   0xc   :  { %s246_s21 = smax.f32 %s212_s20, %s243_s19  ;;  %s54_s23 = ssub.f32 0.0, %s243_s19  ;;  %v109_v48 = vstv %s243_s19 }
   0xd   :  { %v35_v0 = vstv %s246_s21  ;;  %s94_s30 = ssub.f32 0.0, %s246_s21  ;;  %v107_v46 = vstv %s30_s29 }
   0xe   :  { %171 = vrcp.f32 %v35_v0  ;;  %v47_v3 = vand.u32 2147483648, %v35_v0  ;;  %vm41_vm0 = vweird.f32 %v35_v0  ;;  %v45_v5 = vand.u32 2147483647, %v35_v0 }
   0xf   :  { %v105_v44 = vstv %s94_s30 }
  0x10   :  { %v48_v7 = vor.u32 1.1754944e-38, %v47_v3  ;;  %vm46_vm3 = vcmp.eq.f32.partialorder %v45_v5, 8.507059e+37 }
  0x14   :  { %v172_v1 = vpop.eup %171 }
  0x15   :  { %v37_v2 = vmul.f32 %v172_v1, %v35_v0  ;;  %vm42_vm1 = vweird.f32 %v172_v1 }
  0x16   :  { %vm43_vm2 = vmor %vm41_vm0, %vm42_vm1 }
  0x17   :  { %v38_v4 = vsub.f32 1.0, %v37_v2 }
  0x19   :  { %v39_v6 = vmul.f32 %v172_v1, %v38_v4 }
  0x1b   :  { %v40_v8 = vadd.f32 %v172_v1, %v39_v6 }
  0x1d   :  { %v44_v9 = vsel %vm43_vm2, %v172_v1, %v40_v8 }
  0x1e   :  { %v49_v10 = vsel %vm46_vm3, %v48_v7, %v44_v9 }
  0x1f   :  { %159 = vpush %v49_v10  ;;  %v50_v13 = vmul.f32 %v49_v10, %v34_v12 }
  0x21   :  { %v51_v14 = vmul.f32 1.442695, %v50_v13 }
  0x23   :  { %173 = vpow2.f32 %v51_v14 }
  0x29   :  { %v174_v17 = vpop.eup %173 }
  0x2a   :  { %v53_v19 = vmul.f32 1000000.0, %v174_v17 }
  0x2c   :  { %vm84_vm4 = vcmp.eq.f32.partialorder %v53_v19, inf  ;;  %v87_v30 = vand.u32 2147483648, %v53_v19  ;;  %vm86_vm5 = vcmp.eq.f32.partialorder %v53_v19, 0.0 }
  0x50   :  { %s160_s24 = spop %159 }
  0x51   :  { %s71_s25 = smul.f32 %s160_s24, %s54_s23 }
  0x53   :  { %v72_v15 = vstv %s71_s25 }
  0x54   :  { %v73_v16 = vmul.f32 1.442695, %v72_v15 }
  0x56   :  { %175 = vpow2.f32 %v73_v16 }
  0x57   :  { %177 = vrsqrt.f32 %v53_v19 }
  0x58   :  { %179 = vrcp.f32 %v213_v25 }
  0x5c   :  { %v176_v18 = vpop.eup %175 }
  0x5d   :  { %161 = vpush %v176_v18  ;;  %v178_v20 = vpop.eup %177 }
  0x5e   :  { %v78_v21 = vmul.f32 %v178_v20, %v53_v19  ;;  %v180_v27 = vpop.eup %179 }
  0x5f   :  { %v96_v29 = vmul.f32 1000000.0, %v180_v27  ;;  %vm100_vm6 = vweird.f32 %v180_v27 }
  0x60   :  { %v79_v22 = vmul.f32 %v178_v20, %v78_v21 }
  0x61   :  { %v97_v32 = vsub.f32 1.0, %v96_v29 }
  0x62   :  { %v80_v23 = vmul.f32 0.5, %v79_v22 }
  0x63   :  { %v98_v35 = vmul.f32 %v180_v27, %v97_v32 }
  0x64   :  { %v81_v24 = vsub.f32 1.5, %v80_v23 }
  0x65   :  { %v99_v37 = vadd.f32 %v180_v27, %v98_v35 }
  0x66   :  { %v82_v26 = vmul.f32 %v178_v20, %v81_v24 }
  0x67   :  { %v101_v40 = vsel %vm100_vm6, %v180_v27, %v99_v37 }
  0x68   :  { %v83_v28 = vmul.f32 %v82_v26, %v53_v19 }
  0x6a   :  { %v85_v31 = vsel %vm84_vm4, %v53_v19, %v83_v28 }
  0x6b   :  { %v88_v33 = vsel %vm86_vm5, %v87_v30, %v85_v31 }
  0x6c   :  { %v90_v36 = vmul.f32 %v89_v34, %v88_v33 }
  0x6e   :  { %v91_v38 = vadd.f32 %v90_v36, %v53_v19 }
  0x8e   :  { %s162_s27 = spop %161 }
  0x8f   :  { %s76_s28 = smul.f32 1000000.0, %s162_s27 }
  0x91   :  { %v92_v39 = vstv %s76_s28 }
  0x92   :  { %v93_v41 = vmax.f32 %v91_v38, %v92_v39 }
  0x94   :  { %v102_v42 = vmul.f32 %v101_v40, %v93_v41 }
  0x96   :  { %181 = vlog2.f32 %v102_v42 }
  0x9c   :  { %v182_v43 = vpop.eup %181 }
  0x9d   :  { %v104_v45 = vmul.f32 0.6931472, %v182_v43 }
  0x9f   :  { %v106_v47 = vmul.f32 %v105_v44, %v104_v45 }
  0xa1   :  { %v108_v49 = vmax.f32 %v107_v46, %v106_v47 }
  0xa3   :  { %v110_v50 = vmin.f32 %v109_v48, %v108_v49 }
  0xa5   :  { %112 = vmin.xlane.f32.xlu0 %v110_v50  ;;  %111 = vst [vmem:[%s267_s3] sm:$0xff] %v110_v50 }
  0xad   :  { %123 = vmax.xlane.f32.xlu0 %v110_v50 }
 0x118   :  { %v113_v51 = vpop.xlane.xlu0 %112 }
 0x119   :  { %v114_v52 = vrot.slane %v113_v51, 4 }
 0x11b   :  { %v115_v53 = vmin.f32 %v113_v51, %v114_v52 }
 0x11d   :  { %v116_v54 = vrot.slane %v115_v53, 2 }
 0x11f   :  { %v117_v55 = vmin.f32 %v115_v53, %v116_v54 }
 0x120   :  { %v124_v56 = vpop.xlane.xlu0 %123 }
 0x121   :  { %v125_v57 = vrot.slane %v124_v56, 4  ;;  %v118_v58 = vrot.slane %v117_v55, 1 }
 0x123   :  { %v126_v59 = vmax.f32 %v124_v56, %v125_v57  ;;  %v119_v60 = vmin.f32 %v117_v55, %v118_v58 }
 0x125   :  { %v127_v61 = vrot.slane %v126_v59, 2  ;;  %163 = vpush %v119_v60 }
 0x127   :  { %v128_v62 = vmax.f32 %v126_v59, %v127_v61 }
 0x129   :  { %v129_v63 = vrot.slane %v128_v62, 1 }
 0x12b   :  { %v130_v0 = vmax.f32 %v128_v62, %v129_v63 }
 0x12d   :  { %165 = vpush %v130_v0 }
 0x156   :  { %s164_s6 = spop %163 }
 0x157   :  { %122 = sst [smem:[#allocation5]] %s164_s6 }
 0x15e   :  { %s166_s9 = spop %165 }
 0x15f   :  { %136 = sst [smem:[#allocation5 + $0x80]] %s166_s9 }
 0x160   :  { %147 = dma.smem_to_vmem %s214_s10, 32, %s145_s8, [#allocation4]  }
 0x161   :  { %209 = dma.done.wait [#allocation4], 32  }
 0x162   :  { %210 = vsyncadd [#allocation4], 4294967264 }
 0x163   :  { %154 = sfence }
 0x164   :  { %155 = vsyncpa [#allocation3], 1 }
 0x165   :  { %156 = vsyncpa [#allocation4], 1 }

// kernel: _pipeline.15
= control target key start
LH: loop header
LB: loop body
LE: loop exit
PB: predicated region body
PF: predicated region fallthrough
CT: control target
= control target key end

     0   :  { %7 = vsyncpa [#allocation3], 0  ;;  %s4386_s0 = inlined_call_operand.vmem [shape: bf16[2,1024], index: 0, kind: input, shape index: {}]   ;;  %s4387_s1 = inlined_call_operand.hbm [shape: bf16[1024,1024], index: 1, kind: input, shape index: {}]   ;;  %s4388_s2 = inlined_call_operand.vmem [shape: f32[2,1024], index: 2, kind: output, shape index: {}]  }
   0x1   :  { %9 = vsyncpa [#allocation3 + $0x1], 0  ;;  %s3724_s9 = smov 0   ;;  %s3726_s10 = smov 0  }
   0x2   :  { %s3728_s11 = smov 0   ;;  %s3730_s12 = smov 0  }
   0x3   :  { %s3732_s13 = smov 0   ;;  %s3734_s14 = smov 0  }
   0x4 LB: > { %s2263_s15 = sadd.s32 4294967295, %s3704_s14   ;;  %s27_s16 = sadd.s32 1, %s3700_s13  ;;  %s3704_s14 = sphi %s3734_s14, %s15_s14   ;;  %s3700_s13 = sphi %s3732_s13, %s4395_s13   ;;  %s3696_s12 = sphi %s3730_s12, %s4394_s12   ;;  %s3692_s11 = sphi %s3728_s11, %s4393_s11   ;;  %s3688_s10 = sphi %s3726_s10, %s4392_s10   ;;  %s3684_s9 = sphi %s3724_s9, %s4391_s9  }
   0x5   : > { %p29_p0 = scmp.ge.s32.totalorder %s27_s16, 2  ;;  %s57_s17 = sadd.s32 1, %s3692_s11 }
   0x6   : > { %p64_p1 = scmp.ne.s32.totalorder %s3692_s11, %s3688_s10  ;;  %p65_p2 = scmp.eq.s32.totalorder %s3704_s14, 0 }
   0x7   : > { %s4397_s16 = smov (%p29_p0, %s27_s16), 0  ;;  %p70_p4 = scmp.ne.s32.totalorder %s3688_s10, %s3684_s9 }
   0x8   : > { %p3760_p3 = por %p65_p2, %p64_p1  ;;  %s53_s19 = ssub.s32 %s3700_s13, %s4397_s16 }
   0x9   : > { %p71_p5 = scmp.eq.s32.totalorder %s2263_s15, 0  ;;  %p55_p6 = scmp.eq.s32.totalorder %s53_s19, 0 }
   0xa   : > { %p3563_p8 = scmp.lt.s32.totalorder %s3704_s14, 2  ;;  %s123_s22 = sand.u32 1, %s3692_s11  }
   0xb   : > { %p3767_p7 = por %p71_p5, %p70_p4  ;;  %s3300_s23 = sshll.u32 %s3700_s13, 4 }
   0xc   : > { %s3773_s21 = scalar_select %p55_p6, %s3692_s11, %s57_s17  }
   0xd   : > { %s2267_s24 = sshll.u32 %s123_s22, 11  ;;  %s135_s27 = scalar_lea.hbm %s4387_s1, %s3300_s23 }
   0xe   : > { %s136_s28 = sshll.u32 %s135_s27, 4  ;;  %s127_s29 = scalar_lea.vmem [#allocation2], %s2267_s24  ;;  %s137_s28 = int_to_ptr.hbm [resolvable:$true] %s136_s28 }
   0xf   : > { %s138_s30 = sshll.u32 %s127_s29, 4  ;;  %p3560_p9 = pnand %p3563_p8, %p3760_p3  ;;  %s139_s30 = int_to_ptr.vmem [resolvable:$true] %s138_s30 }
  0x10   : > { %p2270_p10 = scmp.ge.s32.totalorder %s3704_s14, 1  ;;  %s124_s3 = scalar_lea.sflag [#allocation3], %s123_s22 }
  0x11   : > { %s3706_s4 = smov 512   ;;  %s3707_s5 = smov 256  }
  0x12   : > { %s3708_s6 = smov 16   ;;  %p146_p11 = scmp.lt.s32.totalorder %s3704_s14, 3 }
  0x13   : > { %3562 = dma.hbm_to_vmem [thread:$0]  (!%p3560_p9), %s137_s28, 32768, %s139_s30, %s124_s3, %s3706_s4, %s3707_s5, %s3708_s6  }
  0x14   : > { %p147_p12 = pnand %p2270_p10, %p146_p11 }
  0x15   : > { %s152_s7 = sand.u32 (!%p147_p12), 1, %s3688_s10  }
  0x16   : > { %150 = sbr.rel (%p147_p12) target bundleno = 430 (0x1ae), region = 28  ;;  %s2271_s8 = sshll.u32 (!%p147_p12), %s152_s7, 11 }
  0x17   : > { %s153_s9 = scalar_lea.sflag (!%p147_p12), [#allocation3], %s152_s7  ;;  %s3785_s15 = scalar_lea.vmem (!%p147_p12), [#allocation2], %s2271_s8 }
  0x1b   : > { %3679 = dma.done.wait (%p3767_p7), %s153_s9, 32768  }
  0x1c   : > { %3681 = vsyncadd (%p3767_p7), %s153_s9, 4294934528  ;;  %v2388_v0 = vld [vmem:[%s3785_s15 + $0xe0] sm:$0xf]  ;;  %v3331_v1 = vld [vmem:[%s3785_s15 + $0xec] sm:$0xf0]  ;;  %vm2174_vm0 = vcmask 1041408  }
  0x1d   : > { %v2516_v2 = vld [vmem:[%s3785_s15 + $0x1e0] sm:$0xf]  ;;  %v2389_v3 = vor.u32 %v3331_v1, %v2388_v0  ;;  %v3363_v4 = vld [vmem:[%s3785_s15 + $0x1ec] sm:$0xf0]  ;;  %s2272_s19 = sshll.u32 %s3696_s12, 2  ;;  %vm2176_vm1 = vcmask 1045508  }
  0x1e   : > { %v2644_v5 = vld [vmem:[%s3785_s15 + $0x2e0] sm:$0xf]  ;;  %v3395_v6 = vld [vmem:[%s3785_s15 + $0x2ec] sm:$0xf0]  ;;  %v2517_v7 = vor.u32 %v3363_v4, %v2516_v2  ;;  %p181_p13 = scmp.lt.s32.totalorder %s2272_s19, 7  ;;  %vm2178_vm2 = vcmask 1043456  }
  0x1f   : > { %v2645_v8 = vor.u32 %v3395_v6, %v2644_v5  ;;  %v2772_v9 = vld [vmem:[%s3785_s15 + $0x3e0] sm:$0xf]  ;;  %v3427_v10 = vld [vmem:[%s3785_s15 + $0x3ec] sm:$0xf0]  ;;  %1751 = vmatpush.bf16.msra.mxu0 %v2389_v3 }
  0x20   : > { %v2372_v11 = vld [vmem:[%s3785_s15 + $0xc0] sm:$0xf]  ;;  %v2773_v12 = vor.u32 %v3427_v10, %v2772_v9  ;;  %v3327_v13 = vld [vmem:[%s3785_s15 + $0xcc] sm:$0xf0]  ;;  %1764 = vmatpush.bf16.msra.mxu1 %v2517_v7  ;;  %s4399_s19 = smov (!%p181_p13, %s2272_s19), 7 }
  0x21   : > { %v2500_v14 = vld [vmem:[%s3785_s15 + $0x1c0] sm:$0xf]  ;;  %v3359_v15 = vld [vmem:[%s3785_s15 + $0x1cc] sm:$0xf0]  ;;  %1777 = vmatpush.bf16.msra.mxu2 %v2645_v8  ;;  %v2373_v16 = vor.u32 %v3327_v13, %v2372_v11  ;;  %s2273_s20 = sshll.u32 %s4399_s19, 1 }
  0x22   : > { %v2501_v17 = vor.u32 %v3359_v15, %v2500_v14  ;;  %v2628_v18 = vld [vmem:[%s3785_s15 + $0x2c0] sm:$0xf]  ;;  %v3391_v19 = vld [vmem:[%s3785_s15 + $0x2cc] sm:$0xf0]  ;;  %1790 = vmatpush.bf16.msra.mxu3 %v2773_v12  ;;  %s184_s23 = scalar_lea.vmem %s4388_s2, %s2273_s20 }
  0x23   : > { %v2756_v20 = vld [vmem:[%s3785_s15 + $0x3c0] sm:$0xf]  ;;  %v2629_v21 = vor.u32 %v3391_v19, %v2628_v18  ;;  %v3423_v22 = vld [vmem:[%s3785_s15 + $0x3cc] sm:$0xf0]  ;;  %1752 = vmatpush.bf16.msra.mxu0 %v2373_v16 }
  0x24   : > { %v2356_v23 = vld [vmem:[%s3785_s15 + $0xa0] sm:$0xf]  ;;  %v3323_v24 = vld [vmem:[%s3785_s15 + $0xac] sm:$0xf0]  ;;  %v2757_v25 = vor.u32 %v3423_v22, %v2756_v20  ;;  %1765 = vmatpush.bf16.msra.mxu1 %v2501_v17 }
  0x25   : > { %v2484_v26 = vld [vmem:[%s3785_s15 + $0x1a0] sm:$0xf]  ;;  %v3355_v27 = vld [vmem:[%s3785_s15 + $0x1ac] sm:$0xf0]  ;;  %v2357_v29 = vor.u32 %v3323_v24, %v2356_v23  ;;  %1778 = vmatpush.bf16.msra.mxu2 %v2629_v21 }
  0x26   : > { %v2612_v28 = vld [vmem:[%s3785_s15 + $0x2a0] sm:$0xf]  ;;  %v3387_v30 = vld [vmem:[%s3785_s15 + $0x2ac] sm:$0xf0]  ;;  %v2485_v33 = vor.u32 %v3355_v27, %v2484_v26  ;;  %1791 = vmatpush.bf16.msra.mxu3 %v2757_v25 }
  0x27   : > { %v2740_v31 = vld [vmem:[%s3785_s15 + $0x3a0] sm:$0xf]  ;;  %v3419_v32 = vld [vmem:[%s3785_s15 + $0x3ac] sm:$0xf0]  ;;  %v2613_v34 = vor.u32 %v3387_v30, %v2612_v28  ;;  %1753 = vmatpush.bf16.msra.mxu0 %v2357_v29 }
  0x28   : > { %v2340_v35 = vld [vmem:[%s3785_s15 + $0x80] sm:$0xf]  ;;  %v3319_v36 = vld [vmem:[%s3785_s15 + $0x8c] sm:$0xf0]  ;;  %v2741_v38 = vor.u32 %v3419_v32, %v2740_v31  ;;  %1766 = vmatpush.bf16.msra.mxu1 %v2485_v33 }
  0x29   : > { %v2468_v37 = vld [vmem:[%s3785_s15 + $0x180] sm:$0xf]  ;;  %v3351_v39 = vld [vmem:[%s3785_s15 + $0x18c] sm:$0xf0]  ;;  %v2341_v44 = vor.u32 %v3319_v36, %v2340_v35  ;;  %1779 = vmatpush.bf16.msra.mxu2 %v2613_v34 }
  0x2a   : > { %v2596_v40 = vld [vmem:[%s3785_s15 + $0x280] sm:$0xf]  ;;  %v3383_v41 = vld [vmem:[%s3785_s15 + $0x28c] sm:$0xf0]  ;;  %v2469_v45 = vor.u32 %v3351_v39, %v2468_v37  ;;  %1792 = vmatpush.bf16.msra.mxu3 %v2741_v38 }
  0x2b   : > { %v2724_v42 = vld [vmem:[%s3785_s15 + $0x380] sm:$0xf]  ;;  %v3415_v43 = vld [vmem:[%s3785_s15 + $0x38c] sm:$0xf0]  ;;  %v2597_v46 = vor.u32 %v3383_v41, %v2596_v40  ;;  %1754 = vmatpush.bf16.msra.mxu0 %v2341_v44 }
  0x2c   : > { %v2324_v47 = vld [vmem:[%s3785_s15 + $0x60] sm:$0xf]  ;;  %v3315_v48 = vld [vmem:[%s3785_s15 + $0x6c] sm:$0xf0]  ;;  %v2725_v50 = vor.u32 %v3415_v43, %v2724_v42  ;;  %1767 = vmatpush.bf16.msra.mxu1 %v2469_v45 }
  0x2d   : > { %v2452_v49 = vld [vmem:[%s3785_s15 + $0x160] sm:$0xf]  ;;  %v3347_v51 = vld [vmem:[%s3785_s15 + $0x16c] sm:$0xf0]  ;;  %v2325_v56 = vor.u32 %v3315_v48, %v2324_v47  ;;  %1780 = vmatpush.bf16.msra.mxu2 %v2597_v46 }
  0x2e   : > { %v2580_v52 = vld [vmem:[%s3785_s15 + $0x260] sm:$0xf]  ;;  %v3379_v53 = vld [vmem:[%s3785_s15 + $0x26c] sm:$0xf0]  ;;  %v2453_v57 = vor.u32 %v3347_v51, %v2452_v49  ;;  %1793 = vmatpush.bf16.msra.mxu3 %v2725_v50 }
  0x2f   : > { %v2708_v54 = vld [vmem:[%s3785_s15 + $0x360] sm:$0xf]  ;;  %v3411_v55 = vld [vmem:[%s3785_s15 + $0x36c] sm:$0xf0]  ;;  %v2581_v58 = vor.u32 %v3379_v53, %v2580_v52  ;;  %1755 = vmatpush.bf16.msra.mxu0 %v2325_v56 }
  0x30   : > { %v2308_v59 = vld [vmem:[%s3785_s15 + $0x40] sm:$0xf]  ;;  %v3311_v60 = vld [vmem:[%s3785_s15 + $0x4c] sm:$0xf0]  ;;  %v2709_v62 = vor.u32 %v3411_v55, %v2708_v54  ;;  %1768 = vmatpush.bf16.msra.mxu1 %v2453_v57 }
  0x31   : > { %v2436_v61 = vld [vmem:[%s3785_s15 + $0x140] sm:$0xf]  ;;  %v3343_v63 = vld [vmem:[%s3785_s15 + $0x14c] sm:$0xf0]  ;;  %v2309_v4 = vor.u32 %v3311_v60, %v2308_v59  ;;  %1781 = vmatpush.bf16.msra.mxu2 %v2581_v58  ;;  %v196_v59 = vld [vmem:[%s4386_s0] sm:$0xff] }
  0x32   : > { %v2564_v0 = vld [vmem:[%s3785_s15 + $0x240] sm:$0xf]  ;;  %v3375_v1 = vld [vmem:[%s3785_s15 + $0x24c] sm:$0xf0]  ;;  %v2437_v5 = vor.u32 %v3343_v63, %v2436_v61  ;;  %1794 = vmatpush.bf16.msra.mxu3 %v2709_v62  ;;  %454 = vst [vmem:[#allocation1] ss:$9 sm:$0xff] %v196_v59 }
  0x33   : > { %v2692_v2 = vld [vmem:[%s3785_s15 + $0x340] sm:$0xf]  ;;  %v3407_v3 = vld [vmem:[%s3785_s15 + $0x34c] sm:$0xf0]  ;;  %v2565_v6 = vor.u32 %v3375_v1, %v2564_v0  ;;  %1756 = vmatpush.bf16.msra.mxu0 %v2309_v4 }
  0x34   : > { %v2292_v7 = vld [vmem:[%s3785_s15 + $0x20] sm:$0xf]  ;;  %v3307_v8 = vld [vmem:[%s3785_s15 + $0x2c] sm:$0xf0]  ;;  %v2693_v10 = vor.u32 %v3407_v3, %v2692_v2  ;;  %1769 = vmatpush.bf16.msra.mxu1 %v2437_v5 }
  0x35   : > { %v2420_v9 = vld [vmem:[%s3785_s15 + $0x120] sm:$0xf]  ;;  %v3339_v11 = vld [vmem:[%s3785_s15 + $0x12c] sm:$0xf0]  ;;  %v2293_v16 = vor.u32 %v3307_v8, %v2292_v7  ;;  %1782 = vmatpush.bf16.msra.mxu2 %v2565_v6 }
  0x36   : > { %v2548_v12 = vld [vmem:[%s3785_s15 + $0x220] sm:$0xf]  ;;  %v3371_v13 = vld [vmem:[%s3785_s15 + $0x22c] sm:$0xf0]  ;;  %v2421_v19 = vor.u32 %v3339_v11, %v2420_v9  ;;  %1795 = vmatpush.bf16.msra.mxu3 %v2693_v10 }
  0x37   : > { %v2676_v14 = vld [vmem:[%s3785_s15 + $0x320] sm:$0xf]  ;;  %v3403_v15 = vld [vmem:[%s3785_s15 + $0x32c] sm:$0xf0]  ;;  %v2549_v20 = vor.u32 %v3371_v13, %v2548_v12  ;;  %1757 = vmatpush.bf16.msra.mxu0 %v2293_v16 }
  0x38   : > { %v2276_v17 = vld [vmem:[%s3785_s15] sm:$0xf]  ;;  %v3303_v18 = vld [vmem:[%s3785_s15 + $0xc] sm:$0xf0]  ;;  %v2677_v24 = vor.u32 %v3403_v15, %v2676_v14  ;;  %1770 = vmatpush.bf16.msra.mxu1 %v2421_v19 }
  0x39   : > { %v2404_v21 = vld [vmem:[%s3785_s15 + $0x100] sm:$0xf]  ;;  %v3335_v22 = vld [vmem:[%s3785_s15 + $0x10c] sm:$0xf0]  ;;  %v2277_v31 = vor.u32 %v3303_v18, %v2276_v17  ;;  %1783 = vmatpush.bf16.msra.mxu2 %v2549_v20 }
  0x3a   : > { %v2532_v23 = vld [vmem:[%s3785_s15 + $0x200] sm:$0xf]  ;;  %v3367_v25 = vld [vmem:[%s3785_s15 + $0x20c] sm:$0xf0]  ;;  %v2405_v35 = vor.u32 %v3335_v22, %v2404_v21  ;;  %1796 = vmatpush.bf16.msra.mxu3 %v2677_v24  ;;  %v3896_v21 = vld [vmem:[#allocation1] sm:$0xff] }
  0x3b   : > { %v2660_v26 = vld [vmem:[%s3785_s15 + $0x300] sm:$0xf]  ;;  %v3399_v27 = vld [vmem:[%s3785_s15 + $0x30c] sm:$0xf0]  ;;  %v2533_v36 = vor.u32 %v3367_v25, %v2532_v23  ;;  %1758 = vmatpush.bf16.msra.mxu0 %v2277_v31 }
  0x3c   : > { %v2900_v28 = vld [vmem:[%s3785_s15 + $0x4e0] sm:$0xf]  ;;  %v3459_v29 = vld [vmem:[%s3785_s15 + $0x4ec] sm:$0xf0]  ;;  %v2661_v39 = vor.u32 %v3399_v27, %v2660_v26  ;;  %1771 = vmatpush.bf16.msra.mxu1 %v2405_v35 }
  0x3d   : > { %v3028_v30 = vld [vmem:[%s3785_s15 + $0x5e0] sm:$0xf]  ;;  %v3491_v32 = vld [vmem:[%s3785_s15 + $0x5ec] sm:$0xf0]  ;;  %v2901_v40 = vor.u32 %v3459_v29, %v2900_v28  ;;  %1784 = vmatpush.bf16.msra.mxu2 %v2533_v36 }
  0x3e   : > { %v3156_v33 = vld [vmem:[%s3785_s15 + $0x6e0] sm:$0xf]  ;;  %v3523_v34 = vld [vmem:[%s3785_s15 + $0x6ec] sm:$0xf0]  ;;  %v3029_v41 = vor.u32 %v3491_v32, %v3028_v30  ;;  %1797 = vmatpush.bf16.msra.mxu3 %v2661_v39  ;;  %1759 = vmatmul.bf16.vlgmr.msra.gmra.mxu0 %v3896_v21 }
  0x3f   : > { %v3284_v37 = vld [vmem:[%s3785_s15 + $0x7e0] sm:$0xf]  ;;  %v3555_v38 = vld [vmem:[%s3785_s15 + $0x7ec] sm:$0xf0]  ;;  %v3157_v42 = vor.u32 %v3523_v34, %v3156_v33  ;;  %1803 = vmatpush.bf16.msrb.mxu0 %v2901_v40 }
  0x40   : > { %v2884_v43 = vld [vmem:[%s3785_s15 + $0x4c0] sm:$0xf]  ;;  %v3455_v44 = vld [vmem:[%s3785_s15 + $0x4cc] sm:$0xf0]  ;;  %v3285_v46 = vor.u32 %v3555_v38, %v3284_v37  ;;  %1816 = vmatpush.bf16.msrb.mxu1 %v3029_v41 }
  0x41   : > { %v3012_v45 = vld [vmem:[%s3785_s15 + $0x5c0] sm:$0xf]  ;;  %v3487_v47 = vld [vmem:[%s3785_s15 + $0x5cc] sm:$0xf0]  ;;  %v2885_v52 = vor.u32 %v3455_v44, %v2884_v43  ;;  %1829 = vmatpush.bf16.msrb.mxu2 %v3157_v42 }
  0x42   : > { %v3140_v48 = vld [vmem:[%s3785_s15 + $0x6c0] sm:$0xf]  ;;  %v3519_v49 = vld [vmem:[%s3785_s15 + $0x6cc] sm:$0xf0]  ;;  %v3013_v55 = vor.u32 %v3487_v47, %v3012_v45  ;;  %1842 = vmatpush.bf16.msrb.mxu3 %v3285_v46 }
  0x43   : > { %v3268_v50 = vld [vmem:[%s3785_s15 + $0x7c0] sm:$0xf]  ;;  %v3551_v51 = vld [vmem:[%s3785_s15 + $0x7cc] sm:$0xf0]  ;;  %v3141_v56 = vor.u32 %v3519_v49, %v3140_v48  ;;  %1804 = vmatpush.bf16.msrb.mxu0 %v2885_v52 }
  0x44   : > { %v2868_v53 = vld [vmem:[%s3785_s15 + $0x4a0] sm:$0xf]  ;;  %v3451_v54 = vld [vmem:[%s3785_s15 + $0x4ac] sm:$0xf0]  ;;  %v3269_v60 = vor.u32 %v3551_v51, %v3268_v50  ;;  %1817 = vmatpush.bf16.msrb.mxu1 %v3013_v55 }
  0x45   : > { %v2996_v57 = vld [vmem:[%s3785_s15 + $0x5a0] sm:$0xf]  ;;  %v3483_v58 = vld [vmem:[%s3785_s15 + $0x5ac] sm:$0xf0]  ;;  %v2869_v1 = vor.u32 %v3451_v54, %v2868_v53  ;;  %1830 = vmatpush.bf16.msrb.mxu2 %v3141_v56 }
  0x46   : > { %v3124_v61 = vld [vmem:[%s3785_s15 + $0x6a0] sm:$0xf]  ;;  %v3515_v62 = vld [vmem:[%s3785_s15 + $0x6ac] sm:$0xf0]  ;;  %v2997_v2 = vor.u32 %v3483_v58, %v2996_v57  ;;  %1843 = vmatpush.bf16.msrb.mxu3 %v3269_v60 }
  0x47   : > { %v3252_v63 = vld [vmem:[%s3785_s15 + $0x7a0] sm:$0xf]  ;;  %v3547_v0 = vld [vmem:[%s3785_s15 + $0x7ac] sm:$0xf0]  ;;  %v3125_v3 = vor.u32 %v3515_v62, %v3124_v61  ;;  %1805 = vmatpush.bf16.msrb.mxu0 %v2869_v1  ;;  %v3329_v1 = vld [vmem:[%s3785_s15 + $0xe4] sm:$0xf] }
  0x48   : > { %v2852_v4 = vld [vmem:[%s3785_s15 + $0x480] sm:$0xf]  ;;  %v3447_v5 = vld [vmem:[%s3785_s15 + $0x48c] sm:$0xf0]  ;;  %v3253_v7 = vor.u32 %v3547_v0, %v3252_v63  ;;  %1818 = vmatpush.bf16.msrb.mxu1 %v2997_v2  ;;  %v2390_v2 = vld [vmem:[%s3785_s15 + $0xf0] sm:$0xf0] }
  0x49   : > { %v2980_v6 = vld [vmem:[%s3785_s15 + $0x580] sm:$0xf]  ;;  %v3479_v8 = vld [vmem:[%s3785_s15 + $0x58c] sm:$0xf0]  ;;  %v2853_v14 = vor.u32 %v3447_v5, %v2852_v4  ;;  %1831 = vmatpush.bf16.msrb.mxu2 %v3125_v3  ;;  %v3361_v3 = vld [vmem:[%s3785_s15 + $0x1e4] sm:$0xf] }
  0x4a   : > { %v3108_v9 = vld [vmem:[%s3785_s15 + $0x680] sm:$0xf]  ;;  %v3511_v10 = vld [vmem:[%s3785_s15 + $0x68c] sm:$0xf0]  ;;  %v2981_v18 = vor.u32 %v3479_v8, %v2980_v6  ;;  %1844 = vmatpush.bf16.msrb.mxu3 %v3253_v7  ;;  %v2518_v5 = vld [vmem:[%s3785_s15 + $0x1f0] sm:$0xf0] }
  0x4b   : > { %v3236_v11 = vld [vmem:[%s3785_s15 + $0x780] sm:$0xf]  ;;  %v3543_v12 = vld [vmem:[%s3785_s15 + $0x78c] sm:$0xf0]  ;;  %v3109_v19 = vor.u32 %v3511_v10, %v3108_v9  ;;  %1806 = vmatpush.bf16.msrb.mxu0 %v2853_v14  ;;  %v3393_v6 = vld [vmem:[%s3785_s15 + $0x2e4] sm:$0xf]  ;;  %v2521_v14 = vor.u32 %v3361_v3, %v2518_v5 }
  0x4c   : > { %v2836_v13 = vld [vmem:[%s3785_s15 + $0x460] sm:$0xf]  ;;  %v3443_v15 = vld [vmem:[%s3785_s15 + $0x46c] sm:$0xf0]  ;;  %v3237_v23 = vor.u32 %v3543_v12, %v3236_v11  ;;  %1819 = vmatpush.bf16.msrb.mxu1 %v2981_v18  ;;  %v2646_v7 = vld [vmem:[%s3785_s15 + $0x2f0] sm:$0xf0] }
  0x4d   : > { %v2964_v16 = vld [vmem:[%s3785_s15 + $0x560] sm:$0xf]  ;;  %v3475_v17 = vld [vmem:[%s3785_s15 + $0x56c] sm:$0xf0]  ;;  %v2837_v29 = vor.u32 %v3443_v15, %v2836_v13  ;;  %1832 = vmatpush.bf16.msrb.mxu2 %v3109_v19  ;;  %v3425_v10 = vld [vmem:[%s3785_s15 + $0x3e4] sm:$0xf]  ;;  %v2393_v13 = vor.u32 %v3329_v1, %v2390_v2  ;;  %v2649_v15 = vor.u32 %v3393_v6, %v2646_v7 }
  0x4e   : > { %v3894_v20 = vld [vmem:[#allocation1 + $0x12] sm:$0xff]  ;;  %v3898_v22 = vld [vmem:[#allocation1 + $0x1b] sm:$0xff]  ;;  %v3092_v24 = vld [vmem:[%s3785_s15 + $0x660] sm:$0xf]  ;;  %v2965_v30 = vor.u32 %v3475_v17, %v2964_v16  ;;  %1845 = vmatpush.bf16.msrb.mxu3 %v3237_v23 }
  0x4f   : > { %v3507_v25 = vld [vmem:[%s3785_s15 + $0x66c] sm:$0xf0]  ;;  %1785 = vmatmul.bf16.vlgmr.msra.gmra.mxu2 %v3894_v20  ;;  %v3903_v26 = vld [vmem:[#allocation1 + $0x9] sm:$0xff]  ;;  %1798 = vmatmul.bf16.vlgmr.msra.gmra.mxu3 %v3898_v22  ;;  %v2774_v11 = vld [vmem:[%s3785_s15 + $0x3f0] sm:$0xf0] }
  0x50   : > { %v3220_v27 = vld [vmem:[%s3785_s15 + $0x760] sm:$0xf]  ;;  %v3539_v28 = vld [vmem:[%s3785_s15 + $0x76c] sm:$0xf0]  ;;  %1772 = vmatmul.bf16.vlgmr.msra.gmra.mxu1 %v3903_v26  ;;  %v3093_v31 = vor.u32 %v3507_v25, %v3092_v24  ;;  %1807 = vmatpush.bf16.msrb.mxu0 %v2837_v29  ;;  %v3325_v16 = vld [vmem:[%s3785_s15 + $0xc4] sm:$0xf]  ;;  %v2777_v19 = vor.u32 %v3425_v10, %v2774_v11 }
  0x51   : > { %v2820_v32 = vld [vmem:[%s3785_s15 + $0x440] sm:$0xf]  ;;  %v3439_v33 = vld [vmem:[%s3785_s15 + $0x44c] sm:$0xf0]  ;;  %v3221_v35 = vor.u32 %v3539_v28, %v3220_v27  ;;  %1820 = vmatpush.bf16.msrb.mxu1 %v2965_v30  ;;  %v2374_v17 = vld [vmem:[%s3785_s15 + $0xd0] sm:$0xf0] }
  0x52   : > { %v2948_v34 = vld [vmem:[%s3785_s15 + $0x540] sm:$0xf]  ;;  %v3471_v36 = vld [vmem:[%s3785_s15 + $0x54c] sm:$0xf0]  ;;  %v2821_v41 = vor.u32 %v3439_v33, %v2820_v32  ;;  %1833 = vmatpush.bf16.msrb.mxu2 %v3093_v31  ;;  %v3357_v18 = vld [vmem:[%s3785_s15 + $0x1c4] sm:$0xf]  ;;  %v2377_v30 = vor.u32 %v3325_v16, %v2374_v17 }
  0x53   : > { %v3076_v37 = vld [vmem:[%s3785_s15 + $0x640] sm:$0xf]  ;;  %v3503_v38 = vld [vmem:[%s3785_s15 + $0x64c] sm:$0xf0]  ;;  %v2949_v42 = vor.u32 %v3471_v36, %v2948_v34  ;;  %1846 = vmatpush.bf16.msrb.mxu3 %v3221_v35  ;;  %v2502_v23 = vld [vmem:[%s3785_s15 + $0x1d0] sm:$0xf0] }
  0x54   : > { %v3204_v39 = vld [vmem:[%s3785_s15 + $0x740] sm:$0xf]  ;;  %v3535_v40 = vld [vmem:[%s3785_s15 + $0x74c] sm:$0xf0]  ;;  %v3077_v43 = vor.u32 %v3503_v38, %v3076_v37  ;;  %1808 = vmatpush.bf16.msrb.mxu0 %v2821_v41  ;;  %v3389_v24 = vld [vmem:[%s3785_s15 + $0x2c4] sm:$0xf]  ;;  %v2505_v34 = vor.u32 %v3357_v18, %v2502_v23 }
  0x55   : > { %v2804_v44 = vld [vmem:[%s3785_s15 + $0x420] sm:$0xf]  ;;  %v3435_v45 = vld [vmem:[%s3785_s15 + $0x42c] sm:$0xf0]  ;;  %v3205_v47 = vor.u32 %v3535_v40, %v3204_v39  ;;  %1821 = vmatpush.bf16.msrb.mxu1 %v2949_v42  ;;  %v2630_v25 = vld [vmem:[%s3785_s15 + $0x2d0] sm:$0xf0] }
  0x56   : > { %v2932_v46 = vld [vmem:[%s3785_s15 + $0x520] sm:$0xf]  ;;  %v3467_v48 = vld [vmem:[%s3785_s15 + $0x52c] sm:$0xf0]  ;;  %v2805_v53 = vor.u32 %v3435_v45, %v2804_v44  ;;  %1834 = vmatpush.bf16.msrb.mxu2 %v3077_v43  ;;  %v3421_v27 = vld [vmem:[%s3785_s15 + $0x3c4] sm:$0xf]  ;;  %v2633_v35 = vor.u32 %v3389_v24, %v2630_v25 }
  0x57   : > { %v3060_v49 = vld [vmem:[%s3785_s15 + $0x620] sm:$0xf]  ;;  %v3499_v50 = vld [vmem:[%s3785_s15 + $0x62c] sm:$0xf0]  ;;  %v2933_v56 = vor.u32 %v3467_v48, %v2932_v46  ;;  %1847 = vmatpush.bf16.msrb.mxu3 %v3205_v47  ;;  %v2758_v28 = vld [vmem:[%s3785_s15 + $0x3d0] sm:$0xf0] }
  0x58   : > { %v3188_v51 = vld [vmem:[%s3785_s15 + $0x720] sm:$0xf]  ;;  %v3531_v52 = vld [vmem:[%s3785_s15 + $0x72c] sm:$0xf0]  ;;  %v3061_v57 = vor.u32 %v3499_v50, %v3060_v49  ;;  %1809 = vmatpush.bf16.msrb.mxu0 %v2805_v53  ;;  %v3954_v32 = vld [vmem:[#allocation1 + $0x3f] sm:$0xff]  ;;  %v2761_v39 = vor.u32 %v3421_v27, %v2758_v28 }
  0x59   : > { %v2788_v54 = vld [vmem:[%s3785_s15 + $0x400] sm:$0xf]  ;;  %v3431_v55 = vld [vmem:[%s3785_s15 + $0x40c] sm:$0xf0]  ;;  %v3189_v61 = vor.u32 %v3531_v52, %v3188_v51  ;;  %1822 = vmatpush.bf16.msrb.mxu1 %v2933_v56  ;;  %v3321_v33 = vld [vmem:[%s3785_s15 + $0xa4] sm:$0xf] }
  0x5a   : > { %v2916_v58 = vld [vmem:[%s3785_s15 + $0x500] sm:$0xf]  ;;  %v3463_v59 = vld [vmem:[%s3785_s15 + $0x50c] sm:$0xf0]  ;;  %v2789_v4 = vor.u32 %v3431_v55, %v2788_v54  ;;  %1835 = vmatpush.bf16.msrb.mxu2 %v3061_v57  ;;  %v2358_v36 = vld [vmem:[%s3785_s15 + $0xb0] sm:$0xf0] }
  0x5b   : > { %v3044_v60 = vld [vmem:[%s3785_s15 + $0x600] sm:$0xf]  ;;  %v3495_v62 = vld [vmem:[%s3785_s15 + $0x60c] sm:$0xf0]  ;;  %v2917_v8 = vor.u32 %v3463_v59, %v2916_v58  ;;  %1848 = vmatpush.bf16.msrb.mxu3 %v3189_v61  ;;  %v3353_v37 = vld [vmem:[%s3785_s15 + $0x1a4] sm:$0xf]  ;;  %v2361_v45 = vor.u32 %v3321_v33, %v2358_v36 }
  0x5c   : > { %v3172_v63 = vld [vmem:[%s3785_s15 + $0x700] sm:$0xf]  ;;  %v3527_v0 = vld [vmem:[%s3785_s15 + $0x70c] sm:$0xf0]  ;;  %v3045_v9 = vor.u32 %v3495_v62, %v3044_v60  ;;  %1810 = vmatpush.bf16.msrb.mxu0 %v2789_v4  ;;  %v3959_v38 = vld [vmem:[#allocation1 + $0x2d] sm:$0xff] }
  0x5d   : > { %v3173_v12 = vor.u32 %v3527_v0, %v3172_v63  ;;  %1823 = vmatpush.bf16.msrb.mxu1 %v2917_v8  ;;  %v3950_v29 = vld [vmem:[#allocation1 + $0x36] sm:$0xff]  ;;  %v3952_v31 = vld [vmem:[#allocation1 + $0x24] sm:$0xff]  ;;  %v3385_v41 = vld [vmem:[%s3785_s15 + $0x2a4] sm:$0xf] }
  0x5e   : > { %1836 = vmatpush.bf16.msrb.mxu2 %v3045_v9  ;;  %v2486_v40 = vld [vmem:[%s3785_s15 + $0x1b0] sm:$0xf0]  ;;  %v3417_v43 = vld [vmem:[%s3785_s15 + $0x3a4] sm:$0xf] }
  0x5f   : > { %1849 = vmatpush.bf16.msrb.mxu3 %v3173_v12  ;;  %v2614_v42 = vld [vmem:[%s3785_s15 + $0x2b0] sm:$0xf0]  ;;  %1811 = vmatmul.bf16.vlgmr.msrb.gmra.mxu0 %v3952_v31  ;;  %v2489_v46 = vor.u32 %v3353_v37, %v2486_v40  ;;  %v3317_v48 = vld [vmem:[%s3785_s15 + $0x84] sm:$0xf] }
  0x60   : > { %1855 = vmatpush.bf16.msra.mxu0 %v2393_v13  ;;  %v2742_v44 = vld [vmem:[%s3785_s15 + $0x3b0] sm:$0xf0]  ;;  %1824 = vmatmul.bf16.vlgmr.msrb.gmra.mxu1 %v3959_v38  ;;  %v2617_v47 = vor.u32 %v3385_v41, %v2614_v42  ;;  %v3349_v50 = vld [vmem:[%s3785_s15 + $0x184] sm:$0xf] }
  0x61   : > { %1868 = vmatpush.bf16.msra.mxu1 %v2521_v14  ;;  %1837 = vmatmul.bf16.vlgmr.msrb.gmra.mxu2 %v3950_v29  ;;  %v2342_v49 = vld [vmem:[%s3785_s15 + $0x90] sm:$0xf0]  ;;  %v2745_v51 = vor.u32 %v3417_v43, %v2742_v44  ;;  %v3381_v53 = vld [vmem:[%s3785_s15 + $0x284] sm:$0xf] }
  0x62   : > { %1881 = vmatpush.bf16.msra.mxu2 %v2649_v15  ;;  %1850 = vmatmul.bf16.vlgmr.msrb.gmra.mxu3 %v3954_v32  ;;  %v2470_v52 = vld [vmem:[%s3785_s15 + $0x190] sm:$0xf0]  ;;  %v3413_v55 = vld [vmem:[%s3785_s15 + $0x384] sm:$0xf]  ;;  %v2345_v57 = vor.u32 %v3317_v48, %v2342_v49 }
  0x63   : > { %1894 = vmatpush.bf16.msra.mxu3 %v2777_v19  ;;  %v2598_v54 = vld [vmem:[%s3785_s15 + $0x290] sm:$0xf0]  ;;  %v2473_v58 = vor.u32 %v3349_v50, %v2470_v52  ;;  %v3313_v60 = vld [vmem:[%s3785_s15 + $0x64] sm:$0xf] }
  0x64   : > { %1856 = vmatpush.bf16.msra.mxu0 %v2377_v30  ;;  %v2726_v56 = vld [vmem:[%s3785_s15 + $0x390] sm:$0xf0]  ;;  %v2601_v59 = vor.u32 %v3381_v53, %v2598_v54  ;;  %v3345_v62 = vld [vmem:[%s3785_s15 + $0x164] sm:$0xf] }
  0x65   : > { %1869 = vmatpush.bf16.msra.mxu1 %v2505_v34  ;;  %v2326_v61 = vld [vmem:[%s3785_s15 + $0x70] sm:$0xf0]  ;;  %v2729_v63 = vor.u32 %v3413_v55, %v2726_v56  ;;  %v3377_v1 = vld [vmem:[%s3785_s15 + $0x264] sm:$0xf] }
  0x66   : > { %1882 = vmatpush.bf16.msra.mxu2 %v2633_v35  ;;  %v2454_v0 = vld [vmem:[%s3785_s15 + $0x170] sm:$0xf0]  ;;  %v3409_v3 = vld [vmem:[%s3785_s15 + $0x364] sm:$0xf]  ;;  %v2329_v5 = vor.u32 %v3313_v60, %v2326_v61 }
  0x67   : > { %1895 = vmatpush.bf16.msra.mxu3 %v2761_v39  ;;  %v2582_v2 = vld [vmem:[%s3785_s15 + $0x270] sm:$0xf0]  ;;  %v2457_v6 = vor.u32 %v3345_v62, %v2454_v0  ;;  %v3309_v8 = vld [vmem:[%s3785_s15 + $0x44] sm:$0xf] }
  0x68   : > { %1857 = vmatpush.bf16.msra.mxu0 %v2361_v45  ;;  %v2710_v4 = vld [vmem:[%s3785_s15 + $0x370] sm:$0xf0]  ;;  %v2585_v7 = vor.u32 %v3377_v1, %v2582_v2  ;;  %v3341_v10 = vld [vmem:[%s3785_s15 + $0x144] sm:$0xf] }
  0x69   : > { %1870 = vmatpush.bf16.msra.mxu1 %v2489_v46  ;;  %v2310_v9 = vld [vmem:[%s3785_s15 + $0x50] sm:$0xf0]  ;;  %v2713_v11 = vor.u32 %v3409_v3, %v2710_v4  ;;  %v3373_v13 = vld [vmem:[%s3785_s15 + $0x244] sm:$0xf] }
  0x6a   : > { %1883 = vmatpush.bf16.msra.mxu2 %v2617_v47  ;;  %v2438_v12 = vld [vmem:[%s3785_s15 + $0x150] sm:$0xf0]  ;;  %v3405_v15 = vld [vmem:[%s3785_s15 + $0x344] sm:$0xf]  ;;  %v2313_v17 = vor.u32 %v3309_v8, %v2310_v9 }
  0x6b   : > { %1896 = vmatpush.bf16.msra.mxu3 %v2745_v51  ;;  %v2566_v14 = vld [vmem:[%s3785_s15 + $0x250] sm:$0xf0]  ;;  %v2441_v18 = vor.u32 %v3341_v10, %v2438_v12  ;;  %v3305_v23 = vld [vmem:[%s3785_s15 + $0x24] sm:$0xf] }
  0x6c   : > { %1858 = vmatpush.bf16.msra.mxu0 %v2345_v57  ;;  %v2694_v16 = vld [vmem:[%s3785_s15 + $0x350] sm:$0xf0]  ;;  %v2569_v19 = vor.u32 %v3373_v13, %v2566_v14  ;;  %v3337_v25 = vld [vmem:[%s3785_s15 + $0x124] sm:$0xf] }
  0x6d   : > { %1871 = vmatpush.bf16.msra.mxu1 %v2473_v58  ;;  %v2294_v24 = vld [vmem:[%s3785_s15 + $0x30] sm:$0xf0]  ;;  %v2697_v27 = vor.u32 %v3405_v15, %v2694_v16  ;;  %v3369_v30 = vld [vmem:[%s3785_s15 + $0x224] sm:$0xf] }
  0x6e   : > { %1884 = vmatpush.bf16.msra.mxu2 %v2601_v59  ;;  %v2422_v28 = vld [vmem:[%s3785_s15 + $0x130] sm:$0xf0]  ;;  %v3401_v34 = vld [vmem:[%s3785_s15 + $0x324] sm:$0xf]  ;;  %v2297_v36 = vor.u32 %v3305_v23, %v2294_v24 }
  0x6f   : > { %1897 = vmatpush.bf16.msra.mxu3 %v2729_v63  ;;  %v2550_v33 = vld [vmem:[%s3785_s15 + $0x230] sm:$0xf0]  ;;  %v3301_v37 = vld [vmem:[%s3785_s15 + $0x4] sm:$0xf]  ;;  %v2425_v40 = vor.u32 %v3337_v25, %v2422_v28 }
  0x70   : > { %1859 = vmatpush.bf16.msra.mxu0 %v2329_v5  ;;  %v2678_v35 = vld [vmem:[%s3785_s15 + $0x330] sm:$0xf0]  ;;  %v2553_v41 = vor.u32 %v3369_v30, %v2550_v33  ;;  %v3333_v42 = vld [vmem:[%s3785_s15 + $0x104] sm:$0xf] }
  0x71   : > { %1872 = vmatpush.bf16.msra.mxu1 %v2457_v6  ;;  %v2278_v39 = vld [vmem:[%s3785_s15 + $0x10] sm:$0xf0]  ;;  %v3365_v44 = vld [vmem:[%s3785_s15 + $0x204] sm:$0xf]  ;;  %v2681_v45 = vor.u32 %v3401_v34, %v2678_v35 }
  0x72   : > { %1885 = vmatpush.bf16.msra.mxu2 %v2585_v7  ;;  %v2406_v43 = vld [vmem:[%s3785_s15 + $0x110] sm:$0xf0]  ;;  %v3397_v47 = vld [vmem:[%s3785_s15 + $0x304] sm:$0xf]  ;;  %v2281_v52 = vor.u32 %v3301_v37, %v2278_v39 }
  0x73   : > { %1898 = vmatpush.bf16.msra.mxu3 %v2713_v11  ;;  %v2534_v46 = vld [vmem:[%s3785_s15 + $0x210] sm:$0xf0]  ;;  %v3457_v49 = vld [vmem:[%s3785_s15 + $0x4e4] sm:$0xf]  ;;  %v2409_v56 = vor.u32 %v3333_v42, %v2406_v43 }
  0x74   : > { %1860 = vmatpush.bf16.msra.mxu0 %v2313_v17  ;;  %v2662_v48 = vld [vmem:[%s3785_s15 + $0x310] sm:$0xf0]  ;;  %v3489_v51 = vld [vmem:[%s3785_s15 + $0x5e4] sm:$0xf]  ;;  %v2537_v57 = vor.u32 %v3365_v44, %v2534_v46 }
  0x75   : > { %1873 = vmatpush.bf16.msra.mxu1 %v2441_v18  ;;  %v2902_v50 = vld [vmem:[%s3785_s15 + $0x4f0] sm:$0xf0]  ;;  %v3521_v54 = vld [vmem:[%s3785_s15 + $0x6e4] sm:$0xf]  ;;  %v2665_v60 = vor.u32 %v3397_v47, %v2662_v48 }
  0x76   : > { %1886 = vmatpush.bf16.msra.mxu2 %v2569_v19  ;;  %v3030_v53 = vld [vmem:[%s3785_s15 + $0x5f0] sm:$0xf0]  ;;  %v3553_v58 = vld [vmem:[%s3785_s15 + $0x7e4] sm:$0xf]  ;;  %v2905_v61 = vor.u32 %v3457_v49, %v2902_v50 }
  0x77   : > { %1899 = vmatpush.bf16.msra.mxu3 %v2697_v27  ;;  %v3158_v55 = vld [vmem:[%s3785_s15 + $0x6f0] sm:$0xf0]  ;;  %v3033_v62 = vor.u32 %v3489_v51, %v3030_v53  ;;  %v3453_v0 = vld [vmem:[%s3785_s15 + $0x4c4] sm:$0xf] }
  0x78   : > { %1861 = vmatpush.bf16.msra.mxu0 %v2297_v36  ;;  %v3286_v59 = vld [vmem:[%s3785_s15 + $0x7f0] sm:$0xf0]  ;;  %v3161_v63 = vor.u32 %v3521_v54, %v3158_v55  ;;  %v3485_v2 = vld [vmem:[%s3785_s15 + $0x5c4] sm:$0xf] }
  0x79   : > { %1874 = vmatpush.bf16.msra.mxu1 %v2425_v40  ;;  %v2886_v1 = vld [vmem:[%s3785_s15 + $0x4d0] sm:$0xf0]  ;;  %v3289_v3 = vor.u32 %v3553_v58, %v3286_v59  ;;  %v3517_v5 = vld [vmem:[%s3785_s15 + $0x6c4] sm:$0xf] }
  0x7a   : > { %1887 = vmatpush.bf16.msra.mxu2 %v2553_v41  ;;  %v3014_v4 = vld [vmem:[%s3785_s15 + $0x5d0] sm:$0xf0]  ;;  %v3549_v7 = vld [vmem:[%s3785_s15 + $0x7c4] sm:$0xf]  ;;  %v2889_v9 = vor.u32 %v3453_v0, %v2886_v1 }
  0x7b   : > { %1900 = vmatpush.bf16.msra.mxu3 %v2681_v45  ;;  %v3142_v6 = vld [vmem:[%s3785_s15 + $0x6d0] sm:$0xf0]  ;;  %v3017_v10 = vor.u32 %v3485_v2, %v3014_v4  ;;  %v3449_v12 = vld [vmem:[%s3785_s15 + $0x4a4] sm:$0xf] }
  0x7c   : > { %1862 = vmatpush.bf16.msra.mxu0 %v2281_v52  ;;  %v3270_v8 = vld [vmem:[%s3785_s15 + $0x7d0] sm:$0xf0]  ;;  %v3145_v11 = vor.u32 %v3517_v5, %v3142_v6  ;;  %v3481_v14 = vld [vmem:[%s3785_s15 + $0x5a4] sm:$0xf] }
  0x7d   : > { %1875 = vmatpush.bf16.msra.mxu1 %v2409_v56  ;;  %v2870_v13 = vld [vmem:[%s3785_s15 + $0x4b0] sm:$0xf0]  ;;  %v3273_v15 = vor.u32 %v3549_v7, %v3270_v8  ;;  %v3513_v17 = vld [vmem:[%s3785_s15 + $0x6a4] sm:$0xf] }
  0x7e   : > { %1888 = vmatpush.bf16.msra.mxu2 %v2537_v57  ;;  %v2998_v16 = vld [vmem:[%s3785_s15 + $0x5b0] sm:$0xf0]  ;;  %v3545_v19 = vld [vmem:[%s3785_s15 + $0x7a4] sm:$0xf]  ;;  %v2873_v24 = vor.u32 %v3449_v12, %v2870_v13 }
  0x7f   : > { %1901 = vmatpush.bf16.msra.mxu3 %v2665_v60  ;;  %v3126_v18 = vld [vmem:[%s3785_s15 + $0x6b0] sm:$0xf0]  ;;  %1863 = vmatmul.bf16.vlgmr.msra.gmra.mxu0 %v3896_v21  ;;  %v3001_v25 = vor.u32 %v3481_v14, %v2998_v16  ;;  %v3445_v28 = vld [vmem:[%s3785_s15 + $0x484] sm:$0xf] }
  0x80   : > { %1907 = vmatpush.bf16.msrb.mxu0 %v2905_v61  ;;  %v3254_v23 = vld [vmem:[%s3785_s15 + $0x7b0] sm:$0xf0]  ;;  %1876 = vmatmul.bf16.vlgmr.msra.gmra.mxu1 %v3903_v26  ;;  %v3129_v27 = vor.u32 %v3513_v17, %v3126_v18  ;;  %v3477_v33 = vld [vmem:[%s3785_s15 + $0x584] sm:$0xf] }
  0x81   : > { %1920 = vmatpush.bf16.msrb.mxu1 %v3033_v62  ;;  %1889 = vmatmul.bf16.vlgmr.msra.gmra.mxu2 %v3894_v20  ;;  %v2854_v30 = vld [vmem:[%s3785_s15 + $0x490] sm:$0xf0]  ;;  %v3257_v34 = vor.u32 %v3545_v19, %v3254_v23  ;;  %v3509_v36 = vld [vmem:[%s3785_s15 + $0x684] sm:$0xf] }
  0x82   : > { %1933 = vmatpush.bf16.msrb.mxu2 %v3161_v63  ;;  %1902 = vmatmul.bf16.vlgmr.msra.gmra.mxu3 %v3898_v22  ;;  %v2982_v35 = vld [vmem:[%s3785_s15 + $0x590] sm:$0xf0]  ;;  %v3541_v39 = vld [vmem:[%s3785_s15 + $0x784] sm:$0xf]  ;;  %v2857_v41 = vor.u32 %v3445_v28, %v2854_v30  ;;  %v2396_v30 = vld [vmem:[%s3785_s15 + $0xe8] sm:$0xf] }
  0x83   : > { %1946 = vmatpush.bf16.msrb.mxu3 %v3289_v3  ;;  %v3110_v37 = vld [vmem:[%s3785_s15 + $0x690] sm:$0xf0]  ;;  %v2985_v42 = vor.u32 %v3477_v33, %v2982_v35  ;;  %v3441_v44 = vld [vmem:[%s3785_s15 + $0x464] sm:$0xf]  ;;  %v3332_v33 = vld [vmem:[%s3785_s15 + $0xf4] sm:$0xf0] }
  0x84   : > { %1908 = vmatpush.bf16.msrb.mxu0 %v2889_v9  ;;  %v3238_v40 = vld [vmem:[%s3785_s15 + $0x790] sm:$0xf0]  ;;  %v3113_v43 = vor.u32 %v3509_v36, %v3110_v37  ;;  %v3473_v46 = vld [vmem:[%s3785_s15 + $0x564] sm:$0xf]  ;;  %v3364_v36 = vld [vmem:[%s3785_s15 + $0x1f4] sm:$0xf0] }
  0x85   : > { %1921 = vmatpush.bf16.msrb.mxu1 %v3017_v10  ;;  %v2838_v45 = vld [vmem:[%s3785_s15 + $0x470] sm:$0xf0]  ;;  %v3241_v47 = vor.u32 %v3541_v39, %v3238_v40  ;;  %v3505_v49 = vld [vmem:[%s3785_s15 + $0x664] sm:$0xf]  ;;  %v2652_v37 = vld [vmem:[%s3785_s15 + $0x2e8] sm:$0xf] }
  0x86   : > { %1934 = vmatpush.bf16.msrb.mxu2 %v3145_v11  ;;  %v2966_v48 = vld [vmem:[%s3785_s15 + $0x570] sm:$0xf0]  ;;  %v3537_v51 = vld [vmem:[%s3785_s15 + $0x764] sm:$0xf]  ;;  %v2841_v53 = vor.u32 %v3441_v44, %v2838_v45  ;;  %v3396_v39 = vld [vmem:[%s3785_s15 + $0x2f4] sm:$0xf0]  ;;  %v2397_v45 = vor.u32 %v3332_v33, %v2396_v30 }
  0x87   : > { %1947 = vmatpush.bf16.msrb.mxu3 %v3273_v15  ;;  %v3094_v50 = vld [vmem:[%s3785_s15 + $0x670] sm:$0xf0]  ;;  %v2969_v54 = vor.u32 %v3473_v46, %v2966_v48  ;;  %v3437_v56 = vld [vmem:[%s3785_s15 + $0x444] sm:$0xf]  ;;  %v2380_v48 = vld [vmem:[%s3785_s15 + $0xc8] sm:$0xf] }
  0x88   : > { %1909 = vmatpush.bf16.msrb.mxu0 %v2873_v24  ;;  %v3222_v52 = vld [vmem:[%s3785_s15 + $0x770] sm:$0xf0]  ;;  %v3097_v55 = vor.u32 %v3505_v49, %v3094_v50  ;;  %v3469_v58 = vld [vmem:[%s3785_s15 + $0x544] sm:$0xf]  ;;  %v3328_v49 = vld [vmem:[%s3785_s15 + $0xd4] sm:$0xf0] }
  0x89   : > { %1922 = vmatpush.bf16.msrb.mxu1 %v3001_v25  ;;  %v2822_v57 = vld [vmem:[%s3785_s15 + $0x450] sm:$0xf0]  ;;  %v3225_v59 = vor.u32 %v3537_v51, %v3222_v52  ;;  %v3501_v61 = vld [vmem:[%s3785_s15 + $0x644] sm:$0xf]  ;;  %v2508_v50 = vld [vmem:[%s3785_s15 + $0x1c8] sm:$0xf] }
  0x8a   : > { %1935 = vmatpush.bf16.msrb.mxu2 %v3129_v27  ;;  %v2950_v60 = vld [vmem:[%s3785_s15 + $0x550] sm:$0xf0]  ;;  %v3533_v63 = vld [vmem:[%s3785_s15 + $0x744] sm:$0xf]  ;;  %v2825_v1 = vor.u32 %v3437_v56, %v2822_v57  ;;  %v3360_v52 = vld [vmem:[%s3785_s15 + $0x1d4] sm:$0xf0]  ;;  %v2381_v57 = vor.u32 %v3328_v49, %v2380_v48 }
  0x8b   : > { %1948 = vmatpush.bf16.msrb.mxu3 %v3257_v34  ;;  %v3078_v62 = vld [vmem:[%s3785_s15 + $0x650] sm:$0xf0]  ;;  %v2953_v2 = vor.u32 %v3469_v58, %v2950_v60  ;;  %v3433_v4 = vld [vmem:[%s3785_s15 + $0x424] sm:$0xf]  ;;  %v2524_v34 = vld [vmem:[%s3785_s15 + $0x1e8] sm:$0xf]  ;;  %v2509_v58 = vor.u32 %v3360_v52, %v2508_v50 }
  0x8c   : > { %1910 = vmatpush.bf16.msrb.mxu0 %v2857_v41  ;;  %v3206_v0 = vld [vmem:[%s3785_s15 + $0x750] sm:$0xf0]  ;;  %v3081_v3 = vor.u32 %v3501_v61, %v3078_v62  ;;  %v3465_v6 = vld [vmem:[%s3785_s15 + $0x524] sm:$0xf]  ;;  %v2525_v46 = vor.u32 %v3364_v36, %v2524_v34  ;;  %v3424_v56 = vld [vmem:[%s3785_s15 + $0x3d4] sm:$0xf0] }
  0x8d   : > { %1923 = vmatpush.bf16.msrb.mxu1 %v2985_v42  ;;  %v2806_v5 = vld [vmem:[%s3785_s15 + $0x430] sm:$0xf0]  ;;  %v3209_v7 = vor.u32 %v3533_v63, %v3206_v0  ;;  %v3497_v9 = vld [vmem:[%s3785_s15 + $0x624] sm:$0xf]  ;;  %v2780_v42 = vld [vmem:[%s3785_s15 + $0x3e8] sm:$0xf] }
  0x8e   : > { %1936 = vmatpush.bf16.msrb.mxu2 %v3113_v43  ;;  %v2934_v8 = vld [vmem:[%s3785_s15 + $0x530] sm:$0xf0]  ;;  %v3529_v11 = vld [vmem:[%s3785_s15 + $0x724] sm:$0xf]  ;;  %v2809_v13 = vor.u32 %v3433_v4, %v2806_v5  ;;  %v3428_v43 = vld [vmem:[%s3785_s15 + $0x3f4] sm:$0xf0] }
  0x8f   : > { %1949 = vmatpush.bf16.msrb.mxu3 %v3241_v47  ;;  %v3062_v10 = vld [vmem:[%s3785_s15 + $0x630] sm:$0xf0]  ;;  %v3429_v14 = vld [vmem:[%s3785_s15 + $0x404] sm:$0xf]  ;;  %v2937_v16 = vor.u32 %v3465_v6, %v2934_v8  ;;  %v2653_v47 = vor.u32 %v3396_v39, %v2652_v37  ;;  %v2781_v51 = vor.u32 %v3428_v43, %v2780_v42  ;;  %v2364_v60 = vld [vmem:[%s3785_s15 + $0xa8] sm:$0xf] }
  0x90   : > { %1911 = vmatpush.bf16.msrb.mxu0 %v2841_v53  ;;  %v3190_v12 = vld [vmem:[%s3785_s15 + $0x730] sm:$0xf0]  ;;  %v3065_v17 = vor.u32 %v3497_v9, %v3062_v10  ;;  %v3461_v18 = vld [vmem:[%s3785_s15 + $0x504] sm:$0xf]  ;;  %v2636_v53 = vld [vmem:[%s3785_s15 + $0x2c8] sm:$0xf] }
  0x91   : > { %1924 = vmatpush.bf16.msrb.mxu1 %v2969_v54  ;;  %v2790_v15 = vld [vmem:[%s3785_s15 + $0x410] sm:$0xf0]  ;;  %v3493_v23 = vld [vmem:[%s3785_s15 + $0x604] sm:$0xf]  ;;  %v3193_v24 = vor.u32 %v3529_v11, %v3190_v12  ;;  %v3392_v54 = vld [vmem:[%s3785_s15 + $0x2d4] sm:$0xf0] }
  0x92   : > { %1937 = vmatpush.bf16.msrb.mxu2 %v3097_v55  ;;  %v2918_v19 = vld [vmem:[%s3785_s15 + $0x510] sm:$0xf0]  ;;  %v3525_v27 = vld [vmem:[%s3785_s15 + $0x704] sm:$0xf]  ;;  %v2793_v35 = vor.u32 %v3429_v14, %v2790_v15  ;;  %v2764_v55 = vld [vmem:[%s3785_s15 + $0x3c8] sm:$0xf] }
  0x93   : > { %1950 = vmatpush.bf16.msrb.mxu3 %v3225_v59  ;;  %v3046_v25 = vld [vmem:[%s3785_s15 + $0x610] sm:$0xf0]  ;;  %v2921_v40 = vor.u32 %v3461_v18, %v2918_v19  ;;  %v2637_v59 = vor.u32 %v3392_v54, %v2636_v53  ;;  %v3324_v61 = vld [vmem:[%s3785_s15 + $0xb4] sm:$0xf0]  ;;  %v2492_v62 = vld [vmem:[%s3785_s15 + $0x1a8] sm:$0xf]  ;;  %v2765_v63 = vor.u32 %v3424_v56, %v2764_v55 }
  0x94   : > { %1912 = vmatpush.bf16.msrb.mxu0 %v2825_v1  ;;  %v3174_v28 = vld [vmem:[%s3785_s15 + $0x710] sm:$0xf0]  ;;  %v3049_v41 = vor.u32 %v3493_v23, %v3046_v25  ;;  %v3356_v0 = vld [vmem:[%s3785_s15 + $0x1b4] sm:$0xf0]  ;;  %v2620_v1 = vld [vmem:[%s3785_s15 + $0x2a8] sm:$0xf] }
  0x95   : > { %1925 = vmatpush.bf16.msrb.mxu1 %v2953_v2  ;;  %v3177_v44 = vor.u32 %v3525_v27, %v3174_v28  ;;  %v3388_v2 = vld [vmem:[%s3785_s15 + $0x2b4] sm:$0xf0]  ;;  %v2493_v5 = vor.u32 %v3356_v0, %v2492_v62  ;;  %v2476_v8 = vld [vmem:[%s3785_s15 + $0x188] sm:$0xf] }
  0x96   : > { %1938 = vmatpush.bf16.msrb.mxu2 %v3081_v3  ;;  %v2748_v3 = vld [vmem:[%s3785_s15 + $0x3a8] sm:$0xf]  ;;  %v3420_v4 = vld [vmem:[%s3785_s15 + $0x3b4] sm:$0xf0]  ;;  %v2621_v6 = vor.u32 %v3388_v2, %v2620_v1 }
  0x97   : > { %1951 = vmatpush.bf16.msrb.mxu3 %v3209_v7  ;;  %v2348_v7 = vld [vmem:[%s3785_s15 + $0x88] sm:$0xf]  ;;  %v3352_v9 = vld [vmem:[%s3785_s15 + $0x194] sm:$0xf0] }
  0x98   : > { %1913 = vmatpush.bf16.msrb.mxu0 %v2809_v13  ;;  %v2604_v10 = vld [vmem:[%s3785_s15 + $0x288] sm:$0xf]  ;;  %v3384_v11 = vld [vmem:[%s3785_s15 + $0x294] sm:$0xf0]  ;;  %v2477_v14 = vor.u32 %v3352_v9, %v2476_v8 }
  0x99   : > { %1926 = vmatpush.bf16.msrb.mxu1 %v2937_v16  ;;  %v3416_v12 = vld [vmem:[%s3785_s15 + $0x394] sm:$0xf0]  ;;  %v2605_v15 = vor.u32 %v3384_v11, %v2604_v10  ;;  %v2332_v16 = vld [vmem:[%s3785_s15 + $0x68] sm:$0xf] }
  0x9a   : > { %1939 = vmatpush.bf16.msrb.mxu2 %v3065_v17  ;;  %v3316_v17 = vld [vmem:[%s3785_s15 + $0x74] sm:$0xf0]  ;;  %v2460_v18 = vld [vmem:[%s3785_s15 + $0x168] sm:$0xf] }
  0x9b   : > { %1952 = vmatpush.bf16.msrb.mxu3 %v3193_v24  ;;  %v3348_v23 = vld [vmem:[%s3785_s15 + $0x174] sm:$0xf0]  ;;  %v2588_v24 = vld [vmem:[%s3785_s15 + $0x268] sm:$0xf]  ;;  %v2333_v30 = vor.u32 %v3316_v17, %v2332_v16 }
  0x9c   : > { %1914 = vmatpush.bf16.msrb.mxu0 %v2793_v35  ;;  %v3380_v25 = vld [vmem:[%s3785_s15 + $0x274] sm:$0xf0]  ;;  %v2716_v27 = vld [vmem:[%s3785_s15 + $0x368] sm:$0xf]  ;;  %v2461_v33 = vor.u32 %v3348_v23, %v2460_v18 }
  0x9d   : > { %1927 = vmatpush.bf16.msrb.mxu1 %v2921_v40  ;;  %v3412_v28 = vld [vmem:[%s3785_s15 + $0x374] sm:$0xf0]  ;;  %v2589_v34 = vor.u32 %v3380_v25, %v2588_v24  ;;  %v2316_v35 = vld [vmem:[%s3785_s15 + $0x48] sm:$0xf] }
  0x9e   : > { %1940 = vmatpush.bf16.msrb.mxu2 %v3049_v41  ;;  %v3312_v36 = vld [vmem:[%s3785_s15 + $0x54] sm:$0xf0]  ;;  %v2444_v37 = vld [vmem:[%s3785_s15 + $0x148] sm:$0xf]  ;;  %v2717_v39 = vor.u32 %v3412_v28, %v2716_v27 }
  0x9f   : > { %1953 = vmatpush.bf16.msrb.mxu3 %v3177_v44  ;;  %1915 = vmatmul.bf16.vlgmr.msrb.gmra.mxu0 %v3952_v31  ;;  %v3320_v31 = vld [vmem:[%s3785_s15 + $0x94] sm:$0xf0]  ;;  %v2572_v41 = vld [vmem:[%s3785_s15 + $0x248] sm:$0xf] }
  0xa0   : > { %1959 = vmatpush.bf16.msra.mxu0 %v2397_v45  ;;  %1928 = vmatmul.bf16.vlgmr.msrb.gmra.mxu1 %v3959_v38  ;;  %v2732_v38 = vld [vmem:[%s3785_s15 + $0x388] sm:$0xf]  ;;  %v2349_v13 = vor.u32 %v3320_v31, %v2348_v7  ;;  %v3344_v40 = vld [vmem:[%s3785_s15 + $0x154] sm:$0xf0]  ;;  %v2317_v45 = vor.u32 %v3312_v36, %v2316_v35 }
  0xa1   : > { %1972 = vmatpush.bf16.msra.mxu1 %v2525_v46  ;;  %1941 = vmatmul.bf16.vlgmr.msrb.gmra.mxu2 %v3950_v29  ;;  %v2365_v29 = vor.u32 %v3324_v61, %v2364_v60  ;;  %v2733_v19 = vor.u32 %v3416_v12, %v2732_v38  ;;  %v3376_v42 = vld [vmem:[%s3785_s15 + $0x254] sm:$0xf0]  ;;  %v2700_v43 = vld [vmem:[%s3785_s15 + $0x348] sm:$0xf]  ;;  %v2445_v46 = vor.u32 %v3344_v40, %v2444_v37 }
  0xa2   : > { %1985 = vmatpush.bf16.msra.mxu2 %v2653_v47  ;;  %1954 = vmatmul.bf16.vlgmr.msrb.gmra.mxu3 %v3954_v32  ;;  %v2749_v32 = vor.u32 %v3420_v4, %v2748_v3  ;;  %v3408_v44 = vld [vmem:[%s3785_s15 + $0x354] sm:$0xf0]  ;;  %v2573_v47 = vor.u32 %v3376_v42, %v2572_v41  ;;  %v2300_v48 = vld [vmem:[%s3785_s15 + $0x28] sm:$0xf] }
  0xa3   : > { %1998 = vmatpush.bf16.msra.mxu3 %v2781_v51  ;;  %v3308_v49 = vld [vmem:[%s3785_s15 + $0x34] sm:$0xf0]  ;;  %v2428_v50 = vld [vmem:[%s3785_s15 + $0x128] sm:$0xf]  ;;  %v2701_v51 = vor.u32 %v3408_v44, %v2700_v43 }
  0xa4   : > { %1960 = vmatpush.bf16.msra.mxu0 %v2381_v57  ;;  %v3340_v52 = vld [vmem:[%s3785_s15 + $0x134] sm:$0xf0]  ;;  %v2556_v53 = vld [vmem:[%s3785_s15 + $0x228] sm:$0xf]  ;;  %v2301_v57 = vor.u32 %v3308_v49, %v2300_v48 }
  0xa5   : > { %1973 = vmatpush.bf16.msra.mxu1 %v2509_v58  ;;  %v3372_v54 = vld [vmem:[%s3785_s15 + $0x234] sm:$0xf0]  ;;  %v2684_v55 = vld [vmem:[%s3785_s15 + $0x328] sm:$0xf]  ;;  %v2429_v60 = vor.u32 %v3340_v52, %v2428_v50 }
  0xa6   : > { %1986 = vmatpush.bf16.msra.mxu2 %v2637_v59  ;;  %v3404_v56 = vld [vmem:[%s3785_s15 + $0x334] sm:$0xf0]  ;;  %v2284_v58 = vld [vmem:[%s3785_s15 + $0x8] sm:$0xf]  ;;  %v2557_v61 = vor.u32 %v3372_v54, %v2556_v53 }
  0xa7   : > { %1999 = vmatpush.bf16.msra.mxu3 %v2765_v63  ;;  %v3304_v59 = vld [vmem:[%s3785_s15 + $0x14] sm:$0xf0]  ;;  %v2412_v62 = vld [vmem:[%s3785_s15 + $0x108] sm:$0xf]  ;;  %v2685_v1 = vor.u32 %v3404_v56, %v2684_v55 }
  0xa8   : > { %1961 = vmatpush.bf16.msra.mxu0 %v2365_v29  ;;  %v3336_v63 = vld [vmem:[%s3785_s15 + $0x114] sm:$0xf0]  ;;  %v2540_v0 = vld [vmem:[%s3785_s15 + $0x208] sm:$0xf]  ;;  %v2285_v7 = vor.u32 %v3304_v59, %v2284_v58 }
  0xa9   : > { %1974 = vmatpush.bf16.msra.mxu1 %v2493_v5  ;;  %v3368_v2 = vld [vmem:[%s3785_s15 + $0x214] sm:$0xf0]  ;;  %v2668_v3 = vld [vmem:[%s3785_s15 + $0x308] sm:$0xf]  ;;  %v2413_v9 = vor.u32 %v3336_v63, %v2412_v62 }
  0xaa   : > { %1987 = vmatpush.bf16.msra.mxu2 %v2621_v6  ;;  %v3400_v4 = vld [vmem:[%s3785_s15 + $0x314] sm:$0xf0]  ;;  %v2908_v29 = vld [vmem:[%s3785_s15 + $0x4e8] sm:$0xf]  ;;  %v2541_v10 = vor.u32 %v3368_v2, %v2540_v0 }
  0xab   : > { %2000 = vmatpush.bf16.msra.mxu3 %v2749_v32  ;;  %v3460_v5 = vld [vmem:[%s3785_s15 + $0x4f4] sm:$0xf0]  ;;  %v3036_v6 = vld [vmem:[%s3785_s15 + $0x5e8] sm:$0xf]  ;;  %v2669_v12 = vor.u32 %v3400_v4, %v2668_v3 }
  0xac   : > { %1962 = vmatpush.bf16.msra.mxu0 %v2349_v13  ;;  %v3492_v31 = vld [vmem:[%s3785_s15 + $0x5f4] sm:$0xf0]  ;;  %v3164_v8 = vld [vmem:[%s3785_s15 + $0x6e8] sm:$0xf]  ;;  %v2909_v13 = vor.u32 %v3460_v5, %v2908_v29 }
  0xad   : > { %1975 = vmatpush.bf16.msra.mxu1 %v2477_v14  ;;  %v3524_v32 = vld [vmem:[%s3785_s15 + $0x6f4] sm:$0xf0]  ;;  %v3292_v11 = vld [vmem:[%s3785_s15 + $0x7e8] sm:$0xf]  ;;  %v3037_v14 = vor.u32 %v3492_v31, %v3036_v6 }
  0xae   : > { %1988 = vmatpush.bf16.msra.mxu2 %v2605_v15  ;;  %v3556_v38 = vld [vmem:[%s3785_s15 + $0x7f4] sm:$0xf0]  ;;  %v3165_v15 = vor.u32 %v3524_v32, %v3164_v8  ;;  %v2892_v16 = vld [vmem:[%s3785_s15 + $0x4c8] sm:$0xf] }
  0xaf   : > { %2001 = vmatpush.bf16.msra.mxu3 %v2733_v19  ;;  %v3456_v17 = vld [vmem:[%s3785_s15 + $0x4d4] sm:$0xf0]  ;;  %v3020_v18 = vld [vmem:[%s3785_s15 + $0x5c8] sm:$0xf]  ;;  %v3293_v19 = vor.u32 %v3556_v38, %v3292_v11 }
  0xb0   : > { %1963 = vmatpush.bf16.msra.mxu0 %v2333_v30  ;;  %v3488_v23 = vld [vmem:[%s3785_s15 + $0x5d4] sm:$0xf0]  ;;  %v3148_v24 = vld [vmem:[%s3785_s15 + $0x6c8] sm:$0xf]  ;;  %v2893_v30 = vor.u32 %v3456_v17, %v2892_v16 }
  0xb1   : > { %1976 = vmatpush.bf16.msra.mxu1 %v2461_v33  ;;  %v3520_v25 = vld [vmem:[%s3785_s15 + $0x6d4] sm:$0xf0]  ;;  %v3276_v27 = vld [vmem:[%s3785_s15 + $0x7c8] sm:$0xf]  ;;  %v3021_v33 = vor.u32 %v3488_v23, %v3020_v18 }
  0xb2   : > { %1989 = vmatpush.bf16.msra.mxu2 %v2589_v34  ;;  %v3552_v28 = vld [vmem:[%s3785_s15 + $0x7d4] sm:$0xf0]  ;;  %v3149_v34 = vor.u32 %v3520_v25, %v3148_v24  ;;  %v2876_v35 = vld [vmem:[%s3785_s15 + $0x4a8] sm:$0xf] }
  0xb3   : > { %2002 = vmatpush.bf16.msra.mxu3 %v2717_v39  ;;  %v3452_v36 = vld [vmem:[%s3785_s15 + $0x4b4] sm:$0xf0]  ;;  %v3004_v37 = vld [vmem:[%s3785_s15 + $0x5a8] sm:$0xf]  ;;  %v3277_v39 = vor.u32 %v3552_v28, %v3276_v27 }
  0xb4   : > { %1964 = vmatpush.bf16.msra.mxu0 %v2317_v45  ;;  %v3484_v40 = vld [vmem:[%s3785_s15 + $0x5b4] sm:$0xf0]  ;;  %v3132_v41 = vld [vmem:[%s3785_s15 + $0x6a8] sm:$0xf]  ;;  %v2877_v45 = vor.u32 %v3452_v36, %v2876_v35 }
  0xb5   : > { %1977 = vmatpush.bf16.msra.mxu1 %v2445_v46  ;;  %v3516_v42 = vld [vmem:[%s3785_s15 + $0x6b4] sm:$0xf0]  ;;  %v3260_v43 = vld [vmem:[%s3785_s15 + $0x7a8] sm:$0xf]  ;;  %v3005_v46 = vor.u32 %v3484_v40, %v3004_v37 }
  0xb6   : > { %1990 = vmatpush.bf16.msra.mxu2 %v2573_v47  ;;  %v3548_v44 = vld [vmem:[%s3785_s15 + $0x7b4] sm:$0xf0]  ;;  %v3133_v47 = vor.u32 %v3516_v42, %v3132_v41  ;;  %v2988_v49 = vld [vmem:[%s3785_s15 + $0x588] sm:$0xf] }
  0xb7   : > { %2003 = vmatpush.bf16.msra.mxu3 %v2701_v51  ;;  %v3448_v48 = vld [vmem:[%s3785_s15 + $0x494] sm:$0xf0]  ;;  %v3244_v52 = vld [vmem:[%s3785_s15 + $0x788] sm:$0xf] }
  0xb8   : > { %1965 = vmatpush.bf16.msra.mxu0 %v2301_v57  ;;  %v3480_v50 = vld [vmem:[%s3785_s15 + $0x594] sm:$0xf0]  ;;  %v2844_v56 = vld [vmem:[%s3785_s15 + $0x468] sm:$0xf] }
  0xb9   : > { %1978 = vmatpush.bf16.msra.mxu1 %v2429_v60  ;;  %v3512_v51 = vld [vmem:[%s3785_s15 + $0x694] sm:$0xf0]  ;;  %v2989_v54 = vor.u32 %v3480_v50, %v2988_v49  ;;  %v2972_v58 = vld [vmem:[%s3785_s15 + $0x568] sm:$0xf]  ;;  %v3394_v50 = vld [vmem:[%s3785_s15 + $0x2ec] sm:$0xf] }
  0xba   : > { %1991 = vmatpush.bf16.msra.mxu2 %v2557_v61  ;;  %v3444_v57 = vld [vmem:[%s3785_s15 + $0x474] sm:$0xf0]  ;;  %v3100_v61 = vld [vmem:[%s3785_s15 + $0x668] sm:$0xf] }
  0xbb   : > { %2004 = vmatpush.bf16.msra.mxu3 %v2685_v1  ;;  %v3476_v60 = vld [vmem:[%s3785_s15 + $0x574] sm:$0xf0]  ;;  %v3228_v63 = vld [vmem:[%s3785_s15 + $0x768] sm:$0xf]  ;;  %v2845_v1 = vor.u32 %v3444_v57, %v2844_v56  ;;  %v1760_v11 = vpop.f32.mrf.mxu0 }
  0xbc   : > { %1966 = vmatpush.bf16.msra.mxu0 %v2285_v7  ;;  %v3508_v62 = vld [vmem:[%s3785_s15 + $0x674] sm:$0xf0]  ;;  %v2973_v2 = vor.u32 %v3476_v60, %v2972_v58  ;;  %v2828_v4 = vld [vmem:[%s3785_s15 + $0x448] sm:$0xf] }
  0xbd   : > { %1979 = vmatpush.bf16.msra.mxu1 %v2413_v9  ;;  %v3540_v0 = vld [vmem:[%s3785_s15 + $0x774] sm:$0xf0]  ;;  %v3101_v3 = vor.u32 %v3508_v62, %v3100_v61  ;;  %v2956_v5 = vld [vmem:[%s3785_s15 + $0x548] sm:$0xf]  ;;  %v3326_v61 = vld [vmem:[%s3785_s15 + $0xcc] sm:$0xf] }
  0xbe   : > { %1992 = vmatpush.bf16.msra.mxu2 %v2541_v10  ;;  %v3440_v29 = vld [vmem:[%s3785_s15 + $0x454] sm:$0xf0]  ;;  %v3229_v6 = vor.u32 %v3540_v0, %v3228_v63  ;;  %v3084_v31 = vld [vmem:[%s3785_s15 + $0x648] sm:$0xf]  ;;  %v2382_v62 = vld [vmem:[%s3785_s15 + $0xd8] sm:$0xf0] }
  0xbf   : > { %2005 = vmatpush.bf16.msra.mxu3 %v2669_v12  ;;  %1967 = vmatmul.bf16.vlgmr.msra.gmra.mxu0 %v3896_v21  ;;  %v3261_v21 = vor.u32 %v3548_v44, %v3260_v43  ;;  %v3472_v7 = vld [vmem:[%s3785_s15 + $0x554] sm:$0xf0]  ;;  %v3212_v32 = vld [vmem:[%s3785_s15 + $0x748] sm:$0xf]  ;;  %v2829_v10 = vor.u32 %v3440_v29, %v2828_v4  ;;  %v3358_v63 = vld [vmem:[%s3785_s15 + $0x1cc] sm:$0xf] }
  0xc0   : > { %2011 = vmatpush.bf16.msrb.mxu0 %v2909_v13  ;;  %1980 = vmatmul.bf16.vlgmr.msra.gmra.mxu1 %v3903_v26  ;;  %v3544_v26 = vld [vmem:[%s3785_s15 + $0x794] sm:$0xf0]  ;;  %v2957_v38 = vor.u32 %v3472_v7, %v2956_v5  ;;  %v2812_v13 = vld [vmem:[%s3785_s15 + $0x428] sm:$0xf]  ;;  %v3422_v4 = vld [vmem:[%s3785_s15 + $0x3cc] sm:$0xf] }
  0xc1   : > { %2024 = vmatpush.bf16.msrb.mxu1 %v3037_v14  ;;  %1993 = vmatmul.bf16.vlgmr.msra.gmra.mxu2 %v3894_v20  ;;  %v2860_v20 = vld [vmem:[%s3785_s15 + $0x488] sm:$0xf]  ;;  %v3245_v59 = vor.u32 %v3544_v26, %v3244_v52  ;;  %v3504_v8 = vld [vmem:[%s3785_s15 + $0x654] sm:$0xf0]  ;;  %v2766_v29 = vld [vmem:[%s3785_s15 + $0x3d8] sm:$0xf0] }
  0xc2   : > { %2037 = vmatpush.bf16.msrb.mxu2 %v3165_v15  ;;  %2006 = vmatmul.bf16.vlgmr.msra.gmra.mxu3 %v3898_v22  ;;  %v3116_v22 = vld [vmem:[%s3785_s15 + $0x688] sm:$0xf]  ;;  %v2861_v53 = vor.u32 %v3448_v48, %v2860_v20  ;;  %v3536_v9 = vld [vmem:[%s3785_s15 + $0x754] sm:$0xf0]  ;;  %v3085_v12 = vor.u32 %v3504_v8, %v3084_v31  ;;  %v2398_v20 = vld [vmem:[%s3785_s15 + $0xf8] sm:$0xf0] }
  0xc3   : > { %2050 = vmatpush.bf16.msrb.mxu3 %v3293_v19  ;;  %v3117_v55 = vor.u32 %v3512_v51, %v3116_v22  ;;  %v3436_v14 = vld [vmem:[%s3785_s15 + $0x434] sm:$0xf0]  ;;  %v2940_v15 = vld [vmem:[%s3785_s15 + $0x528] sm:$0xf]  ;;  %v3213_v17 = vor.u32 %v3536_v9, %v3212_v32  ;;  %v3362_v48 = vld [vmem:[%s3785_s15 + $0x1ec] sm:$0xf]  ;;  %v1762_v52 = vpop.f32.mrf.mxu0 }
  0xc4   : > { %2012 = vmatpush.bf16.msrb.mxu0 %v2893_v30  ;;  %v3468_v18 = vld [vmem:[%s3785_s15 + $0x534] sm:$0xf0]  ;;  %v3068_v19 = vld [vmem:[%s3785_s15 + $0x628] sm:$0xf]  ;;  %v2813_v28 = vor.u32 %v3436_v14, %v2812_v13  ;;  %v2654_v22 = vld [vmem:[%s3785_s15 + $0x2f8] sm:$0xf0] }
  0xc5   : > { %2025 = vmatpush.bf16.msrb.mxu1 %v3021_v33  ;;  %v3500_v23 = vld [vmem:[%s3785_s15 + $0x634] sm:$0xf0]  ;;  %v3196_v25 = vld [vmem:[%s3785_s15 + $0x728] sm:$0xf]  ;;  %v2657_v60 = vor.u32 %v3394_v50, %v2654_v22  ;;  %v3322_v32 = vld [vmem:[%s3785_s15 + $0xac] sm:$0xf] }
  0xc6   : > { %2038 = vmatpush.bf16.msrb.mxu2 %v3149_v34  ;;  %v3532_v27 = vld [vmem:[%s3785_s15 + $0x734] sm:$0xf0]  ;;  %v2796_v30 = vld [vmem:[%s3785_s15 + $0x408] sm:$0xf]  ;;  %v2941_v34 = vor.u32 %v3468_v18, %v2940_v15  ;;  %v3069_v35 = vor.u32 %v3500_v23, %v3068_v19  ;;  %v2366_v9 = vld [vmem:[%s3785_s15 + $0xb8] sm:$0xf0] }
  0xc7   : > { %2051 = vmatpush.bf16.msrb.mxu3 %v3277_v39  ;;  %v3432_v33 = vld [vmem:[%s3785_s15 + $0x414] sm:$0xf0]  ;;  %v2924_v36 = vld [vmem:[%s3785_s15 + $0x508] sm:$0xf]  ;;  %v3197_v41 = vor.u32 %v3532_v27, %v3196_v25  ;;  %v3386_v13 = vld [vmem:[%s3785_s15 + $0x2ac] sm:$0xf]  ;;  %v2369_v19 = vor.u32 %v3322_v32, %v2366_v9 }
  0xc8   : > { %2013 = vmatpush.bf16.msrb.mxu0 %v2877_v45  ;;  %v3464_v37 = vld [vmem:[%s3785_s15 + $0x514] sm:$0xf0]  ;;  %v3052_v39 = vld [vmem:[%s3785_s15 + $0x608] sm:$0xf]  ;;  %v2797_v49 = vor.u32 %v3432_v33, %v2796_v30  ;;  %v2622_v14 = vld [vmem:[%s3785_s15 + $0x2b8] sm:$0xf0] }
  0xc9   : > { %2026 = vmatpush.bf16.msrb.mxu1 %v3005_v46  ;;  %v3496_v42 = vld [vmem:[%s3785_s15 + $0x614] sm:$0xf0]  ;;  %v3180_v43 = vld [vmem:[%s3785_s15 + $0x708] sm:$0xf]  ;;  %v2925_v26 = vor.u32 %v3464_v37, %v2924_v36  ;;  %v4241_v15 = vld [vmem:[#allocation1 + $0x24] sm:$0xff]  ;;  %v2625_v25 = vor.u32 %v3386_v13, %v2622_v14 }
  0xca   : > { %2039 = vmatpush.bf16.msrb.mxu2 %v3133_v47  ;;  %v3528_v44 = vld [vmem:[%s3785_s15 + $0x714] sm:$0xf0]  ;;  %v3330_v47 = vld [vmem:[%s3785_s15 + $0xec] sm:$0xf]  ;;  %v2750_v18 = vld [vmem:[%s3785_s15 + $0x3b8] sm:$0xf0] }
  0xcb   : > { %2052 = vmatpush.bf16.msrb.mxu3 %v3261_v21  ;;  %v2526_v21 = vld [vmem:[%s3785_s15 + $0x1f8] sm:$0xf0]  ;;  %v3181_v57 = vor.u32 %v3528_v44, %v3180_v43  ;;  %v2401_v58 = vor.u32 %v3330_v47, %v2398_v20  ;;  %v4249_v23 = vld [vmem:[#allocation1 + $0x2d] sm:$0xff] }
  0xcc   : > { %2014 = vmatpush.bf16.msrb.mxu0 %v2861_v53  ;;  %v3053_v53 = vor.u32 %v3496_v42, %v3052_v39  ;;  %v3318_v27 = vld [vmem:[%s3785_s15 + $0x8c] sm:$0xf]  ;;  %v2606_v36 = vld [vmem:[%s3785_s15 + $0x298] sm:$0xf0] }
  0xcd   : > { %2027 = vmatpush.bf16.msrb.mxu1 %v2989_v54  ;;  %v1773_v16 = vpop.f32.mrf.mxu1  ;;  %v3426_v54 = vld [vmem:[%s3785_s15 + $0x3ec] sm:$0xf]  ;;  %v2734_v39 = vld [vmem:[%s3785_s15 + $0x398] sm:$0xf0] }
  0xce   : > { %2040 = vmatpush.bf16.msrb.mxu2 %v3117_v55  ;;  %v1774_v24 = vadd.f32 %v1773_v16, %v1760_v11  ;;  %v2782_v55 = vld [vmem:[%s3785_s15 + $0x3f8] sm:$0xf0]  ;;  %v2769_v11 = vor.u32 %v3422_v4, %v2766_v29  ;;  %v3350_v30 = vld [vmem:[%s3785_s15 + $0x18c] sm:$0xf] }
  0xcf   : > { %2053 = vmatpush.bf16.msrb.mxu3 %v3245_v59  ;;  %v2529_v59 = vor.u32 %v3362_v48, %v2526_v21  ;;  %v2785_v0 = vor.u32 %v3426_v54, %v2782_v55  ;;  %v4244_v16 = vld [vmem:[#allocation1 + $0x3f] sm:$0xff]  ;;  %v3414_v37 = vld [vmem:[%s3785_s15 + $0x38c] sm:$0xf] }
  0xd0   : > { %2015 = vmatpush.bf16.msrb.mxu0 %v2845_v1  ;;  %v2510_v1 = vld [vmem:[%s3785_s15 + $0x1d8] sm:$0xf0]  ;;  %v3314_v44 = vld [vmem:[%s3785_s15 + $0x6c] sm:$0xf]  ;;  %v2737_v48 = vor.u32 %v3414_v37, %v2734_v39 }
  0xd1   : > { %2028 = vmatpush.bf16.msrb.mxu1 %v2973_v2  ;;  %v3390_v2 = vld [vmem:[%s3785_s15 + $0x2cc] sm:$0xf]  ;;  %v2513_v31 = vor.u32 %v3358_v63, %v2510_v1  ;;  %v2590_v50 = vld [vmem:[%s3785_s15 + $0x278] sm:$0xf0] }
  0xd2   : > { %2041 = vmatpush.bf16.msrb.mxu2 %v3101_v3  ;;  %v1786_v40 = vpop.f32.mrf.mxu2  ;;  %v1799_v46 = vpop.f32.mrf.mxu3  ;;  %v2638_v3 = vld [vmem:[%s3785_s15 + $0x2d8] sm:$0xf0]  ;;  %v3378_v21 = vld [vmem:[%s3785_s15 + $0x26c] sm:$0xf] }
  0xd3   : > { %2054 = vmatpush.bf16.msrb.mxu3 %v3229_v6  ;;  %v1787_v45 = vadd.f32 %v1786_v40, %v1774_v24  ;;  %v2385_v6 = vor.u32 %v3326_v61, %v2382_v62  ;;  %v2641_v8 = vor.u32 %v3390_v2, %v2638_v3  ;;  %v3410_v22 = vld [vmem:[%s3785_s15 + $0x36c] sm:$0xf]  ;;  %v2718_v52 = vld [vmem:[%s3785_s15 + $0x378] sm:$0xf0]  ;;  %v2593_v54 = vor.u32 %v3378_v21, %v2590_v50 }
  0xd4   : > { %2016 = vmatpush.bf16.msrb.mxu0 %v2829_v10  ;;  %v3354_v10 = vld [vmem:[%s3785_s15 + $0x1ac] sm:$0xf]  ;;  %v2574_v62 = vld [vmem:[%s3785_s15 + $0x258] sm:$0xf0] }
  0xd5   : > { %2029 = vmatpush.bf16.msrb.mxu1 %v2957_v38  ;;  %v4220_v51 = vadd.f32 %v1799_v46, %v1787_v45  ;;  %v1775_v56 = vpop.f32.mrf.mxu1  ;;  %v4235_v38 = vld [vmem:[#allocation1 + $0x36] sm:$0xff]  ;;  %v2334_v45 = vld [vmem:[%s3785_s15 + $0x78] sm:$0xf0] }
  0xd6   : > { %2042 = vmatpush.bf16.msrb.mxu2 %v3085_v12  ;;  %v2494_v12 = vld [vmem:[%s3785_s15 + $0x1b8] sm:$0xf0]  ;;  %v3346_v46 = vld [vmem:[%s3785_s15 + $0x16c] sm:$0xf] }
  0xd7   : > { %2055 = vmatpush.bf16.msrb.mxu3 %v3213_v17  ;;  %v3418_v17 = vld [vmem:[%s3785_s15 + $0x3ac] sm:$0xf]  ;;  %v2497_v24 = vor.u32 %v3354_v10, %v2494_v12  ;;  %v2318_v56 = vld [vmem:[%s3785_s15 + $0x58] sm:$0xf0] }
  0xd8   : > { %2017 = vmatpush.bf16.msrb.mxu0 %v2813_v28  ;;  %v2350_v28 = vld [vmem:[%s3785_s15 + $0x98] sm:$0xf0]  ;;  %v2753_v33 = vor.u32 %v3418_v17, %v2750_v18  ;;  %v3310_v55 = vld [vmem:[%s3785_s15 + $0x4c] sm:$0xf] }
  0xd9   : > { %2030 = vmatpush.bf16.msrb.mxu1 %v2941_v34  ;;  %v2478_v34 = vld [vmem:[%s3785_s15 + $0x198] sm:$0xf0]  ;;  %v2353_v40 = vor.u32 %v3318_v27, %v2350_v28  ;;  %v3374_v61 = vld [vmem:[%s3785_s15 + $0x24c] sm:$0xf]  ;;  %v2321_v3 = vor.u32 %v3310_v55, %v2318_v56 }
  0xda   : > { %2043 = vmatpush.bf16.msrb.mxu2 %v3069_v35  ;;  %v1788_v5 = vpop.f32.mrf.mxu2  ;;  %v1801_v7 = vpop.f32.mrf.mxu3  ;;  %v3382_v35 = vld [vmem:[%s3785_s15 + $0x28c] sm:$0xf]  ;;  %v2481_v42 = vor.u32 %v3350_v30, %v2478_v34  ;;  %v2702_v2 = vld [vmem:[%s3785_s15 + $0x358] sm:$0xf0] }
  0xdb   : > { %2056 = vmatpush.bf16.msrb.mxu3 %v3197_v41  ;;  %v2609_v43 = vor.u32 %v3382_v35, %v2606_v36  ;;  %v3406_v1 = vld [vmem:[%s3785_s15 + $0x34c] sm:$0xf]  ;;  %v2430_v10 = vld [vmem:[%s3785_s15 + $0x138] sm:$0xf0] }
  0xdc   : > { %2018 = vmatpush.bf16.msrb.mxu0 %v2797_v49  ;;  %v1812_v41 = vpop.f32.mrf.mxu0  ;;  %v2462_v49 = vld [vmem:[%s3785_s15 + $0x178] sm:$0xf0]  ;;  %v3306_v7 = vld [vmem:[%s3785_s15 + $0x2c] sm:$0xf]  ;;  %v2705_v9 = vor.u32 %v3406_v1, %v2702_v2 }
  0xdd   : > { %2031 = vmatpush.bf16.msrb.mxu1 %v2925_v26  ;;  %v1813_v47 = vadd.f32 %v1812_v41, %v4220_v51  ;;  %v1825_v20 = vpop.f32.mrf.mxu1  ;;  %v2465_v51 = vor.u32 %v3346_v46, %v2462_v49  ;;  %v2558_v12 = vld [vmem:[%s3785_s15 + $0x238] sm:$0xf0]  ;;  %v3402_v13 = vld [vmem:[%s3785_s15 + $0x32c] sm:$0xf] }
  0xde   : > { %2044 = vmatpush.bf16.msrb.mxu2 %v3053_v53  ;;  %v2337_v53 = vor.u32 %v3314_v44, %v2334_v45  ;;  %v2686_v14 = vld [vmem:[%s3785_s15 + $0x338] sm:$0xf0]  ;;  %v3302_v18 = vld [vmem:[%s3785_s15 + $0xc] sm:$0xf] }
  0xdf   : > { %2057 = vmatpush.bf16.msrb.mxu3 %v3181_v57  ;;  %2019 = vmatmul.bf16.vlgmr.msrb.gmra.mxu0 %v4241_v15  ;;  %v1826_v26 = vadd.f32 %v1825_v20, %v1813_v47  ;;  %v3342_v57 = vld [vmem:[%s3785_s15 + $0x14c] sm:$0xf]  ;;  %v2414_v28 = vld [vmem:[%s3785_s15 + $0x118] sm:$0xf0]  ;;  %v2689_v34 = vor.u32 %v3402_v13, %v2686_v14 }
  0xe0   : > { %2063 = vmatpush.bf16.msra.mxu0 %v2401_v58  ;;  %2032 = vmatmul.bf16.vlgmr.msrb.gmra.mxu1 %v4249_v23  ;;  %v3334_v27 = vld [vmem:[%s3785_s15 + $0x10c] sm:$0xf]  ;;  %v2542_v35 = vld [vmem:[%s3785_s15 + $0x218] sm:$0xf0] }
  0xe1   : > { %2076 = vmatpush.bf16.msra.mxu1 %v2529_v59  ;;  %2045 = vmatmul.bf16.vlgmr.msrb.gmra.mxu2 %v4235_v38  ;;  %v2721_v59 = vor.u32 %v3410_v22, %v2718_v52  ;;  %v3366_v30 = vld [vmem:[%s3785_s15 + $0x20c] sm:$0xf]  ;;  %v2670_v37 = vld [vmem:[%s3785_s15 + $0x318] sm:$0xf0]  ;;  %v2417_v47 = vor.u32 %v3334_v27, %v2414_v28 }
  0xe2   : > { %2089 = vmatpush.bf16.msra.mxu2 %v2657_v60  ;;  %2058 = vmatmul.bf16.vlgmr.msrb.gmra.mxu3 %v4244_v16  ;;  %v2446_v60 = vld [vmem:[%s3785_s15 + $0x158] sm:$0xf0]  ;;  %v3398_v36 = vld [vmem:[%s3785_s15 + $0x30c] sm:$0xf]  ;;  %v2545_v20 = vor.u32 %v3366_v30, %v2542_v35 }
  0xe3   : > { %2102 = vmatpush.bf16.msra.mxu3 %v2785_v0  ;;  %v2449_v5 = vor.u32 %v3342_v57, %v2446_v60  ;;  %v2910_v41 = vld [vmem:[%s3785_s15 + $0x4f8] sm:$0xf0]  ;;  %v3522_v45 = vld [vmem:[%s3785_s15 + $0x6ec] sm:$0xf]  ;;  %v2673_v21 = vor.u32 %v3398_v36, %v2670_v37 }
  0xe4   : > { %2064 = vmatpush.bf16.msra.mxu0 %v2385_v6  ;;  %v1838_v58 = vpop.f32.mrf.mxu2  ;;  %v1814_v29 = vpop.f32.mrf.mxu0  ;;  %v2577_v6 = vor.u32 %v3374_v61, %v2574_v62  ;;  %v3038_v44 = vld [vmem:[%s3785_s15 + $0x5f8] sm:$0xf0]  ;;  %v3518_v56 = vld [vmem:[%s3785_s15 + $0x6cc] sm:$0xf] }
  0xe5   : > { %2077 = vmatpush.bf16.msra.mxu1 %v2513_v31  ;;  %v1839_v63 = vadd.f32 %v1838_v58, %v1826_v26  ;;  %v1851_v0 = vpop.f32.mrf.mxu3  ;;  %v2302_v31 = vld [vmem:[%s3785_s15 + $0x38] sm:$0xf0]  ;;  %v1827_v32 = vpop.f32.mrf.mxu1  ;;  %v3454_v26 = vld [vmem:[%s3785_s15 + $0x4cc] sm:$0xf] }
  0xe6   : > { %2090 = vmatpush.bf16.msra.mxu2 %v2641_v8  ;;  %v3338_v8 = vld [vmem:[%s3785_s15 + $0x12c] sm:$0xf]  ;;  %v2305_v17 = vor.u32 %v3306_v7, %v2302_v31  ;;  %v3166_v46 = vld [vmem:[%s3785_s15 + $0x6f8] sm:$0xf0]  ;;  %v3622_v32 = vld [vmem:[#allocation1 + $0x1b] sm:$0xff] }
  0xe7   : > { %2103 = vmatpush.bf16.msra.mxu3 %v2769_v11  ;;  %v4277_v4 = vadd.f32 %v1851_v0, %v1839_v63  ;;  %v3370_v11 = vld [vmem:[%s3785_s15 + $0x22c] sm:$0xf]  ;;  %v3294_v49 = vld [vmem:[%s3785_s15 + $0x7f8] sm:$0xf0]  ;;  %v3169_v52 = vor.u32 %v3522_v45, %v3166_v46 }
  0xe8   : > { %2065 = vmatpush.bf16.msra.mxu0 %v2369_v19  ;;  %v2286_v19 = vld [vmem:[%s3785_s15 + $0x18] sm:$0xf0]  ;;  %v3550_v58 = vld [vmem:[%s3785_s15 + $0x7cc] sm:$0xf] }
  0xe9   : > { %2078 = vmatpush.bf16.msra.mxu1 %v2497_v24  ;;  %v2433_v24 = vor.u32 %v3338_v8, %v2430_v10  ;;  %v3022_v55 = vld [vmem:[%s3785_s15 + $0x5d8] sm:$0xf0]  ;;  %v3450_v63 = vld [vmem:[%s3785_s15 + $0x4ac] sm:$0xf]  ;;  %v3623_v10 = vld [vmem:[#allocation1 + $0x9] sm:$0xff] }
  0xea   : > { %2091 = vmatpush.bf16.msra.mxu2 %v2625_v25  ;;  %v2561_v25 = vor.u32 %v3370_v11, %v2558_v12  ;;  %v3150_v57 = vld [vmem:[%s3785_s15 + $0x6d8] sm:$0xf0]  ;;  %v3482_v1 = vld [vmem:[%s3785_s15 + $0x5ac] sm:$0xf] }
  0xeb   : > { %2104 = vmatpush.bf16.msra.mxu3 %v2753_v33  ;;  %v3153_v62 = vor.u32 %v3518_v56, %v3150_v57  ;;  %v2878_v0 = vld [vmem:[%s3785_s15 + $0x4b8] sm:$0xf0]  ;;  %v3546_v7 = vld [vmem:[%s3785_s15 + $0x7ac] sm:$0xf] }
  0xec   : > { %2066 = vmatpush.bf16.msra.mxu0 %v2353_v40  ;;  %v1840_v33 = vpop.f32.mrf.mxu2  ;;  %v3458_v40 = vld [vmem:[%s3785_s15 + $0x4ec] sm:$0xf]  ;;  %v3006_v29 = vld [vmem:[%s3785_s15 + $0x5b8] sm:$0xf0] }
  0xed   : > { %2079 = vmatpush.bf16.msra.mxu1 %v2481_v42  ;;  %v1853_v39 = vpop.f32.mrf.mxu3  ;;  %v3490_v42 = vld [vmem:[%s3785_s15 + $0x5ec] sm:$0xf]  ;;  %v2913_v50 = vor.u32 %v3458_v40, %v2910_v41  ;;  %v3262_v31 = vld [vmem:[%s3785_s15 + $0x7b8] sm:$0xf0]  ;;  %v3009_v11 = vor.u32 %v3482_v1, %v3006_v29 }
  0xee   : > { %2092 = vmatpush.bf16.msra.mxu2 %v2609_v43  ;;  %v2289_v43 = vor.u32 %v3302_v18, %v2286_v19  ;;  %v3041_v22 = vor.u32 %v3490_v42, %v3038_v44  ;;  %v3621_v8 = vld [vmem:[#allocation1] sm:$0xff]  ;;  %v3446_v13 = vld [vmem:[%s3785_s15 + $0x48c] sm:$0xf]  ;;  %v3265_v18 = vor.u32 %v3546_v7, %v3262_v31 }
  0xef   : > { %2105 = vmatpush.bf16.msra.mxu3 %v2737_v48  ;;  %v3554_v48 = vld [vmem:[%s3785_s15 + $0x7ec] sm:$0xf]  ;;  %v2862_v14 = vld [vmem:[%s3785_s15 + $0x498] sm:$0xf0] }
  0xf0   : > { %2067 = vmatpush.bf16.msra.mxu0 %v2337_v53  ;;  %v2894_v53 = vld [vmem:[%s3785_s15 + $0x4d8] sm:$0xf0]  ;;  %v3542_v27 = vld [vmem:[%s3785_s15 + $0x78c] sm:$0xf]  ;;  %v2865_v30 = vor.u32 %v3446_v13, %v2862_v14 }
  0xf1   : > { %2080 = vmatpush.bf16.msra.mxu1 %v2465_v51  ;;  %v3486_v51 = vld [vmem:[%s3785_s15 + $0x5cc] sm:$0xf]  ;;  %v2897_v60 = vor.u32 %v3454_v26, %v2894_v53  ;;  %v2990_v19 = vld [vmem:[%s3785_s15 + $0x598] sm:$0xf0] }
  0xf2   : > { %2093 = vmatpush.bf16.msra.mxu2 %v2593_v54  ;;  %v3297_v54 = vor.u32 %v3554_v48, %v3294_v49  ;;  %v3025_v61 = vor.u32 %v3486_v51, %v3022_v55  ;;  %v3246_v28 = vld [vmem:[%s3785_s15 + $0x798] sm:$0xf0]  ;;  %v3442_v36 = vld [vmem:[%s3785_s15 + $0x46c] sm:$0xf] }
  0xf3   : > { %2106 = vmatpush.bf16.msra.mxu3 %v2721_v59  ;;  %v3278_v59 = vld [vmem:[%s3785_s15 + $0x7d8] sm:$0xf0]  ;;  %v3474_v39 = vld [vmem:[%s3785_s15 + $0x56c] sm:$0xf]  ;;  %v3249_v41 = vor.u32 %v3542_v27, %v3246_v28 }
  0xf4   : > { %2068 = vmatpush.bf16.msra.mxu0 %v2321_v3  ;;  %v3281_v2 = vor.u32 %v3550_v58, %v3278_v59  ;;  %v3620_v3 = vld [vmem:[#allocation1 + $0x12] sm:$0xff]  ;;  %v2846_v37 = vld [vmem:[%s3785_s15 + $0x478] sm:$0xf0] }
  0xf5   : > { %2081 = vmatpush.bf16.msra.mxu1 %v2449_v5  ;;  %v3514_v5 = vld [vmem:[%s3785_s15 + $0x6ac] sm:$0xf]  ;;  %v2974_v42 = vld [vmem:[%s3785_s15 + $0x578] sm:$0xf0] }
  0xf6   : > { %2094 = vmatpush.bf16.msra.mxu2 %v2577_v6  ;;  %v3134_v6 = vld [vmem:[%s3785_s15 + $0x6b8] sm:$0xf0]  ;;  %v3538_v46 = vld [vmem:[%s3785_s15 + $0x76c] sm:$0xf]  ;;  %v2977_v48 = vor.u32 %v3474_v39, %v2974_v42 }
  0xf7   : > { %2107 = vmatpush.bf16.msra.mxu3 %v2705_v9  ;;  %v2881_v9 = vor.u32 %v3450_v63, %v2878_v0  ;;  %v3137_v12 = vor.u32 %v3514_v5, %v3134_v6  ;;  %v3102_v44 = vld [vmem:[%s3785_s15 + $0x678] sm:$0xf0]  ;;  %v3502_v51 = vld [vmem:[%s3785_s15 + $0x64c] sm:$0xf] }
  0xf8   : > { %2069 = vmatpush.bf16.msra.mxu0 %v2305_v17  ;;  %v3478_v17 = vld [vmem:[%s3785_s15 + $0x58c] sm:$0xf]  ;;  %v2958_v53 = vld [vmem:[%s3785_s15 + $0x558] sm:$0xf0] }
  0xf9   : > { %2082 = vmatpush.bf16.msra.mxu1 %v2433_v24  ;;  %v3510_v24 = vld [vmem:[%s3785_s15 + $0x68c] sm:$0xf]  ;;  %v3214_v58 = vld [vmem:[%s3785_s15 + $0x758] sm:$0xf0] }
  0xfa   : > { %2095 = vmatpush.bf16.msra.mxu2 %v2561_v25  ;;  %v3118_v25 = vld [vmem:[%s3785_s15 + $0x698] sm:$0xf0]  ;;  %v3534_v57 = vld [vmem:[%s3785_s15 + $0x74c] sm:$0xf] }
  0xfb   : > { %2108 = vmatpush.bf16.msra.mxu3 %v2689_v34  ;;  %v2993_v34 = vor.u32 %v3478_v17, %v2990_v19  ;;  %v3121_v35 = vor.u32 %v3510_v24, %v3118_v25  ;;  %v3434_v0 = vld [vmem:[%s3785_s15 + $0x42c] sm:$0xf]  ;;  %v2814_v1 = vld [vmem:[%s3785_s15 + $0x438] sm:$0xf0]  ;;  %v3217_v29 = vor.u32 %v3534_v57, %v3214_v58 }
  0xfc   : > { %2070 = vmatpush.bf16.msra.mxu0 %v2289_v43  ;;  %v1864_v33 = vpop.f32.mrf.mxu0  ;;  %v3506_v43 = vld [vmem:[%s3785_s15 + $0x66c] sm:$0xf]  ;;  %v2942_v5 = vld [vmem:[%s3785_s15 + $0x538] sm:$0xf0] }
  0xfd   : > { %2083 = vmatpush.bf16.msra.mxu1 %v2417_v47  ;;  %v1877_v40 = vpop.f32.mrf.mxu1  ;;  %v3230_v47 = vld [vmem:[%s3785_s15 + $0x778] sm:$0xf0]  ;;  %v3105_v49 = vor.u32 %v3506_v43, %v3102_v44  ;;  %v3498_v6 = vld [vmem:[%s3785_s15 + $0x62c] sm:$0xf] }
  0xfe   : > { %2096 = vmatpush.bf16.msra.mxu2 %v2545_v20  ;;  %v1878_v45 = vadd.f32 %v1877_v40, %v1864_v33  ;;  %v2849_v20 = vor.u32 %v3442_v36, %v2846_v37  ;;  %v3233_v26 = vor.u32 %v3538_v46, %v3230_v47  ;;  %v3070_v7 = vld [vmem:[%s3785_s15 + $0x638] sm:$0xf0]  ;;  %v3530_v31 = vld [vmem:[%s3785_s15 + $0x72c] sm:$0xf] }
  0xff   : > { %2109 = vmatpush.bf16.msra.mxu3 %v2673_v21  ;;  %2071 = vmatmul.bf16.vlgmr.msra.gmra.mxu0 %v3621_v8  ;;  %v3438_v21 = vld [vmem:[%s3785_s15 + $0x44c] sm:$0xf]  ;;  %v3198_v8 = vld [vmem:[%s3785_s15 + $0x738] sm:$0xf0] }
 0x100   : > { %2115 = vmatpush.bf16.msrb.mxu0 %v2913_v50  ;;  %2084 = vmatmul.bf16.vlgmr.msra.gmra.mxu1 %v3623_v10  ;;  %v2830_v50 = vld [vmem:[%s3785_s15 + $0x458] sm:$0xf0]  ;;  %v3073_v10 = vor.u32 %v3498_v6, %v3070_v7  ;;  %v3462_v13 = vld [vmem:[%s3785_s15 + $0x50c] sm:$0xf]  ;;  %v3201_v17 = vor.u32 %v3530_v31, %v3198_v8 }
 0x101   : > { %2128 = vmatpush.bf16.msrb.mxu1 %v3041_v22  ;;  %2097 = vmatmul.bf16.vlgmr.msra.gmra.mxu2 %v3620_v3  ;;  %v3470_v22 = vld [vmem:[%s3785_s15 + $0x54c] sm:$0xf]  ;;  %v2833_v59 = vor.u32 %v3438_v21, %v2830_v50  ;;  %v3054_v24 = vld [vmem:[%s3785_s15 + $0x618] sm:$0xf0] }
 0x102   : > { %2141 = vmatpush.bf16.msrb.mxu2 %v3169_v52  ;;  %2110 = vmatmul.bf16.vlgmr.msra.gmra.mxu3 %v3622_v32  ;;  %v2817_v32 = vor.u32 %v3434_v0, %v2814_v1  ;;  %v3494_v19 = vld [vmem:[%s3785_s15 + $0x60c] sm:$0xf]  ;;  %v3182_v28 = vld [vmem:[%s3785_s15 + $0x718] sm:$0xf0] }
 0x103   : > { %2154 = vmatpush.bf16.msrb.mxu3 %v3297_v54  ;;  %v3086_v54 = vld [vmem:[%s3785_s15 + $0x658] sm:$0xf0]  ;;  %v3526_v27 = vld [vmem:[%s3785_s15 + $0x70c] sm:$0xf] }
 0x104   : > { %2116 = vmatpush.bf16.msrb.mxu0 %v2897_v60  ;;  %v1890_v52 = vpop.f32.mrf.mxu2  ;;  %v3089_v63 = vor.u32 %v3502_v51, %v3086_v54 }
 0x105   : > { %2129 = vmatpush.bf16.msrb.mxu1 %v3025_v61  ;;  %v1891_v55 = vadd.f32 %v1890_v52, %v1878_v45  ;;  %v1903_v56 = vpop.f32.mrf.mxu3  ;;  %v1866_v61 = vpop.f32.mrf.mxu0 }
 0x106   : > { %2142 = vmatpush.bf16.msrb.mxu2 %v3153_v62  ;;  %v2961_v62 = vor.u32 %v3470_v22, %v2958_v53  ;;  %v1879_v3 = vpop.f32.mrf.mxu1 }
 0x107   : > { %2155 = vmatpush.bf16.msrb.mxu3 %v3281_v2  ;;  %v1904_v60 = vadd.f32 %v1903_v56, %v1891_v55  ;;  %v3466_v2 = vld [vmem:[%s3785_s15 + $0x52c] sm:$0xf] }
 0x108   : > { %2117 = vmatpush.bf16.msrb.mxu0 %v2881_v9  ;;  %v2945_v9 = vor.u32 %v3466_v2, %v2942_v5 }
 0x109   : > { %2130 = vmatpush.bf16.msrb.mxu1 %v3009_v11  ;;  %v3430_v11 = vld [vmem:[%s3785_s15 + $0x40c] sm:$0xf] }
 0x10a   : > { %2143 = vmatpush.bf16.msrb.mxu2 %v3137_v12  ;;  %v2798_v12 = vld [vmem:[%s3785_s15 + $0x418] sm:$0xf0] }
 0x10b   : > { %2156 = vmatpush.bf16.msrb.mxu3 %v3265_v18  ;;  %v2926_v18 = vld [vmem:[%s3785_s15 + $0x518] sm:$0xf0] }
 0x10c   : > { %2118 = vmatpush.bf16.msrb.mxu0 %v2865_v30  ;;  %v1892_v14 = vpop.f32.mrf.mxu2  ;;  %v2801_v30 = vor.u32 %v3430_v11, %v2798_v12  ;;  %v2929_v33 = vor.u32 %v3462_v13, %v2926_v18 }
 0x10d   : > { %2131 = vmatpush.bf16.msrb.mxu1 %v2993_v34  ;;  %v1905_v25 = vpop.f32.mrf.mxu3  ;;  %v3057_v34 = vor.u32 %v3494_v19, %v3054_v24 }
 0x10e   : > { %2144 = vmatpush.bf16.msrb.mxu2 %v3121_v35  ;;  %v3185_v35 = vor.u32 %v3526_v27, %v3182_v28 }
 0x10f   : > { %2157 = vmatpush.bf16.msrb.mxu3 %v3249_v41 }
 0x110   : > { %2119 = vmatpush.bf16.msrb.mxu0 %v2849_v20 }
 0x111   : > { %2132 = vmatpush.bf16.msrb.mxu1 %v2977_v48 }
 0x112   : > { %2145 = vmatpush.bf16.msrb.mxu2 %v3105_v49 }
 0x113   : > { %2158 = vmatpush.bf16.msrb.mxu3 %v3233_v26 }
 0x114   : > { %2120 = vmatpush.bf16.msrb.mxu0 %v2833_v59 }
 0x115   : > { %2133 = vmatpush.bf16.msrb.mxu1 %v2961_v62 }
 0x116   : > { %2146 = vmatpush.bf16.msrb.mxu2 %v3089_v63 }
 0x117   : > { %2159 = vmatpush.bf16.msrb.mxu3 %v3217_v29 }
 0x118   : > { %2121 = vmatpush.bf16.msrb.mxu0 %v2817_v32 }
 0x119   : > { %2134 = vmatpush.bf16.msrb.mxu1 %v2945_v9 }
 0x11a   : > { %2147 = vmatpush.bf16.msrb.mxu2 %v3073_v10 }
 0x11b   : > { %2160 = vmatpush.bf16.msrb.mxu3 %v3201_v17 }
 0x11c   : > { %2122 = vmatpush.bf16.msrb.mxu0 %v2801_v30  ;;  %v1916_v36 = vpop.f32.mrf.mxu0 }
 0x11d   : > { %2135 = vmatpush.bf16.msrb.mxu1 %v2929_v33  ;;  %v1917_v37 = vadd.f32 %v1916_v36, %v1904_v60  ;;  %v1929_v39 = vpop.f32.mrf.mxu1 }
 0x11e   : > { %2148 = vmatpush.bf16.msrb.mxu2 %v3057_v34 }
 0x11f   : > { %2161 = vmatpush.bf16.msrb.mxu3 %v3185_v35  ;;  %2123 = vmatmul.bf16.vlgmr.msrb.gmra.mxu0 %v4241_v15  ;;  %v1930_v40 = vadd.f32 %v1929_v39, %v1917_v37 }
 0x120   : > { %2136 = vmatmul.bf16.vlgmr.msrb.gmra.mxu1 %v4249_v23 }
 0x121   : > { %2149 = vmatmul.bf16.vlgmr.msrb.gmra.mxu2 %v4235_v38 }
 0x122   : > { %2162 = vmatmul.bf16.vlgmr.msrb.gmra.mxu3 %v4244_v16 }
 0x124   : > { %v1942_v41 = vpop.f32.mrf.mxu2  ;;  %v1918_v45 = vpop.f32.mrf.mxu0 }
 0x125   : > { %v1943_v42 = vadd.f32 %v1942_v41, %v1930_v40  ;;  %v1955_v43 = vpop.f32.mrf.mxu3  ;;  %v1931_v46 = vpop.f32.mrf.mxu1 }
 0x127   : > { %v1956_v44 = vadd.f32 %v1955_v43, %v1943_v42 }
 0x129   : > { %v2171_v47 = vrot.slane %v1956_v44, 6 }
 0x12b   : > { %v2175_v15 = vsel %vm2174_vm0, %v4277_v4, %v2171_v47 }
 0x12c   : > { %v1944_v20 = vpop.f32.mrf.mxu2 }
 0x12d   : > { %v1957_v23 = vpop.f32.mrf.mxu3 }
 0x13c   : > { %v1968_v48 = vpop.f32.mrf.mxu0 }
 0x13d   : > { %v1981_v38 = vpop.f32.mrf.mxu1 }
 0x13e   : > { %v1982_v49 = vadd.f32 %v1981_v38, %v1968_v48 }
 0x144   : > { %v1994_v16 = vpop.f32.mrf.mxu2  ;;  %v1970_v52 = vpop.f32.mrf.mxu0 }
 0x145   : > { %v1995_v21 = vadd.f32 %v1994_v16, %v1982_v49  ;;  %v2007_v50 = vpop.f32.mrf.mxu3  ;;  %v1983_v26 = vpop.f32.mrf.mxu1 }
 0x147   : > { %v2008_v22 = vadd.f32 %v2007_v50, %v1995_v21 }
 0x14c   : > { %v1996_v53 = vpop.f32.mrf.mxu2 }
 0x14d   : > { %v2009_v51 = vpop.f32.mrf.mxu3 }
 0x15c   : > { %v2020_v54 = vpop.f32.mrf.mxu0 }
 0x15d   : > { %v2033_v55 = vpop.f32.mrf.mxu1  ;;  %v2021_v6 = vadd.f32 %v2020_v54, %v2008_v22 }
 0x15f   : > { %v2034_v31 = vadd.f32 %v2033_v55, %v2021_v6 }
 0x164   : > { %v2046_v56 = vpop.f32.mrf.mxu2  ;;  %v2022_v58 = vpop.f32.mrf.mxu0 }
 0x165   : > { %v2059_v57 = vpop.f32.mrf.mxu3  ;;  %v2035_v59 = vpop.f32.mrf.mxu1  ;;  %v2047_v11 = vadd.f32 %v2046_v56, %v2034_v31 }
 0x167   : > { %v2060_v14 = vadd.f32 %v2059_v57, %v2047_v11 }
 0x169   : > { %v2172_v27 = vrot.slane %v2060_v14, 4 }
 0x16c   : > { %v2048_v4 = vpop.f32.mrf.mxu2 }
 0x16d   : > { %v2061_v60 = vpop.f32.mrf.mxu3 }
 0x17c   : > { %v2072_v61 = vpop.f32.mrf.mxu0 }
 0x17d   : > { %v2085_v62 = vpop.f32.mrf.mxu1 }
 0x17e   : > { %v2086_v5 = vadd.f32 %v2085_v62, %v2072_v61 }
 0x184   : > { %v2098_v63 = vpop.f32.mrf.mxu2  ;;  %v2074_v1 = vpop.f32.mrf.mxu0 }
 0x185   : > { %v2111_v0 = vpop.f32.mrf.mxu3  ;;  %v2087_v2 = vpop.f32.mrf.mxu1  ;;  %v2099_v7 = vadd.f32 %v2098_v63, %v2086_v5 }
 0x187   : > { %v2112_v8 = vadd.f32 %v2111_v0, %v2099_v7 }
 0x18c   : > { %v2100_v3 = vpop.f32.mrf.mxu2 }
 0x18d   : > { %v2113_v29 = vpop.f32.mrf.mxu3 }
 0x19c   : > { %v2124_v32 = vpop.f32.mrf.mxu0 }
 0x19d   : > { %v2137_v9 = vpop.f32.mrf.mxu1  ;;  %v2125_v10 = vadd.f32 %v2124_v32, %v2112_v8 }
 0x19f   : > { %v2138_v12 = vadd.f32 %v2137_v9, %v2125_v10 }
 0x1a4   : > { %v2150_v13 = vpop.f32.mrf.mxu2  ;;  %v2126_v19 = vpop.f32.mrf.mxu0 }
 0x1a5   : > { %v2151_v17 = vadd.f32 %v2150_v13, %v2138_v12  ;;  %v2163_v18 = vpop.f32.mrf.mxu3  ;;  %v2139_v24 = vpop.f32.mrf.mxu1 }
 0x1a7   : > { %v2164_v25 = vadd.f32 %v2163_v18, %v2151_v17 }
 0x1a9   : > { %v2173_v28 = vrot.slane %v2164_v25, 2 }
 0x1ab   : > { %v2177_v30 = vsel %vm2176_vm1, %v2172_v27, %v2173_v28 }
 0x1ac   : > { %v2179_v33 = vsel %vm2178_vm2, %v2175_v15, %v2177_v30  ;;  %v2152_v34 = vpop.f32.mrf.mxu2 }
 0x1ad   : > { %v2165_v35 = vpop.f32.mrf.mxu3  ;;  %2182 = vst [vmem:[%s184_s23] sm:$0xff] %v2179_v33 }
 0x1ae PF: > { %s15_s14 = sadd.s32 1, %s3704_s14   ;;  %s4391_s9 = smov %s3688_s10 }
 0x1af   : > { %p12_p0 = scmp.ge.s32.totalorder %s15_s14, 4   ;;  %s4392_s10 = smov %s3692_s11 }
 0x1b0   : > { %s4393_s11 = smov %s3773_s21  ;;  %s4394_s12 = smov %s3700_s13 }
 0x1b1   : > { %s4395_s13 = smov %s4397_s16  ;;  %14 = sbr.rel (!%p12_p0) target bundleno = 4 (0x4), region = 73 }
 0x1b6   :  { %2205 = vsyncpa [#allocation3], 1 }
 0x1b7   :  { %2207 = vsyncpa [#allocation3 + $0x1], 1 }

// kernel: _pipeline.9
= control target key start
LH: loop header
LB: loop body
LE: loop exit
PB: predicated region body
PF: predicated region fallthrough
CT: control target
= control target key end

     0   :  { %7 = vsyncpa [#allocation3], 0  ;;  %s6348_s0 = inlined_call_operand.vmem [shape: bf16[2,1024], index: 0, kind: input, shape index: {}]   ;;  %s6349_s1 = inlined_call_operand.hbm [shape: bf16[1024,1536], index: 1, kind: input, shape index: {}]   ;;  %s6350_s2 = inlined_call_operand.vmem [shape: f32[2,1536], index: 2, kind: output, shape index: {}]  }
   0x1   :  { %9 = vsyncpa [#allocation3 + $0x1], 0  ;;  %s5356_s9 = smov 0   ;;  %s5358_s10 = smov 0  }
   0x2   :  { %s5360_s11 = smov 0   ;;  %s5362_s12 = smov 0  }
   0x3   :  { %s5364_s13 = smov 0   ;;  %s5366_s14 = smov 0  }
   0x4 LB: > { %s3248_s15 = sadd.s32 4294967295, %s5335_s14   ;;  %s27_s16 = sadd.s32 1, %s5331_s13  ;;  %s5335_s14 = sphi %s5366_s14, %s15_s14   ;;  %s5331_s13 = sphi %s5364_s13, %s6357_s13   ;;  %s5327_s12 = sphi %s5362_s12, %s6356_s12   ;;  %s5323_s11 = sphi %s5360_s11, %s6355_s11   ;;  %s5319_s10 = sphi %s5358_s10, %s6354_s10   ;;  %s5315_s9 = sphi %s5356_s9, %s6353_s9  }
   0x5   : > { %p29_p0 = scmp.ge.s32.totalorder %s27_s16, 2  ;;  %s57_s17 = sadd.s32 1, %s5323_s11 }
   0x6   : > { %p64_p1 = scmp.ne.s32.totalorder %s5323_s11, %s5319_s10  ;;  %p65_p2 = scmp.eq.s32.totalorder %s5335_s14, 0 }
   0x7   : > { %s6359_s16 = smov (%p29_p0, %s27_s16), 0  ;;  %p70_p4 = scmp.ne.s32.totalorder %s5319_s10, %s5315_s9 }
   0x8   : > { %p66_p3 = por %p65_p2, %p64_p1  ;;  %s53_s18 = ssub.s32 %s5331_s13, %s6359_s16 }
   0x9   : > { %p71_p5 = scmp.eq.s32.totalorder %s3248_s15, 0  ;;  %p55_p6 = scmp.eq.s32.totalorder %s53_s18, 0 }
   0xa   : > { %p5186_p8 = scmp.lt.s32.totalorder %s5335_s14, 2  ;;  %s123_s21 = sand.u32 1, %s5323_s11  }
   0xb   : > { %p5395_p7 = por %p71_p5, %p70_p4  ;;  %s4793_s22 = smul.u32 24, %s5331_s13 }
   0xc   : > { %s5401_s20 = scalar_select %p55_p6, %s5323_s11, %s57_s17  }
   0xd   : > { %s5178_s23 = smul.u32 3072, %s123_s21  ;;  %s135_s26 = scalar_lea.hbm %s6349_s1, %s4793_s22 }
   0xe   : > { %p5183_p9 = pnand %p5186_p8, %p66_p3  ;;  %s136_s27 = sshll.u32 %s135_s26, 4  ;;  %s137_s27 = int_to_ptr.hbm [resolvable:$true] %s136_s27 }
   0xf   : > { %s127_s28 = scalar_lea.vmem [#allocation2], %s5178_s23  ;;  %p3253_p10 = scmp.ge.s32.totalorder %s5335_s14, 1 }
  0x10   : > { %s138_s29 = sshll.u32 %s127_s28, 4  ;;  %s124_s30 = scalar_lea.sflag [#allocation3], %s123_s21  ;;  %s139_s29 = int_to_ptr.vmem [resolvable:$true] %s138_s29 }
  0x11   : > { %s5337_s3 = smov 768   ;;  %s5338_s4 = smov 384  }
  0x12   : > { %s5339_s5 = smov 24   ;;  %p146_p11 = scmp.lt.s32.totalorder %s5335_s14, 3 }
  0x13   : > { %5185 = dma.hbm_to_vmem [thread:$0]  (!%p5183_p9), %s137_s27, 49152, %s139_s29, %s124_s30, %s5337_s3, %s5338_s4, %s5339_s5  }
  0x14   : > { %p147_p12 = pnand %p3253_p10, %p146_p11 }
  0x15   : > { %s152_s6 = sand.u32 (!%p147_p12), 1, %s5319_s10  }
  0x16   : > { %150 = sbr.rel (%p147_p12) target bundleno = 558 (0x22e), region = 28  ;;  %s153_s8 = scalar_lea.sflag (!%p147_p12), [#allocation3], %s152_s6 }
  0x17   : > { %s5179_s7 = smul.u32 (!%p147_p12), 3072, %s152_s6 }
  0x19   : > { %s5411_s9 = scalar_lea.vmem (!%p147_p12), [#allocation2], %s5179_s7 }
  0x1b   : > { %5310 = dma.done.wait (%p5395_p7), %s153_s8, 49152  }
  0x1c   : > { %5312 = vsyncadd (%p5395_p7), %s153_s8, 4294918144  ;;  %v3425_v0 = vld [vmem:[%s5411_s9 + $0x150] sm:$0xf]  ;;  %v4839_v1 = vld [vmem:[%s5411_s9 + $0x164] sm:$0xf0]  ;;  %vm3155_vm0 = vcmask 1041408  }
  0x1d   : > { %v3617_v2 = vld [vmem:[%s5411_s9 + $0x2d0] sm:$0xf]  ;;  %v3426_v3 = vor.u32 %v4839_v1, %v3425_v0  ;;  %v4887_v4 = vld [vmem:[%s5411_s9 + $0x2e4] sm:$0xf0]  ;;  %v3401_v11 = vld [vmem:[%s5411_s9 + $0x120] sm:$0xf] }
  0x1e   : > { %v3809_v5 = vld [vmem:[%s5411_s9 + $0x450] sm:$0xf]  ;;  %v4935_v6 = vld [vmem:[%s5411_s9 + $0x464] sm:$0xf0]  ;;  %v3618_v7 = vor.u32 %v4887_v4, %v3617_v2  ;;  %v4833_v13 = vld [vmem:[%s5411_s9 + $0x134] sm:$0xf0] }
  0x1f   : > { %v3810_v8 = vor.u32 %v4935_v6, %v3809_v5  ;;  %v4001_v9 = vld [vmem:[%s5411_s9 + $0x5d0] sm:$0xf]  ;;  %v4983_v10 = vld [vmem:[%s5411_s9 + $0x5e4] sm:$0xf0]  ;;  %2521 = vmatpush.bf16.msra.mxu0 %v3426_v3  ;;  %v3593_v14 = vld [vmem:[%s5411_s9 + $0x2a0] sm:$0xf]  ;;  %v3402_v16 = vor.u32 %v4833_v13, %v3401_v11 }
  0x20   : > { %v4002_v12 = vor.u32 %v4983_v10, %v4001_v9  ;;  %v4881_v15 = vld [vmem:[%s5411_s9 + $0x2b4] sm:$0xf0]  ;;  %2534 = vmatpush.bf16.msra.mxu1 %v3618_v7  ;;  %v3785_v18 = vld [vmem:[%s5411_s9 + $0x420] sm:$0xf]  ;;  %v3377_v23 = vld [vmem:[%s5411_s9 + $0xf0] sm:$0xf] }
  0x21   : > { %2547 = vmatpush.bf16.msra.mxu2 %v3810_v8  ;;  %v3594_v17 = vor.u32 %v4881_v15, %v3593_v14  ;;  %v4929_v19 = vld [vmem:[%s5411_s9 + $0x434] sm:$0xf0]  ;;  %v3977_v20 = vld [vmem:[%s5411_s9 + $0x5a0] sm:$0xf]  ;;  %v4827_v24 = vld [vmem:[%s5411_s9 + $0x104] sm:$0xf0] }
  0x22   : > { %2560 = vmatpush.bf16.msra.mxu3 %v4002_v12  ;;  %v3786_v21 = vor.u32 %v4929_v19, %v3785_v18  ;;  %v4977_v22 = vld [vmem:[%s5411_s9 + $0x5b4] sm:$0xf0]  ;;  %v3569_v26 = vld [vmem:[%s5411_s9 + $0x270] sm:$0xf]  ;;  %v4875_v27 = vld [vmem:[%s5411_s9 + $0x284] sm:$0xf0]  ;;  %v3378_v29 = vor.u32 %v4827_v24, %v3377_v23 }
  0x23   : > { %v3978_v25 = vor.u32 %v4977_v22, %v3977_v20  ;;  %v3761_v28 = vld [vmem:[%s5411_s9 + $0x3f0] sm:$0xf]  ;;  %2522 = vmatpush.bf16.msra.mxu0 %v3402_v16  ;;  %v4923_v30 = vld [vmem:[%s5411_s9 + $0x404] sm:$0xf0]  ;;  %v3570_v33 = vor.u32 %v4875_v27, %v3569_v26  ;;  %v3353_v35 = vld [vmem:[%s5411_s9 + $0xc0] sm:$0xf] }
  0x24   : > { %v3953_v31 = vld [vmem:[%s5411_s9 + $0x570] sm:$0xf]  ;;  %v4971_v32 = vld [vmem:[%s5411_s9 + $0x584] sm:$0xf0]  ;;  %2535 = vmatpush.bf16.msra.mxu1 %v3594_v17  ;;  %v3762_v34 = vor.u32 %v4923_v30, %v3761_v28  ;;  %v4821_v36 = vld [vmem:[%s5411_s9 + $0xd4] sm:$0xf0] }
  0x25   : > { %2548 = vmatpush.bf16.msra.mxu2 %v3786_v21  ;;  %v3545_v37 = vld [vmem:[%s5411_s9 + $0x240] sm:$0xf]  ;;  %v3954_v38 = vor.u32 %v4971_v32, %v3953_v31  ;;  %v4869_v39 = vld [vmem:[%s5411_s9 + $0x254] sm:$0xf0]  ;;  %v3354_v44 = vor.u32 %v4821_v36, %v3353_v35  ;;  %v3329_v47 = vld [vmem:[%s5411_s9 + $0x90] sm:$0xf] }
  0x26   : > { %2561 = vmatpush.bf16.msra.mxu3 %v3978_v25  ;;  %v3737_v40 = vld [vmem:[%s5411_s9 + $0x3c0] sm:$0xf]  ;;  %v4917_v41 = vld [vmem:[%s5411_s9 + $0x3d4] sm:$0xf0]  ;;  %v3546_v45 = vor.u32 %v4869_v39, %v3545_v37  ;;  %v4815_v48 = vld [vmem:[%s5411_s9 + $0xa4] sm:$0xf0] }
  0x27   : > { %v3929_v42 = vld [vmem:[%s5411_s9 + $0x540] sm:$0xf]  ;;  %v4965_v43 = vld [vmem:[%s5411_s9 + $0x554] sm:$0xf0]  ;;  %2523 = vmatpush.bf16.msra.mxu0 %v3378_v29  ;;  %v3738_v46 = vor.u32 %v4917_v41, %v3737_v40  ;;  %v3521_v49 = vld [vmem:[%s5411_s9 + $0x210] sm:$0xf]  ;;  %v3330_v56 = vor.u32 %v4815_v48, %v3329_v47 }
  0x28   : > { %2536 = vmatpush.bf16.msra.mxu1 %v3570_v33  ;;  %v3930_v50 = vor.u32 %v4965_v43, %v3929_v42  ;;  %v4863_v51 = vld [vmem:[%s5411_s9 + $0x224] sm:$0xf0]  ;;  %v3713_v52 = vld [vmem:[%s5411_s9 + $0x390] sm:$0xf]  ;;  %v3305_v59 = vld [vmem:[%s5411_s9 + $0x60] sm:$0xf] }
  0x29   : > { %2549 = vmatpush.bf16.msra.mxu2 %v3762_v34  ;;  %v4911_v53 = vld [vmem:[%s5411_s9 + $0x3a4] sm:$0xf0]  ;;  %v3905_v54 = vld [vmem:[%s5411_s9 + $0x510] sm:$0xf]  ;;  %v3522_v57 = vor.u32 %v4863_v51, %v3521_v49  ;;  %v4809_v60 = vld [vmem:[%s5411_s9 + $0x74] sm:$0xf0] }
  0x2a   : > { %2562 = vmatpush.bf16.msra.mxu3 %v3954_v38  ;;  %v4959_v55 = vld [vmem:[%s5411_s9 + $0x524] sm:$0xf0]  ;;  %v3714_v58 = vor.u32 %v4911_v53, %v3713_v52  ;;  %v3497_v61 = vld [vmem:[%s5411_s9 + $0x1e0] sm:$0xf]  ;;  %v4857_v63 = vld [vmem:[%s5411_s9 + $0x1f4] sm:$0xf0]  ;;  %v3306_v4 = vor.u32 %v4809_v60, %v3305_v59 }
  0x2b   : > { %2524 = vmatpush.bf16.msra.mxu0 %v3354_v44  ;;  %v3906_v62 = vor.u32 %v4959_v55, %v3905_v54  ;;  %v3689_v0 = vld [vmem:[%s5411_s9 + $0x360] sm:$0xf]  ;;  %v4905_v1 = vld [vmem:[%s5411_s9 + $0x374] sm:$0xf0]  ;;  %v3498_v5 = vor.u32 %v4857_v63, %v3497_v61  ;;  %v3281_v7 = vld [vmem:[%s5411_s9 + $0x30] sm:$0xf] }
  0x2c   : > { %2537 = vmatpush.bf16.msra.mxu1 %v3546_v45  ;;  %v3881_v2 = vld [vmem:[%s5411_s9 + $0x4e0] sm:$0xf]  ;;  %v4953_v3 = vld [vmem:[%s5411_s9 + $0x4f4] sm:$0xf0]  ;;  %v3690_v6 = vor.u32 %v4905_v1, %v3689_v0  ;;  %v4803_v8 = vld [vmem:[%s5411_s9 + $0x44] sm:$0xf0] }
  0x2d   : > { %2550 = vmatpush.bf16.msra.mxu2 %v3738_v46  ;;  %v3473_v9 = vld [vmem:[%s5411_s9 + $0x1b0] sm:$0xf]  ;;  %v3882_v10 = vor.u32 %v4953_v3, %v3881_v2  ;;  %v4851_v11 = vld [vmem:[%s5411_s9 + $0x1c4] sm:$0xf0]  ;;  %v3282_v16 = vor.u32 %v4803_v8, %v3281_v7  ;;  %v3257_v17 = vld [vmem:[%s5411_s9] sm:$0xf] }
  0x2e   : > { %2563 = vmatpush.bf16.msra.mxu3 %v3930_v50  ;;  %v3665_v12 = vld [vmem:[%s5411_s9 + $0x330] sm:$0xf]  ;;  %v4899_v13 = vld [vmem:[%s5411_s9 + $0x344] sm:$0xf0]  ;;  %v4797_v18 = vld [vmem:[%s5411_s9 + $0x14] sm:$0xf0]  ;;  %v3474_v19 = vor.u32 %v4851_v11, %v3473_v9 }
  0x2f   : > { %2525 = vmatpush.bf16.msra.mxu0 %v3330_v56  ;;  %v3857_v14 = vld [vmem:[%s5411_s9 + $0x4b0] sm:$0xf]  ;;  %v4947_v15 = vld [vmem:[%s5411_s9 + $0x4c4] sm:$0xf0]  ;;  %v3666_v20 = vor.u32 %v4899_v13, %v3665_v12  ;;  %v3449_v21 = vld [vmem:[%s5411_s9 + $0x180] sm:$0xf]  ;;  %v3258_v31 = vor.u32 %v4797_v18, %v3257_v17 }
  0x30   : > { %2538 = vmatpush.bf16.msra.mxu1 %v3522_v57  ;;  %v4845_v22 = vld [vmem:[%s5411_s9 + $0x194] sm:$0xf0]  ;;  %v3641_v23 = vld [vmem:[%s5411_s9 + $0x300] sm:$0xf]  ;;  %v3858_v24 = vor.u32 %v4947_v15, %v3857_v14  ;;  %v4193_v28 = vld [vmem:[%s5411_s9 + $0x750] sm:$0xf] }
  0x31   : > { %2551 = vmatpush.bf16.msra.mxu2 %v3714_v58  ;;  %v4893_v25 = vld [vmem:[%s5411_s9 + $0x314] sm:$0xf0]  ;;  %v3833_v26 = vld [vmem:[%s5411_s9 + $0x480] sm:$0xf]  ;;  %v5031_v29 = vld [vmem:[%s5411_s9 + $0x764] sm:$0xf0]  ;;  %v3450_v35 = vor.u32 %v4845_v22, %v3449_v21 }
  0x32   : > { %2564 = vmatpush.bf16.msra.mxu3 %v3906_v62  ;;  %v4941_v27 = vld [vmem:[%s5411_s9 + $0x494] sm:$0xf0]  ;;  %v4385_v30 = vld [vmem:[%s5411_s9 + $0x8d0] sm:$0xf]  ;;  %v5079_v32 = vld [vmem:[%s5411_s9 + $0x8e4] sm:$0xf0]  ;;  %v3642_v36 = vor.u32 %v4893_v25, %v3641_v23  ;;  %v4194_v40 = vor.u32 %v5031_v29, %v4193_v28 }
  0x33   : > { %2526 = vmatpush.bf16.msra.mxu0 %v3306_v4  ;;  %v4577_v33 = vld [vmem:[%s5411_s9 + $0xa50] sm:$0xf]  ;;  %v5127_v34 = vld [vmem:[%s5411_s9 + $0xa64] sm:$0xf0]  ;;  %v3834_v39 = vor.u32 %v4941_v27, %v3833_v26  ;;  %v4386_v41 = vor.u32 %v5079_v32, %v4385_v30  ;;  %v4169_v43 = vld [vmem:[%s5411_s9 + $0x720] sm:$0xf] }
  0x34   : > { %2539 = vmatpush.bf16.msra.mxu1 %v3498_v5  ;;  %v4769_v37 = vld [vmem:[%s5411_s9 + $0xbd0] sm:$0xf]  ;;  %v5175_v38 = vld [vmem:[%s5411_s9 + $0xbe4] sm:$0xf0]  ;;  %v4578_v42 = vor.u32 %v5127_v34, %v4577_v33  ;;  %v5025_v44 = vld [vmem:[%s5411_s9 + $0x734] sm:$0xf0] }
  0x35   : > { %2552 = vmatpush.bf16.msra.mxu2 %v3690_v6  ;;  %v4361_v45 = vld [vmem:[%s5411_s9 + $0x8a0] sm:$0xf]  ;;  %v4770_v46 = vor.u32 %v5175_v38, %v4769_v37  ;;  %v5073_v47 = vld [vmem:[%s5411_s9 + $0x8b4] sm:$0xf0]  ;;  %v4170_v52 = vor.u32 %v5025_v44, %v4169_v43  ;;  %v4145_v53 = vld [vmem:[%s5411_s9 + $0x6f0] sm:$0xf] }
  0x36   : > { %2565 = vmatpush.bf16.msra.mxu3 %v3882_v10  ;;  %v4553_v48 = vld [vmem:[%s5411_s9 + $0xa20] sm:$0xf]  ;;  %v5121_v49 = vld [vmem:[%s5411_s9 + $0xa34] sm:$0xf0]  ;;  %v5019_v54 = vld [vmem:[%s5411_s9 + $0x704] sm:$0xf0]  ;;  %v4362_v55 = vor.u32 %v5073_v47, %v4361_v45 }
  0x37   : > { %2527 = vmatpush.bf16.msra.mxu0 %v3282_v16  ;;  %v4745_v50 = vld [vmem:[%s5411_s9 + $0xba0] sm:$0xf]  ;;  %v5169_v51 = vld [vmem:[%s5411_s9 + $0xbb4] sm:$0xf0]  ;;  %v4554_v56 = vor.u32 %v5121_v49, %v4553_v48  ;;  %v4337_v57 = vld [vmem:[%s5411_s9 + $0x870] sm:$0xf]  ;;  %v4146_v1 = vor.u32 %v5019_v54, %v4145_v53 }
  0x38   : > { %2540 = vmatpush.bf16.msra.mxu1 %v3474_v19  ;;  %v5067_v58 = vld [vmem:[%s5411_s9 + $0x884] sm:$0xf0]  ;;  %v198_v59 = vld [vmem:[%s6348_s0] sm:$0xff]  ;;  %v4746_v60 = vor.u32 %v5169_v51, %v4745_v50  ;;  %v4529_v61 = vld [vmem:[%s5411_s9 + $0x9f0] sm:$0xf]  ;;  %s180_s18 = smul.u32 6, %s5327_s12 }
  0x39   : > { %2553 = vmatpush.bf16.msra.mxu2 %v3666_v20  ;;  %v5115_v62 = vld [vmem:[%s5411_s9 + $0xa04] sm:$0xf0]  ;;  %584 = vst [vmem:[#allocation1] ss:$9 sm:$0xff] %v198_v59  ;;  %v4721_v63 = vld [vmem:[%s5411_s9 + $0xb70] sm:$0xf]  ;;  %v4338_v2 = vor.u32 %v5067_v58, %v4337_v57 }
  0x3a   : > { %2566 = vmatpush.bf16.msra.mxu3 %v3858_v24  ;;  %v5163_v0 = vld [vmem:[%s5411_s9 + $0xb84] sm:$0xf0]  ;;  %v4530_v3 = vor.u32 %v5115_v62, %v4529_v61  ;;  %v4121_v4 = vld [vmem:[%s5411_s9 + $0x6c0] sm:$0xf]  ;;  %v5013_v5 = vld [vmem:[%s5411_s9 + $0x6d4] sm:$0xf0] }
  0x3b   : > { %2528 = vmatpush.bf16.msra.mxu0 %v3258_v31  ;;  %v4313_v6 = vld [vmem:[%s5411_s9 + $0x840] sm:$0xf]  ;;  %v4722_v7 = vor.u32 %v5163_v0, %v4721_v63  ;;  %v5061_v8 = vld [vmem:[%s5411_s9 + $0x854] sm:$0xf0]  ;;  %v4097_v13 = vld [vmem:[%s5411_s9 + $0x690] sm:$0xf]  ;;  %v4122_v14 = vor.u32 %v5013_v5, %v4121_v4 }
  0x3c   : > { %2541 = vmatpush.bf16.msra.mxu1 %v3450_v35  ;;  %v4505_v9 = vld [vmem:[%s5411_s9 + $0x9c0] sm:$0xf]  ;;  %v5109_v10 = vld [vmem:[%s5411_s9 + $0x9d4] sm:$0xf0]  ;;  %v5007_v15 = vld [vmem:[%s5411_s9 + $0x6a4] sm:$0xf0]  ;;  %v4314_v18 = vor.u32 %v5061_v8, %v4313_v6 }
  0x3d   : > { %2554 = vmatpush.bf16.msra.mxu2 %v3642_v36  ;;  %v4697_v11 = vld [vmem:[%s5411_s9 + $0xb40] sm:$0xf]  ;;  %v5157_v12 = vld [vmem:[%s5411_s9 + $0xb54] sm:$0xf0]  ;;  %v4289_v16 = vld [vmem:[%s5411_s9 + $0x810] sm:$0xf]  ;;  %v4506_v19 = vor.u32 %v5109_v10, %v4505_v9  ;;  %v4098_v29 = vor.u32 %v5007_v15, %v4097_v13 }
  0x3e   : > { %2567 = vmatpush.bf16.msra.mxu3 %v3834_v39  ;;  %v5055_v17 = vld [vmem:[%s5411_s9 + $0x824] sm:$0xf0]  ;;  %v4698_v23 = vor.u32 %v5157_v12, %v4697_v11  ;;  %v4481_v24 = vld [vmem:[%s5411_s9 + $0x990] sm:$0xf]  ;;  %v4073_v32 = vld [vmem:[%s5411_s9 + $0x660] sm:$0xf] }
  0x3f   : > { %2573 = vmatpush.bf16.msrb.mxu0 %v4194_v40  ;;  %v5103_v25 = vld [vmem:[%s5411_s9 + $0x9a4] sm:$0xf0]  ;;  %v4673_v27 = vld [vmem:[%s5411_s9 + $0xb10] sm:$0xf]  ;;  %v4290_v30 = vor.u32 %v5055_v17, %v4289_v16  ;;  %v5001_v33 = vld [vmem:[%s5411_s9 + $0x674] sm:$0xf0] }
  0x40   : > { %2586 = vmatpush.bf16.msrb.mxu1 %v4386_v41  ;;  %v5520_v20 = vld [vmem:[#allocation1 + $0x12] sm:$0xff]  ;;  %v5522_v21 = vld [vmem:[#allocation1] sm:$0xff]  ;;  %v5529_v26 = vld [vmem:[#allocation1 + $0x9] sm:$0xff]  ;;  %v4482_v31 = vor.u32 %v5103_v25, %v4481_v24  ;;  %v4074_v41 = vor.u32 %v5001_v33, %v4073_v32  ;;  %p6245_p13 = scmp.lt.s32.totalorder %s180_s18, 11  ;;  %vm3157_vm1 = vcmask 1045508   ;;  %vm3159_vm2 = vcmask 1043456  }
  0x41   : > { %2599 = vmatpush.bf16.msrb.mxu2 %v4578_v42  ;;  %v5524_v22 = vld [vmem:[#allocation1 + $0x1b] sm:$0xff]  ;;  %v5151_v28 = vld [vmem:[%s5411_s9 + $0xb24] sm:$0xf0]  ;;  %2529 = vmatmul.bf16.vlgmr.msra.gmra.mxu0 %v5522_v21  ;;  %v4265_v34 = vld [vmem:[%s5411_s9 + $0x7e0] sm:$0xf] }
  0x42   : > { %2612 = vmatpush.bf16.msrb.mxu3 %v4770_v46  ;;  %2555 = vmatmul.bf16.vlgmr.msra.gmra.mxu2 %v5520_v20  ;;  %v4674_v35 = vor.u32 %v5151_v28, %v4673_v27  ;;  %v5049_v36 = vld [vmem:[%s5411_s9 + $0x7f4] sm:$0xf0]  ;;  %v4457_v37 = vld [vmem:[%s5411_s9 + $0x960] sm:$0xf]  ;;  %v4049_v44 = vld [vmem:[%s5411_s9 + $0x630] sm:$0xf] }
  0x43   : > { %2574 = vmatpush.bf16.msrb.mxu0 %v4170_v52  ;;  %2568 = vmatmul.bf16.vlgmr.msra.gmra.mxu3 %v5524_v22  ;;  %v5097_v38 = vld [vmem:[%s5411_s9 + $0x974] sm:$0xf0]  ;;  %v4649_v39 = vld [vmem:[%s5411_s9 + $0xae0] sm:$0xf]  ;;  %v4266_v42 = vor.u32 %v5049_v36, %v4265_v34  ;;  %v4995_v45 = vld [vmem:[%s5411_s9 + $0x644] sm:$0xf0] }
  0x44   : > { %2587 = vmatpush.bf16.msrb.mxu1 %v4362_v55  ;;  %v5145_v40 = vld [vmem:[%s5411_s9 + $0xaf4] sm:$0xf0]  ;;  %v4458_v43 = vor.u32 %v5097_v38, %v4457_v37  ;;  %v4241_v46 = vld [vmem:[%s5411_s9 + $0x7b0] sm:$0xf]  ;;  %v5043_v48 = vld [vmem:[%s5411_s9 + $0x7c4] sm:$0xf0]  ;;  %v4050_v53 = vor.u32 %v4995_v45, %v4049_v44 }
  0x45   : > { %2600 = vmatpush.bf16.msrb.mxu2 %v4554_v56  ;;  %2542 = vmatmul.bf16.vlgmr.msra.gmra.mxu1 %v5529_v26  ;;  %v4650_v47 = vor.u32 %v5145_v40, %v4649_v39  ;;  %v4433_v49 = vld [vmem:[%s5411_s9 + $0x930] sm:$0xf]  ;;  %v5091_v50 = vld [vmem:[%s5411_s9 + $0x944] sm:$0xf0]  ;;  %v4025_v54 = vld [vmem:[%s5411_s9 + $0x600] sm:$0xf]  ;;  %v4242_v56 = vor.u32 %v5043_v48, %v4241_v46 }
  0x46   : > { %2613 = vmatpush.bf16.msrb.mxu3 %v4746_v60  ;;  %v4625_v51 = vld [vmem:[%s5411_s9 + $0xab0] sm:$0xf]  ;;  %v5139_v52 = vld [vmem:[%s5411_s9 + $0xac4] sm:$0xf0]  ;;  %v4989_v55 = vld [vmem:[%s5411_s9 + $0x614] sm:$0xf0]  ;;  %v4434_v57 = vor.u32 %v5091_v50, %v4433_v49 }
  0x47   : > { %2575 = vmatpush.bf16.msrb.mxu0 %v4146_v1  ;;  %v4217_v58 = vld [vmem:[%s5411_s9 + $0x780] sm:$0xf]  ;;  %v5037_v59 = vld [vmem:[%s5411_s9 + $0x794] sm:$0xf0]  ;;  %v4626_v61 = vor.u32 %v5139_v52, %v4625_v51  ;;  %v4836_v1 = vld [vmem:[%s5411_s9 + $0x154] sm:$0xf]  ;;  %v4026_v4 = vor.u32 %v4989_v55, %v4025_v54 }
  0x48   : > { %2588 = vmatpush.bf16.msrb.mxu1 %v4338_v2  ;;  %v4409_v60 = vld [vmem:[%s5411_s9 + $0x900] sm:$0xf]  ;;  %v5085_v62 = vld [vmem:[%s5411_s9 + $0x914] sm:$0xf0]  ;;  %v3427_v2 = vld [vmem:[%s5411_s9 + $0x168] sm:$0xf0]  ;;  %v4218_v8 = vor.u32 %v5037_v59, %v4217_v58 }
  0x49   : > { %2601 = vmatpush.bf16.msrb.mxu2 %v4530_v3  ;;  %v4601_v63 = vld [vmem:[%s5411_s9 + $0xa80] sm:$0xf]  ;;  %v5133_v0 = vld [vmem:[%s5411_s9 + $0xa94] sm:$0xf0]  ;;  %v4884_v3 = vld [vmem:[%s5411_s9 + $0x2d4] sm:$0xf]  ;;  %v4410_v9 = vor.u32 %v5085_v62, %v4409_v60  ;;  %v3430_v13 = vor.u32 %v4836_v1, %v3427_v2 }
  0x4a   : > { %2614 = vmatpush.bf16.msrb.mxu3 %v4722_v7  ;;  %v3619_v5 = vld [vmem:[%s5411_s9 + $0x2e8] sm:$0xf0]  ;;  %v4932_v6 = vld [vmem:[%s5411_s9 + $0x454] sm:$0xf]  ;;  %v4602_v12 = vor.u32 %v5133_v0, %v4601_v63  ;;  %v4830_v16 = vld [vmem:[%s5411_s9 + $0x124] sm:$0xf] }
  0x4b   : > { %2576 = vmatpush.bf16.msrb.mxu0 %v4122_v14  ;;  %v3811_v7 = vld [vmem:[%s5411_s9 + $0x468] sm:$0xf0]  ;;  %v4980_v10 = vld [vmem:[%s5411_s9 + $0x5d4] sm:$0xf]  ;;  %v3622_v14 = vor.u32 %v4884_v3, %v3619_v5  ;;  %v3403_v17 = vld [vmem:[%s5411_s9 + $0x138] sm:$0xf0] }
  0x4c   : > { %2589 = vmatpush.bf16.msrb.mxu1 %v4314_v18  ;;  %v4003_v11 = vld [vmem:[%s5411_s9 + $0x5e8] sm:$0xf0]  ;;  %v3814_v15 = vor.u32 %v4932_v6, %v3811_v7  ;;  %v4878_v18 = vld [vmem:[%s5411_s9 + $0x2a4] sm:$0xf]  ;;  %v3787_v25 = vld [vmem:[%s5411_s9 + $0x438] sm:$0xf0] }
  0x4d   : > { %2602 = vmatpush.bf16.msrb.mxu2 %v4506_v19  ;;  %v4006_v19 = vor.u32 %v4980_v10, %v4003_v11  ;;  %v4926_v24 = vld [vmem:[%s5411_s9 + $0x424] sm:$0xf]  ;;  %v3979_v28 = vld [vmem:[%s5411_s9 + $0x5b8] sm:$0xf0]  ;;  %v4824_v33 = vld [vmem:[%s5411_s9 + $0xf4] sm:$0xf] }
  0x4e   : > { %2615 = vmatpush.bf16.msrb.mxu3 %v4698_v23  ;;  %v3595_v23 = vld [vmem:[%s5411_s9 + $0x2b8] sm:$0xf0]  ;;  %v4974_v27 = vld [vmem:[%s5411_s9 + $0x5a4] sm:$0xf]  ;;  %v3379_v36 = vld [vmem:[%s5411_s9 + $0x108] sm:$0xf0] }
  0x4f   : > { %2577 = vmatpush.bf16.msrb.mxu0 %v4098_v29  ;;  %v5576_v29 = vld [vmem:[#allocation1 + $0x36] sm:$0xff]  ;;  %v5580_v32 = vld [vmem:[#allocation1 + $0x3f] sm:$0xff]  ;;  %v3598_v34 = vor.u32 %v4878_v18, %v3595_v23  ;;  %v5585_v38 = vld [vmem:[#allocation1 + $0x2d] sm:$0xff]  ;;  %v3982_v39 = vor.u32 %v4974_v27, %v3979_v28  ;;  %v3382_v45 = vor.u32 %v4824_v33, %v3379_v36  ;;  %s6361_s18 = smov (!%p6245_p13, %s180_s18), 11 }
  0x50   : > { %2590 = vmatpush.bf16.msrb.mxu1 %v4290_v30  ;;  %v3406_v30 = vor.u32 %v4830_v16, %v3403_v17  ;;  %v4872_v37 = vld [vmem:[%s5411_s9 + $0x274] sm:$0xf]  ;;  %v3571_v40 = vld [vmem:[%s5411_s9 + $0x288] sm:$0xf0]  ;;  %v4818_v48 = vld [vmem:[%s5411_s9 + $0xc4] sm:$0xf] }
  0x51   : > { %2603 = vmatpush.bf16.msrb.mxu2 %v4482_v31  ;;  %v5578_v31 = vld [vmem:[#allocation1 + $0x24] sm:$0xff]  ;;  %v3955_v44 = vld [vmem:[%s5411_s9 + $0x588] sm:$0xf0]  ;;  %v3574_v46 = vor.u32 %v4872_v37, %v3571_v40  ;;  %v4866_v50 = vld [vmem:[%s5411_s9 + $0x244] sm:$0xf]  ;;  %s3254_s12 = sshll.u32 %s6361_s18, 1 }
  0x52   : > { %2616 = vmatpush.bf16.msrb.mxu3 %v4674_v35  ;;  %v3790_v35 = vor.u32 %v4926_v24, %v3787_v25  ;;  %v3355_v49 = vld [vmem:[%s5411_s9 + $0xd8] sm:$0xf0]  ;;  %v4962_v55 = vld [vmem:[%s5411_s9 + $0x544] sm:$0xf]  ;;  %v4812_v60 = vld [vmem:[%s5411_s9 + $0x94] sm:$0xf]  ;;  %s6288_s23 = scalar_lea.vmem %s6350_s2, %s3254_s12 }
  0x53   : > { %2578 = vmatpush.bf16.msrb.mxu0 %v4074_v41  ;;  %v4920_v41 = vld [vmem:[%s5411_s9 + $0x3f4] sm:$0xf]  ;;  %v3547_v52 = vld [vmem:[%s5411_s9 + $0x258] sm:$0xf0]  ;;  %v3523_v0 = vld [vmem:[%s5411_s9 + $0x228] sm:$0xf0] }
  0x54   : > { %2591 = vmatpush.bf16.msrb.mxu1 %v4266_v42  ;;  %v3763_v42 = vld [vmem:[%s5411_s9 + $0x408] sm:$0xf0]  ;;  %v3739_v54 = vld [vmem:[%s5411_s9 + $0x3d8] sm:$0xf0]  ;;  %v3550_v58 = vor.u32 %v4866_v50, %v3547_v52  ;;  %v4860_v62 = vld [vmem:[%s5411_s9 + $0x214] sm:$0xf] }
  0x55   : > { %2604 = vmatpush.bf16.msrb.mxu2 %v4458_v43  ;;  %v4968_v43 = vld [vmem:[%s5411_s9 + $0x574] sm:$0xf]  ;;  %v3715_v2 = vld [vmem:[%s5411_s9 + $0x3a8] sm:$0xf0]  ;;  %v3526_v6 = vor.u32 %v4860_v62, %v3523_v0  ;;  %v4854_v10 = vld [vmem:[%s5411_s9 + $0x1e4] sm:$0xf] }
  0x56   : > { %2617 = vmatpush.bf16.msrb.mxu3 %v4650_v47  ;;  %v3766_v47 = vor.u32 %v4920_v41, %v3763_v42  ;;  %v3958_v51 = vor.u32 %v4968_v43, %v3955_v44  ;;  %v4908_v1 = vld [vmem:[%s5411_s9 + $0x394] sm:$0xf]  ;;  %v3883_v16 = vld [vmem:[%s5411_s9 + $0x4f8] sm:$0xf0]  ;;  %v3283_v24 = vld [vmem:[%s5411_s9 + $0x48] sm:$0xf0] }
  0x57   : > { %2579 = vmatpush.bf16.msrb.mxu0 %v4050_v53  ;;  %v4914_v53 = vld [vmem:[%s5411_s9 + $0x3c4] sm:$0xf]  ;;  %v4956_v3 = vld [vmem:[%s5411_s9 + $0x514] sm:$0xf]  ;;  %v3718_v7 = vor.u32 %v4908_v1, %v3715_v2  ;;  %v3475_v28 = vld [vmem:[%s5411_s9 + $0x1c8] sm:$0xf0] }
  0x58   : > { %2592 = vmatpush.bf16.msrb.mxu1 %v4242_v56  ;;  %v3931_v56 = vld [vmem:[%s5411_s9 + $0x558] sm:$0xf0]  ;;  %v3742_v59 = vor.u32 %v4914_v53, %v3739_v54  ;;  %v4800_v23 = vld [vmem:[%s5411_s9 + $0x34] sm:$0xf]  ;;  %v3667_v33 = vld [vmem:[%s5411_s9 + $0x348] sm:$0xf0] }
  0x59   : > { %2605 = vmatpush.bf16.msrb.mxu2 %v4434_v57  ;;  %v3358_v57 = vor.u32 %v4818_v48, %v3355_v49  ;;  %v3934_v63 = vor.u32 %v4962_v55, %v3931_v56  ;;  %v4848_v25 = vld [vmem:[%s5411_s9 + $0x1b4] sm:$0xf]  ;;  %v3286_v36 = vor.u32 %v4800_v23, %v3283_v24  ;;  %v4794_v37 = vld [vmem:[%s5411_s9 + $0x4] sm:$0xf]  ;;  %v3451_v43 = vld [vmem:[%s5411_s9 + $0x198] sm:$0xf0] }
  0x5a   : > { %2618 = vmatpush.bf16.msrb.mxu3 %v4626_v61  ;;  %v3331_v61 = vld [vmem:[%s5411_s9 + $0xa8] sm:$0xf0]  ;;  %v3478_v40 = vor.u32 %v4848_v25, %v3475_v28  ;;  %v4842_v42 = vld [vmem:[%s5411_s9 + $0x184] sm:$0xf]  ;;  %v3835_v48 = vld [vmem:[%s5411_s9 + $0x498] sm:$0xf0] }
  0x5b   : > { %2580 = vmatpush.bf16.msrb.mxu0 %v4026_v4  ;;  %v3907_v4 = vld [vmem:[%s5411_s9 + $0x528] sm:$0xf0]  ;;  %v3334_v5 = vor.u32 %v4812_v60, %v3331_v61  ;;  %v4890_v44 = vld [vmem:[%s5411_s9 + $0x304] sm:$0xf]  ;;  %v5028_v49 = vld [vmem:[%s5411_s9 + $0x754] sm:$0xf]  ;;  %v3454_v56 = vor.u32 %v4842_v42, %v3451_v43 }
  0x5c   : > { %2593 = vmatpush.bf16.msrb.mxu1 %v4218_v8  ;;  %v4806_v8 = vld [vmem:[%s5411_s9 + $0x64] sm:$0xf]  ;;  %v3910_v11 = vor.u32 %v4956_v3, %v3907_v4  ;;  %v4195_v50 = vld [vmem:[%s5411_s9 + $0x768] sm:$0xf0]  ;;  %v5124_v54 = vld [vmem:[%s5411_s9 + $0xa54] sm:$0xf] }
  0x5d   : > { %2606 = vmatpush.bf16.msrb.mxu2 %v4410_v9  ;;  %v3307_v9 = vld [vmem:[%s5411_s9 + $0x78] sm:$0xf0]  ;;  %v4387_v53 = vld [vmem:[%s5411_s9 + $0x8e8] sm:$0xf0]  ;;  %v4198_v61 = vor.u32 %v5028_v49, %v4195_v50  ;;  %v5022_v0 = vld [vmem:[%s5411_s9 + $0x724] sm:$0xf] }
  0x5e   : > { %2619 = vmatpush.bf16.msrb.mxu3 %v4602_v12  ;;  %2581 = vmatmul.bf16.vlgmr.msrb.gmra.mxu0 %v5578_v31  ;;  %v3499_v12 = vld [vmem:[%s5411_s9 + $0x1f8] sm:$0xf0]  ;;  %v3310_v17 = vor.u32 %v4806_v8, %v3307_v9  ;;  %v4579_v55 = vld [vmem:[%s5411_s9 + $0xa68] sm:$0xf0]  ;;  %v5070_v2 = vld [vmem:[%s5411_s9 + $0x8a4] sm:$0xf] }
  0x5f   : > { %2625 = vmatpush.bf16.msra.mxu0 %v3430_v13  ;;  %2594 = vmatmul.bf16.vlgmr.msrb.gmra.mxu1 %v5585_v38  ;;  %v4902_v13 = vld [vmem:[%s5411_s9 + $0x364] sm:$0xf]  ;;  %v3502_v18 = vor.u32 %v4854_v10, %v3499_v12  ;;  %v4171_v1 = vld [vmem:[%s5411_s9 + $0x738] sm:$0xf0]  ;;  %v5016_v12 = vld [vmem:[%s5411_s9 + $0x6f4] sm:$0xf] }
  0x60   : > { %2638 = vmatpush.bf16.msra.mxu1 %v3622_v14  ;;  %2607 = vmatmul.bf16.vlgmr.msrb.gmra.mxu2 %v5576_v29  ;;  %v3691_v14 = vld [vmem:[%s5411_s9 + $0x378] sm:$0xf0]  ;;  %v4174_v9 = vor.u32 %v5022_v0, %v4171_v1  ;;  %v4723_v23 = vld [vmem:[%s5411_s9 + $0xb88] sm:$0xf0]  ;;  %v5010_v28 = vld [vmem:[%s5411_s9 + $0x6c4] sm:$0xf] }
  0x61   : > { %2651 = vmatpush.bf16.msra.mxu2 %v3814_v15  ;;  %2620 = vmatmul.bf16.vlgmr.msrb.gmra.mxu3 %v5580_v32  ;;  %v4950_v15 = vld [vmem:[%s5411_s9 + $0x4e4] sm:$0xf]  ;;  %v4363_v4 = vld [vmem:[%s5411_s9 + $0x8b8] sm:$0xf0]  ;;  %v5100_v49 = vld [vmem:[%s5411_s9 + $0x994] sm:$0xf] }
  0x62   : > { %2664 = vmatpush.bf16.msra.mxu3 %v4006_v19  ;;  %v3694_v19 = vor.u32 %v4902_v13, %v3691_v14  ;;  %v3886_v27 = vor.u32 %v4950_v15, %v3883_v16  ;;  %v4747_v8 = vld [vmem:[%s5411_s9 + $0xbb8] sm:$0xf0]  ;;  %v4366_v10 = vor.u32 %v5070_v2, %v4363_v4  ;;  %v4147_v13 = vld [vmem:[%s5411_s9 + $0x708] sm:$0xf0]  ;;  %v5064_v14 = vld [vmem:[%s5411_s9 + $0x874] sm:$0xf] }
  0x63   : > { %2626 = vmatpush.bf16.msra.mxu0 %v3406_v30  ;;  %v4896_v30 = vld [vmem:[%s5411_s9 + $0x334] sm:$0xf]  ;;  %v4339_v16 = vld [vmem:[%s5411_s9 + $0x888] sm:$0xf0]  ;;  %v4150_v24 = vor.u32 %v5016_v12, %v4147_v13  ;;  %v4651_v0 = vld [vmem:[%s5411_s9 + $0xaf8] sm:$0xf0] }
  0x64   : > { %2639 = vmatpush.bf16.msra.mxu1 %v3598_v34  ;;  %v4944_v34 = vld [vmem:[%s5411_s9 + $0x4b4] sm:$0xf]  ;;  %v3670_v41 = vor.u32 %v4896_v30, %v3667_v33  ;;  %v4342_v25 = vor.u32 %v5064_v14, %v4339_v16  ;;  %v4123_v30 = vld [vmem:[%s5411_s9 + $0x6d8] sm:$0xf0]  ;;  %v5058_v33 = vld [vmem:[%s5411_s9 + $0x844] sm:$0xf] }
  0x65   : > { %2652 = vmatpush.bf16.msra.mxu2 %v3790_v35  ;;  %v3859_v35 = vld [vmem:[%s5411_s9 + $0x4c8] sm:$0xf0]  ;;  %v4992_v4 = vld [vmem:[%s5411_s9 + $0x634] sm:$0xf]  ;;  %v4986_v14 = vld [vmem:[%s5411_s9 + $0x604] sm:$0xf] }
  0x66   : > { %2665 = vmatpush.bf16.msra.mxu3 %v3982_v39  ;;  %v3259_v39 = vld [vmem:[%s5411_s9 + $0x18] sm:$0xf0]  ;;  %v4483_v50 = vld [vmem:[%s5411_s9 + $0x9a8] sm:$0xf0] }
  0x67   : > { %2627 = vmatpush.bf16.msra.mxu0 %v3382_v45  ;;  %v3862_v45 = vor.u32 %v4944_v34, %v3859_v35  ;;  %v3262_v52 = vor.u32 %v4794_v37, %v3259_v39  ;;  %v4315_v35 = vld [vmem:[%s5411_s9 + $0x858] sm:$0xf0]  ;;  %v5154_v39 = vld [vmem:[%s5411_s9 + $0xb44] sm:$0xf]  ;;  %v4627_v12 = vld [vmem:[%s5411_s9 + $0xac8] sm:$0xf0] }
  0x68   : > { %2640 = vmatpush.bf16.msra.mxu1 %v3574_v46  ;;  %v3643_v46 = vld [vmem:[%s5411_s9 + $0x318] sm:$0xf0]  ;;  %v4318_v42 = vor.u32 %v5058_v33, %v4315_v35  ;;  %v4840_v33 = vld [vmem:[%s5411_s9 + $0x16c] sm:$0xf0] }
  0x69   : > { %2653 = vmatpush.bf16.msra.mxu2 %v3766_v47  ;;  %v4938_v47 = vld [vmem:[%s5411_s9 + $0x484] sm:$0xf]  ;;  %v4507_v37 = vld [vmem:[%s5411_s9 + $0x9d8] sm:$0xf0] }
  0x6a   : > { %2666 = vmatpush.bf16.msra.mxu3 %v3958_v51  ;;  %v5076_v51 = vld [vmem:[%s5411_s9 + $0x8d4] sm:$0xf]  ;;  %v3838_v60 = vor.u32 %v4938_v47, %v3835_v48  ;;  %v4291_v48 = vld [vmem:[%s5411_s9 + $0x828] sm:$0xf0] }
  0x6b   : > { %2628 = vmatpush.bf16.msra.mxu0 %v3358_v57  ;;  %v3646_v57 = vor.u32 %v4890_v44, %v3643_v46  ;;  %v4390_v62 = vor.u32 %v5076_v51, %v4387_v53  ;;  %v5004_v44 = vld [vmem:[%s5411_s9 + $0x694] sm:$0xf] }
  0x6c   : > { %2641 = vmatpush.bf16.msra.mxu1 %v3550_v58  ;;  %v5172_v58 = vld [vmem:[%s5411_s9 + $0xbd4] sm:$0xf] }
  0x6d   : > { %2654 = vmatpush.bf16.msra.mxu2 %v3742_v59  ;;  %v4771_v59 = vld [vmem:[%s5411_s9 + $0xbe8] sm:$0xf0]  ;;  %v5052_v46 = vld [vmem:[%s5411_s9 + $0x814] sm:$0xf] }
  0x6e   : > { %2667 = vmatpush.bf16.msra.mxu3 %v3934_v63  ;;  %v4582_v63 = vor.u32 %v5124_v54, %v4579_v55  ;;  %v4774_v3 = vor.u32 %v5172_v58, %v4771_v59  ;;  %v5148_v51 = vld [vmem:[%s5411_s9 + $0xb14] sm:$0xf]  ;;  %v4294_v54 = vor.u32 %v5052_v46, %v4291_v48  ;;  %v4486_v55 = vor.u32 %v5100_v49, %v4483_v50  ;;  %v5046_v58 = vld [vmem:[%s5411_s9 + $0x7e4] sm:$0xf]  ;;  %v3409_v48 = vld [vmem:[%s5411_s9 + $0x128] sm:$0xf] }
  0x6f   : > { %2629 = vmatpush.bf16.msra.mxu0 %v3334_v5  ;;  %v5118_v5 = vld [vmem:[%s5411_s9 + $0xa24] sm:$0xf]  ;;  %v4834_v49 = vld [vmem:[%s5411_s9 + $0x13c] sm:$0xf0]  ;;  %v3601_v50 = vld [vmem:[%s5411_s9 + $0x2a8] sm:$0xf] }
  0x70   : > { %2642 = vmatpush.bf16.msra.mxu1 %v3526_v6  ;;  %v4555_v6 = vld [vmem:[%s5411_s9 + $0xa38] sm:$0xf0] }
  0x71   : > { %2655 = vmatpush.bf16.msra.mxu2 %v3718_v7  ;;  %v5166_v7 = vld [vmem:[%s5411_s9 + $0xba4] sm:$0xf] }
  0x72   : > { %2668 = vmatpush.bf16.msra.mxu3 %v3910_v11  ;;  %v4558_v11 = vor.u32 %v5118_v5, %v4555_v6  ;;  %v4750_v15 = vor.u32 %v5166_v7, %v4747_v8  ;;  %v4051_v5 = vld [vmem:[%s5411_s9 + $0x648] sm:$0xf0]  ;;  %v5040_v6 = vld [vmem:[%s5411_s9 + $0x7b4] sm:$0xf] }
  0x73   : > { %2630 = vmatpush.bf16.msra.mxu0 %v3310_v17  ;;  %v5112_v17 = vld [vmem:[%s5411_s9 + $0x9f4] sm:$0xf]  ;;  %v4243_v8 = vld [vmem:[%s5411_s9 + $0x7c8] sm:$0xf0]  ;;  %v4054_v13 = vor.u32 %v4992_v4, %v4051_v5  ;;  %v4972_v4 = vld [vmem:[%s5411_s9 + $0x58c] sm:$0xf0] }
  0x74   : > { %2643 = vmatpush.bf16.msra.mxu1 %v3502_v18  ;;  %v4531_v18 = vld [vmem:[%s5411_s9 + $0xa08] sm:$0xf0]  ;;  %v4246_v16 = vor.u32 %v5040_v6, %v4243_v8  ;;  %v3553_v8 = vld [vmem:[%s5411_s9 + $0x248] sm:$0xf] }
  0x75   : > { %2656 = vmatpush.bf16.msra.mxu2 %v3694_v19  ;;  %v5160_v19 = vld [vmem:[%s5411_s9 + $0xb74] sm:$0xf] }
  0x76   : > { %2669 = vmatpush.bf16.msra.mxu3 %v3886_v27  ;;  %v4534_v27 = vor.u32 %v5112_v17, %v4531_v18  ;;  %v4726_v34 = vor.u32 %v5160_v19, %v4723_v23  ;;  %v5034_v18 = vld [vmem:[%s5411_s9 + $0x784] sm:$0xf]  ;;  %v4219_v19 = vld [vmem:[%s5411_s9 + $0x798] sm:$0xf0] }
  0x77   : > { %2631 = vmatpush.bf16.msra.mxu0 %v3286_v36  ;;  %v5106_v36 = vld [vmem:[%s5411_s9 + $0x9c4] sm:$0xf] }
  0x78   : > { %2644 = vmatpush.bf16.msra.mxu1 %v3478_v40  ;;  %v4699_v40 = vld [vmem:[%s5411_s9 + $0xb58] sm:$0xf0]  ;;  %v4510_v43 = vor.u32 %v5106_v36, %v4507_v37  ;;  %v5082_v23 = vld [vmem:[%s5411_s9 + $0x904] sm:$0xf]  ;;  %v4888_v36 = vld [vmem:[%s5411_s9 + $0x2ec] sm:$0xf0] }
  0x79   : > { %2657 = vmatpush.bf16.msra.mxu2 %v3670_v41  ;;  %v4126_v41 = vor.u32 %v5010_v28, %v4123_v30  ;;  %v4702_v47 = vor.u32 %v5154_v39, %v4699_v40  ;;  %v4603_v28 = vld [vmem:[%s5411_s9 + $0xa98] sm:$0xf0]  ;;  %v3433_v30 = vld [vmem:[%s5411_s9 + $0x158] sm:$0xf]  ;;  %v4936_v39 = vld [vmem:[%s5411_s9 + $0x46c] sm:$0xf0]  ;;  %v4222_v40 = vor.u32 %v5034_v18, %v4219_v19 }
  0x7a   : > { %2670 = vmatpush.bf16.msra.mxu3 %v3862_v45  ;;  %v4099_v45 = vld [vmem:[%s5411_s9 + $0x6a8] sm:$0xf0]  ;;  %v3817_v37 = vld [vmem:[%s5411_s9 + $0x458] sm:$0xf] }
  0x7b   : > { %2632 = vmatpush.bf16.msra.mxu0 %v3262_v52  ;;  %v4675_v52 = vld [vmem:[%s5411_s9 + $0xb28] sm:$0xf0]  ;;  %v4102_v53 = vor.u32 %v5004_v44, %v4099_v45  ;;  %v3434_v45 = vor.u32 %v4840_v33, %v3433_v30  ;;  %v3529_v18 = vld [vmem:[%s5411_s9 + $0x218] sm:$0xf] }
  0x7c   : > { %2645 = vmatpush.bf16.msra.mxu1 %v3454_v56  ;;  %v4998_v56 = vld [vmem:[%s5411_s9 + $0x664] sm:$0xf]  ;;  %v4678_v59 = vor.u32 %v5148_v51, %v4675_v52  ;;  %v4882_v52 = vld [vmem:[%s5411_s9 + $0x2bc] sm:$0xf0] }
  0x7d   : > { %2658 = vmatpush.bf16.msra.mxu2 %v3646_v57  ;;  %v4075_v57 = vld [vmem:[%s5411_s9 + $0x678] sm:$0xf0] }
  0x7e   : > { %2671 = vmatpush.bf16.msra.mxu3 %v3838_v60  ;;  %2633 = vmatmul.bf16.vlgmr.msra.gmra.mxu0 %v5522_v21  ;;  %v4267_v60 = vld [vmem:[%s5411_s9 + $0x7f8] sm:$0xf0]  ;;  %v4078_v1 = vor.u32 %v4998_v56, %v4075_v57  ;;  %v4978_v56 = vld [vmem:[%s5411_s9 + $0x5bc] sm:$0xf0]  ;;  %v3410_v57 = vor.u32 %v4834_v49, %v3409_v48  ;;  %v3289_v48 = vld [vmem:[%s5411_s9 + $0x38] sm:$0xf] }
  0x7f   : > { %2677 = vmatpush.bf16.msrb.mxu0 %v4198_v61  ;;  %2646 = vmatmul.bf16.vlgmr.msra.gmra.mxu1 %v5529_v26  ;;  %v5094_v61 = vld [vmem:[%s5411_s9 + $0x964] sm:$0xf]  ;;  %v4270_v2 = vor.u32 %v5046_v58, %v4267_v60  ;;  %v3602_v58 = vor.u32 %v4882_v52, %v3601_v50  ;;  %v3385_v60 = vld [vmem:[%s5411_s9 + $0xf8] sm:$0xf]  ;;  %v4804_v49 = vld [vmem:[%s5411_s9 + $0x4c] sm:$0xf0] }
  0x80   : > { %2690 = vmatpush.bf16.msrb.mxu1 %v4390_v62  ;;  %2659 = vmatmul.bf16.vlgmr.msra.gmra.mxu2 %v5520_v20  ;;  %v4459_v62 = vld [vmem:[%s5411_s9 + $0x978] sm:$0xf0]  ;;  %v3481_v50 = vld [vmem:[%s5411_s9 + $0x1b8] sm:$0xf]  ;;  %v4852_v52 = vld [vmem:[%s5411_s9 + $0x1cc] sm:$0xf0] }
  0x81   : > { %2703 = vmatpush.bf16.msrb.mxu2 %v4582_v63  ;;  %2672 = vmatmul.bf16.vlgmr.msra.gmra.mxu3 %v5524_v22  ;;  %v5142_v63 = vld [vmem:[%s5411_s9 + $0xae4] sm:$0xf] }
  0x82   : > { %2716 = vmatpush.bf16.msrb.mxu3 %v4774_v3  ;;  %v4462_v3 = vor.u32 %v5094_v61, %v4459_v62  ;;  %v4654_v7 = vor.u32 %v5142_v63, %v4651_v0  ;;  %v4828_v61 = vld [vmem:[%s5411_s9 + $0x10c] sm:$0xf0]  ;;  %v3577_v62 = vld [vmem:[%s5411_s9 + $0x278] sm:$0xf] }
  0x83   : > { %2678 = vmatpush.bf16.msrb.mxu0 %v4174_v9  ;;  %v5088_v9 = vld [vmem:[%s5411_s9 + $0x934] sm:$0xf]  ;;  %v4876_v0 = vld [vmem:[%s5411_s9 + $0x28c] sm:$0xf0] }
  0x84   : > { %2691 = vmatpush.bf16.msrb.mxu1 %v4366_v10  ;;  %v4435_v10 = vld [vmem:[%s5411_s9 + $0x948] sm:$0xf0]  ;;  %v3578_v5 = vor.u32 %v4876_v0, %v3577_v62  ;;  %v3457_v62 = vld [vmem:[%s5411_s9 + $0x188] sm:$0xf] }
  0x85   : > { %2704 = vmatpush.bf16.msrb.mxu2 %v4558_v11  ;;  %v5136_v11 = vld [vmem:[%s5411_s9 + $0xab4] sm:$0xf]  ;;  %v4438_v17 = vor.u32 %v5088_v9, %v4435_v10  ;;  %v4870_v9 = vld [vmem:[%s5411_s9 + $0x25c] sm:$0xf0]  ;;  %v3745_v10 = vld [vmem:[%s5411_s9 + $0x3c8] sm:$0xf] }
  0x86   : > { %2717 = vmatpush.bf16.msrb.mxu3 %v4750_v15  ;;  %v4027_v15 = vld [vmem:[%s5411_s9 + $0x618] sm:$0xf0]  ;;  %v3649_v0 = vld [vmem:[%s5411_s9 + $0x308] sm:$0xf] }
  0x87   : > { %2679 = vmatpush.bf16.msrb.mxu0 %v4150_v24  ;;  %v4630_v24 = vor.u32 %v5136_v11, %v4627_v12  ;;  %v4030_v35 = vor.u32 %v4986_v14, %v4027_v15  ;;  %v4918_v11 = vld [vmem:[%s5411_s9 + $0x3dc] sm:$0xf0]  ;;  %v3554_v14 = vor.u32 %v4870_v9, %v3553_v8  ;;  %v4585_v8 = vld [vmem:[%s5411_s9 + $0xa58] sm:$0xf] }
  0x88   : > { %2692 = vmatpush.bf16.msrb.mxu1 %v4342_v25  ;;  %v4411_v25 = vld [vmem:[%s5411_s9 + $0x918] sm:$0xf0]  ;;  %v4966_v12 = vld [vmem:[%s5411_s9 + $0x55c] sm:$0xf0]  ;;  %v3746_v15 = vor.u32 %v4918_v11, %v3745_v10  ;;  %v4777_v11 = vld [vmem:[%s5411_s9 + $0xbd8] sm:$0xf] }
  0x89   : > { %2705 = vmatpush.bf16.msrb.mxu2 %v4534_v27  ;;  %v5130_v27 = vld [vmem:[%s5411_s9 + $0xa84] sm:$0xf] }
  0x8a   : > { %2718 = vmatpush.bf16.msrb.mxu3 %v4726_v34  ;;  %v3625_v34 = vld [vmem:[%s5411_s9 + $0x2d8] sm:$0xf]  ;;  %v4606_v44 = vor.u32 %v5130_v27, %v4603_v28  ;;  %v4960_v28 = vld [vmem:[%s5411_s9 + $0x52c] sm:$0xf0] }
  0x8b   : > { %2680 = vmatpush.bf16.msrb.mxu0 %v4126_v41  ;;  %v4414_v41 = vor.u32 %v5082_v23, %v4411_v25  ;;  %v3626_v46 = vor.u32 %v4888_v36, %v3625_v34  ;;  %v4864_v23 = vld [vmem:[%s5411_s9 + $0x22c] sm:$0xf0]  ;;  %v3913_v27 = vld [vmem:[%s5411_s9 + $0x518] sm:$0xf]  ;;  %v4810_v36 = vld [vmem:[%s5411_s9 + $0x7c] sm:$0xf0] }
  0x8c   : > { %2693 = vmatpush.bf16.msrb.mxu1 %v4318_v42  ;;  %v4009_v42 = vld [vmem:[%s5411_s9 + $0x5d8] sm:$0xf]  ;;  %v4912_v25 = vld [vmem:[%s5411_s9 + $0x3ac] sm:$0xf0]  ;;  %v3530_v33 = vor.u32 %v4864_v23, %v3529_v18  ;;  %v4369_v18 = vld [vmem:[%s5411_s9 + $0x8a8] sm:$0xf] }
  0x8d   : > { %2706 = vmatpush.bf16.msrb.mxu2 %v4510_v43  ;;  %v4984_v43 = vld [vmem:[%s5411_s9 + $0x5ec] sm:$0xf0]  ;;  %v5074_v23 = vld [vmem:[%s5411_s9 + $0x8bc] sm:$0xf0] }
  0x8e   : > { %2719 = vmatpush.bf16.msrb.mxu3 %v4702_v47  ;;  %v3818_v47 = vor.u32 %v4936_v39, %v3817_v37  ;;  %v4010_v51 = vor.u32 %v4984_v43, %v4009_v42  ;;  %v3505_v37 = vld [vmem:[%s5411_s9 + $0x1e8] sm:$0xf]  ;;  %v3914_v39 = vor.u32 %v4960_v28, %v3913_v27  ;;  %v4906_v42 = vld [vmem:[%s5411_s9 + $0x37c] sm:$0xf0] }
  0x8f   : > { %2681 = vmatpush.bf16.msrb.mxu0 %v4102_v53  ;;  %v3793_v53 = vld [vmem:[%s5411_s9 + $0x428] sm:$0xf]  ;;  %v5170_v28 = vld [vmem:[%s5411_s9 + $0xbbc] sm:$0xf0] }
  0x90   : > { %2694 = vmatpush.bf16.msrb.mxu1 %v4294_v54  ;;  %v4930_v54 = vld [vmem:[%s5411_s9 + $0x43c] sm:$0xf0]  ;;  %v3889_v43 = vld [vmem:[%s5411_s9 + $0x4e8] sm:$0xf] }
  0x91   : > { %2707 = vmatpush.bf16.msrb.mxu2 %v4486_v55  ;;  %v3985_v55 = vld [vmem:[%s5411_s9 + $0x5a8] sm:$0xf] }
  0x92   : > { %2720 = vmatpush.bf16.msrb.mxu3 %v4678_v59  ;;  %v3794_v59 = vor.u32 %v4930_v54, %v3793_v53  ;;  %v3986_v63 = vor.u32 %v4978_v56, %v3985_v55  ;;  %v3673_v53 = vld [vmem:[%s5411_s9 + $0x338] sm:$0xf]  ;;  %v4900_v54 = vld [vmem:[%s5411_s9 + $0x34c] sm:$0xf0]  ;;  %v4753_v27 = vld [vmem:[%s5411_s9 + $0xba8] sm:$0xf] }
  0x93   : > { %2682 = vmatpush.bf16.msrb.mxu0 %v4078_v1  ;;  %v3769_v1 = vld [vmem:[%s5411_s9 + $0x3f8] sm:$0xf]  ;;  %v4948_v56 = vld [vmem:[%s5411_s9 + $0x4cc] sm:$0xf0] }
  0x94   : > { %2695 = vmatpush.bf16.msrb.mxu1 %v4270_v2  ;;  %v4924_v2 = vld [vmem:[%s5411_s9 + $0x40c] sm:$0xf0]  ;;  %v3865_v55 = vld [vmem:[%s5411_s9 + $0x4b8] sm:$0xf] }
  0x95   : > { %2708 = vmatpush.bf16.msrb.mxu2 %v4462_v3  ;;  %v3961_v3 = vld [vmem:[%s5411_s9 + $0x578] sm:$0xf]  ;;  %v3770_v6 = vor.u32 %v4924_v2, %v3769_v1  ;;  %v3866_v1 = vor.u32 %v4948_v56, %v3865_v55  ;;  %v4894_v2 = vld [vmem:[%s5411_s9 + $0x31c] sm:$0xf0] }
  0x96   : > { %2721 = vmatpush.bf16.msrb.mxu3 %v4654_v7  ;;  %v3361_v7 = vld [vmem:[%s5411_s9 + $0xc8] sm:$0xf]  ;;  %v3650_v10 = vor.u32 %v4894_v2, %v3649_v0  ;;  %v4105_v56 = vld [vmem:[%s5411_s9 + $0x698] sm:$0xf]  ;;  %v5152_v0 = vld [vmem:[%s5411_s9 + $0xb2c] sm:$0xf0] }
  0x97   : > { %2683 = vmatpush.bf16.msrb.mxu0 %v4054_v13 }
  0x98   : > { %2696 = vmatpush.bf16.msrb.mxu1 %v4246_v16  ;;  %v3337_v16 = vld [vmem:[%s5411_s9 + $0x98] sm:$0xf] }
  0x99   : > { %2709 = vmatpush.bf16.msrb.mxu2 %v4438_v17  ;;  %v4816_v17 = vld [vmem:[%s5411_s9 + $0xac] sm:$0xf0] }
  0x9a   : > { %2722 = vmatpush.bf16.msrb.mxu3 %v4630_v24  ;;  %v3721_v24 = vld [vmem:[%s5411_s9 + $0x398] sm:$0xf]  ;;  %v3338_v30 = vor.u32 %v4816_v17, %v3337_v16  ;;  %v4177_v16 = vld [vmem:[%s5411_s9 + $0x728] sm:$0xf]  ;;  %v5026_v17 = vld [vmem:[%s5411_s9 + $0x73c] sm:$0xf0] }
  0x9b   : > { %2684 = vmatpush.bf16.msrb.mxu0 %v4030_v35  ;;  %v3722_v34 = vor.u32 %v4912_v25, %v3721_v24  ;;  %v3313_v35 = vld [vmem:[%s5411_s9 + $0x68] sm:$0xf]  ;;  %v5122_v25 = vld [vmem:[%s5411_s9 + $0xa3c] sm:$0xf0] }
  0x9c   : > { %2697 = vmatpush.bf16.msrb.mxu1 %v4222_v40  ;;  %v4858_v40 = vld [vmem:[%s5411_s9 + $0x1fc] sm:$0xf0]  ;;  %v4561_v24 = vld [vmem:[%s5411_s9 + $0xa28] sm:$0xf] }
  0x9d   : > { %2710 = vmatpush.bf16.msrb.mxu2 %v4414_v41  ;;  %v3697_v41 = vld [vmem:[%s5411_s9 + $0x368] sm:$0xf] }
  0x9e   : > { %2723 = vmatpush.bf16.msrb.mxu3 %v4606_v44  ;;  %2685 = vmatmul.bf16.vlgmr.msrb.gmra.mxu0 %v5578_v31  ;;  %v4822_v31 = vld [vmem:[%s5411_s9 + $0xdc] sm:$0xf0] }
  0x9f   : > { %2729 = vmatpush.bf16.msra.mxu0 %v3434_v45  ;;  %2698 = vmatmul.bf16.vlgmr.msrb.gmra.mxu1 %v5585_v38  ;;  %v3937_v38 = vld [vmem:[%s5411_s9 + $0x548] sm:$0xf]  ;;  %v3362_v13 = vor.u32 %v4822_v31, %v3361_v7  ;;  %v4954_v44 = vld [vmem:[%s5411_s9 + $0x4fc] sm:$0xf0]  ;;  %v3314_v45 = vor.u32 %v4810_v36, %v3313_v35  ;;  %v5080_v31 = vld [vmem:[%s5411_s9 + $0x8ec] sm:$0xf0] }
  0xa0   : > { %2742 = vmatpush.bf16.msra.mxu1 %v3626_v46  ;;  %2711 = vmatmul.bf16.vlgmr.msrb.gmra.mxu2 %v5576_v29  ;;  %v3386_v29 = vor.u32 %v4828_v61, %v3385_v60  ;;  %v3938_v19 = vor.u32 %v4966_v12, %v3937_v38  ;;  %v3506_v46 = vor.u32 %v4858_v40, %v3505_v37  ;;  %v5176_v38 = vld [vmem:[%s5411_s9 + $0xbec] sm:$0xf0]  ;;  %v4153_v35 = vld [vmem:[%s5411_s9 + $0x6f8] sm:$0xf] }
  0xa1   : > { %2755 = vmatpush.bf16.msra.mxu2 %v3818_v47  ;;  %2724 = vmatmul.bf16.vlgmr.msrb.gmra.mxu3 %v5580_v32  ;;  %v3962_v32 = vor.u32 %v4972_v4, %v3961_v3  ;;  %v3698_v47 = vor.u32 %v4906_v42, %v3697_v41  ;;  %v3482_v60 = vor.u32 %v4852_v52, %v3481_v50  ;;  %v3841_v3 = vld [vmem:[%s5411_s9 + $0x488] sm:$0xf]  ;;  %v4942_v4 = vld [vmem:[%s5411_s9 + $0x49c] sm:$0xf0]  ;;  %v5020_v36 = vld [vmem:[%s5411_s9 + $0x70c] sm:$0xf0] }
  0xa2   : > { %2768 = vmatpush.bf16.msra.mxu3 %v4010_v51  ;;  %v3890_v51 = vor.u32 %v4954_v44, %v3889_v43  ;;  %v3674_v61 = vor.u32 %v4900_v54, %v3673_v53  ;;  %v3842_v12 = vor.u32 %v4942_v4, %v3841_v3  ;;  %v4345_v37 = vld [vmem:[%s5411_s9 + $0x878] sm:$0xf]  ;;  %v5068_v40 = vld [vmem:[%s5411_s9 + $0x88c] sm:$0xf0]  ;;  %v5062_v50 = vld [vmem:[%s5411_s9 + $0x85c] sm:$0xf0] }
  0xa3   : > { %2730 = vmatpush.bf16.msra.mxu0 %v3410_v57  ;;  %v3290_v57 = vor.u32 %v4804_v49, %v3289_v48  ;;  %v4537_v41 = vld [vmem:[%s5411_s9 + $0x9f8] sm:$0xf]  ;;  %v5116_v42 = vld [vmem:[%s5411_s9 + $0xa0c] sm:$0xf0]  ;;  %v5014_v48 = vld [vmem:[%s5411_s9 + $0x6dc] sm:$0xf0] }
  0xa4   : > { %2743 = vmatpush.bf16.msra.mxu1 %v3602_v58  ;;  %v3265_v58 = vld [vmem:[%s5411_s9 + $0x8] sm:$0xf]  ;;  %v4729_v43 = vld [vmem:[%s5411_s9 + $0xb78] sm:$0xf]  ;;  %v5164_v44 = vld [vmem:[%s5411_s9 + $0xb8c] sm:$0xf0] }
  0xa5   : > { %2756 = vmatpush.bf16.msra.mxu2 %v3794_v59  ;;  %v4798_v59 = vld [vmem:[%s5411_s9 + $0x1c] sm:$0xf0]  ;;  %v4321_v49 = vld [vmem:[%s5411_s9 + $0x848] sm:$0xf] }
  0xa6   : > { %2769 = vmatpush.bf16.msra.mxu3 %v3986_v63  ;;  %v4846_v63 = vld [vmem:[%s5411_s9 + $0x19c] sm:$0xf0]  ;;  %v3266_v7 = vor.u32 %v4798_v59, %v3265_v58  ;;  %v4705_v52 = vld [vmem:[%s5411_s9 + $0xb48] sm:$0xf]  ;;  %v4322_v54 = vor.u32 %v5062_v50, %v4321_v49  ;;  %v4297_v58 = vld [vmem:[%s5411_s9 + $0x818] sm:$0xf] }
  0xa7   : > { %2731 = vmatpush.bf16.msra.mxu0 %v3386_v29  ;;  %v4201_v29 = vld [vmem:[%s5411_s9 + $0x758] sm:$0xf]  ;;  %v3458_v9 = vor.u32 %v4846_v63, %v3457_v62  ;;  %v5104_v62 = vld [vmem:[%s5411_s9 + $0x9ac] sm:$0xf0]  ;;  %v4081_v4 = vld [vmem:[%s5411_s9 + $0x668] sm:$0xf] }
  0xa8   : > { %2744 = vmatpush.bf16.msra.mxu1 %v3578_v5  ;;  %v5032_v5 = vld [vmem:[%s5411_s9 + $0x76c] sm:$0xf0]  ;;  %v4681_v63 = vld [vmem:[%s5411_s9 + $0xb18] sm:$0xf]  ;;  %v4933_v50 = vld [vmem:[%s5411_s9 + $0x45c] sm:$0xf] }
  0xa9   : > { %2757 = vmatpush.bf16.msra.mxu2 %v3770_v6  ;;  %v4393_v6 = vld [vmem:[%s5411_s9 + $0x8d8] sm:$0xf] }
  0xaa   : > { %2770 = vmatpush.bf16.msra.mxu3 %v3962_v32  ;;  %v5128_v32 = vld [vmem:[%s5411_s9 + $0xa6c] sm:$0xf0] }
  0xab   : > { %2732 = vmatpush.bf16.msra.mxu0 %v3362_v13  ;;  %v4202_v13 = vor.u32 %v5032_v5, %v4201_v29  ;;  %v5002_v29 = vld [vmem:[%s5411_s9 + $0x67c] sm:$0xf0]  ;;  %v4273_v5 = vld [vmem:[%s5411_s9 + $0x7e8] sm:$0xf] }
  0xac   : > { %2745 = vmatpush.bf16.msra.mxu1 %v3554_v14  ;;  %v4394_v14 = vor.u32 %v5080_v31, %v4393_v6  ;;  %v4682_v6 = vor.u32 %v5152_v0, %v4681_v63  ;;  %v4465_v31 = vld [vmem:[%s5411_s9 + $0x968] sm:$0xf]  ;;  %v4879_v63 = vld [vmem:[%s5411_s9 + $0x2ac] sm:$0xf] }
  0xad   : > { %2758 = vmatpush.bf16.msra.mxu2 %v3746_v15  ;;  %v4586_v15 = vor.u32 %v5128_v32, %v4585_v8  ;;  %v5098_v8 = vld [vmem:[%s5411_s9 + $0x97c] sm:$0xf0]  ;;  %v4657_v32 = vld [vmem:[%s5411_s9 + $0xae8] sm:$0xf] }
  0xae   : > { %2771 = vmatpush.bf16.msra.mxu3 %v3938_v19  ;;  %v4778_v19 = vor.u32 %v5176_v38, %v4777_v11 }
  0xaf   : > { %2733 = vmatpush.bf16.msra.mxu0 %v3338_v30  ;;  %v4178_v30 = vor.u32 %v5026_v17, %v4177_v16 }
  0xb0   : > { %2746 = vmatpush.bf16.msra.mxu1 %v3530_v33  ;;  %v4370_v33 = vor.u32 %v5074_v23, %v4369_v18  ;;  %v5044_v18 = vld [vmem:[%s5411_s9 + $0x7cc] sm:$0xf0] }
  0xb1   : > { %2759 = vmatpush.bf16.msra.mxu2 %v3722_v34  ;;  %v4562_v34 = vor.u32 %v5122_v25, %v4561_v24  ;;  %v5092_v23 = vld [vmem:[%s5411_s9 + $0x94c] sm:$0xf0]  ;;  %v4633_v25 = vld [vmem:[%s5411_s9 + $0xab8] sm:$0xf] }
  0xb2   : > { %2772 = vmatpush.bf16.msra.mxu3 %v3914_v39  ;;  %v4754_v39 = vor.u32 %v5170_v28, %v4753_v27  ;;  %v5140_v27 = vld [vmem:[%s5411_s9 + $0xacc] sm:$0xf0] }
  0xb3   : > { %2734 = vmatpush.bf16.msra.mxu0 %v3314_v45  ;;  %v4154_v45 = vor.u32 %v5020_v36, %v4153_v35  ;;  %v4225_v36 = vld [vmem:[%s5411_s9 + $0x788] sm:$0xf] }
  0xb4   : > { %2747 = vmatpush.bf16.msra.mxu1 %v3506_v46  ;;  %v4346_v46 = vor.u32 %v5068_v40, %v4345_v37  ;;  %v5038_v37 = vld [vmem:[%s5411_s9 + $0x79c] sm:$0xf0] }
  0xb5   : > { %2760 = vmatpush.bf16.msra.mxu2 %v3698_v47  ;;  %v4538_v47 = vor.u32 %v5116_v42, %v4537_v41  ;;  %v4634_v41 = vor.u32 %v5140_v27, %v4633_v25  ;;  %v5086_v42 = vld [vmem:[%s5411_s9 + $0x91c] sm:$0xf0]  ;;  %v4819_v27 = vld [vmem:[%s5411_s9 + $0xcc] sm:$0xf] }
  0xb6   : > { %2773 = vmatpush.bf16.msra.mxu3 %v3890_v51  ;;  %v5110_v51 = vld [vmem:[%s5411_s9 + $0x9dc] sm:$0xf0] }
  0xb7   : > { %2735 = vmatpush.bf16.msra.mxu0 %v3290_v57  ;;  %v5008_v57 = vld [vmem:[%s5411_s9 + $0x6ac] sm:$0xf0] }
  0xb8   : > { %2748 = vmatpush.bf16.msra.mxu1 %v3482_v60  ;;  %v5056_v60 = vld [vmem:[%s5411_s9 + $0x82c] sm:$0xf0] }
  0xb9   : > { %2761 = vmatpush.bf16.msra.mxu2 %v3674_v61  ;;  %v4489_v61 = vld [vmem:[%s5411_s9 + $0x998] sm:$0xf]  ;;  %v4298_v2 = vor.u32 %v5056_v60, %v4297_v58 }
  0xba   : > { %2774 = vmatpush.bf16.msra.mxu3 %v3866_v1  ;;  %v4106_v1 = vor.u32 %v5008_v57, %v4105_v56  ;;  %v4490_v3 = vor.u32 %v5104_v62, %v4489_v61  ;;  %v4831_v61 = vld [vmem:[%s5411_s9 + $0x12c] sm:$0xf]  ;;  %v3411_v62 = vld [vmem:[%s5411_s9 + $0x140] sm:$0xf0] }
  0xbb   : > { %2736 = vmatpush.bf16.msra.mxu0 %v3266_v7  ;;  %v5050_v7 = vld [vmem:[%s5411_s9 + $0x7fc] sm:$0xf0] }
  0xbc   : > { %2749 = vmatpush.bf16.msra.mxu1 %v3458_v9  ;;  %v5146_v9 = vld [vmem:[%s5411_s9 + $0xafc] sm:$0xf0]  ;;  %v4274_v38 = vor.u32 %v5050_v7, %v4273_v5 }
  0xbd   : > { %2762 = vmatpush.bf16.msra.mxu2 %v3650_v10  ;;  %v4082_v10 = vor.u32 %v5002_v29, %v4081_v4  ;;  %v4658_v17 = vor.u32 %v5146_v9, %v4657_v32  ;;  %v4975_v4 = vld [vmem:[%s5411_s9 + $0x5ac] sm:$0xf]  ;;  %v3987_v29 = vld [vmem:[%s5411_s9 + $0x5c0] sm:$0xf0]  ;;  %v4825_v32 = vld [vmem:[%s5411_s9 + $0xfc] sm:$0xf] }
  0xbe   : > { %2775 = vmatpush.bf16.msra.mxu3 %v3842_v12  ;;  %2737 = vmatmul.bf16.vlgmr.msra.gmra.mxu0 %v5522_v21  ;;  %v4730_v21 = vor.u32 %v5164_v44, %v4729_v43  ;;  %v2530_v11 = vpop.f32.mrf.mxu0  ;;  %v4466_v12 = vor.u32 %v5098_v8, %v4465_v31  ;;  %v4609_v43 = vld [vmem:[%s5411_s9 + $0xa88] sm:$0xf]  ;;  %v5134_v44 = vld [vmem:[%s5411_s9 + $0xa9c] sm:$0xf0]  ;;  %v3387_v9 = vld [vmem:[%s5411_s9 + $0x110] sm:$0xf0] }
  0xbf   : > { %2781 = vmatpush.bf16.msrb.mxu0 %v4202_v13  ;;  %2750 = vmatmul.bf16.vlgmr.msra.gmra.mxu1 %v5529_v26  ;;  %v5158_v26 = vld [vmem:[%s5411_s9 + $0xb5c] sm:$0xf0]  ;;  %v4057_v13 = vld [vmem:[%s5411_s9 + $0x638] sm:$0xf]  ;;  %v4610_v57 = vor.u32 %v5134_v44, %v4609_v43  ;;  %v4813_v44 = vld [vmem:[%s5411_s9 + $0x9c] sm:$0xf] }
  0xc0   : > { %2794 = vmatpush.bf16.msrb.mxu1 %v4394_v14  ;;  %2763 = vmatmul.bf16.vlgmr.msra.gmra.mxu2 %v5520_v20  ;;  %v4129_v20 = vld [vmem:[%s5411_s9 + $0x6c8] sm:$0xf]  ;;  %v4706_v59 = vor.u32 %v5158_v26, %v4705_v52  ;;  %v4996_v14 = vld [vmem:[%s5411_s9 + $0x64c] sm:$0xf0]  ;;  %v4226_v26 = vor.u32 %v5038_v37, %v4225_v36  ;;  %v3747_v36 = vld [vmem:[%s5411_s9 + $0x3e0] sm:$0xf0] }
  0xc1   : > { %2807 = vmatpush.bf16.msrb.mxu2 %v4586_v15  ;;  %2776 = vmatmul.bf16.vlgmr.msra.gmra.mxu3 %v5524_v22  ;;  %v4513_v22 = vld [vmem:[%s5411_s9 + $0x9c8] sm:$0xf]  ;;  %v4130_v53 = vor.u32 %v5014_v48, %v4129_v20  ;;  %v4249_v15 = vld [vmem:[%s5411_s9 + $0x7b8] sm:$0xf]  ;;  %v4058_v28 = vor.u32 %v4996_v14, %v4057_v13  ;;  %v3435_v20 = vld [vmem:[%s5411_s9 + $0x170] sm:$0xf0] }
  0xc2   : > { %2820 = vmatpush.bf16.msrb.mxu3 %v4778_v19  ;;  %v4514_v55 = vor.u32 %v5110_v51, %v4513_v22  ;;  %v2543_v16 = vpop.f32.mrf.mxu1  ;;  %v4441_v19 = vld [vmem:[%s5411_s9 + $0x938] sm:$0xf]  ;;  %v4885_v48 = vld [vmem:[%s5411_s9 + $0x2dc] sm:$0xf]  ;;  %v3819_v22 = vld [vmem:[%s5411_s9 + $0x470] sm:$0xf0] }
  0xc3   : > { %2782 = vmatpush.bf16.msrb.mxu0 %v4178_v30  ;;  %v2544_v24 = vadd.f32 %v2543_v16, %v2530_v11  ;;  %v4033_v30 = vld [vmem:[%s5411_s9 + $0x608] sm:$0xf]  ;;  %v4442_v35 = vor.u32 %v5092_v23, %v4441_v19  ;;  %v3822_v60 = vor.u32 %v4933_v50, %v3819_v22  ;;  %v3990_v11 = vor.u32 %v4975_v4, %v3987_v29  ;;  %v4921_v13 = vld [vmem:[%s5411_s9 + $0x3fc] sm:$0xf]  ;;  %v3771_v14 = vld [vmem:[%s5411_s9 + $0x410] sm:$0xf0] }
  0xc4   : > { %2795 = vmatpush.bf16.msrb.mxu1 %v4370_v33  ;;  %v4990_v33 = vld [vmem:[%s5411_s9 + $0x61c] sm:$0xf0]  ;;  %v5870_v16 = vld [vmem:[#allocation1 + $0x3f] sm:$0xff]  ;;  %v3390_v19 = vor.u32 %v4825_v32, %v3387_v9  ;;  %v5875_v23 = vld [vmem:[#allocation1 + $0x2d] sm:$0xff]  ;;  %v3774_v25 = vor.u32 %v4921_v13, %v3771_v14 }
  0xc5   : > { %2808 = vmatpush.bf16.msrb.mxu2 %v4562_v34  ;;  %v4250_v34 = vor.u32 %v5044_v18, %v4249_v15  ;;  %v2556_v40 = vpop.f32.mrf.mxu2  ;;  %v4034_v49 = vor.u32 %v4990_v33, %v4033_v30  ;;  %v5867_v15 = vld [vmem:[#allocation1 + $0x24] sm:$0xff]  ;;  %v3963_v18 = vld [vmem:[%s5411_s9 + $0x590] sm:$0xf0]  ;;  %v4867_v30 = vld [vmem:[%s5411_s9 + $0x24c] sm:$0xf] }
  0xc6   : > { %2821 = vmatpush.bf16.msrb.mxu3 %v4754_v39  ;;  %v4417_v39 = vld [vmem:[%s5411_s9 + $0x908] sm:$0xf]  ;;  %v2532_v52 = vpop.f32.mrf.mxu0  ;;  %v4963_v37 = vld [vmem:[%s5411_s9 + $0x54c] sm:$0xf]  ;;  %v3723_v50 = vld [vmem:[%s5411_s9 + $0x3b0] sm:$0xf0] }
  0xc7   : > { %2783 = vmatpush.bf16.msrb.mxu0 %v4154_v45  ;;  %v2557_v45 = vadd.f32 %v2556_v40, %v2544_v24  ;;  %v4957_v22 = vld [vmem:[%s5411_s9 + $0x51c] sm:$0xf]  ;;  %v3915_v52 = vld [vmem:[%s5411_s9 + $0x530] sm:$0xf0] }
  0xc8   : > { %2796 = vmatpush.bf16.msrb.mxu1 %v4346_v46  ;;  %v2569_v46 = vpop.f32.mrf.mxu3  ;;  %v4945_v13 = vld [vmem:[%s5411_s9 + $0x4bc] sm:$0xf]  ;;  %v3867_v14 = vld [vmem:[%s5411_s9 + $0x4d0] sm:$0xf0] }
  0xc9   : > { %2809 = vmatpush.bf16.msrb.mxu2 %v4538_v47  ;;  %v4837_v47 = vld [vmem:[%s5411_s9 + $0x15c] sm:$0xf]  ;;  %v5846_v51 = vadd.f32 %v2569_v46, %v2557_v45  ;;  %v3339_v45 = vld [vmem:[%s5411_s9 + $0xb0] sm:$0xf0] }
  0xca   : > { %2822 = vmatpush.bf16.msrb.mxu3 %v4730_v21  ;;  %v3627_v21 = vld [vmem:[%s5411_s9 + $0x2f0] sm:$0xf0]  ;;  %v2545_v56 = vpop.f32.mrf.mxu1  ;;  %v3438_v58 = vor.u32 %v4837_v47, %v3435_v20  ;;  %v4861_v46 = vld [vmem:[%s5411_s9 + $0x21c] sm:$0xf] }
  0xcb   : > { %2784 = vmatpush.bf16.msrb.mxu0 %v4130_v53  ;;  %v4418_v53 = vor.u32 %v5086_v42, %v4417_v39  ;;  %v3939_v39 = vld [vmem:[%s5411_s9 + $0x560] sm:$0xf0] }
  0xcc   : > { %2797 = vmatpush.bf16.msrb.mxu1 %v4322_v54  ;;  %v4981_v54 = vld [vmem:[%s5411_s9 + $0x5dc] sm:$0xf]  ;;  %v3315_v56 = vld [vmem:[%s5411_s9 + $0x80] sm:$0xf0] }
  0xcd   : > { %2810 = vmatpush.bf16.msrb.mxu2 %v4514_v55  ;;  %v4011_v55 = vld [vmem:[%s5411_s9 + $0x5f0] sm:$0xf0]  ;;  %v2558_v5 = vpop.f32.mrf.mxu2 }
  0xce   : > { %2823 = vmatpush.bf16.msrb.mxu3 %v4706_v59  ;;  %v3630_v59 = vor.u32 %v4885_v48, %v3627_v21  ;;  %v4014_v0 = vor.u32 %v4981_v54, %v4011_v55  ;;  %v3942_v48 = vor.u32 %v4963_v37, %v3939_v39  ;;  %v4909_v21 = vld [vmem:[%s5411_s9 + $0x39c] sm:$0xf]  ;;  %v4807_v55 = vld [vmem:[%s5411_s9 + $0x6c] sm:$0xf]  ;;  %v3843_v37 = vld [vmem:[%s5411_s9 + $0x4a0] sm:$0xf0] }
  0xcf   : > { %2785 = vmatpush.bf16.msrb.mxu0 %v4106_v1  ;;  %v3603_v1 = vld [vmem:[%s5411_s9 + $0x2c0] sm:$0xf0]  ;;  %v3726_v54 = vor.u32 %v4909_v21, %v3723_v50 }
  0xd0   : > { %2798 = vmatpush.bf16.msrb.mxu1 %v4298_v2  ;;  %v4927_v2 = vld [vmem:[%s5411_s9 + $0x42c] sm:$0xf]  ;;  %v2571_v7 = vpop.f32.mrf.mxu3  ;;  %v3606_v31 = vor.u32 %v4879_v63, %v3603_v1 }
  0xd1   : > { %2811 = vmatpush.bf16.msrb.mxu2 %v4490_v3  ;;  %v3795_v3 = vld [vmem:[%s5411_s9 + $0x440] sm:$0xf0]  ;;  %v4951_v1 = vld [vmem:[%s5411_s9 + $0x4ec] sm:$0xf]  ;;  %v4801_v7 = vld [vmem:[%s5411_s9 + $0x3c] sm:$0xf] }
  0xd2   : > { %2824 = vmatpush.bf16.msrb.mxu3 %v4682_v6  ;;  %v3414_v6 = vor.u32 %v4831_v61, %v3411_v62  ;;  %v3798_v8 = vor.u32 %v4927_v2, %v3795_v3  ;;  %v4903_v61 = vld [vmem:[%s5411_s9 + $0x36c] sm:$0xf]  ;;  %v3699_v62 = vld [vmem:[%s5411_s9 + $0x380] sm:$0xf0]  ;;  %v3318_v3 = vor.u32 %v4807_v55, %v3315_v56 }
  0xd3   : > { %2786 = vmatpush.bf16.msrb.mxu0 %v4082_v10  ;;  %v4873_v10 = vld [vmem:[%s5411_s9 + $0x27c] sm:$0xf]  ;;  %v3891_v2 = vld [vmem:[%s5411_s9 + $0x500] sm:$0xf0]  ;;  %v5119_v56 = vld [vmem:[%s5411_s9 + $0xa2c] sm:$0xf] }
  0xd4   : > { %2799 = vmatpush.bf16.msrb.mxu1 %v4274_v38  ;;  %v5861_v38 = vld [vmem:[#allocation1 + $0x36] sm:$0xff]  ;;  %v3894_v9 = vor.u32 %v4951_v1, %v3891_v2  ;;  %v4371_v55 = vld [vmem:[%s5411_s9 + $0x8c0] sm:$0xf0]  ;;  %v5065_v1 = vld [vmem:[%s5411_s9 + $0x87c] sm:$0xf] }
  0xd5   : > { %2812 = vmatpush.bf16.msrb.mxu2 %v4466_v12  ;;  %v3579_v12 = vld [vmem:[%s5411_s9 + $0x290] sm:$0xf0] }
  0xd6   : > { %2825 = vmatpush.bf16.msrb.mxu3 %v4658_v17  ;;  %v4969_v17 = vld [vmem:[%s5411_s9 + $0x57c] sm:$0xf]  ;;  %v3582_v24 = vor.u32 %v4873_v10, %v3579_v12  ;;  %v3483_v10 = vld [vmem:[%s5411_s9 + $0x1d0] sm:$0xf0] }
  0xd7   : > { %2787 = vmatpush.bf16.msrb.mxu0 %v4058_v28  ;;  %v3363_v28 = vld [vmem:[%s5411_s9 + $0xe0] sm:$0xf0]  ;;  %v3966_v33 = vor.u32 %v4969_v17, %v3963_v18  ;;  %v3675_v12 = vld [vmem:[%s5411_s9 + $0x350] sm:$0xf0]  ;;  %v4795_v18 = vld [vmem:[%s5411_s9 + $0xc] sm:$0xf] }
  0xd8   : > { %2800 = vmatpush.bf16.msrb.mxu1 %v4250_v34  ;;  %v3555_v34 = vld [vmem:[%s5411_s9 + $0x260] sm:$0xf0]  ;;  %v3366_v40 = vor.u32 %v4819_v27, %v3363_v28  ;;  %v4843_v27 = vld [vmem:[%s5411_s9 + $0x18c] sm:$0xf] }
  0xd9   : > { %2813 = vmatpush.bf16.msrb.mxu2 %v4442_v35  ;;  %v4915_v35 = vld [vmem:[%s5411_s9 + $0x3cc] sm:$0xf]  ;;  %v3558_v42 = vor.u32 %v4867_v30, %v3555_v34  ;;  %v3459_v28 = vld [vmem:[%s5411_s9 + $0x1a0] sm:$0xf0]  ;;  %v3870_v34 = vor.u32 %v4945_v13, %v3867_v14 }
  0xda   : > { %2826 = vmatpush.bf16.msrb.mxu3 %v4634_v41  ;;  %v3750_v43 = vor.u32 %v4915_v35, %v3747_v36  ;;  %v4891_v30 = vld [vmem:[%s5411_s9 + $0x30c] sm:$0xf]  ;;  %v3651_v35 = vld [vmem:[%s5411_s9 + $0x320] sm:$0xf0] }
  0xdb   : > { %2788 = vmatpush.bf16.msrb.mxu0 %v4034_v49  ;;  %v2582_v41 = vpop.f32.mrf.mxu0  ;;  %v3531_v49 = vld [vmem:[%s5411_s9 + $0x230] sm:$0xf0]  ;;  %v4939_v36 = vld [vmem:[%s5411_s9 + $0x48c] sm:$0xf]  ;;  %v4131_v14 = vld [vmem:[%s5411_s9 + $0x6e0] sm:$0xf0] }
  0xdc   : > { %2801 = vmatpush.bf16.msrb.mxu1 %v4226_v26  ;;  %v2583_v47 = vadd.f32 %v2582_v41, %v5846_v51  ;;  %v2595_v20 = vpop.f32.mrf.mxu1  ;;  %v3534_v51 = vor.u32 %v4861_v46, %v3531_v49  ;;  %v4203_v41 = vld [vmem:[%s5411_s9 + $0x770] sm:$0xf0]  ;;  %v3846_v21 = vor.u32 %v4939_v36, %v3843_v37  ;;  %v5011_v13 = vld [vmem:[%s5411_s9 + $0x6cc] sm:$0xf]  ;;  %v5005_v36 = vld [vmem:[%s5411_s9 + $0x69c] sm:$0xf] }
  0xdd   : > { %2814 = vmatpush.bf16.msrb.mxu2 %v4418_v53  ;;  %v3342_v53 = vor.u32 %v4813_v44, %v3339_v45  ;;  %v4395_v44 = vld [vmem:[%s5411_s9 + $0x8f0] sm:$0xf0]  ;;  %v5125_v45 = vld [vmem:[%s5411_s9 + $0xa5c] sm:$0xf] }
  0xde   : > { %2827 = vmatpush.bf16.msrb.mxu3 %v4610_v57  ;;  %2789 = vmatmul.bf16.vlgmr.msrb.gmra.mxu0 %v5867_v15  ;;  %v2596_v26 = vadd.f32 %v2595_v20, %v2583_v47  ;;  %v4855_v57 = vld [vmem:[%s5411_s9 + $0x1ec] sm:$0xf]  ;;  %v4587_v46 = vld [vmem:[%s5411_s9 + $0xa70] sm:$0xf0]  ;;  %v3462_v47 = vor.u32 %v4843_v27, %v3459_v28  ;;  %v3654_v20 = vor.u32 %v4891_v30, %v3651_v35  ;;  %v4707_v28 = vld [vmem:[%s5411_s9 + $0xb60] sm:$0xf0] }
  0xdf   : > { %2833 = vmatpush.bf16.msra.mxu0 %v3438_v58  ;;  %2802 = vmatmul.bf16.vlgmr.msrb.gmra.mxu1 %v5875_v23  ;;  %v4779_v49 = vld [vmem:[%s5411_s9 + $0xbf0] sm:$0xf0]  ;;  %v5155_v27 = vld [vmem:[%s5411_s9 + $0xb4c] sm:$0xf]  ;;  %v4134_v30 = vor.u32 %v5011_v13, %v4131_v14  ;;  %v4035_v14 = vld [vmem:[%s5411_s9 + $0x620] sm:$0xf0] }
  0xe0   : > { %2846 = vmatpush.bf16.msra.mxu1 %v3630_v59  ;;  %2815 = vmatmul.bf16.vlgmr.msrb.gmra.mxu2 %v5861_v38  ;;  %v3918_v59 = vor.u32 %v4957_v22, %v3915_v52  ;;  %v4590_v52 = vor.u32 %v5125_v45, %v4587_v46  ;;  %v4107_v37 = vld [vmem:[%s5411_s9 + $0x6b0] sm:$0xf0]  ;;  %v5149_v46 = vld [vmem:[%s5411_s9 + $0xb1c] sm:$0xf]  ;;  %v4987_v13 = vld [vmem:[%s5411_s9 + $0x60c] sm:$0xf] }
  0xe1   : > { %2859 = vmatpush.bf16.msra.mxu2 %v3822_v60  ;;  %2828 = vmatmul.bf16.vlgmr.msrb.gmra.mxu3 %v5870_v16  ;;  %v3507_v60 = vld [vmem:[%s5411_s9 + $0x200] sm:$0xf0] }
  0xe2   : > { %2872 = vmatpush.bf16.msra.mxu3 %v4014_v0  ;;  %v3510_v5 = vor.u32 %v4855_v57, %v3507_v60  ;;  %v4563_v57 = vld [vmem:[%s5411_s9 + $0xa40] sm:$0xf0] }
  0xe3   : > { %2834 = vmatpush.bf16.msra.mxu0 %v3414_v6  ;;  %v2608_v58 = vpop.f32.mrf.mxu2  ;;  %v2584_v29 = vpop.f32.mrf.mxu0  ;;  %v3702_v6 = vor.u32 %v4903_v61, %v3699_v62  ;;  %v4566_v62 = vor.u32 %v5119_v56, %v4563_v57  ;;  %v5143_v57 = vld [vmem:[%s5411_s9 + $0xaec] sm:$0xf] }
  0xe4   : > { %2847 = vmatpush.bf16.msra.mxu1 %v3606_v31  ;;  %v2609_v63 = vadd.f32 %v2608_v58, %v2596_v26  ;;  %v2621_v0 = vpop.f32.mrf.mxu3  ;;  %v3291_v31 = vld [vmem:[%s5411_s9 + $0x50] sm:$0xf0]  ;;  %v2597_v32 = vpop.f32.mrf.mxu1  ;;  %v5023_v26 = vld [vmem:[%s5411_s9 + $0x72c] sm:$0xf]  ;;  %v5113_v29 = vld [vmem:[%s5411_s9 + $0x9fc] sm:$0xf] }
  0xe5   : > { %2860 = vmatpush.bf16.msra.mxu2 %v3798_v8  ;;  %v4849_v8 = vld [vmem:[%s5411_s9 + $0x1bc] sm:$0xf]  ;;  %v3294_v17 = vor.u32 %v4801_v7, %v3291_v31  ;;  %v5167_v58 = vld [vmem:[%s5411_s9 + $0xbac] sm:$0xf]  ;;  %v4731_v31 = vld [vmem:[%s5411_s9 + $0xb90] sm:$0xf0] }
  0xe6   : > { %2873 = vmatpush.bf16.msra.mxu3 %v3990_v11  ;;  %v5903_v4 = vadd.f32 %v2621_v0, %v2609_v63  ;;  %v4897_v11 = vld [vmem:[%s5411_s9 + $0x33c] sm:$0xf]  ;;  %v4155_v0 = vld [vmem:[%s5411_s9 + $0x710] sm:$0xf0] }
  0xe7   : > { %2835 = vmatpush.bf16.msra.mxu0 %v3390_v19  ;;  %v3267_v19 = vld [vmem:[%s5411_s9 + $0x20] sm:$0xf0]  ;;  %v5017_v63 = vld [vmem:[%s5411_s9 + $0x6fc] sm:$0xf]  ;;  %v5951_v32 = vld [vmem:[#allocation1 + $0x1b] sm:$0xff] }
  0xe8   : > { %2848 = vmatpush.bf16.msra.mxu1 %v3582_v24  ;;  %v3486_v24 = vor.u32 %v4849_v8, %v3483_v10  ;;  %v5161_v7 = vld [vmem:[%s5411_s9 + $0xb7c] sm:$0xf]  ;;  %v5954_v10 = vld [vmem:[#allocation1 + $0x9] sm:$0xff] }
  0xe9   : > { %2861 = vmatpush.bf16.msra.mxu2 %v3774_v25  ;;  %v3678_v25 = vor.u32 %v4897_v11, %v3675_v12  ;;  %v5948_v8 = vld [vmem:[#allocation1] sm:$0xff] }
  0xea   : > { %2874 = vmatpush.bf16.msra.mxu3 %v3966_v33 }
  0xeb   : > { %2836 = vmatpush.bf16.msra.mxu0 %v3366_v40  ;;  %v2610_v33 = vpop.f32.mrf.mxu2  ;;  %v5029_v40 = vld [vmem:[%s5411_s9 + $0x75c] sm:$0xf] }
  0xec   : > { %2849 = vmatpush.bf16.msra.mxu1 %v3558_v42  ;;  %v2623_v39 = vpop.f32.mrf.mxu3  ;;  %v5077_v42 = vld [vmem:[%s5411_s9 + $0x8dc] sm:$0xf]  ;;  %v4206_v50 = vor.u32 %v5029_v40, %v4203_v41  ;;  %v4710_v41 = vor.u32 %v5155_v27, %v4707_v28 }
  0xed   : > { %2862 = vmatpush.bf16.msra.mxu2 %v3750_v43  ;;  %v3270_v43 = vor.u32 %v4795_v18, %v3267_v19  ;;  %v4398_v22 = vor.u32 %v5077_v42, %v4395_v44  ;;  %v4734_v18 = vor.u32 %v5161_v7, %v4731_v31  ;;  %v4323_v19 = vld [vmem:[%s5411_s9 + $0x860] sm:$0xf0]  ;;  %v5053_v39 = vld [vmem:[%s5411_s9 + $0x81c] sm:$0xf]  ;;  %v4299_v42 = vld [vmem:[%s5411_s9 + $0x830] sm:$0xf0] }
  0xee   : > { %2875 = vmatpush.bf16.msra.mxu3 %v3942_v48  ;;  %v5173_v48 = vld [vmem:[%s5411_s9 + $0xbdc] sm:$0xf]  ;;  %v4491_v44 = vld [vmem:[%s5411_s9 + $0x9b0] sm:$0xf0] }
  0xef   : > { %2837 = vmatpush.bf16.msra.mxu0 %v3342_v53  ;;  %v4179_v53 = vld [vmem:[%s5411_s9 + $0x740] sm:$0xf0]  ;;  %v5089_v7 = vld [vmem:[%s5411_s9 + $0x93c] sm:$0xf]  ;;  %v4443_v31 = vld [vmem:[%s5411_s9 + $0x950] sm:$0xf0] }
  0xf0   : > { %2850 = vmatpush.bf16.msra.mxu1 %v3534_v51  ;;  %v5071_v51 = vld [vmem:[%s5411_s9 + $0x8ac] sm:$0xf]  ;;  %v4182_v60 = vor.u32 %v5023_v26, %v4179_v53  ;;  %v4275_v53 = vld [vmem:[%s5411_s9 + $0x800] sm:$0xf0] }
  0xf1   : > { %2863 = vmatpush.bf16.msra.mxu2 %v3726_v54  ;;  %v4782_v54 = vor.u32 %v5173_v48, %v4779_v49  ;;  %v4374_v61 = vor.u32 %v5071_v51, %v4371_v55  ;;  %v4302_v48 = vor.u32 %v5053_v39, %v4299_v42  ;;  %v5095_v51 = vld [vmem:[%s5411_s9 + $0x96c] sm:$0xf]  ;;  %v3633_v39 = vld [vmem:[%s5411_s9 + $0x2e0] sm:$0xf] }
  0xf2   : > { %2876 = vmatpush.bf16.msra.mxu3 %v3918_v59  ;;  %v4755_v59 = vld [vmem:[%s5411_s9 + $0xbc0] sm:$0xf0]  ;;  %v3825_v42 = vld [vmem:[%s5411_s9 + $0x460] sm:$0xf] }
  0xf3   : > { %2838 = vmatpush.bf16.msra.mxu0 %v3318_v3  ;;  %v4758_v2 = vor.u32 %v5167_v58, %v4755_v59  ;;  %v4347_v3 = vld [vmem:[%s5411_s9 + $0x890] sm:$0xf0]  ;;  %v4659_v58 = vld [vmem:[%s5411_s9 + $0xb00] sm:$0xf0] }
  0xf4   : > { %2851 = vmatpush.bf16.msra.mxu1 %v3510_v5  ;;  %v4539_v5 = vld [vmem:[%s5411_s9 + $0xa10] sm:$0xf0]  ;;  %v4350_v11 = vor.u32 %v5065_v1, %v4347_v3 }
  0xf5   : > { %2864 = vmatpush.bf16.msra.mxu2 %v3702_v6  ;;  %v5943_v6 = vld [vmem:[#allocation1 + $0x12] sm:$0xff]  ;;  %v4542_v12 = vor.u32 %v5113_v29, %v4539_v5  ;;  %v4059_v1 = vld [vmem:[%s5411_s9 + $0x650] sm:$0xf0]  ;;  %v4662_v29 = vor.u32 %v5143_v57, %v4659_v58 }
  0xf6   : > { %2877 = vmatpush.bf16.msra.mxu3 %v3894_v9  ;;  %v4158_v9 = vor.u32 %v5017_v63, %v4155_v0  ;;  %v4993_v0 = vld [vmem:[%s5411_s9 + $0x63c] sm:$0xf]  ;;  %v4251_v5 = vld [vmem:[%s5411_s9 + $0x7d0] sm:$0xf0] }
  0xf7   : > { %2839 = vmatpush.bf16.msra.mxu0 %v3294_v17  ;;  %v5059_v17 = vld [vmem:[%s5411_s9 + $0x84c] sm:$0xf] }
  0xf8   : > { %2852 = vmatpush.bf16.msra.mxu1 %v3486_v24  ;;  %v5107_v24 = vld [vmem:[%s5411_s9 + $0x9cc] sm:$0xf] }
  0xf9   : > { %2865 = vmatpush.bf16.msra.mxu2 %v3678_v25  ;;  %v4515_v25 = vld [vmem:[%s5411_s9 + $0x9e0] sm:$0xf0] }
  0xfa   : > { %2878 = vmatpush.bf16.msra.mxu3 %v3870_v34  ;;  %v4326_v34 = vor.u32 %v5059_v17, %v4323_v19  ;;  %v4518_v35 = vor.u32 %v5107_v24, %v4515_v25  ;;  %v5035_v19 = vld [vmem:[%s5411_s9 + $0x78c] sm:$0xf]  ;;  %v4227_v24 = vld [vmem:[%s5411_s9 + $0x7a0] sm:$0xf0] }
  0xfb   : > { %2840 = vmatpush.bf16.msra.mxu0 %v3270_v43  ;;  %v2634_v33 = vpop.f32.mrf.mxu0  ;;  %v5101_v43 = vld [vmem:[%s5411_s9 + $0x99c] sm:$0xf]  ;;  %v5083_v25 = vld [vmem:[%s5411_s9 + $0x90c] sm:$0xf] }
  0xfc   : > { %2853 = vmatpush.bf16.msra.mxu1 %v3462_v47  ;;  %v2647_v40 = vpop.f32.mrf.mxu1  ;;  %v4683_v47 = vld [vmem:[%s5411_s9 + $0xb30] sm:$0xf0]  ;;  %v4494_v49 = vor.u32 %v5101_v43, %v4491_v44  ;;  %v4937_v43 = vld [vmem:[%s5411_s9 + $0x474] sm:$0xf0]  ;;  %v4230_v44 = vor.u32 %v5035_v19, %v4227_v24 }
  0xfd   : > { %2866 = vmatpush.bf16.msra.mxu2 %v3654_v20  ;;  %v2648_v45 = vadd.f32 %v2647_v40, %v2634_v33  ;;  %v4110_v20 = vor.u32 %v5005_v36, %v4107_v37  ;;  %v4686_v26 = vor.u32 %v5149_v46, %v4683_v47  ;;  %v5131_v33 = vld [vmem:[%s5411_s9 + $0xa8c] sm:$0xf]  ;;  %v3441_v36 = vld [vmem:[%s5411_s9 + $0x160] sm:$0xf]  ;;  %v4841_v37 = vld [vmem:[%s5411_s9 + $0x174] sm:$0xf0]  ;;  %v4038_v40 = vor.u32 %v4987_v13, %v4035_v14 }
  0xfe   : > { %2879 = vmatpush.bf16.msra.mxu3 %v3846_v21  ;;  %2841 = vmatmul.bf16.vlgmr.msra.gmra.mxu0 %v5948_v8  ;;  %v4999_v21 = vld [vmem:[%s5411_s9 + $0x66c] sm:$0xf]  ;;  %v4017_v46 = vld [vmem:[%s5411_s9 + $0x5e0] sm:$0xf]  ;;  %v4985_v47 = vld [vmem:[%s5411_s9 + $0x5f4] sm:$0xf0] }
  0xff   : > { %2885 = vmatpush.bf16.msrb.mxu0 %v4206_v50  ;;  %2854 = vmatmul.bf16.vlgmr.msra.gmra.mxu1 %v5954_v10  ;;  %v4083_v50 = vld [vmem:[%s5411_s9 + $0x680] sm:$0xf0]  ;;  %v3753_v13 = vld [vmem:[%s5411_s9 + $0x3d0] sm:$0xf]  ;;  %v4919_v14 = vld [vmem:[%s5411_s9 + $0x3e4] sm:$0xf0] }
 0x100   : > { %2898 = vmatpush.bf16.msrb.mxu1 %v4398_v22  ;;  %2867 = vmatmul.bf16.vlgmr.msra.gmra.mxu2 %v5943_v6  ;;  %v5047_v22 = vld [vmem:[%s5411_s9 + $0x7ec] sm:$0xf]  ;;  %v4086_v59 = vor.u32 %v4999_v21, %v4083_v50  ;;  %v3826_v21 = vor.u32 %v4937_v43, %v3825_v42  ;;  %v3417_v50 = vld [vmem:[%s5411_s9 + $0x130] sm:$0xf]  ;;  %v4961_v42 = vld [vmem:[%s5411_s9 + $0x534] sm:$0xf0] }
 0x101   : > { %2911 = vmatpush.bf16.msrb.mxu2 %v4590_v52  ;;  %2880 = vmatmul.bf16.vlgmr.msra.gmra.mxu3 %v5951_v32 }
 0x102   : > { %2924 = vmatpush.bf16.msrb.mxu3 %v4782_v54  ;;  %v4467_v54 = vld [vmem:[%s5411_s9 + $0x980] sm:$0xf0] }
 0x103   : > { %2886 = vmatpush.bf16.msrb.mxu0 %v4182_v60  ;;  %v2660_v52 = vpop.f32.mrf.mxu2  ;;  %v4470_v63 = vor.u32 %v5095_v51, %v4467_v54  ;;  %v3801_v51 = vld [vmem:[%s5411_s9 + $0x430] sm:$0xf]  ;;  %v4931_v54 = vld [vmem:[%s5411_s9 + $0x444] sm:$0xf0] }
 0x104   : > { %2899 = vmatpush.bf16.msrb.mxu1 %v4374_v61  ;;  %v2661_v55 = vadd.f32 %v2660_v52, %v2648_v45  ;;  %v2673_v56 = vpop.f32.mrf.mxu3  ;;  %v2636_v61 = vpop.f32.mrf.mxu0  ;;  %v3609_v52 = vld [vmem:[%s5411_s9 + $0x2b0] sm:$0xf] }
 0x105   : > { %2912 = vmatpush.bf16.msrb.mxu2 %v4566_v62  ;;  %v4278_v62 = vor.u32 %v5047_v22, %v4275_v53  ;;  %v2649_v3 = vpop.f32.mrf.mxu1  ;;  %v4835_v22 = vld [vmem:[%s5411_s9 + $0x144] sm:$0xf0]  ;;  %v3393_v61 = vld [vmem:[%s5411_s9 + $0x100] sm:$0xf] }
 0x106   : > { %2925 = vmatpush.bf16.msrb.mxu3 %v4758_v2  ;;  %v5981_v60 = vadd.f32 %v2673_v56, %v2661_v55  ;;  %v5041_v2 = vld [vmem:[%s5411_s9 + $0x7bc] sm:$0xf]  ;;  %v4883_v53 = vld [vmem:[%s5411_s9 + $0x2c4] sm:$0xf0]  ;;  %v3993_v55 = vld [vmem:[%s5411_s9 + $0x5b0] sm:$0xf]  ;;  %v3418_v57 = vor.u32 %v4835_v22, %v3417_v50 }
 0x107   : > { %2887 = vmatpush.bf16.msrb.mxu0 %v4158_v9  ;;  %v5137_v9 = vld [vmem:[%s5411_s9 + $0xabc] sm:$0xf]  ;;  %v4254_v17 = vor.u32 %v5041_v2, %v4251_v5  ;;  %v4979_v56 = vld [vmem:[%s5411_s9 + $0x5c4] sm:$0xf0]  ;;  %v3610_v58 = vor.u32 %v4883_v53, %v3609_v52  ;;  %v3777_v2 = vld [vmem:[%s5411_s9 + $0x400] sm:$0xf] }
 0x108   : > { %2900 = vmatpush.bf16.msrb.mxu1 %v4350_v11  ;;  %v4635_v11 = vld [vmem:[%s5411_s9 + $0xad0] sm:$0xf0]  ;;  %v4925_v3 = vld [vmem:[%s5411_s9 + $0x414] sm:$0xf0]  ;;  %v4859_v50 = vld [vmem:[%s5411_s9 + $0x204] sm:$0xf0] }
 0x109   : > { %2913 = vmatpush.bf16.msrb.mxu2 %v4542_v12  ;;  %v4062_v12 = vor.u32 %v4993_v0, %v4059_v1  ;;  %v4638_v28 = vor.u32 %v5137_v9, %v4635_v11  ;;  %v3994_v0 = vor.u32 %v4979_v56, %v3993_v55  ;;  %v4877_v1 = vld [vmem:[%s5411_s9 + $0x294] sm:$0xf0]  ;;  %v3369_v9 = vld [vmem:[%s5411_s9 + $0xd0] sm:$0xf]  ;;  %v4823_v11 = vld [vmem:[%s5411_s9 + $0xe4] sm:$0xf0] }
 0x10a   : > { %2926 = vmatpush.bf16.msrb.mxu3 %v4734_v18  ;;  %v4446_v18 = vor.u32 %v5089_v7, %v4443_v31  ;;  %v4973_v5 = vld [vmem:[%s5411_s9 + $0x594] sm:$0xf0]  ;;  %v3778_v31 = vor.u32 %v4925_v3, %v3777_v2  ;;  %v3705_v22 = vld [vmem:[%s5411_s9 + $0x370] sm:$0xf]  ;;  %v4907_v52 = vld [vmem:[%s5411_s9 + $0x384] sm:$0xf0] }
 0x10b   : > { %2888 = vmatpush.bf16.msrb.mxu0 %v4134_v30  ;;  %v2662_v27 = vpop.f32.mrf.mxu2  ;;  %v4419_v30 = vld [vmem:[%s5411_s9 + $0x920] sm:$0xf0]  ;;  %v4955_v53 = vld [vmem:[%s5411_s9 + $0x504] sm:$0xf0]  ;;  %v3297_v55 = vld [vmem:[%s5411_s9 + $0x40] sm:$0xf] }
 0x10c   : > { %2901 = vmatpush.bf16.msrb.mxu1 %v4326_v34  ;;  %v4611_v34 = vld [vmem:[%s5411_s9 + $0xaa0] sm:$0xf0]  ;;  %v4422_v45 = vor.u32 %v5083_v25, %v4419_v30  ;;  %v3754_v25 = vor.u32 %v4919_v14, %v3753_v13  ;;  %v3345_v30 = vld [vmem:[%s5411_s9 + $0xa0] sm:$0xf]  ;;  %v4901_v3 = vld [vmem:[%s5411_s9 + $0x354] sm:$0xf0] }
 0x10d   : > { %2914 = vmatpush.bf16.msrb.mxu2 %v4518_v35  ;;  %v2675_v35 = vpop.f32.mrf.mxu3  ;;  %v3681_v2 = vld [vmem:[%s5411_s9 + $0x340] sm:$0xf] }
 0x10e   : > { %2927 = vmatpush.bf16.msrb.mxu3 %v4710_v41  ;;  %v4889_v41 = vld [vmem:[%s5411_s9 + $0x2f4] sm:$0xf0] }
 0x10f   : > { %2889 = vmatpush.bf16.msrb.mxu0 %v4110_v20  ;;  %v4614_v20 = vor.u32 %v5131_v33, %v4611_v34  ;;  %v4817_v33 = vld [vmem:[%s5411_s9 + $0xb4] sm:$0xf0]  ;;  %v3537_v34 = vld [vmem:[%s5411_s9 + $0x220] sm:$0xf] }
 0x110   : > { %2902 = vmatpush.bf16.msrb.mxu1 %v4302_v48  ;;  %v3442_v48 = vor.u32 %v4841_v37, %v3441_v36  ;;  %v4865_v36 = vld [vmem:[%s5411_s9 + $0x234] sm:$0xf0]  ;;  %v3729_v37 = vld [vmem:[%s5411_s9 + $0x3a0] sm:$0xf] }
 0x111   : > { %2915 = vmatpush.bf16.msrb.mxu2 %v4494_v49  ;;  %v3634_v49 = vor.u32 %v4889_v41, %v3633_v39  ;;  %v4913_v39 = vld [vmem:[%s5411_s9 + $0x3b4] sm:$0xf0]  ;;  %v3921_v41 = vld [vmem:[%s5411_s9 + $0x520] sm:$0xf]  ;;  %v3538_v43 = vor.u32 %v4865_v36, %v3537_v34 }
 0x112   : > { %2928 = vmatpush.bf16.msrb.mxu3 %v4686_v26  ;;  %v4018_v26 = vor.u32 %v4985_v47, %v4017_v46  ;;  %v3321_v46 = vld [vmem:[%s5411_s9 + $0x70] sm:$0xf]  ;;  %v4811_v47 = vld [vmem:[%s5411_s9 + $0x84] sm:$0xf0]  ;;  %v5129_v34 = vld [vmem:[%s5411_s9 + $0xa74] sm:$0xf0] }
 0x113   : > { %2890 = vmatpush.bf16.msrb.mxu0 %v4086_v59  ;;  %v3802_v59 = vor.u32 %v4931_v54, %v3801_v51  ;;  %v3322_v54 = vor.u32 %v4811_v47, %v3321_v46  ;;  %v5075_v47 = vld [vmem:[%s5411_s9 + $0x8c4] sm:$0xf0] }
 0x114   : > { %2903 = vmatpush.bf16.msrb.mxu1 %v4278_v62  ;;  %v4829_v62 = vld [vmem:[%s5411_s9 + $0x114] sm:$0xf0] }
 0x115   : > { %2916 = vmatpush.bf16.msrb.mxu2 %v4470_v63  ;;  %v3585_v63 = vld [vmem:[%s5411_s9 + $0x280] sm:$0xf] }
 0x116   : > { %2929 = vmatpush.bf16.msrb.mxu3 %v4662_v29  ;;  %v3969_v29 = vld [vmem:[%s5411_s9 + $0x580] sm:$0xf]  ;;  %v3586_v7 = vor.u32 %v4877_v1, %v3585_v63 }
 0x117   : > { %2891 = vmatpush.bf16.msrb.mxu0 %v4062_v12  ;;  %v4871_v12 = vld [vmem:[%s5411_s9 + $0x264] sm:$0xf0] }
 0x118   : > { %2904 = vmatpush.bf16.msrb.mxu1 %v4254_v17  ;;  %v3945_v17 = vld [vmem:[%s5411_s9 + $0x550] sm:$0xf] }
 0x119   : > { %2917 = vmatpush.bf16.msrb.mxu2 %v4446_v18  ;;  %v4967_v18 = vld [vmem:[%s5411_s9 + $0x564] sm:$0xf0] }
 0x11a   : > { %2930 = vmatpush.bf16.msrb.mxu3 %v4638_v28  ;;  %v3946_v35 = vor.u32 %v4967_v18, %v3945_v17  ;;  %v4895_v17 = vld [vmem:[%s5411_s9 + $0x324] sm:$0xf0]  ;;  %v3849_v18 = vld [vmem:[%s5411_s9 + $0x490] sm:$0xf] }
 0x11b   : > { %2892 = vmatpush.bf16.msrb.mxu0 %v4038_v40  ;;  %v2686_v19 = vpop.f32.mrf.mxu0 }
 0x11c   : > { %2905 = vmatpush.bf16.msrb.mxu1 %v4230_v44  ;;  %v2687_v27 = vadd.f32 %v2686_v19, %v5981_v60  ;;  %v2699_v28 = vpop.f32.mrf.mxu1  ;;  %v3346_v60 = vor.u32 %v4817_v33, %v3345_v30  ;;  %v3730_v44 = vor.u32 %v4913_v39, %v3729_v37  ;;  %v5081_v30 = vld [vmem:[%s5411_s9 + $0x8f4] sm:$0xf0]  ;;  %v4593_v33 = vld [vmem:[%s5411_s9 + $0xa60] sm:$0xf] }
 0x11d   : > { %2918 = vmatpush.bf16.msrb.mxu2 %v4422_v45  ;;  %v4785_v37 = vld [vmem:[%s5411_s9 + $0xbe0] sm:$0xf]  ;;  %v5177_v39 = vld [vmem:[%s5411_s9 + $0xbf4] sm:$0xf0] }
 0x11e   : > { %2931 = vmatpush.bf16.msrb.mxu3 %v4614_v20  ;;  %2893 = vmatmul.bf16.vlgmr.msrb.gmra.mxu0 %v5867_v15  ;;  %v3561_v15 = vld [vmem:[%s5411_s9 + $0x250] sm:$0xf]  ;;  %v2700_v40 = vadd.f32 %v2699_v28, %v2687_v27  ;;  %v4401_v27 = vld [vmem:[%s5411_s9 + $0x8e0] sm:$0xf]  ;;  %v4786_v46 = vor.u32 %v5177_v39, %v4785_v37  ;;  %v5099_v39 = vld [vmem:[%s5411_s9 + $0x984] sm:$0xf0] }
 0x11f   : > { %2937 = vmatpush.bf16.msra.mxu0 %v3442_v48  ;;  %2906 = vmatmul.bf16.vlgmr.msrb.gmra.mxu1 %v5875_v23  ;;  %v3370_v23 = vor.u32 %v4823_v11, %v3369_v9  ;;  %v3562_v24 = vor.u32 %v4871_v12, %v3561_v15  ;;  %v3513_v20 = vld [vmem:[%s5411_s9 + $0x1f0] sm:$0xf]  ;;  %v3922_v48 = vor.u32 %v4961_v42, %v3921_v41  ;;  %v4799_v9 = vld [vmem:[%s5411_s9 + $0x24] sm:$0xf0] }
 0x120   : > { %2950 = vmatpush.bf16.msra.mxu1 %v3634_v49  ;;  %2919 = vmatmul.bf16.vlgmr.msrb.gmra.mxu2 %v5861_v38  ;;  %v3394_v38 = vor.u32 %v4829_v62, %v3393_v61  ;;  %v3489_v61 = vld [vmem:[%s5411_s9 + $0x1c0] sm:$0xf]  ;;  %v4853_v62 = vld [vmem:[%s5411_s9 + $0x1d4] sm:$0xf0]  ;;  %v3682_v15 = vor.u32 %v4901_v3, %v3681_v2  ;;  %v4847_v12 = vld [vmem:[%s5411_s9 + $0x1a4] sm:$0xf0]  ;;  %v4402_v42 = vor.u32 %v5081_v30, %v4401_v27 }
 0x121   : > { %2963 = vmatpush.bf16.msra.mxu2 %v3826_v21  ;;  %2932 = vmatmul.bf16.vlgmr.msrb.gmra.mxu3 %v5870_v16  ;;  %v3970_v16 = vor.u32 %v4973_v5, %v3969_v29  ;;  %v3873_v29 = vld [vmem:[%s5411_s9 + $0x4c0] sm:$0xf]  ;;  %v4949_v5 = vld [vmem:[%s5411_s9 + $0x4d4] sm:$0xf0]  ;;  %v3490_v11 = vor.u32 %v4853_v62, %v3489_v61  ;;  %v5063_v2 = vld [vmem:[%s5411_s9 + $0x864] sm:$0xf0] }
 0x122   : > { %2976 = vmatpush.bf16.msra.mxu3 %v4018_v26  ;;  %v3897_v26 = vld [vmem:[%s5411_s9 + $0x4f0] sm:$0xf]  ;;  %v3874_v14 = vor.u32 %v4949_v5, %v3873_v29  ;;  %v5111_v3 = vld [vmem:[%s5411_s9 + $0x9e4] sm:$0xf0] }
 0x123   : > { %2938 = vmatpush.bf16.msra.mxu0 %v3418_v57  ;;  %v2712_v45 = vpop.f32.mrf.mxu2  ;;  %v2688_v56 = vpop.f32.mrf.mxu0  ;;  %v3514_v57 = vor.u32 %v4859_v50, %v3513_v20  ;;  %v3898_v1 = vor.u32 %v4955_v53, %v3897_v26  ;;  %v4569_v20 = vld [vmem:[%s5411_s9 + $0xa30] sm:$0xf]  ;;  %v4161_v26 = vld [vmem:[%s5411_s9 + $0x700] sm:$0xf]  ;;  %v5021_v53 = vld [vmem:[%s5411_s9 + $0x714] sm:$0xf0] }
 0x124   : > { %2951 = vmatpush.bf16.msra.mxu1 %v3610_v58  ;;  %v2713_v49 = vadd.f32 %v2712_v45, %v2700_v40  ;;  %v2725_v21 = vpop.f32.mrf.mxu3  ;;  %v3706_v58 = vor.u32 %v4907_v52, %v3705_v22  ;;  %v2701_v63 = vpop.f32.mrf.mxu1  ;;  %v4377_v45 = vld [vmem:[%s5411_s9 + $0x8b0] sm:$0xf]  ;;  %v4545_v56 = vld [vmem:[%s5411_s9 + $0xa00] sm:$0xf]  ;;  %v4162_v61 = vor.u32 %v5021_v53, %v4161_v26  ;;  %v5159_v5 = vld [vmem:[%s5411_s9 + $0xb64] sm:$0xf0] }
 0x125   : > { %2964 = vmatpush.bf16.msra.mxu2 %v3802_v59  ;;  %v4805_v59 = vld [vmem:[%s5411_s9 + $0x54] sm:$0xf0]  ;;  %v4378_v22 = vor.u32 %v5075_v47, %v4377_v45  ;;  %v4713_v29 = vld [vmem:[%s5411_s9 + $0xb50] sm:$0xf]  ;;  %v5003_v30 = vld [vmem:[%s5411_s9 + $0x684] sm:$0xf0] }
 0x126   : > { %2977 = vmatpush.bf16.msra.mxu3 %v3994_v0  ;;  %v2726_v51 = vadd.f32 %v2725_v21, %v2713_v49  ;;  %v4761_v49 = vld [vmem:[%s5411_s9 + $0xbb0] sm:$0xf]  ;;  %v5171_v21 = vld [vmem:[%s5411_s9 + $0xbc4] sm:$0xf0]  ;;  %v5093_v26 = vld [vmem:[%s5411_s9 + $0x954] sm:$0xf0] }
 0x127   : > { %2939 = vmatpush.bf16.msra.mxu0 %v3394_v38  ;;  %v4473_v37 = vld [vmem:[%s5411_s9 + $0x970] sm:$0xf]  ;;  %v4641_v53 = vld [vmem:[%s5411_s9 + $0xac0] sm:$0xf] }
 0x128   : > { %2952 = vmatpush.bf16.msra.mxu1 %v3586_v7  ;;  %v3151_v0 = vrot.slane %v2726_v51, 6  ;;  %v3298_v7 = vor.u32 %v4805_v59, %v3297_v55  ;;  %v4353_v51 = vld [vmem:[%s5411_s9 + $0x880] sm:$0xf]  ;;  %v5069_v55 = vld [vmem:[%s5411_s9 + $0x894] sm:$0xf0]  ;;  %v4474_v47 = vor.u32 %v5099_v39, %v4473_v37 }
 0x129   : > { %2965 = vmatpush.bf16.msra.mxu2 %v3778_v31  ;;  %v3273_v31 = vld [vmem:[%s5411_s9 + $0x10] sm:$0xf]  ;;  %v5165_v59 = vld [vmem:[%s5411_s9 + $0xb94] sm:$0xf0]  ;;  %v4354_v62 = vor.u32 %v5069_v55, %v4353_v51  ;;  %v3395_v37 = vld [vmem:[%s5411_s9 + $0x118] sm:$0xf0] }
 0x12a   : > { %2978 = vmatpush.bf16.msra.mxu3 %v3970_v16  ;;  %v6062_v38 = vsel %vm3155_vm0, %v5903_v4, %v3151_v0  ;;  %v3465_v16 = vld [vmem:[%s5411_s9 + $0x190] sm:$0xf]  ;;  %v3274_v28 = vor.u32 %v4799_v9, %v3273_v31  ;;  %v5015_v0 = vld [vmem:[%s5411_s9 + $0x6e4] sm:$0xf0]  ;;  %v5141_v51 = vld [vmem:[%s5411_s9 + $0xad4] sm:$0xf0] }
 0x12b   : > { %2940 = vmatpush.bf16.msra.mxu0 %v3370_v23  ;;  %v3657_v4 = vld [vmem:[%s5411_s9 + $0x310] sm:$0xf]  ;;  %v2714_v13 = vpop.f32.mrf.mxu2  ;;  %v4943_v23 = vld [vmem:[%s5411_s9 + $0x4a4] sm:$0xf0]  ;;  %v4874_v39 = vld [vmem:[%s5411_s9 + $0x284] sm:$0xf] }
 0x12c   : > { %2953 = vmatpush.bf16.msra.mxu1 %v3562_v24  ;;  %v2727_v19 = vpop.f32.mrf.mxu3  ;;  %v4209_v24 = vld [vmem:[%s5411_s9 + $0x760] sm:$0xf]  ;;  %v3658_v36 = vor.u32 %v4895_v17, %v3657_v4  ;;  %v3850_v40 = vor.u32 %v4943_v23, %v3849_v18  ;;  %v4714_v4 = vor.u32 %v5159_v5, %v4713_v29  ;;  %v5057_v13 = vld [vmem:[%s5411_s9 + $0x834] sm:$0xf0]  ;;  %v4041_v55 = vld [vmem:[%s5411_s9 + $0x610] sm:$0xf] }
 0x12d   : > { %2966 = vmatpush.bf16.msra.mxu2 %v3754_v25  ;;  %v5033_v25 = vld [vmem:[%s5411_s9 + $0x774] sm:$0xf0]  ;;  %v4689_v23 = vld [vmem:[%s5411_s9 + $0xb20] sm:$0xf]  ;;  %v4886_v29 = vld [vmem:[%s5411_s9 + $0x2e4] sm:$0xf] }
 0x12e   : > { %2979 = vmatpush.bf16.msra.mxu3 %v3946_v35  ;;  %v3466_v35 = vor.u32 %v4847_v12, %v3465_v16  ;;  %v4210_v41 = vor.u32 %v5033_v25, %v4209_v24  ;;  %v4305_v16 = vld [vmem:[%s5411_s9 + $0x820] sm:$0xf]  ;;  %v5105_v17 = vld [vmem:[%s5411_s9 + $0x9b4] sm:$0xf0] }
 0x12f   : > { %2941 = vmatpush.bf16.msra.mxu0 %v3346_v60  ;;  %v4594_v60 = vor.u32 %v5129_v34, %v4593_v33  ;;  %v5153_v19 = vld [vmem:[%s5411_s9 + $0xb34] sm:$0xf0]  ;;  %v4306_v25 = vor.u32 %v5057_v13, %v4305_v16  ;;  %v4281_v33 = vld [vmem:[%s5411_s9 + $0x7f0] sm:$0xf]  ;;  %v4019_v16 = vld [vmem:[%s5411_s9 + $0x5f8] sm:$0xf0] }
 0x130   : > { %2954 = vmatpush.bf16.msra.mxu1 %v3538_v43  ;;  %v4185_v43 = vld [vmem:[%s5411_s9 + $0x730] sm:$0xf] }
 0x131   : > { %2967 = vmatpush.bf16.msra.mxu2 %v3730_v44  ;;  %v5027_v44 = vld [vmem:[%s5411_s9 + $0x744] sm:$0xf0] }
 0x132   : > { %2980 = vmatpush.bf16.msra.mxu3 %v3922_v48  ;;  %v5123_v48 = vld [vmem:[%s5411_s9 + $0xa44] sm:$0xf0]  ;;  %v4186_v50 = vor.u32 %v5027_v44, %v4185_v43 }
 0x133   : > { %2942 = vmatpush.bf16.msra.mxu0 %v3322_v54  ;;  %v4570_v52 = vor.u32 %v5123_v48, %v4569_v20  ;;  %v4762_v54 = vor.u32 %v5171_v21, %v4761_v49  ;;  %v4065_v20 = vld [vmem:[%s5411_s9 + $0x640] sm:$0xf]  ;;  %v4997_v48 = vld [vmem:[%s5411_s9 + $0x654] sm:$0xf0] }
 0x134   : > { %2955 = vmatpush.bf16.msra.mxu1 %v3514_v57  ;;  %v5117_v57 = vld [vmem:[%s5411_s9 + $0xa14] sm:$0xf0]  ;;  %v4257_v49 = vld [vmem:[%s5411_s9 + $0x7c0] sm:$0xf] }
 0x135   : > { %2968 = vmatpush.bf16.msra.mxu2 %v3706_v58  ;;  %v4737_v58 = vld [vmem:[%s5411_s9 + $0xb80] sm:$0xf]  ;;  %v4546_v63 = vor.u32 %v5117_v57, %v4545_v56  ;;  %v4991_v56 = vld [vmem:[%s5411_s9 + $0x624] sm:$0xf0] }
 0x136   : > { %2981 = vmatpush.bf16.msra.mxu3 %v3898_v1  ;;  %v4329_v1 = vld [vmem:[%s5411_s9 + $0x850] sm:$0xf]  ;;  %v4042_v5 = vor.u32 %v4991_v56, %v4041_v55  ;;  %v3755_v55 = vld [vmem:[%s5411_s9 + $0x3e8] sm:$0xf0]  ;;  %v4964_v56 = vld [vmem:[%s5411_s9 + $0x554] sm:$0xf] }
 0x137   : > { %2943 = vmatpush.bf16.msra.mxu0 %v3298_v7  ;;  %v4330_v31 = vor.u32 %v5063_v2, %v4329_v1  ;;  %v4617_v1 = vld [vmem:[%s5411_s9 + $0xa90] sm:$0xf] }
 0x138   : > { %2956 = vmatpush.bf16.msra.mxu1 %v3490_v11  ;;  %v4113_v11 = vld [vmem:[%s5411_s9 + $0x6a0] sm:$0xf] }
 0x139   : > { %2969 = vmatpush.bf16.msra.mxu2 %v3682_v15  ;;  %v5009_v15 = vld [vmem:[%s5411_s9 + $0x6b4] sm:$0xf0] }
 0x13a   : > { %2982 = vmatpush.bf16.msra.mxu3 %v3874_v14  ;;  %v4497_v14 = vld [vmem:[%s5411_s9 + $0x9a0] sm:$0xf]  ;;  %v4114_v24 = vor.u32 %v5009_v15, %v4113_v11  ;;  %v4982_v15 = vld [vmem:[%s5411_s9 + $0x5e4] sm:$0xf] }
 0x13b   : > { %2944 = vmatpush.bf16.msra.mxu0 %v3274_v28  ;;  %v2738_v7 = vpop.f32.mrf.mxu0  ;;  %v4498_v27 = vor.u32 %v5105_v17, %v4497_v14  ;;  %v4089_v28 = vld [vmem:[%s5411_s9 + $0x670] sm:$0xf]  ;;  %v4832_v17 = vld [vmem:[%s5411_s9 + $0x134] sm:$0xf] }
 0x13c   : > { %2957 = vmatpush.bf16.msra.mxu1 %v3466_v35  ;;  %v2751_v12 = vpop.f32.mrf.mxu1  ;;  %v4690_v35 = vor.u32 %v5153_v19, %v4689_v23  ;;  %v4090_v43 = vor.u32 %v5003_v30, %v4089_v28  ;;  %v4880_v23 = vld [vmem:[%s5411_s9 + $0x2b4] sm:$0xf]  ;;  %v4022_v19 = vor.u32 %v4982_v15, %v4019_v16  ;;  %v3995_v30 = vld [vmem:[%s5411_s9 + $0x5c8] sm:$0xf0] }
 0x13d   : > { %2970 = vmatpush.bf16.msra.mxu2 %v3658_v36  ;;  %v2752_v18 = vadd.f32 %v2751_v12, %v2738_v7  ;;  %v5051_v36 = vld [vmem:[%s5411_s9 + $0x804] sm:$0xf0]  ;;  %v4934_v7 = vld [vmem:[%s5411_s9 + $0x464] sm:$0xf]  ;;  %v4976_v28 = vld [vmem:[%s5411_s9 + $0x5b4] sm:$0xf] }
 0x13e   : > { %2983 = vmatpush.bf16.msra.mxu3 %v3850_v40  ;;  %2945 = vmatmul.bf16.vlgmr.msra.gmra.mxu0 %v5948_v8  ;;  %v4738_v8 = vor.u32 %v5165_v59, %v4737_v58  ;;  %v4233_v59 = vld [vmem:[%s5411_s9 + $0x790] sm:$0xf]  ;;  %v4856_v15 = vld [vmem:[%s5411_s9 + $0x1f4] sm:$0xf] }
 0x13f   : > { %2989 = vmatpush.bf16.msrb.mxu0 %v4210_v41  ;;  %2958 = vmatmul.bf16.vlgmr.msra.gmra.mxu1 %v5954_v10 }
 0x140   : > { %3002 = vmatpush.bf16.msrb.mxu1 %v4402_v42  ;;  %2971 = vmatmul.bf16.vlgmr.msra.gmra.mxu2 %v5943_v6  ;;  %v4137_v6 = vld [vmem:[%s5411_s9 + $0x6d0] sm:$0xf] }
 0x141   : > { %3015 = vmatpush.bf16.msrb.mxu2 %v4594_v60  ;;  %2984 = vmatmul.bf16.vlgmr.msra.gmra.mxu3 %v5951_v32  ;;  %v4521_v32 = vld [vmem:[%s5411_s9 + $0x9d0] sm:$0xf]  ;;  %v4138_v10 = vor.u32 %v5015_v0, %v4137_v6  ;;  %v5147_v60 = vld [vmem:[%s5411_s9 + $0xb04] sm:$0xf0]  ;;  %v4642_v6 = vor.u32 %v5141_v51, %v4641_v53  ;;  %v3563_v51 = vld [vmem:[%s5411_s9 + $0x268] sm:$0xf0] }
 0x142   : > { %3028 = vmatpush.bf16.msrb.mxu3 %v4786_v46  ;;  %v4522_v9 = vor.u32 %v5111_v3, %v4521_v32  ;;  %v4665_v42 = vld [vmem:[%s5411_s9 + $0xaf0] sm:$0xf]  ;;  %v4282_v46 = vor.u32 %v5051_v36, %v4281_v33  ;;  %v5087_v0 = vld [vmem:[%s5411_s9 + $0x924] sm:$0xf0]  ;;  %v4838_v32 = vld [vmem:[%s5411_s9 + $0x164] sm:$0xf] }
 0x143   : > { %2990 = vmatpush.bf16.msrb.mxu0 %v4186_v50  ;;  %v2764_v34 = vpop.f32.mrf.mxu2  ;;  %v2740_v45 = vpop.f32.mrf.mxu0  ;;  %v4666_v50 = vor.u32 %v5147_v60, %v4665_v42  ;;  %v3443_v3 = vld [vmem:[%s5411_s9 + $0x178] sm:$0xf0]  ;;  %v4826_v36 = vld [vmem:[%s5411_s9 + $0x104] sm:$0xf] }
 0x144   : > { %3003 = vmatpush.bf16.msrb.mxu1 %v4378_v22  ;;  %v2765_v40 = vadd.f32 %v2764_v34, %v2752_v18  ;;  %v2777_v41 = vpop.f32.mrf.mxu3  ;;  %v2753_v21 = vpop.f32.mrf.mxu1  ;;  %v5045_v22 = vld [vmem:[%s5411_s9 + $0x7d4] sm:$0xf0]  ;;  %v3419_v18 = vld [vmem:[%s5411_s9 + $0x148] sm:$0xf0]  ;;  %v3587_v42 = vld [vmem:[%s5411_s9 + $0x298] sm:$0xf0] }
 0x145   : > { %3016 = vmatpush.bf16.msrb.mxu2 %v4570_v52  ;;  %v4449_v52 = vld [vmem:[%s5411_s9 + $0x940] sm:$0xf]  ;;  %v4258_v57 = vor.u32 %v5045_v22, %v4257_v49  ;;  %v3422_v33 = vor.u32 %v4832_v17, %v3419_v18  ;;  %v4922_v60 = vld [vmem:[%s5411_s9 + $0x404] sm:$0xf]  ;;  %v3590_v21 = vor.u32 %v4874_v39, %v3587_v42  ;;  %v4820_v22 = vld [vmem:[%s5411_s9 + $0xd4] sm:$0xf] }
 0x146   : > { %3029 = vmatpush.bf16.msrb.mxu3 %v4762_v54  ;;  %v6124_v44 = vadd.f32 %v2777_v41, %v2765_v40  ;;  %v4066_v54 = vor.u32 %v4997_v48, %v4065_v20  ;;  %v4450_v58 = vor.u32 %v5093_v26, %v4449_v52  ;;  %v3998_v40 = vor.u32 %v4976_v28, %v3995_v30  ;;  %v6161_v41 = vld [vmem:[#allocation1 + $0x36] sm:$0xff]  ;;  %v6167_v45 = vld [vmem:[#allocation1 + $0x24] sm:$0xff]  ;;  %v6175_v49 = vld [vmem:[#allocation1 + $0x2d] sm:$0xff] }
 0x147   : > { %2991 = vmatpush.bf16.msrb.mxu0 %v4162_v61  ;;  %v5039_v61 = vld [vmem:[%s5411_s9 + $0x7a4] sm:$0xf0]  ;;  %v3971_v20 = vld [vmem:[%s5411_s9 + $0x598] sm:$0xf0]  ;;  %v3398_v48 = vor.u32 %v4826_v36, %v3395_v37  ;;  %v3371_v52 = vld [vmem:[%s5411_s9 + $0xe8] sm:$0xf0] }
 0x148   : > { %3004 = vmatpush.bf16.msrb.mxu1 %v4354_v62  ;;  %v4425_v62 = vld [vmem:[%s5411_s9 + $0x910] sm:$0xf]  ;;  %v4868_v26 = vld [vmem:[%s5411_s9 + $0x254] sm:$0xf]  ;;  %v4802_v28 = vld [vmem:[%s5411_s9 + $0x44] sm:$0xf] }
 0x149   : > { %3017 = vmatpush.bf16.msrb.mxu2 %v4546_v63  ;;  %v4426_v11 = vor.u32 %v5087_v0, %v4425_v62  ;;  %v4862_v0 = vld [vmem:[%s5411_s9 + $0x224] sm:$0xf]  ;;  %v4952_v18 = vld [vmem:[%s5411_s9 + $0x4f4] sm:$0xf]  ;;  %v3299_v30 = vld [vmem:[%s5411_s9 + $0x58] sm:$0xf0] }
 0x14a   : > { %3030 = vmatpush.bf16.msrb.mxu3 %v4738_v8  ;;  %v5135_v8 = vld [vmem:[%s5411_s9 + $0xaa4] sm:$0xf0]  ;;  %v3491_v36 = vld [vmem:[%s5411_s9 + $0x1d8] sm:$0xf0]  ;;  %v4898_v37 = vld [vmem:[%s5411_s9 + $0x344] sm:$0xf] }
 0x14b   : > { %2992 = vmatpush.bf16.msrb.mxu0 %v4138_v10  ;;  %v2766_v63 = vpop.f32.mrf.mxu2  ;;  %v3635_v10 = vld [vmem:[%s5411_s9 + $0x2f8] sm:$0xf0]  ;;  %v4618_v12 = vor.u32 %v5135_v8, %v4617_v1 }
 0x14c   : > { %3005 = vmatpush.bf16.msrb.mxu1 %v4330_v31  ;;  %v2779_v2 = vpop.f32.mrf.mxu3  ;;  %v3827_v31 = vld [vmem:[%s5411_s9 + $0x478] sm:$0xf0]  ;;  %v3638_v13 = vor.u32 %v4886_v29, %v3635_v10  ;;  %v4814_v63 = vld [vmem:[%s5411_s9 + $0xa4] sm:$0xf] }
 0x14d   : > { %3018 = vmatpush.bf16.msrb.mxu2 %v4522_v9  ;;  %v4234_v9 = vor.u32 %v5039_v61, %v4233_v59  ;;  %v3830_v14 = vor.u32 %v4934_v7, %v3827_v31  ;;  %v3566_v61 = vor.u32 %v4868_v26, %v3563_v51  ;;  %v3539_v2 = vld [vmem:[%s5411_s9 + $0x238] sm:$0xf0]  ;;  %v4958_v29 = vld [vmem:[%s5411_s9 + $0x524] sm:$0xf]  ;;  %v4940_v51 = vld [vmem:[%s5411_s9 + $0x494] sm:$0xf] }
 0x14e   : > { %3031 = vmatpush.bf16.msrb.mxu3 %v4714_v4  ;;  %v3446_v4 = vor.u32 %v4838_v32, %v3443_v3  ;;  %v4910_v32 = vld [vmem:[%s5411_s9 + $0x3a4] sm:$0xf]  ;;  %v3731_v3 = vld [vmem:[%s5411_s9 + $0x3b8] sm:$0xf0]  ;;  %v3542_v7 = vor.u32 %v4862_v0, %v3539_v2 }
 0x14f   : > { %2993 = vmatpush.bf16.msrb.mxu0 %v4114_v24  ;;  %v3611_v24 = vld [vmem:[%s5411_s9 + $0x2c8] sm:$0xf0]  ;;  %v3734_v31 = vor.u32 %v4910_v32, %v3731_v3  ;;  %v3683_v39 = vld [vmem:[%s5411_s9 + $0x358] sm:$0xf0]  ;;  %v5174_v2 = vld [vmem:[%s5411_s9 + $0xbe4] sm:$0xf] }
 0x150   : > { %3006 = vmatpush.bf16.msrb.mxu1 %v4306_v25  ;;  %v4928_v25 = vld [vmem:[%s5411_s9 + $0x434] sm:$0xf]  ;;  %v3614_v34 = vor.u32 %v4880_v23, %v3611_v24  ;;  %v3899_v23 = vld [vmem:[%s5411_s9 + $0x508] sm:$0xf0]  ;;  %v3875_v42 = vld [vmem:[%s5411_s9 + $0x4d8] sm:$0xf0] }
 0x151   : > { %3019 = vmatpush.bf16.msrb.mxu2 %v4498_v27  ;;  %v3803_v27 = vld [vmem:[%s5411_s9 + $0x448] sm:$0xf0]  ;;  %v4787_v32 = vld [vmem:[%s5411_s9 + $0xbf8] sm:$0xf0] }
 0x152   : > { %3032 = vmatpush.bf16.msrb.mxu3 %v4690_v35  ;;  %v3806_v35 = vor.u32 %v4928_v25, %v3803_v27 }
 0x153   : > { %2994 = vmatpush.bf16.msrb.mxu0 %v4090_v43  ;;  %v3779_v43 = vld [vmem:[%s5411_s9 + $0x418] sm:$0xf0] }
 0x154   : > { %3007 = vmatpush.bf16.msrb.mxu1 %v4282_v46  ;;  %v6170_v46 = vld [vmem:[#allocation1 + $0x3f] sm:$0xff] }
 0x155   : > { %3020 = vmatpush.bf16.msrb.mxu2 %v4474_v47  ;;  %v4970_v47 = vld [vmem:[%s5411_s9 + $0x584] sm:$0xf] }
 0x156   : > { %3033 = vmatpush.bf16.msrb.mxu3 %v4666_v50  ;;  %v3782_v50 = vor.u32 %v4922_v60, %v3779_v43  ;;  %v3974_v53 = vor.u32 %v4970_v47, %v3971_v20  ;;  %v3302_v60 = vor.u32 %v4802_v28, %v3299_v30  ;;  %v4796_v43 = vld [vmem:[%s5411_s9 + $0x14] sm:$0xf]  ;;  %v3275_v47 = vld [vmem:[%s5411_s9 + $0x28] sm:$0xf0] }
 0x157   : > { %2995 = vmatpush.bf16.msrb.mxu0 %v4066_v54  ;;  %v4916_v54 = vld [vmem:[%s5411_s9 + $0x3d4] sm:$0xf]  ;;  %v5251_v30 = vld [vmem:[#allocation1 + $0x12] sm:$0xff] }
 0x158   : > { %3008 = vmatpush.bf16.msrb.mxu1 %v4258_v57  ;;  %v3947_v57 = vld [vmem:[%s5411_s9 + $0x568] sm:$0xf0]  ;;  %v3758_v62 = vor.u32 %v4916_v54, %v3755_v55 }
 0x159   : > { %3021 = vmatpush.bf16.msrb.mxu2 %v4450_v58  ;;  %v3374_v58 = vor.u32 %v4820_v22, %v3371_v52  ;;  %v3950_v8 = vor.u32 %v4964_v56, %v3947_v57  ;;  %v4892_v22 = vld [vmem:[%s5411_s9 + $0x314] sm:$0xf]  ;;  %v3851_v54 = vld [vmem:[%s5411_s9 + $0x4a8] sm:$0xf0]  ;;  %v5030_v56 = vld [vmem:[%s5411_s9 + $0x764] sm:$0xf] }
 0x15a   : > { %3034 = vmatpush.bf16.msrb.mxu3 %v4642_v6  ;;  %v3347_v6 = vld [vmem:[%s5411_s9 + $0xb8] sm:$0xf0]  ;;  %v3854_v3 = vor.u32 %v4940_v51, %v3851_v54  ;;  %v4715_v51 = vld [vmem:[%s5411_s9 + $0xb68] sm:$0xf0] }
 0x15b   : > { %2996 = vmatpush.bf16.msrb.mxu0 %v4042_v5  ;;  %v6186_v59 = vpop.f32.mrf.mxu0  ;;  %v3923_v5 = vld [vmem:[%s5411_s9 + $0x538] sm:$0xf0]  ;;  %v3350_v10 = vor.u32 %v4814_v63, %v3347_v6  ;;  %v5126_v63 = vld [vmem:[%s5411_s9 + $0xa64] sm:$0xf] }
 0x15c   : > { %3009 = vmatpush.bf16.msrb.mxu1 %v4234_v9  ;;  %v6191_v1 = vpop.f32.mrf.mxu1  ;;  %v4808_v9 = vld [vmem:[%s5411_s9 + $0x74] sm:$0xf]  ;;  %v4211_v57 = vld [vmem:[%s5411_s9 + $0x778] sm:$0xf0] }
 0x15d   : > { %3022 = vmatpush.bf16.msrb.mxu2 %v4426_v11  ;;  %v3323_v11 = vld [vmem:[%s5411_s9 + $0x88] sm:$0xf0]  ;;  %v4595_v6 = vld [vmem:[%s5411_s9 + $0xa78] sm:$0xf0] }
 0x15e   : > { %3035 = vmatpush.bf16.msrb.mxu3 %v4618_v12  ;;  %2997 = vmatmul.bf16.vlgmr.msrb.gmra.mxu0 %v6167_v45  ;;  %v3926_v12 = vor.u32 %v4958_v29, %v3923_v5  ;;  %v4214_v29 = vor.u32 %v5030_v56, %v4211_v57 }
 0x15f   : > { %3041 = vmatpush.bf16.msra.mxu0 %v3446_v4  ;;  %3010 = vmatmul.bf16.vlgmr.msrb.gmra.mxu1 %v6175_v49  ;;  %v3515_v4 = vld [vmem:[%s5411_s9 + $0x208] sm:$0xf0] }
 0x160   : > { %3054 = vmatpush.bf16.msra.mxu1 %v3638_v13  ;;  %3023 = vmatmul.bf16.vlgmr.msrb.gmra.mxu2 %v6161_v41  ;;  %v4904_v13 = vld [vmem:[%s5411_s9 + $0x374] sm:$0xf]  ;;  %v3518_v25 = vor.u32 %v4856_v15, %v3515_v4  ;;  %v4379_v15 = vld [vmem:[%s5411_s9 + $0x8c8] sm:$0xf0] }
 0x161   : > { %3067 = vmatpush.bf16.msra.mxu2 %v3830_v14  ;;  %3036 = vmatmul.bf16.vlgmr.msrb.gmra.mxu3 %v6170_v46  ;;  %v3707_v14 = vld [vmem:[%s5411_s9 + $0x388] sm:$0xf0] }
 0x162   : > { %3080 = vmatpush.bf16.msra.mxu3 %v4022_v19  ;;  %v3326_v19 = vor.u32 %v4808_v9, %v3323_v11  ;;  %v3710_v27 = vor.u32 %v4904_v13, %v3707_v14  ;;  %v5072_v9 = vld [vmem:[%s5411_s9 + $0x8b4] sm:$0xf]  ;;  %v4790_v11 = vor.u32 %v5174_v2, %v4787_v32  ;;  %v4571_v4 = vld [vmem:[%s5411_s9 + $0xa48] sm:$0xf0]  ;;  %v4499_v2 = vld [vmem:[%s5411_s9 + $0x9b8] sm:$0xf0] }
 0x163   : > { %3042 = vmatpush.bf16.msra.mxu0 %v3422_v33  ;;  %v6201_v16 = vpop.f32.mrf.mxu2  ;;  %v2792_v24 = vpop.f32.mrf.mxu0  ;;  %v4850_v33 = vld [vmem:[%s5411_s9 + $0x1c4] sm:$0xf]  ;;  %v5168_v13 = vld [vmem:[%s5411_s9 + $0xbb4] sm:$0xf]  ;;  %v4763_v14 = vld [vmem:[%s5411_s9 + $0xbc8] sm:$0xf0] }
 0x164   : > { %3055 = vmatpush.bf16.msra.mxu1 %v3614_v34  ;;  %v6206_v17 = vpop.f32.mrf.mxu3  ;;  %v2805_v34 = vpop.f32.mrf.mxu1  ;;  %v3494_v20 = vor.u32 %v4850_v33, %v3491_v36  ;;  %v5018_v24 = vld [vmem:[%s5411_s9 + $0x704] sm:$0xf]  ;;  %v4766_v28 = vor.u32 %v5168_v13, %v4763_v14  ;;  %v4355_v33 = vld [vmem:[%s5411_s9 + $0x898] sm:$0xf0]  ;;  %v5096_v13 = vld [vmem:[%s5411_s9 + $0x974] sm:$0xf] }
 0x165   : > { %3068 = vmatpush.bf16.msra.mxu2 %v3806_v35  ;;  %v3902_v35 = vor.u32 %v4952_v18, %v3899_v23  ;;  %v4382_v23 = vor.u32 %v5072_v9, %v4379_v15  ;;  %v5114_v34 = vld [vmem:[%s5411_s9 + $0xa04] sm:$0xf]  ;;  %v5048_v9 = vld [vmem:[%s5411_s9 + $0x7f4] sm:$0xf]  ;;  %v5340_v15 = vmov 0.0  }
 0x166   : > { %3081 = vmatpush.bf16.msra.mxu3 %v3998_v40  ;;  %v4946_v40 = vld [vmem:[%s5411_s9 + $0x4c4] sm:$0xf]  ;;  %191 = vst [vmem:[%s6288_s23 + $0x8] sm:$0xf] %v5340_v15  ;;  %v4475_v14 = vld [vmem:[%s5411_s9 + $0x988] sm:$0xf0] }
 0x167   : > { %3043 = vmatpush.bf16.msra.mxu0 %v3398_v48  ;;  %v3686_v48 = vor.u32 %v4898_v37, %v3683_v39  ;;  %v3878_v26 = vor.u32 %v4946_v40, %v3875_v42  ;;  %v5162_v36 = vld [vmem:[%s5411_s9 + $0xb84] sm:$0xf]  ;;  %v4739_v37 = vld [vmem:[%s5411_s9 + $0xb98] sm:$0xf0]  ;;  %v5253_v40 = vld [vmem:[#allocation1 + $0x1b] sm:$0xff] }
 0x168   : > { %3056 = vmatpush.bf16.msra.mxu1 %v3590_v21  ;;  %v4844_v21 = vld [vmem:[%s5411_s9 + $0x194] sm:$0xf]  ;;  %v5252_v39 = vld [vmem:[#allocation1] sm:$0xff]  ;;  %v5150_v32 = vld [vmem:[%s5411_s9 + $0xb24] sm:$0xf] }
 0x169   : > { %3069 = vmatpush.bf16.msra.mxu2 %v3782_v50  ;;  %v3467_v50 = vld [vmem:[%s5411_s9 + $0x1a8] sm:$0xf0] }
 0x16a   : > { %3082 = vmatpush.bf16.msra.mxu3 %v3974_v53  ;;  %v3659_v53 = vld [vmem:[%s5411_s9 + $0x328] sm:$0xf0]  ;;  %v3470_v0 = vor.u32 %v4844_v21, %v3467_v50  ;;  %v5060_v21 = vld [vmem:[%s5411_s9 + $0x854] sm:$0xf]  ;;  %v4742_v50 = vor.u32 %v5162_v36, %v4739_v37  ;;  %v4259_v37 = vld [vmem:[%s5411_s9 + $0x7d8] sm:$0xf0] }
 0x16b   : > { %3044 = vmatpush.bf16.msra.mxu0 %v3374_v58  ;;  %v2818_v52 = vpop.f32.mrf.mxu2  ;;  %v5078_v58 = vld [vmem:[%s5411_s9 + $0x8e4] sm:$0xf] }
 0x16c   : > { %3057 = vmatpush.bf16.msra.mxu1 %v3566_v61  ;;  %v2831_v55 = vpop.f32.mrf.mxu3  ;;  %v3278_v61 = vor.u32 %v4796_v43, %v3275_v47  ;;  %v5108_v52 = vld [vmem:[%s5411_s9 + $0x9d4] sm:$0xf] }
 0x16d   : > { %3070 = vmatpush.bf16.msra.mxu2 %v3758_v62  ;;  %v4403_v62 = vld [vmem:[%s5411_s9 + $0x8f8] sm:$0xf0] }
 0x16e   : > { %3083 = vmatpush.bf16.msra.mxu3 %v3950_v8  ;;  %v3662_v8 = vor.u32 %v4892_v22, %v3659_v53  ;;  %v4406_v5 = vor.u32 %v5078_v58, %v4403_v62  ;;  %v4331_v22 = vld [vmem:[%s5411_s9 + $0x868] sm:$0xf0]  ;;  %v5156_v53 = vld [vmem:[%s5411_s9 + $0xb54] sm:$0xf]  ;;  %v5006_v58 = vld [vmem:[%s5411_s9 + $0x6a4] sm:$0xf] }
 0x16f   : > { %3045 = vmatpush.bf16.msra.mxu0 %v3350_v10  ;;  %v4598_v10 = vor.u32 %v5126_v63, %v4595_v6  ;;  %v4334_v56 = vor.u32 %v5060_v21, %v4331_v22  ;;  %v5054_v62 = vld [vmem:[%s5411_s9 + $0x824] sm:$0xf]  ;;  %v4718_v6 = vor.u32 %v5156_v53, %v4715_v51  ;;  %v4043_v21 = vld [vmem:[%s5411_s9 + $0x628] sm:$0xf0]  ;;  %v5084_v53 = vld [vmem:[%s5411_s9 + $0x914] sm:$0xf] }
 0x170   : > { %3058 = vmatpush.bf16.msra.mxu1 %v3542_v7  ;;  %v5024_v7 = vld [vmem:[%s5411_s9 + $0x734] sm:$0xf]  ;;  %v4427_v51 = vld [vmem:[%s5411_s9 + $0x928] sm:$0xf0] }
 0x171   : > { %3071 = vmatpush.bf16.msra.mxu2 %v3734_v31  ;;  %v4187_v31 = vld [vmem:[%s5411_s9 + $0x748] sm:$0xf0] }
 0x172   : > { %3084 = vmatpush.bf16.msra.mxu3 %v3926_v12  ;;  %v5120_v12 = vld [vmem:[%s5411_s9 + $0xa34] sm:$0xf]  ;;  %v4190_v18 = vor.u32 %v5024_v7, %v4187_v31  ;;  %v4091_v31 = vld [vmem:[%s5411_s9 + $0x688] sm:$0xf0] }
 0x173   : > { %3046 = vmatpush.bf16.msra.mxu0 %v3326_v19  ;;  %v4574_v19 = vor.u32 %v5120_v12, %v4571_v4  ;;  %v4283_v4 = vld [vmem:[%s5411_s9 + $0x808] sm:$0xf0] }
 0x174   : > { %3059 = vmatpush.bf16.msra.mxu1 %v3518_v25  ;;  %v4163_v25 = vld [vmem:[%s5411_s9 + $0x718] sm:$0xf0] }
 0x175   : > { %3072 = vmatpush.bf16.msra.mxu2 %v3710_v27  ;;  %v5066_v27 = vld [vmem:[%s5411_s9 + $0x884] sm:$0xf]  ;;  %v4166_v42 = vor.u32 %v5018_v24, %v4163_v25 }
 0x176   : > { %3085 = vmatpush.bf16.msra.mxu3 %v3902_v35  ;;  %v4547_v35 = vld [vmem:[%s5411_s9 + $0xa18] sm:$0xf0]  ;;  %v4358_v43 = vor.u32 %v5066_v27, %v4355_v33  ;;  %v4286_v27 = vor.u32 %v5048_v9, %v4283_v4 }
 0x177   : > { %3047 = vmatpush.bf16.msra.mxu0 %v3302_v60  ;;  %v5254_v60 = vld [vmem:[#allocation1 + $0x9] sm:$0xff]  ;;  %v4550_v47 = vor.u32 %v5114_v34, %v4547_v35  ;;  %v4067_v33 = vld [vmem:[%s5411_s9 + $0x658] sm:$0xf0] }
 0x178   : > { %3060 = vmatpush.bf16.msra.mxu1 %v3494_v20  ;;  %v5012_v20 = vld [vmem:[%s5411_s9 + $0x6d4] sm:$0xf]  ;;  %v5042_v34 = vld [vmem:[%s5411_s9 + $0x7c4] sm:$0xf] }
 0x179   : > { %3073 = vmatpush.bf16.msra.mxu2 %v3686_v48  ;;  %v4139_v48 = vld [vmem:[%s5411_s9 + $0x6e8] sm:$0xf0] }
 0x17a   : > { %3086 = vmatpush.bf16.msra.mxu3 %v3878_v26  ;;  %v4523_v26 = vld [vmem:[%s5411_s9 + $0x9e8] sm:$0xf0]  ;;  %v4142_v54 = vor.u32 %v5012_v20, %v4139_v48  ;;  %v4988_v48 = vld [vmem:[%s5411_s9 + $0x614] sm:$0xf] }
 0x17b   : > { %3048 = vmatpush.bf16.msra.mxu0 %v3278_v61  ;;  %v6271_v55 = vpop.f32.mrf.mxu0  ;;  %v4526_v57 = vor.u32 %v5108_v52, %v4523_v26  ;;  %v4115_v61 = vld [vmem:[%s5411_s9 + $0x6b8] sm:$0xf0]  ;;  %v4235_v26 = vld [vmem:[%s5411_s9 + $0x7a8] sm:$0xf0] }
 0x17c   : > { %3061 = vmatpush.bf16.msra.mxu1 %v3470_v0  ;;  %v6277_v63 = vpop.f32.mrf.mxu1  ;;  %v4307_v0 = vld [vmem:[%s5411_s9 + $0x838] sm:$0xf0] }
 0x17d   : > { %3074 = vmatpush.bf16.msra.mxu2 %v3662_v8  ;;  %v5102_v8 = vld [vmem:[%s5411_s9 + $0x9a4] sm:$0xf] }
 0x17e   : > { %3087 = vmatpush.bf16.msra.mxu3 %v3854_v3  ;;  %3049 = vmatmul.bf16.vlgmr.msra.gmra.mxu0 %v5252_v39  ;;  %v4691_v3 = vld [vmem:[%s5411_s9 + $0xb38] sm:$0xf0]  ;;  %v4502_v7 = vor.u32 %v5102_v8, %v4499_v2  ;;  %v5090_v39 = vld [vmem:[%s5411_s9 + $0x944] sm:$0xf]  ;;  %v2791_v2 = vadd.f32 %v6186_v59, %v6124_v44 }
 0x17f   : > { %3093 = vmatpush.bf16.msrb.mxu0 %v4214_v29  ;;  %3062 = vmatmul.bf16.vlgmr.msra.gmra.mxu1 %v5254_v60  ;;  %v4118_v29 = vor.u32 %v5006_v58, %v4115_v61  ;;  %v4694_v12 = vor.u32 %v5150_v32, %v4691_v3  ;;  %v4643_v60 = vld [vmem:[%s5411_s9 + $0xad8] sm:$0xf0]  ;;  %v4046_v58 = vor.u32 %v4988_v48, %v4043_v21 }
 0x180   : > { %3106 = vmatpush.bf16.msrb.mxu1 %v4406_v5  ;;  %3075 = vmatmul.bf16.vlgmr.msra.gmra.mxu2 %v5251_v30  ;;  %v5000_v5 = vld [vmem:[%s5411_s9 + $0x674] sm:$0xf]  ;;  %v4994_v30 = vld [vmem:[%s5411_s9 + $0x644] sm:$0xf]  ;;  %v2804_v3 = vadd.f32 %v6191_v1, %v2791_v2 }
 0x181   : > { %3119 = vmatpush.bf16.msrb.mxu2 %v4598_v10  ;;  %3088 = vmatmul.bf16.vlgmr.msra.gmra.mxu3 %v5253_v40  ;;  %v4310_v10 = vor.u32 %v5054_v62, %v4307_v0  ;;  %v4094_v24 = vor.u32 %v5000_v5, %v4091_v31  ;;  %v4451_v40 = vld [vmem:[%s5411_s9 + $0x958] sm:$0xf0]  ;;  %v4430_v62 = vor.u32 %v5084_v53, %v4427_v51 }
 0x182   : > { %3132 = vmatpush.bf16.msrb.mxu3 %v4790_v11  ;;  %v4454_v20 = vor.u32 %v5090_v39, %v4451_v40  ;;  %v2856_v0 = vadd.f32 %v6277_v63, %v6271_v55  ;;  %v2817_v5 = vadd.f32 %v6201_v16, %v2804_v3 }
 0x183   : > { %3094 = vmatpush.bf16.msrb.mxu0 %v4190_v18  ;;  %v2868_v11 = vpop.f32.mrf.mxu2  ;;  %v2844_v25 = vpop.f32.mrf.mxu0 }
 0x184   : > { %3107 = vmatpush.bf16.msrb.mxu1 %v4382_v23  ;;  %v2881_v18 = vpop.f32.mrf.mxu3  ;;  %v5144_v23 = vld [vmem:[%s5411_s9 + $0xaf4] sm:$0xf]  ;;  %v2857_v35 = vpop.f32.mrf.mxu1  ;;  %v2869_v8 = vadd.f32 %v2868_v11, %v2856_v0 }
 0x185   : > { %3120 = vmatpush.bf16.msrb.mxu2 %v4574_v19  ;;  %v4667_v19 = vld [vmem:[%s5411_s9 + $0xb08] sm:$0xf0] }
 0x186   : > { %3133 = vmatpush.bf16.msrb.mxu3 %v4766_v28  ;;  %v4478_v28 = vor.u32 %v5096_v13, %v4475_v14  ;;  %v4670_v36 = vor.u32 %v5144_v23, %v4667_v19  ;;  %v2882_v32 = vadd.f32 %v2881_v18, %v2869_v8 }
 0x187   : > { %3095 = vmatpush.bf16.msrb.mxu0 %v4166_v42  ;;  %v5138_v42 = vld [vmem:[%s5411_s9 + $0xac4] sm:$0xf] }
 0x188   : > { %3108 = vmatpush.bf16.msrb.mxu1 %v4358_v43  ;;  %v4070_v43 = vor.u32 %v4994_v30, %v4067_v33  ;;  %v4646_v52 = vor.u32 %v5138_v42, %v4643_v60 }
 0x189   : > { %3121 = vmatpush.bf16.msrb.mxu2 %v4550_v47  ;;  %v4262_v47 = vor.u32 %v5042_v34, %v4259_v37 }
 0x18a   : > { %3134 = vmatpush.bf16.msrb.mxu3 %v4742_v50  ;;  %v5036_v50 = vld [vmem:[%s5411_s9 + $0x794] sm:$0xf] }
 0x18b   : > { %3096 = vmatpush.bf16.msrb.mxu0 %v4142_v54  ;;  %v2870_v22 = vpop.f32.mrf.mxu2  ;;  %v4238_v61 = vor.u32 %v5036_v50, %v4235_v26 }
 0x18c   : > { %3109 = vmatpush.bf16.msrb.mxu1 %v4334_v56  ;;  %v2883_v54 = vpop.f32.mrf.mxu3  ;;  %v5132_v56 = vld [vmem:[%s5411_s9 + $0xa94] sm:$0xf] }
 0x18d   : > { %3122 = vmatpush.bf16.msrb.mxu2 %v4526_v57  ;;  %v4619_v57 = vld [vmem:[%s5411_s9 + $0xaa8] sm:$0xf0] }
 0x18e   : > { %3135 = vmatpush.bf16.msrb.mxu3 %v4718_v6  ;;  %v4622_v6 = vor.u32 %v5132_v56, %v4619_v57 }
 0x18f   : > { %3097 = vmatpush.bf16.msrb.mxu0 %v4118_v29 }
 0x190   : > { %3110 = vmatpush.bf16.msrb.mxu1 %v4310_v10 }
 0x191   : > { %3123 = vmatpush.bf16.msrb.mxu2 %v4502_v7  ;;  %v2830_v7 = vadd.f32 %v6206_v17, %v2817_v5 }
 0x192   : > { %3136 = vmatpush.bf16.msrb.mxu3 %v4694_v12 }
 0x193   : > { %3098 = vmatpush.bf16.msrb.mxu0 %v4094_v24 }
 0x194   : > { %3111 = vmatpush.bf16.msrb.mxu1 %v4286_v27 }
 0x195   : > { %3124 = vmatpush.bf16.msrb.mxu2 %v4478_v28 }
 0x196   : > { %3137 = vmatpush.bf16.msrb.mxu3 %v4670_v36 }
 0x197   : > { %3099 = vmatpush.bf16.msrb.mxu0 %v4070_v43 }
 0x198   : > { %3112 = vmatpush.bf16.msrb.mxu1 %v4262_v47 }
 0x199   : > { %3125 = vmatpush.bf16.msrb.mxu2 %v4454_v20 }
 0x19a   : > { %3138 = vmatpush.bf16.msrb.mxu3 %v4646_v52 }
 0x19b   : > { %3100 = vmatpush.bf16.msrb.mxu0 %v4046_v58  ;;  %v2894_v55 = vpop.f32.mrf.mxu0 }
 0x19c   : > { %3113 = vmatpush.bf16.msrb.mxu1 %v4238_v61  ;;  %v2895_v63 = vadd.f32 %v2894_v55, %v2882_v32  ;;  %v2907_v29 = vpop.f32.mrf.mxu1  ;;  %v194_v32 = vld [vmem:[%s6288_s23 + $0x8] sm:$0xf] }
 0x19d   : > { %3126 = vmatpush.bf16.msrb.mxu2 %v4430_v62 }
 0x19e   : > { %3139 = vmatpush.bf16.msrb.mxu3 %v4622_v6  ;;  %3101 = vmatmul.bf16.vlgmr.msrb.gmra.mxu0 %v6167_v45  ;;  %v2908_v10 = vadd.f32 %v2907_v29, %v2895_v63 }
 0x19f   : > { %3114 = vmatmul.bf16.vlgmr.msrb.gmra.mxu1 %v6175_v49 }
 0x1a0   : > { %3127 = vmatmul.bf16.vlgmr.msrb.gmra.mxu2 %v6161_v41 }
 0x1a1   : > { %3140 = vmatmul.bf16.vlgmr.msrb.gmra.mxu3 %v6170_v46  ;;  %v3152_v46 = vrot.slane %v2830_v7, 4 }
 0x1a3   : > { %v2920_v45 = vpop.f32.mrf.mxu2  ;;  %v2896_v31 = vpop.f32.mrf.mxu0 }
 0x1a4   : > { %v2921_v44 = vadd.f32 %v2920_v45, %v2908_v10  ;;  %v2933_v59 = vpop.f32.mrf.mxu3  ;;  %v2909_v41 = vpop.f32.mrf.mxu1 }
 0x1a6   : > { %v2934_v49 = vadd.f32 %v2933_v59, %v2921_v44 }
 0x1a8   : > { %v3153_v9 = vrot.slane %v2934_v49, 2 }
 0x1aa   : > { %v3158_v1 = vsel %vm3157_vm1, %v3152_v46, %v3153_v9 }
 0x1ab   : > { %v3160_v11 = vsel %vm3159_vm2, %v6062_v38, %v3158_v1  ;;  %v2922_v15 = vpop.f32.mrf.mxu2 }
 0x1ac   : > { %v2935_v12 = vpop.f32.mrf.mxu3  ;;  %3166 = vst [vmem:[%s6288_s23] sm:$0xff] %v3160_v11 }
 0x1bb   : > { %v2946_v16 = vpop.f32.mrf.mxu0 }
 0x1bc   : > { %v2959_v4 = vpop.f32.mrf.mxu1 }
 0x1bd   : > { %v2960_v13 = vadd.f32 %v2959_v4, %v2946_v16 }
 0x1c3   : > { %v2972_v14 = vpop.f32.mrf.mxu2  ;;  %v2948_v19 = vpop.f32.mrf.mxu0 }
 0x1c4   : > { %v2973_v17 = vadd.f32 %v2972_v14, %v2960_v13  ;;  %v2985_v18 = vpop.f32.mrf.mxu3  ;;  %v2961_v24 = vpop.f32.mrf.mxu1 }
 0x1c6   : > { %v2986_v23 = vadd.f32 %v2985_v18, %v2973_v17 }
 0x1cb   : > { %v2974_v25 = vpop.f32.mrf.mxu2 }
 0x1cc   : > { %v2987_v27 = vpop.f32.mrf.mxu3 }
 0x1db   : > { %v2998_v28 = vpop.f32.mrf.mxu0 }
 0x1dc   : > { %v2999_v30 = vadd.f32 %v2998_v28, %v2986_v23  ;;  %v3011_v33 = vpop.f32.mrf.mxu1 }
 0x1de   : > { %v3012_v34 = vadd.f32 %v3011_v33, %v2999_v30 }
 0x1e3   : > { %v3024_v35 = vpop.f32.mrf.mxu2  ;;  %v3000_v36 = vpop.f32.mrf.mxu0 }
 0x1e4   : > { %v3037_v38 = vpop.f32.mrf.mxu3  ;;  %v3013_v37 = vpop.f32.mrf.mxu1  ;;  %v3025_v58 = vadd.f32 %v3024_v35, %v3012_v34 }
 0x1e6   : > { %v3038_v2 = vadd.f32 %v3037_v38, %v3025_v58 }
 0x1eb   : > { %v3026_v39 = vpop.f32.mrf.mxu2 }
 0x1ec   : > { %v3039_v40 = vpop.f32.mrf.mxu3 }
 0x1fb   : > { %v3050_v42 = vpop.f32.mrf.mxu0 }
 0x1fc   : > { %v3063_v60 = vpop.f32.mrf.mxu1 }
 0x1fd   : > { %v3064_v22 = vadd.f32 %v3063_v60, %v3050_v42 }
 0x203   : > { %v3076_v43 = vpop.f32.mrf.mxu2  ;;  %v3052_v20 = vpop.f32.mrf.mxu0 }
 0x204   : > { %v3089_v47 = vpop.f32.mrf.mxu3  ;;  %v3065_v48 = vpop.f32.mrf.mxu1  ;;  %v3077_v52 = vadd.f32 %v3076_v43, %v3064_v22 }
 0x206   : > { %v3090_v26 = vadd.f32 %v3089_v47, %v3077_v52 }
 0x20b   : > { %v3078_v21 = vpop.f32.mrf.mxu2 }
 0x20c   : > { %v3091_v50 = vpop.f32.mrf.mxu3 }
 0x21b   : > { %v3102_v53 = vpop.f32.mrf.mxu0 }
 0x21c   : > { %v3115_v51 = vpop.f32.mrf.mxu1  ;;  %v3103_v54 = vadd.f32 %v3102_v53, %v3090_v26 }
 0x21e   : > { %v3116_v56 = vadd.f32 %v3115_v51, %v3103_v54 }
 0x223   : > { %v3128_v57 = vpop.f32.mrf.mxu2  ;;  %v3104_v6 = vpop.f32.mrf.mxu0 }
 0x224   : > { %v3129_v61 = vadd.f32 %v3128_v57, %v3116_v56  ;;  %v3141_v62 = vpop.f32.mrf.mxu3  ;;  %v3117_v0 = vpop.f32.mrf.mxu1 }
 0x226   : > { %v3142_v8 = vadd.f32 %v3141_v62, %v3129_v61 }
 0x228   : > { %v3154_v3 = vrot.slane %v3142_v8, 6 }
 0x22a   : > { %v3161_v55 = vsel %vm3155_vm0, %v3038_v2, %v3154_v3 }
 0x22b   : > { %v3165_v63 = vadd.f32 %v3161_v55, %v194_v32  ;;  %v3130_v29 = vpop.f32.mrf.mxu2 }
 0x22c   : > { %v3143_v5 = vpop.f32.mrf.mxu3 }
 0x22d   : > { %3167 = vst [vmem:[%s6288_s23 + $0x8] sm:$0xf] %v3165_v63 }
 0x22e PF: > { %s15_s14 = sadd.s32 1, %s5335_s14   ;;  %s6353_s9 = smov %s5319_s10 }
 0x22f   : > { %p12_p0 = scmp.ge.s32.totalorder %s15_s14, 4   ;;  %s6354_s10 = smov %s5323_s11 }
 0x230   : > { %s6355_s11 = smov %s5401_s20  ;;  %s6356_s12 = smov %s5331_s13 }
 0x231   : > { %s6357_s13 = smov %s6359_s16  ;;  %14 = sbr.rel (!%p12_p0) target bundleno = 4 (0x4), region = 73 }
 0x236   :  { %3190 = vsyncpa [#allocation3], 1 }
 0x237   :  { %3192 = vsyncpa [#allocation3 + $0x1], 1 }

// kernel: _pipeline.12
= control target key start
LH: loop header
LB: loop body
LE: loop exit
PB: predicated region body
PF: predicated region fallthrough
CT: control target
= control target key end

     0   :  { %7 = vsyncpa [#allocation3], 0  ;;  %s2464_s0 = inlined_call_operand.vmem [shape: bf16[2,512], index: 0, kind: input, shape index: {}]   ;;  %s2465_s1 = inlined_call_operand.hbm [shape: bf16[512,1024], index: 1, kind: input, shape index: {}]   ;;  %s2466_s2 = inlined_call_operand.vmem [shape: f32[2,1024], index: 2, kind: output, shape index: {}]  }
   0x1   :  { %9 = vsyncpa [#allocation3 + $0x1], 0  ;;  %s2092_s9 = smov 0   ;;  %s2094_s10 = smov 0  }
   0x2   :  { %s2096_s11 = smov 0   ;;  %s2098_s12 = smov 0  }
   0x3   :  { %s2100_s13 = smov 0   ;;  %s2102_s14 = smov 0  }
   0x4 LB: > { %s1279_s15 = sadd.s32 4294967295, %s2072_s14   ;;  %s27_s16 = sadd.s32 1, %s2068_s13  ;;  %s2072_s14 = sphi %s2102_s14, %s15_s14   ;;  %s2068_s13 = sphi %s2100_s13, %s2473_s13   ;;  %s2064_s12 = sphi %s2098_s12, %s2472_s12   ;;  %s2060_s11 = sphi %s2096_s11, %s2471_s11   ;;  %s2056_s10 = sphi %s2094_s10, %s2470_s10   ;;  %s2052_s9 = sphi %s2092_s9, %s2469_s9  }
   0x5   : > { %p29_p0 = scmp.ge.s32.totalorder %s27_s16, 2  ;;  %s57_s17 = sadd.s32 1, %s2060_s11 }
   0x6   : > { %p64_p1 = scmp.ne.s32.totalorder %s2060_s11, %s2056_s10  ;;  %p65_p2 = scmp.eq.s32.totalorder %s2072_s14, 0 }
   0x7   : > { %s2475_s16 = smov (%p29_p0, %s27_s16), 0  ;;  %p70_p4 = scmp.ne.s32.totalorder %s2056_s10, %s2052_s9 }
   0x8   : > { %p2128_p3 = por %p65_p2, %p64_p1  ;;  %s53_s19 = ssub.s32 %s2068_s13, %s2475_s16 }
   0x9   : > { %p71_p5 = scmp.eq.s32.totalorder %s1279_s15, 0  ;;  %p55_p6 = scmp.eq.s32.totalorder %s53_s19, 0 }
   0xa   : > { %p1939_p8 = scmp.lt.s32.totalorder %s2072_s14, 2  ;;  %s123_s22 = sand.u32 1, %s2060_s11  }
   0xb   : > { %p2135_p7 = por %p71_p5, %p70_p4  ;;  %s1804_s23 = sshll.u32 %s2068_s13, 4 }
   0xc   : > { %s2141_s21 = scalar_select %p55_p6, %s2060_s11, %s57_s17  }
   0xd   : > { %s1283_s24 = sshll.u32 %s123_s22, 10  ;;  %s135_s27 = scalar_lea.hbm %s2465_s1, %s1804_s23 }
   0xe   : > { %s136_s28 = sshll.u32 %s135_s27, 4  ;;  %s127_s29 = scalar_lea.vmem [#allocation2], %s1283_s24  ;;  %s137_s28 = int_to_ptr.hbm [resolvable:$true] %s136_s28 }
   0xf   : > { %s138_s30 = sshll.u32 %s127_s29, 4  ;;  %p1936_p9 = pnand %p1939_p8, %p2128_p3  ;;  %s139_s30 = int_to_ptr.vmem [resolvable:$true] %s138_s30 }
  0x10   : > { %p1286_p10 = scmp.ge.s32.totalorder %s2072_s14, 1  ;;  %s124_s3 = scalar_lea.sflag [#allocation3], %s123_s22 }
  0x11   : > { %s2074_s4 = smov 512   ;;  %s2075_s5 = smov 256  }
  0x12   : > { %s2076_s6 = smov 16   ;;  %p146_p11 = scmp.lt.s32.totalorder %s2072_s14, 3 }
  0x13   : > { %1938 = dma.hbm_to_vmem [thread:$0]  (!%p1936_p9), %s137_s28, 16384, %s139_s30, %s124_s3, %s2074_s4, %s2075_s5, %s2076_s6  }
  0x14   : > { %p147_p12 = pnand %p1286_p10, %p146_p11 }
  0x15   : > { %s152_s7 = sand.u32 (!%p147_p12), 1, %s2056_s10  }
  0x16   : > { %150 = sbr.rel (%p147_p12) target bundleno = 301 (0x12d), region = 28  ;;  %s1287_s8 = sshll.u32 (!%p147_p12), %s152_s7, 10 }
  0x17   : > { %s153_s9 = scalar_lea.sflag (!%p147_p12), [#allocation3], %s152_s7  ;;  %s2153_s15 = scalar_lea.vmem (!%p147_p12), [#allocation2], %s1287_s8 }
  0x1b   : > { %2047 = dma.done.wait (%p2135_p7), %s153_s9, 16384  }
  0x1c   : > { %2049 = vsyncadd (%p2135_p7), %s153_s9, 4294950912  ;;  %v1404_v0 = vld [vmem:[%s2153_s15 + $0xe0] sm:$0xf]  ;;  %v1835_v1 = vld [vmem:[%s2153_s15 + $0xec] sm:$0xf0]  ;;  %s1288_s19 = sshll.u32 %s2064_s12, 2 }
  0x1d   : > { %v1532_v2 = vld [vmem:[%s2153_s15 + $0x1e0] sm:$0xf]  ;;  %v1405_v3 = vor.u32 %v1835_v1, %v1404_v0  ;;  %v1867_v4 = vld [vmem:[%s2153_s15 + $0x1ec] sm:$0xf0]  ;;  %p181_p13 = scmp.lt.s32.totalorder %s1288_s19, 7  ;;  %vm1190_vm0 = vcmask 1041408  }
  0x1e   : > { %v1660_v5 = vld [vmem:[%s2153_s15 + $0x2e0] sm:$0xf]  ;;  %v1899_v6 = vld [vmem:[%s2153_s15 + $0x2ec] sm:$0xf0]  ;;  %v1533_v7 = vor.u32 %v1867_v4, %v1532_v2  ;;  %vm1192_vm1 = vcmask 1045508   ;;  %vm1194_vm2 = vcmask 1043456  }
  0x1f   : > { %v1661_v8 = vor.u32 %v1899_v6, %v1660_v5  ;;  %v1788_v9 = vld [vmem:[%s2153_s15 + $0x3e0] sm:$0xf]  ;;  %v1931_v10 = vld [vmem:[%s2153_s15 + $0x3ec] sm:$0xf0]  ;;  %975 = vmatpush.bf16.msra.mxu0 %v1405_v3  ;;  %s2477_s19 = smov (!%p181_p13, %s1288_s19), 7 }
  0x20   : > { %v1388_v11 = vld [vmem:[%s2153_s15 + $0xc0] sm:$0xf]  ;;  %v1789_v12 = vor.u32 %v1931_v10, %v1788_v9  ;;  %v1831_v13 = vld [vmem:[%s2153_s15 + $0xcc] sm:$0xf0]  ;;  %988 = vmatpush.bf16.msra.mxu1 %v1533_v7  ;;  %s1289_s20 = sshll.u32 %s2477_s19, 1 }
  0x21   : > { %v1516_v14 = vld [vmem:[%s2153_s15 + $0x1c0] sm:$0xf]  ;;  %v1863_v15 = vld [vmem:[%s2153_s15 + $0x1cc] sm:$0xf0]  ;;  %1001 = vmatpush.bf16.msra.mxu2 %v1661_v8  ;;  %v1389_v16 = vor.u32 %v1831_v13, %v1388_v11  ;;  %s184_s23 = scalar_lea.vmem %s2466_s2, %s1289_s20 }
  0x22   : > { %v1517_v17 = vor.u32 %v1863_v15, %v1516_v14  ;;  %v1644_v18 = vld [vmem:[%s2153_s15 + $0x2c0] sm:$0xf]  ;;  %v1895_v19 = vld [vmem:[%s2153_s15 + $0x2cc] sm:$0xf0]  ;;  %1014 = vmatpush.bf16.msra.mxu3 %v1789_v12 }
  0x23   : > { %v1772_v20 = vld [vmem:[%s2153_s15 + $0x3c0] sm:$0xf]  ;;  %v1645_v21 = vor.u32 %v1895_v19, %v1644_v18  ;;  %v1927_v22 = vld [vmem:[%s2153_s15 + $0x3cc] sm:$0xf0]  ;;  %976 = vmatpush.bf16.msra.mxu0 %v1389_v16 }
  0x24   : > { %v1372_v23 = vld [vmem:[%s2153_s15 + $0xa0] sm:$0xf]  ;;  %v1827_v24 = vld [vmem:[%s2153_s15 + $0xac] sm:$0xf0]  ;;  %v1773_v25 = vor.u32 %v1927_v22, %v1772_v20  ;;  %989 = vmatpush.bf16.msra.mxu1 %v1517_v17 }
  0x25   : > { %v1500_v26 = vld [vmem:[%s2153_s15 + $0x1a0] sm:$0xf]  ;;  %v1859_v27 = vld [vmem:[%s2153_s15 + $0x1ac] sm:$0xf0]  ;;  %v1373_v29 = vor.u32 %v1827_v24, %v1372_v23  ;;  %1002 = vmatpush.bf16.msra.mxu2 %v1645_v21 }
  0x26   : > { %v1628_v28 = vld [vmem:[%s2153_s15 + $0x2a0] sm:$0xf]  ;;  %v1891_v30 = vld [vmem:[%s2153_s15 + $0x2ac] sm:$0xf0]  ;;  %v1501_v33 = vor.u32 %v1859_v27, %v1500_v26  ;;  %1015 = vmatpush.bf16.msra.mxu3 %v1773_v25 }
  0x27   : > { %v1756_v31 = vld [vmem:[%s2153_s15 + $0x3a0] sm:$0xf]  ;;  %v1923_v32 = vld [vmem:[%s2153_s15 + $0x3ac] sm:$0xf0]  ;;  %v1629_v34 = vor.u32 %v1891_v30, %v1628_v28  ;;  %977 = vmatpush.bf16.msra.mxu0 %v1373_v29  ;;  %v1833_v28 = vld [vmem:[%s2153_s15 + $0xe4] sm:$0xf] }
  0x28   : > { %v1356_v35 = vld [vmem:[%s2153_s15 + $0x80] sm:$0xf]  ;;  %v1823_v36 = vld [vmem:[%s2153_s15 + $0x8c] sm:$0xf0]  ;;  %v1757_v38 = vor.u32 %v1923_v32, %v1756_v31  ;;  %990 = vmatpush.bf16.msra.mxu1 %v1501_v33  ;;  %v1406_v29 = vld [vmem:[%s2153_s15 + $0xf0] sm:$0xf0] }
  0x29   : > { %v1484_v37 = vld [vmem:[%s2153_s15 + $0x180] sm:$0xf]  ;;  %v1855_v39 = vld [vmem:[%s2153_s15 + $0x18c] sm:$0xf0]  ;;  %v1357_v44 = vor.u32 %v1823_v36, %v1356_v35  ;;  %1003 = vmatpush.bf16.msra.mxu2 %v1629_v34  ;;  %v1865_v30 = vld [vmem:[%s2153_s15 + $0x1e4] sm:$0xf] }
  0x2a   : > { %v1612_v40 = vld [vmem:[%s2153_s15 + $0x280] sm:$0xf]  ;;  %v1887_v41 = vld [vmem:[%s2153_s15 + $0x28c] sm:$0xf0]  ;;  %v1485_v45 = vor.u32 %v1855_v39, %v1484_v37  ;;  %1016 = vmatpush.bf16.msra.mxu3 %v1757_v38  ;;  %v1534_v32 = vld [vmem:[%s2153_s15 + $0x1f0] sm:$0xf0] }
  0x2b   : > { %v1740_v42 = vld [vmem:[%s2153_s15 + $0x380] sm:$0xf]  ;;  %v1919_v43 = vld [vmem:[%s2153_s15 + $0x38c] sm:$0xf0]  ;;  %v1613_v46 = vor.u32 %v1887_v41, %v1612_v40  ;;  %978 = vmatpush.bf16.msra.mxu0 %v1357_v44  ;;  %v1897_v33 = vld [vmem:[%s2153_s15 + $0x2e4] sm:$0xf]  ;;  %v1409_v40 = vor.u32 %v1833_v28, %v1406_v29  ;;  %v1537_v41 = vor.u32 %v1865_v30, %v1534_v32 }
  0x2c   : > { %v1340_v47 = vld [vmem:[%s2153_s15 + $0x60] sm:$0xf]  ;;  %v1819_v48 = vld [vmem:[%s2153_s15 + $0x6c] sm:$0xf0]  ;;  %v1741_v50 = vor.u32 %v1919_v43, %v1740_v42  ;;  %991 = vmatpush.bf16.msra.mxu1 %v1485_v45  ;;  %v1662_v34 = vld [vmem:[%s2153_s15 + $0x2f0] sm:$0xf0] }
  0x2d   : > { %v1468_v49 = vld [vmem:[%s2153_s15 + $0x160] sm:$0xf]  ;;  %v1851_v51 = vld [vmem:[%s2153_s15 + $0x16c] sm:$0xf0]  ;;  %v1341_v56 = vor.u32 %v1819_v48, %v1340_v47  ;;  %1004 = vmatpush.bf16.msra.mxu2 %v1613_v46  ;;  %v1929_v37 = vld [vmem:[%s2153_s15 + $0x3e4] sm:$0xf]  ;;  %v1665_v42 = vor.u32 %v1897_v33, %v1662_v34 }
  0x2e   : > { %v1596_v52 = vld [vmem:[%s2153_s15 + $0x260] sm:$0xf]  ;;  %v1883_v53 = vld [vmem:[%s2153_s15 + $0x26c] sm:$0xf0]  ;;  %v1469_v57 = vor.u32 %v1851_v51, %v1468_v49  ;;  %1017 = vmatpush.bf16.msra.mxu3 %v1741_v50  ;;  %v1790_v38 = vld [vmem:[%s2153_s15 + $0x3f0] sm:$0xf0] }
  0x2f   : > { %v1724_v54 = vld [vmem:[%s2153_s15 + $0x360] sm:$0xf]  ;;  %v1915_v55 = vld [vmem:[%s2153_s15 + $0x36c] sm:$0xf0]  ;;  %v1597_v58 = vor.u32 %v1883_v53, %v1596_v52  ;;  %979 = vmatpush.bf16.msra.mxu0 %v1341_v56  ;;  %v1829_v43 = vld [vmem:[%s2153_s15 + $0xc4] sm:$0xf]  ;;  %v1793_v46 = vor.u32 %v1929_v37, %v1790_v38 }
  0x30   : > { %v1324_v59 = vld [vmem:[%s2153_s15 + $0x40] sm:$0xf]  ;;  %v1815_v60 = vld [vmem:[%s2153_s15 + $0x4c] sm:$0xf0]  ;;  %v1725_v62 = vor.u32 %v1915_v55, %v1724_v54  ;;  %992 = vmatpush.bf16.msra.mxu1 %v1469_v57  ;;  %v1390_v44 = vld [vmem:[%s2153_s15 + $0xd0] sm:$0xf0] }
  0x31   : > { %v1452_v61 = vld [vmem:[%s2153_s15 + $0x140] sm:$0xf]  ;;  %v1847_v63 = vld [vmem:[%s2153_s15 + $0x14c] sm:$0xf0]  ;;  %v1325_v4 = vor.u32 %v1815_v60, %v1324_v59  ;;  %1005 = vmatpush.bf16.msra.mxu2 %v1597_v58  ;;  %v1861_v45 = vld [vmem:[%s2153_s15 + $0x1c4] sm:$0xf]  ;;  %v1393_v53 = vor.u32 %v1829_v43, %v1390_v44 }
  0x32   : > { %v1580_v0 = vld [vmem:[%s2153_s15 + $0x240] sm:$0xf]  ;;  %v1879_v1 = vld [vmem:[%s2153_s15 + $0x24c] sm:$0xf0]  ;;  %v1453_v5 = vor.u32 %v1847_v63, %v1452_v61  ;;  %1018 = vmatpush.bf16.msra.mxu3 %v1725_v62  ;;  %v1518_v47 = vld [vmem:[%s2153_s15 + $0x1d0] sm:$0xf0] }
  0x33   : > { %v1708_v2 = vld [vmem:[%s2153_s15 + $0x340] sm:$0xf]  ;;  %v1911_v3 = vld [vmem:[%s2153_s15 + $0x34c] sm:$0xf0]  ;;  %v1581_v6 = vor.u32 %v1879_v1, %v1580_v0  ;;  %980 = vmatpush.bf16.msra.mxu0 %v1325_v4  ;;  %v1893_v48 = vld [vmem:[%s2153_s15 + $0x2c4] sm:$0xf]  ;;  %v1521_v54 = vor.u32 %v1861_v45, %v1518_v47 }
  0x34   : > { %v1308_v7 = vld [vmem:[%s2153_s15 + $0x20] sm:$0xf]  ;;  %v1811_v8 = vld [vmem:[%s2153_s15 + $0x2c] sm:$0xf0]  ;;  %v1709_v10 = vor.u32 %v1911_v3, %v1708_v2  ;;  %993 = vmatpush.bf16.msra.mxu1 %v1453_v5  ;;  %v1646_v49 = vld [vmem:[%s2153_s15 + $0x2d0] sm:$0xf0] }
  0x35   : > { %v1436_v9 = vld [vmem:[%s2153_s15 + $0x120] sm:$0xf]  ;;  %v1843_v11 = vld [vmem:[%s2153_s15 + $0x12c] sm:$0xf0]  ;;  %v1309_v16 = vor.u32 %v1811_v8, %v1308_v7  ;;  %1006 = vmatpush.bf16.msra.mxu2 %v1581_v6  ;;  %v1925_v50 = vld [vmem:[%s2153_s15 + $0x3c4] sm:$0xf]  ;;  %v1649_v55 = vor.u32 %v1893_v48, %v1646_v49 }
  0x36   : > { %v1564_v12 = vld [vmem:[%s2153_s15 + $0x220] sm:$0xf]  ;;  %v1875_v13 = vld [vmem:[%s2153_s15 + $0x22c] sm:$0xf0]  ;;  %v1437_v19 = vor.u32 %v1843_v11, %v1436_v9  ;;  %1019 = vmatpush.bf16.msra.mxu3 %v1709_v10  ;;  %v1774_v51 = vld [vmem:[%s2153_s15 + $0x3d0] sm:$0xf0] }
  0x37   : > { %v1692_v14 = vld [vmem:[%s2153_s15 + $0x320] sm:$0xf]  ;;  %v1907_v15 = vld [vmem:[%s2153_s15 + $0x32c] sm:$0xf0]  ;;  %v1565_v20 = vor.u32 %v1875_v13, %v1564_v12  ;;  %981 = vmatpush.bf16.msra.mxu0 %v1309_v16  ;;  %v196_v52 = vld [vmem:[%s2464_s0] sm:$0xf]  ;;  %v1777_v59 = vor.u32 %v1925_v50, %v1774_v51 }
  0x38   : > { %v1292_v17 = vld [vmem:[%s2153_s15] sm:$0xf]  ;;  %v1807_v18 = vld [vmem:[%s2153_s15 + $0xc] sm:$0xf0]  ;;  %v1693_v24 = vor.u32 %v1907_v15, %v1692_v14  ;;  %994 = vmatpush.bf16.msra.mxu1 %v1437_v19  ;;  %326 = vst [vmem:[#allocation1] ss:$9 sm:$0xff] %v196_v52 }
  0x39   : > { %v1420_v21 = vld [vmem:[%s2153_s15 + $0x100] sm:$0xf]  ;;  %v1839_v22 = vld [vmem:[%s2153_s15 + $0x10c] sm:$0xf0]  ;;  %v1293_v31 = vor.u32 %v1807_v18, %v1292_v17  ;;  %1007 = vmatpush.bf16.msra.mxu2 %v1565_v20  ;;  %v1825_v56 = vld [vmem:[%s2153_s15 + $0xa4] sm:$0xf] }
  0x3a   : > { %v1548_v23 = vld [vmem:[%s2153_s15 + $0x200] sm:$0xf]  ;;  %v1871_v25 = vld [vmem:[%s2153_s15 + $0x20c] sm:$0xf0]  ;;  %v1421_v35 = vor.u32 %v1839_v22, %v1420_v21  ;;  %1020 = vmatpush.bf16.msra.mxu3 %v1693_v24  ;;  %v1374_v57 = vld [vmem:[%s2153_s15 + $0xb0] sm:$0xf0] }
  0x3b   : > { %v1676_v26 = vld [vmem:[%s2153_s15 + $0x300] sm:$0xf]  ;;  %v1903_v27 = vld [vmem:[%s2153_s15 + $0x30c] sm:$0xf0]  ;;  %v1549_v36 = vor.u32 %v1871_v25, %v1548_v23  ;;  %982 = vmatpush.bf16.msra.mxu0 %v1293_v31  ;;  %v1857_v58 = vld [vmem:[%s2153_s15 + $0x1a4] sm:$0xf]  ;;  %v1377_v1 = vor.u32 %v1825_v56, %v1374_v57 }
  0x3c   : > { %v1677_v39 = vor.u32 %v1903_v27, %v1676_v26  ;;  %995 = vmatpush.bf16.msra.mxu1 %v1421_v35  ;;  %v1502_v60 = vld [vmem:[%s2153_s15 + $0x1b0] sm:$0xf0]  ;;  %v1889_v61 = vld [vmem:[%s2153_s15 + $0x2a4] sm:$0xf] }
  0x3d   : > { %1008 = vmatpush.bf16.msra.mxu2 %v1549_v36  ;;  %v1630_v62 = vld [vmem:[%s2153_s15 + $0x2b0] sm:$0xf0]  ;;  %v1921_v63 = vld [vmem:[%s2153_s15 + $0x3a4] sm:$0xf]  ;;  %v1505_v3 = vor.u32 %v1857_v58, %v1502_v60 }
  0x3e   : > { %1021 = vmatpush.bf16.msra.mxu3 %v1677_v39  ;;  %v1758_v0 = vld [vmem:[%s2153_s15 + $0x3b0] sm:$0xf0]  ;;  %v1821_v2 = vld [vmem:[%s2153_s15 + $0x84] sm:$0xf]  ;;  %v1633_v4 = vor.u32 %v1889_v61, %v1630_v62 }
  0x3f   : > { %1027 = vmatpush.bf16.msrb.mxu0 %v1409_v40  ;;  %v1358_v5 = vld [vmem:[%s2153_s15 + $0x90] sm:$0xf0]  ;;  %v1853_v6 = vld [vmem:[%s2153_s15 + $0x184] sm:$0xf]  ;;  %v1761_v8 = vor.u32 %v1921_v63, %v1758_v0  ;;  %v2258_v13 = vld [vmem:[#allocation1 + $0x12] sm:$0xff] }
  0x40   : > { %1040 = vmatpush.bf16.msrb.mxu1 %v1537_v41  ;;  %v1486_v7 = vld [vmem:[%s2153_s15 + $0x190] sm:$0xf0]  ;;  %v1885_v9 = vld [vmem:[%s2153_s15 + $0x284] sm:$0xf]  ;;  %v2260_v14 = vld [vmem:[#allocation1] sm:$0xff]  ;;  %v1361_v15 = vor.u32 %v1821_v2, %v1358_v5  ;;  %1009 = vmatmul.bf16.vlgmr.msra.gmra.mxu2 %v2258_v13 }
  0x41   : > { %1053 = vmatpush.bf16.msrb.mxu2 %v1665_v42  ;;  %v1614_v10 = vld [vmem:[%s2153_s15 + $0x290] sm:$0xf0]  ;;  %v1917_v11 = vld [vmem:[%s2153_s15 + $0x384] sm:$0xf]  ;;  %v1489_v18 = vor.u32 %v1853_v6, %v1486_v7  ;;  %983 = vmatmul.bf16.vlgmr.msra.gmra.mxu0 %v2260_v14  ;;  %v1836_v2 = vld [vmem:[%s2153_s15 + $0xf4] sm:$0xf0] }
  0x42   : > { %1066 = vmatpush.bf16.msrb.mxu3 %v1793_v46  ;;  %v1742_v12 = vld [vmem:[%s2153_s15 + $0x390] sm:$0xf0]  ;;  %v2265_v17 = vld [vmem:[#allocation1 + $0x9] sm:$0xff]  ;;  %v1617_v19 = vor.u32 %v1885_v9, %v1614_v10  ;;  %v1868_v5 = vld [vmem:[%s2153_s15 + $0x1f4] sm:$0xf0] }
  0x43   : > { %1028 = vmatpush.bf16.msrb.mxu0 %v1393_v53  ;;  %v2263_v16 = vld [vmem:[#allocation1 + $0x1b] sm:$0xff]  ;;  %v1817_v20 = vld [vmem:[%s2153_s15 + $0x64] sm:$0xf]  ;;  %v1745_v23 = vor.u32 %v1917_v11, %v1742_v12  ;;  %996 = vmatmul.bf16.vlgmr.msra.gmra.mxu1 %v2265_v17  ;;  %v1668_v6 = vld [vmem:[%s2153_s15 + $0x2e8] sm:$0xf] }
  0x44   : > { %1041 = vmatpush.bf16.msrb.mxu1 %v1521_v54  ;;  %v1342_v21 = vld [vmem:[%s2153_s15 + $0x70] sm:$0xf0]  ;;  %v1849_v22 = vld [vmem:[%s2153_s15 + $0x164] sm:$0xf]  ;;  %1022 = vmatmul.bf16.vlgmr.msra.gmra.mxu3 %v2263_v16  ;;  %v1900_v7 = vld [vmem:[%s2153_s15 + $0x2f4] sm:$0xf0] }
  0x45   : > { %1054 = vmatpush.bf16.msrb.mxu2 %v1649_v55  ;;  %v1470_v24 = vld [vmem:[%s2153_s15 + $0x170] sm:$0xf0]  ;;  %v1881_v25 = vld [vmem:[%s2153_s15 + $0x264] sm:$0xf]  ;;  %v1345_v29 = vor.u32 %v1817_v20, %v1342_v21  ;;  %v1796_v10 = vld [vmem:[%s2153_s15 + $0x3e8] sm:$0xf] }
  0x46   : > { %1067 = vmatpush.bf16.msrb.mxu3 %v1777_v59  ;;  %v1598_v26 = vld [vmem:[%s2153_s15 + $0x270] sm:$0xf0]  ;;  %v1913_v27 = vld [vmem:[%s2153_s15 + $0x364] sm:$0xf]  ;;  %v1473_v30 = vor.u32 %v1849_v22, %v1470_v24  ;;  %v1932_v11 = vld [vmem:[%s2153_s15 + $0x3f4] sm:$0xf0] }
  0x47   : > { %1029 = vmatpush.bf16.msrb.mxu0 %v1377_v1  ;;  %v1726_v28 = vld [vmem:[%s2153_s15 + $0x370] sm:$0xf0]  ;;  %v1601_v31 = vor.u32 %v1881_v25, %v1598_v26  ;;  %v1813_v32 = vld [vmem:[%s2153_s15 + $0x44] sm:$0xf]  ;;  %v1412_v1 = vld [vmem:[%s2153_s15 + $0xe8] sm:$0xf] }
  0x48   : > { %1042 = vmatpush.bf16.msrb.mxu1 %v1505_v3  ;;  %v1326_v33 = vld [vmem:[%s2153_s15 + $0x50] sm:$0xf0]  ;;  %v1845_v34 = vld [vmem:[%s2153_s15 + $0x144] sm:$0xf]  ;;  %v1729_v35 = vor.u32 %v1913_v27, %v1726_v28  ;;  %v1540_v3 = vld [vmem:[%s2153_s15 + $0x1e8] sm:$0xf] }
  0x49   : > { %1055 = vmatpush.bf16.msrb.mxu2 %v1633_v4  ;;  %v1454_v36 = vld [vmem:[%s2153_s15 + $0x150] sm:$0xf0]  ;;  %v1877_v37 = vld [vmem:[%s2153_s15 + $0x244] sm:$0xf]  ;;  %v1329_v41 = vor.u32 %v1813_v32, %v1326_v33  ;;  %v1396_v20 = vld [vmem:[%s2153_s15 + $0xc8] sm:$0xf] }
  0x4a   : > { %1068 = vmatpush.bf16.msrb.mxu3 %v1761_v8  ;;  %v1582_v38 = vld [vmem:[%s2153_s15 + $0x250] sm:$0xf0]  ;;  %v1909_v39 = vld [vmem:[%s2153_s15 + $0x344] sm:$0xf]  ;;  %v1457_v42 = vor.u32 %v1845_v34, %v1454_v36  ;;  %v1832_v21 = vld [vmem:[%s2153_s15 + $0xd4] sm:$0xf0] }
  0x4b   : > { %1030 = vmatpush.bf16.msrb.mxu0 %v1361_v15  ;;  %v1710_v40 = vld [vmem:[%s2153_s15 + $0x350] sm:$0xf0]  ;;  %v1585_v43 = vor.u32 %v1877_v37, %v1582_v38  ;;  %v1809_v44 = vld [vmem:[%s2153_s15 + $0x24] sm:$0xf]  ;;  %v1413_v15 = vor.u32 %v1836_v2, %v1412_v1  ;;  %v1524_v22 = vld [vmem:[%s2153_s15 + $0x1c8] sm:$0xf] }
  0x4c   : > { %1043 = vmatpush.bf16.msrb.mxu1 %v1489_v18  ;;  %v1310_v45 = vld [vmem:[%s2153_s15 + $0x30] sm:$0xf0]  ;;  %v1841_v46 = vld [vmem:[%s2153_s15 + $0x124] sm:$0xf]  ;;  %v1713_v47 = vor.u32 %v1909_v39, %v1710_v40  ;;  %v1541_v18 = vor.u32 %v1868_v5, %v1540_v3  ;;  %v1864_v24 = vld [vmem:[%s2153_s15 + $0x1d4] sm:$0xf0] }
  0x4d   : > { %1056 = vmatpush.bf16.msrb.mxu2 %v1617_v19  ;;  %v1438_v48 = vld [vmem:[%s2153_s15 + $0x130] sm:$0xf0]  ;;  %v1873_v49 = vld [vmem:[%s2153_s15 + $0x224] sm:$0xf]  ;;  %v1313_v53 = vor.u32 %v1809_v44, %v1310_v45  ;;  %v1669_v19 = vor.u32 %v1900_v7, %v1668_v6  ;;  %v1652_v25 = vld [vmem:[%s2153_s15 + $0x2c8] sm:$0xf] }
  0x4e   : > { %1069 = vmatpush.bf16.msrb.mxu3 %v1745_v23  ;;  %v1566_v50 = vld [vmem:[%s2153_s15 + $0x230] sm:$0xf0]  ;;  %v1905_v51 = vld [vmem:[%s2153_s15 + $0x324] sm:$0xf]  ;;  %v1441_v56 = vor.u32 %v1841_v46, %v1438_v48  ;;  %v1797_v23 = vor.u32 %v1932_v11, %v1796_v10  ;;  %v1896_v26 = vld [vmem:[%s2153_s15 + $0x2d4] sm:$0xf0] }
  0x4f   : > { %1031 = vmatpush.bf16.msrb.mxu0 %v1345_v29  ;;  %v1694_v52 = vld [vmem:[%s2153_s15 + $0x330] sm:$0xf0]  ;;  %v1805_v54 = vld [vmem:[%s2153_s15 + $0x4] sm:$0xf]  ;;  %v1569_v57 = vor.u32 %v1873_v49, %v1566_v50  ;;  %v1780_v27 = vld [vmem:[%s2153_s15 + $0x3c8] sm:$0xf]  ;;  %v1397_v29 = vor.u32 %v1832_v21, %v1396_v20 }
  0x50   : > { %1044 = vmatpush.bf16.msrb.mxu1 %v1473_v30  ;;  %v1294_v55 = vld [vmem:[%s2153_s15 + $0x10] sm:$0xf0]  ;;  %v1837_v58 = vld [vmem:[%s2153_s15 + $0x104] sm:$0xf]  ;;  %v1697_v61 = vor.u32 %v1905_v51, %v1694_v52  ;;  %v1928_v28 = vld [vmem:[%s2153_s15 + $0x3d4] sm:$0xf0]  ;;  %v1525_v30 = vor.u32 %v1864_v24, %v1524_v22 }
  0x51   : > { %1057 = vmatpush.bf16.msrb.mxu2 %v1601_v31  ;;  %v1422_v59 = vld [vmem:[%s2153_s15 + $0x110] sm:$0xf0]  ;;  %v1869_v60 = vld [vmem:[%s2153_s15 + $0x204] sm:$0xf]  ;;  %v1297_v4 = vor.u32 %v1805_v54, %v1294_v55  ;;  %v1653_v31 = vor.u32 %v1896_v26, %v1652_v25  ;;  %v1380_v32 = vld [vmem:[%s2153_s15 + $0xa8] sm:$0xf] }
  0x52   : > { %1070 = vmatpush.bf16.msrb.mxu3 %v1729_v35  ;;  %v1550_v62 = vld [vmem:[%s2153_s15 + $0x210] sm:$0xf0]  ;;  %v1901_v63 = vld [vmem:[%s2153_s15 + $0x304] sm:$0xf]  ;;  %v1425_v8 = vor.u32 %v1837_v58, %v1422_v59  ;;  %v1828_v33 = vld [vmem:[%s2153_s15 + $0xb4] sm:$0xf0]  ;;  %v1781_v35 = vor.u32 %v1928_v28, %v1780_v27 }
  0x53   : > { %1032 = vmatpush.bf16.msrb.mxu0 %v1329_v41  ;;  %v1678_v0 = vld [vmem:[%s2153_s15 + $0x310] sm:$0xf0]  ;;  %v1553_v9 = vor.u32 %v1869_v60, %v1550_v62  ;;  %v1508_v34 = vld [vmem:[%s2153_s15 + $0x1a8] sm:$0xf]  ;;  %v1860_v36 = vld [vmem:[%s2153_s15 + $0x1b4] sm:$0xf0]  ;;  %v1381_v41 = vor.u32 %v1828_v33, %v1380_v32 }
  0x54   : > { %1045 = vmatpush.bf16.msrb.mxu1 %v1457_v42  ;;  %v1681_v12 = vor.u32 %v1901_v63, %v1678_v0  ;;  %v1636_v37 = vld [vmem:[%s2153_s15 + $0x2a8] sm:$0xf]  ;;  %v1892_v38 = vld [vmem:[%s2153_s15 + $0x2b4] sm:$0xf0]  ;;  %v1509_v42 = vor.u32 %v1860_v36, %v1508_v34 }
  0x55   : > { %1058 = vmatpush.bf16.msrb.mxu2 %v1585_v43  ;;  %v1764_v39 = vld [vmem:[%s2153_s15 + $0x3a8] sm:$0xf]  ;;  %v1924_v40 = vld [vmem:[%s2153_s15 + $0x3b4] sm:$0xf0]  ;;  %v1637_v43 = vor.u32 %v1892_v38, %v1636_v37 }
  0x56   : > { %1071 = vmatpush.bf16.msrb.mxu3 %v1713_v47  ;;  %v1364_v44 = vld [vmem:[%s2153_s15 + $0x88] sm:$0xf]  ;;  %v1824_v45 = vld [vmem:[%s2153_s15 + $0x94] sm:$0xf0]  ;;  %v1765_v47 = vor.u32 %v1924_v40, %v1764_v39 }
  0x57   : > { %1033 = vmatpush.bf16.msrb.mxu0 %v1313_v53  ;;  %v1492_v46 = vld [vmem:[%s2153_s15 + $0x188] sm:$0xf]  ;;  %v1856_v48 = vld [vmem:[%s2153_s15 + $0x194] sm:$0xf0]  ;;  %v1365_v53 = vor.u32 %v1824_v45, %v1364_v44  ;;  %v1542_v45 = vld [vmem:[%s2153_s15 + $0x1f8] sm:$0xf0] }
  0x58   : > { %1046 = vmatpush.bf16.msrb.mxu1 %v1441_v56  ;;  %v1620_v49 = vld [vmem:[%s2153_s15 + $0x288] sm:$0xf]  ;;  %v1888_v50 = vld [vmem:[%s2153_s15 + $0x294] sm:$0xf0]  ;;  %v1493_v54 = vor.u32 %v1856_v48, %v1492_v46  ;;  %v1898_v46 = vld [vmem:[%s2153_s15 + $0x2ec] sm:$0xf] }
  0x59   : > { %1059 = vmatpush.bf16.msrb.mxu2 %v1569_v57  ;;  %v1748_v51 = vld [vmem:[%s2153_s15 + $0x388] sm:$0xf]  ;;  %v1920_v52 = vld [vmem:[%s2153_s15 + $0x394] sm:$0xf0]  ;;  %v1621_v55 = vor.u32 %v1888_v50, %v1620_v49  ;;  %v1930_v50 = vld [vmem:[%s2153_s15 + $0x3ec] sm:$0xf] }
  0x5a   : > { %1072 = vmatpush.bf16.msrb.mxu3 %v1697_v61  ;;  %v1348_v56 = vld [vmem:[%s2153_s15 + $0x68] sm:$0xf]  ;;  %v1820_v57 = vld [vmem:[%s2153_s15 + $0x74] sm:$0xf0]  ;;  %v1749_v59 = vor.u32 %v1920_v52, %v1748_v51  ;;  %v1798_v51 = vld [vmem:[%s2153_s15 + $0x3f8] sm:$0xf0] }
  0x5b   : > { %1034 = vmatpush.bf16.msrb.mxu0 %v1297_v4  ;;  %v1476_v58 = vld [vmem:[%s2153_s15 + $0x168] sm:$0xf]  ;;  %v1852_v60 = vld [vmem:[%s2153_s15 + $0x174] sm:$0xf0]  ;;  %v1349_v1 = vor.u32 %v1820_v57, %v1348_v56  ;;  %v1830_v56 = vld [vmem:[%s2153_s15 + $0xcc] sm:$0xf] }
  0x5c   : > { %1047 = vmatpush.bf16.msrb.mxu1 %v1425_v8  ;;  %v1604_v61 = vld [vmem:[%s2153_s15 + $0x268] sm:$0xf]  ;;  %v1884_v62 = vld [vmem:[%s2153_s15 + $0x274] sm:$0xf0]  ;;  %v1477_v2 = vor.u32 %v1852_v60, %v1476_v58  ;;  %v1398_v57 = vld [vmem:[%s2153_s15 + $0xd8] sm:$0xf0] }
  0x5d   : > { %1060 = vmatpush.bf16.msrb.mxu2 %v1553_v9  ;;  %v1732_v63 = vld [vmem:[%s2153_s15 + $0x368] sm:$0xf]  ;;  %v1916_v0 = vld [vmem:[%s2153_s15 + $0x374] sm:$0xf0]  ;;  %v1605_v3 = vor.u32 %v1884_v62, %v1604_v61  ;;  %v1862_v58 = vld [vmem:[%s2153_s15 + $0x1cc] sm:$0xf] }
  0x5e   : > { %1073 = vmatpush.bf16.msrb.mxu3 %v1681_v12  ;;  %1035 = vmatmul.bf16.vlgmr.msrb.gmra.mxu0 %v2260_v14  ;;  %v1332_v4 = vld [vmem:[%s2153_s15 + $0x48] sm:$0xf]  ;;  %v1816_v5 = vld [vmem:[%s2153_s15 + $0x54] sm:$0xf0]  ;;  %v1733_v7 = vor.u32 %v1916_v0, %v1732_v63  ;;  %v1526_v60 = vld [vmem:[%s2153_s15 + $0x1d8] sm:$0xf0] }
  0x5f   : > { %1079 = vmatpush.bf16.msra.mxu0 %v1413_v15  ;;  %1048 = vmatmul.bf16.vlgmr.msrb.gmra.mxu1 %v2265_v17  ;;  %v1460_v6 = vld [vmem:[%s2153_s15 + $0x148] sm:$0xf]  ;;  %v1848_v8 = vld [vmem:[%s2153_s15 + $0x154] sm:$0xf0]  ;;  %v1333_v15 = vor.u32 %v1816_v5, %v1332_v4  ;;  %v1894_v61 = vld [vmem:[%s2153_s15 + $0x2cc] sm:$0xf] }
  0x60   : > { %1092 = vmatpush.bf16.msra.mxu1 %v1541_v18  ;;  %1061 = vmatmul.bf16.vlgmr.msrb.gmra.mxu2 %v2258_v13  ;;  %v1588_v9 = vld [vmem:[%s2153_s15 + $0x248] sm:$0xf]  ;;  %v1880_v10 = vld [vmem:[%s2153_s15 + $0x254] sm:$0xf0]  ;;  %v1461_v18 = vor.u32 %v1848_v8, %v1460_v6  ;;  %v1654_v62 = vld [vmem:[%s2153_s15 + $0x2d8] sm:$0xf0] }
  0x61   : > { %1105 = vmatpush.bf16.msra.mxu2 %v1669_v19  ;;  %1074 = vmatmul.bf16.vlgmr.msrb.gmra.mxu3 %v2263_v16  ;;  %v1716_v11 = vld [vmem:[%s2153_s15 + $0x348] sm:$0xf]  ;;  %v1912_v12 = vld [vmem:[%s2153_s15 + $0x354] sm:$0xf0]  ;;  %v1589_v19 = vor.u32 %v1880_v10, %v1588_v9  ;;  %v1926_v63 = vld [vmem:[%s2153_s15 + $0x3cc] sm:$0xf] }
  0x62   : > { %1118 = vmatpush.bf16.msra.mxu3 %v1797_v23  ;;  %v1316_v20 = vld [vmem:[%s2153_s15 + $0x28] sm:$0xf]  ;;  %v1812_v21 = vld [vmem:[%s2153_s15 + $0x34] sm:$0xf0]  ;;  %v1717_v23 = vor.u32 %v1912_v12, %v1716_v11  ;;  %v1782_v0 = vld [vmem:[%s2153_s15 + $0x3d8] sm:$0xf0] }
  0x63   : > { %1080 = vmatpush.bf16.msra.mxu0 %v1397_v29  ;;  %v1444_v22 = vld [vmem:[%s2153_s15 + $0x128] sm:$0xf]  ;;  %v1844_v24 = vld [vmem:[%s2153_s15 + $0x134] sm:$0xf0]  ;;  %v1317_v29 = vor.u32 %v1812_v21, %v1316_v20  ;;  %v1826_v4 = vld [vmem:[%s2153_s15 + $0xac] sm:$0xf] }
  0x64   : > { %1093 = vmatpush.bf16.msra.mxu1 %v1525_v30  ;;  %v1572_v25 = vld [vmem:[%s2153_s15 + $0x228] sm:$0xf]  ;;  %v1876_v26 = vld [vmem:[%s2153_s15 + $0x234] sm:$0xf0]  ;;  %v1445_v32 = vor.u32 %v1844_v24, %v1444_v22  ;;  %v1382_v5 = vld [vmem:[%s2153_s15 + $0xb8] sm:$0xf0] }
  0x65   : > { %1106 = vmatpush.bf16.msra.mxu2 %v1653_v31  ;;  %v1700_v27 = vld [vmem:[%s2153_s15 + $0x328] sm:$0xf]  ;;  %v1908_v28 = vld [vmem:[%s2153_s15 + $0x334] sm:$0xf0]  ;;  %v1573_v33 = vor.u32 %v1876_v26, %v1572_v25  ;;  %v1858_v6 = vld [vmem:[%s2153_s15 + $0x1ac] sm:$0xf] }
  0x66   : > { %1119 = vmatpush.bf16.msra.mxu3 %v1781_v35  ;;  %v1300_v30 = vld [vmem:[%s2153_s15 + $0x8] sm:$0xf]  ;;  %v1808_v31 = vld [vmem:[%s2153_s15 + $0x14] sm:$0xf0]  ;;  %v1701_v37 = vor.u32 %v1908_v28, %v1700_v27  ;;  %v1510_v8 = vld [vmem:[%s2153_s15 + $0x1b8] sm:$0xf0] }
  0x67   : > { %1081 = vmatpush.bf16.msra.mxu0 %v1381_v41  ;;  %v1428_v34 = vld [vmem:[%s2153_s15 + $0x108] sm:$0xf]  ;;  %v1840_v35 = vld [vmem:[%s2153_s15 + $0x114] sm:$0xf0]  ;;  %v1834_v41 = vld [vmem:[%s2153_s15 + $0xec] sm:$0xf]  ;;  %v1301_v44 = vor.u32 %v1808_v31, %v1300_v30 }
  0x68   : > { %1094 = vmatpush.bf16.msra.mxu1 %v1509_v42  ;;  %v1556_v36 = vld [vmem:[%s2153_s15 + $0x208] sm:$0xf]  ;;  %v1872_v38 = vld [vmem:[%s2153_s15 + $0x214] sm:$0xf0]  ;;  %v1414_v42 = vld [vmem:[%s2153_s15 + $0xf8] sm:$0xf0]  ;;  %v1429_v48 = vor.u32 %v1840_v35, %v1428_v34 }
  0x69   : > { %1107 = vmatpush.bf16.msra.mxu2 %v1637_v43  ;;  %v1684_v39 = vld [vmem:[%s2153_s15 + $0x308] sm:$0xf]  ;;  %v1904_v40 = vld [vmem:[%s2153_s15 + $0x314] sm:$0xf0]  ;;  %v1866_v43 = vld [vmem:[%s2153_s15 + $0x1ec] sm:$0xf]  ;;  %v1557_v49 = vor.u32 %v1872_v38, %v1556_v36 }
  0x6a   : > { %1120 = vmatpush.bf16.msra.mxu3 %v1765_v47  ;;  %v1670_v47 = vld [vmem:[%s2153_s15 + $0x2f8] sm:$0xf0]  ;;  %v1685_v52 = vor.u32 %v1904_v40, %v1684_v39  ;;  %v1890_v9 = vld [vmem:[%s2153_s15 + $0x2ac] sm:$0xf] }
  0x6b   : > { %1082 = vmatpush.bf16.msra.mxu0 %v1365_v53  ;;  %v1417_v53 = vor.u32 %v1834_v41, %v1414_v42  ;;  %v1638_v10 = vld [vmem:[%s2153_s15 + $0x2b8] sm:$0xf0]  ;;  %v1922_v11 = vld [vmem:[%s2153_s15 + $0x3ac] sm:$0xf] }
  0x6c   : > { %1095 = vmatpush.bf16.msra.mxu1 %v1493_v54  ;;  %v1545_v54 = vor.u32 %v1866_v43, %v1542_v45  ;;  %v1766_v12 = vld [vmem:[%s2153_s15 + $0x3b8] sm:$0xf0]  ;;  %v1822_v20 = vld [vmem:[%s2153_s15 + $0x8c] sm:$0xf] }
  0x6d   : > { %1108 = vmatpush.bf16.msra.mxu2 %v1621_v55  ;;  %v1673_v55 = vor.u32 %v1898_v46, %v1670_v47  ;;  %v1366_v21 = vld [vmem:[%s2153_s15 + $0x98] sm:$0xf0]  ;;  %v1854_v22 = vld [vmem:[%s2153_s15 + $0x18c] sm:$0xf] }
  0x6e   : > { %1121 = vmatpush.bf16.msra.mxu3 %v1749_v59  ;;  %v1801_v59 = vor.u32 %v1930_v50, %v1798_v51  ;;  %v1494_v24 = vld [vmem:[%s2153_s15 + $0x198] sm:$0xf0]  ;;  %v1886_v25 = vld [vmem:[%s2153_s15 + $0x28c] sm:$0xf] }
  0x6f   : > { %1083 = vmatpush.bf16.msra.mxu0 %v1349_v1  ;;  %v1401_v1 = vor.u32 %v1830_v56, %v1398_v57  ;;  %v1622_v26 = vld [vmem:[%s2153_s15 + $0x298] sm:$0xf0]  ;;  %v1918_v27 = vld [vmem:[%s2153_s15 + $0x38c] sm:$0xf]  ;;  %v1497_v30 = vor.u32 %v1854_v22, %v1494_v24 }
  0x70   : > { %1096 = vmatpush.bf16.msra.mxu1 %v1477_v2  ;;  %v1529_v2 = vor.u32 %v1862_v58, %v1526_v60  ;;  %v1750_v28 = vld [vmem:[%s2153_s15 + $0x398] sm:$0xf0]  ;;  %v1625_v31 = vor.u32 %v1886_v25, %v1622_v26  ;;  %v1850_v34 = vld [vmem:[%s2153_s15 + $0x16c] sm:$0xf] }
  0x71   : > { %1109 = vmatpush.bf16.msra.mxu2 %v1605_v3  ;;  %v1657_v3 = vor.u32 %v1894_v61, %v1654_v62  ;;  %v1753_v35 = vor.u32 %v1918_v27, %v1750_v28  ;;  %v1478_v36 = vld [vmem:[%s2153_s15 + $0x178] sm:$0xf0]  ;;  %v1914_v39 = vld [vmem:[%s2153_s15 + $0x36c] sm:$0xf] }
  0x72   : > { %1122 = vmatpush.bf16.msra.mxu3 %v1733_v7  ;;  %v1785_v7 = vor.u32 %v1926_v63, %v1782_v0  ;;  %v1606_v38 = vld [vmem:[%s2153_s15 + $0x278] sm:$0xf0]  ;;  %v1481_v42 = vor.u32 %v1850_v34, %v1478_v36  ;;  %v1846_v46 = vld [vmem:[%s2153_s15 + $0x14c] sm:$0xf] }
  0x73   : > { %1084 = vmatpush.bf16.msra.mxu0 %v1333_v15  ;;  %v1385_v15 = vor.u32 %v1826_v4, %v1382_v5  ;;  %v1734_v40 = vld [vmem:[%s2153_s15 + $0x378] sm:$0xf0]  ;;  %v1910_v51 = vld [vmem:[%s2153_s15 + $0x34c] sm:$0xf] }
  0x74   : > { %1097 = vmatpush.bf16.msra.mxu1 %v1461_v18  ;;  %v1513_v18 = vor.u32 %v1858_v6, %v1510_v8  ;;  %v1334_v45 = vld [vmem:[%s2153_s15 + $0x58] sm:$0xf0]  ;;  %v1737_v47 = vor.u32 %v1914_v39, %v1734_v40  ;;  %v1810_v56 = vld [vmem:[%s2153_s15 + $0x2c] sm:$0xf] }
  0x75   : > { %1110 = vmatpush.bf16.msra.mxu2 %v1589_v19  ;;  %v1641_v19 = vor.u32 %v1890_v9, %v1638_v10  ;;  %v1590_v50 = vld [vmem:[%s2153_s15 + $0x258] sm:$0xf0]  ;;  %v1842_v58 = vld [vmem:[%s2153_s15 + $0x12c] sm:$0xf] }
  0x76   : > { %1123 = vmatpush.bf16.msra.mxu3 %v1717_v23  ;;  %v1769_v23 = vor.u32 %v1922_v11, %v1766_v12  ;;  %v1318_v57 = vld [vmem:[%s2153_s15 + $0x38] sm:$0xf0]  ;;  %v1874_v61 = vld [vmem:[%s2153_s15 + $0x22c] sm:$0xf] }
  0x77   : > { %1085 = vmatpush.bf16.msra.mxu0 %v1317_v29  ;;  %v1369_v29 = vor.u32 %v1822_v20, %v1366_v21  ;;  %v1446_v60 = vld [vmem:[%s2153_s15 + $0x138] sm:$0xf0]  ;;  %v1906_v63 = vld [vmem:[%s2153_s15 + $0x32c] sm:$0xf] }
  0x78   : > { %1098 = vmatpush.bf16.msra.mxu1 %v1445_v32  ;;  %v1818_v32 = vld [vmem:[%s2153_s15 + $0x6c] sm:$0xf]  ;;  %v1574_v62 = vld [vmem:[%s2153_s15 + $0x238] sm:$0xf0] }
  0x79   : > { %1111 = vmatpush.bf16.msra.mxu2 %v1573_v33  ;;  %v1350_v33 = vld [vmem:[%s2153_s15 + $0x78] sm:$0xf0]  ;;  %v1806_v4 = vld [vmem:[%s2153_s15 + $0xc] sm:$0xf] }
  0x7a   : > { %1124 = vmatpush.bf16.msra.mxu3 %v1701_v37  ;;  %v1882_v37 = vld [vmem:[%s2153_s15 + $0x26c] sm:$0xf]  ;;  %v1353_v41 = vor.u32 %v1818_v32, %v1350_v33  ;;  %v1702_v0 = vld [vmem:[%s2153_s15 + $0x338] sm:$0xf0] }
  0x7b   : > { %1086 = vmatpush.bf16.msra.mxu0 %v1301_v44  ;;  %v1609_v43 = vor.u32 %v1882_v37, %v1606_v38  ;;  %v1814_v44 = vld [vmem:[%s2153_s15 + $0x4c] sm:$0xf]  ;;  %v1302_v5 = vld [vmem:[%s2153_s15 + $0x18] sm:$0xf0] }
  0x7c   : > { %1099 = vmatpush.bf16.msra.mxu1 %v1429_v48  ;;  %v1462_v48 = vld [vmem:[%s2153_s15 + $0x158] sm:$0xf0]  ;;  %v1838_v6 = vld [vmem:[%s2153_s15 + $0x10c] sm:$0xf] }
  0x7d   : > { %1112 = vmatpush.bf16.msra.mxu2 %v1557_v49  ;;  %v1878_v49 = vld [vmem:[%s2153_s15 + $0x24c] sm:$0xf]  ;;  %v1430_v8 = vld [vmem:[%s2153_s15 + $0x118] sm:$0xf0] }
  0x7e   : > { %1125 = vmatpush.bf16.msra.mxu3 %v1685_v52  ;;  %1087 = vmatmul.bf16.vlgmr.msra.gmra.mxu0 %v2260_v14  ;;  %v1718_v52 = vld [vmem:[%s2153_s15 + $0x358] sm:$0xf0]  ;;  %v1870_v9 = vld [vmem:[%s2153_s15 + $0x20c] sm:$0xf] }
  0x7f   : > { %1131 = vmatpush.bf16.msrb.mxu0 %v1417_v53  ;;  %1100 = vmatmul.bf16.vlgmr.msra.gmra.mxu1 %v2265_v17  ;;  %v1337_v53 = vor.u32 %v1814_v44, %v1334_v45  ;;  %v1558_v10 = vld [vmem:[%s2153_s15 + $0x218] sm:$0xf0]  ;;  %v1902_v11 = vld [vmem:[%s2153_s15 + $0x30c] sm:$0xf] }
  0x80   : > { %1144 = vmatpush.bf16.msrb.mxu1 %v1545_v54  ;;  %1113 = vmatmul.bf16.vlgmr.msra.gmra.mxu2 %v2258_v13  ;;  %v1465_v54 = vor.u32 %v1846_v46, %v1462_v48  ;;  %v1686_v12 = vld [vmem:[%s2153_s15 + $0x318] sm:$0xf0] }
  0x81   : > { %1157 = vmatpush.bf16.msrb.mxu2 %v1673_v55  ;;  %1126 = vmatmul.bf16.vlgmr.msra.gmra.mxu3 %v2263_v16  ;;  %v1593_v55 = vor.u32 %v1878_v49, %v1590_v50  ;;  %v1689_v20 = vor.u32 %v1902_v11, %v1686_v12 }
  0x82   : > { %1170 = vmatpush.bf16.msrb.mxu3 %v1801_v59  ;;  %v1721_v59 = vor.u32 %v1910_v51, %v1718_v52 }
  0x83   : > { %1132 = vmatpush.bf16.msrb.mxu0 %v1401_v1  ;;  %v1321_v1 = vor.u32 %v1810_v56, %v1318_v57 }
  0x84   : > { %1145 = vmatpush.bf16.msrb.mxu1 %v1529_v2  ;;  %v1449_v2 = vor.u32 %v1842_v58, %v1446_v60 }
  0x85   : > { %1158 = vmatpush.bf16.msrb.mxu2 %v1657_v3  ;;  %v1577_v3 = vor.u32 %v1874_v61, %v1574_v62 }
  0x86   : > { %1171 = vmatpush.bf16.msrb.mxu3 %v1785_v7  ;;  %v1705_v7 = vor.u32 %v1906_v63, %v1702_v0 }
  0x87   : > { %1133 = vmatpush.bf16.msrb.mxu0 %v1385_v15  ;;  %v1305_v15 = vor.u32 %v1806_v4, %v1302_v5 }
  0x88   : > { %1146 = vmatpush.bf16.msrb.mxu1 %v1513_v18  ;;  %v1433_v18 = vor.u32 %v1838_v6, %v1430_v8 }
  0x89   : > { %1159 = vmatpush.bf16.msrb.mxu2 %v1641_v19  ;;  %v1561_v19 = vor.u32 %v1870_v9, %v1558_v10 }
  0x8a   : > { %1172 = vmatpush.bf16.msrb.mxu3 %v1769_v23 }
  0x8b   : > { %1134 = vmatpush.bf16.msrb.mxu0 %v1369_v29 }
  0x8c   : > { %1147 = vmatpush.bf16.msrb.mxu1 %v1497_v30 }
  0x8d   : > { %1160 = vmatpush.bf16.msrb.mxu2 %v1625_v31 }
  0x8e   : > { %1173 = vmatpush.bf16.msrb.mxu3 %v1753_v35 }
  0x8f   : > { %1135 = vmatpush.bf16.msrb.mxu0 %v1353_v41 }
  0x90   : > { %1148 = vmatpush.bf16.msrb.mxu1 %v1481_v42 }
  0x91   : > { %1161 = vmatpush.bf16.msrb.mxu2 %v1609_v43 }
  0x92   : > { %1174 = vmatpush.bf16.msrb.mxu3 %v1737_v47 }
  0x93   : > { %1136 = vmatpush.bf16.msrb.mxu0 %v1337_v53 }
  0x94   : > { %1149 = vmatpush.bf16.msrb.mxu1 %v1465_v54 }
  0x95   : > { %1162 = vmatpush.bf16.msrb.mxu2 %v1593_v55 }
  0x96   : > { %1175 = vmatpush.bf16.msrb.mxu3 %v1721_v59 }
  0x97   : > { %1137 = vmatpush.bf16.msrb.mxu0 %v1321_v1 }
  0x98   : > { %1150 = vmatpush.bf16.msrb.mxu1 %v1449_v2 }
  0x99   : > { %1163 = vmatpush.bf16.msrb.mxu2 %v1577_v3 }
  0x9a   : > { %1176 = vmatpush.bf16.msrb.mxu3 %v1705_v7 }
  0x9b   : > { %1138 = vmatpush.bf16.msrb.mxu0 %v1305_v15 }
  0x9c   : > { %1151 = vmatpush.bf16.msrb.mxu1 %v1433_v18 }
  0x9d   : > { %1164 = vmatpush.bf16.msrb.mxu2 %v1561_v19 }
  0x9e   : > { %1177 = vmatpush.bf16.msrb.mxu3 %v1689_v20  ;;  %1139 = vmatmul.bf16.vlgmr.msrb.gmra.mxu0 %v2260_v14 }
  0x9f   : > { %1152 = vmatmul.bf16.vlgmr.msrb.gmra.mxu1 %v2265_v17 }
  0xa0   : > { %1165 = vmatmul.bf16.vlgmr.msrb.gmra.mxu2 %v2258_v13 }
  0xa1   : > { %1178 = vmatmul.bf16.vlgmr.msrb.gmra.mxu3 %v2263_v16 }
  0xbe   : > { %v984_v21 = vpop.f32.mrf.mxu0 }
  0xc0   : > { %v997_v22 = vpop.f32.mrf.mxu1 }
  0xc1   : > { %v998_v23 = vadd.f32 %v997_v22, %v984_v21 }
  0xc3   : > { %v1010_v24 = vpop.f32.mrf.mxu2 }
  0xc4   : > { %v1011_v25 = vadd.f32 %v1010_v24, %v998_v23 }
  0xc6   : > { %v986_v28 = vpop.f32.mrf.mxu0 }
  0xc7   : > { %v1023_v26 = vpop.f32.mrf.mxu3 }
  0xc8   : > { %v1024_v27 = vadd.f32 %v1023_v26, %v1011_v25  ;;  %v999_v29 = vpop.f32.mrf.mxu1 }
  0xcb   : > { %v1012_v30 = vpop.f32.mrf.mxu2 }
  0xcf   : > { %v1025_v31 = vpop.f32.mrf.mxu3 }
  0xdb   : > { %v1036_v32 = vpop.f32.mrf.mxu0 }
  0xdc   : > { %v1049_v33 = vpop.f32.mrf.mxu1 }
  0xdd   : > { %v1050_v44 = vadd.f32 %v1049_v33, %v1036_v32 }
  0xe3   : > { %v1062_v14 = vpop.f32.mrf.mxu2  ;;  %v1038_v17 = vpop.f32.mrf.mxu0 }
  0xe4   : > { %v1075_v34 = vpop.f32.mrf.mxu3  ;;  %v1051_v13 = vpop.f32.mrf.mxu1  ;;  %v1063_v48 = vadd.f32 %v1062_v14, %v1050_v44 }
  0xe6   : > { %v1076_v51 = vadd.f32 %v1075_v34, %v1063_v48 }
  0xe8   : > { %v1187_v58 = vrot.slane %v1076_v51, 6 }
  0xea   : > { %v1191_v62 = vsel %vm1190_vm0, %v1024_v27, %v1187_v58 }
  0xeb   : > { %v1064_v35 = vpop.f32.mrf.mxu2 }
  0xec   : > { %v1077_v16 = vpop.f32.mrf.mxu3 }
  0xfb   : > { %v1088_v36 = vpop.f32.mrf.mxu0 }
  0xfc   : > { %v1101_v37 = vpop.f32.mrf.mxu1 }
  0xfd   : > { %v1102_v45 = vadd.f32 %v1101_v37, %v1088_v36 }
 0x103   : > { %v1114_v38 = vpop.f32.mrf.mxu2  ;;  %v1090_v40 = vpop.f32.mrf.mxu0 }
 0x104   : > { %v1127_v39 = vpop.f32.mrf.mxu3  ;;  %v1103_v41 = vpop.f32.mrf.mxu1  ;;  %v1115_v49 = vadd.f32 %v1114_v38, %v1102_v45 }
 0x106   : > { %v1128_v53 = vadd.f32 %v1127_v39, %v1115_v49 }
 0x108   : > { %v1188_v60 = vrot.slane %v1128_v53, 4 }
 0x10b   : > { %v1116_v42 = vpop.f32.mrf.mxu2 }
 0x10c   : > { %v1129_v43 = vpop.f32.mrf.mxu3 }
 0x11b   : > { %v1140_v46 = vpop.f32.mrf.mxu0 }
 0x11c   : > { %v1153_v47 = vpop.f32.mrf.mxu1 }
 0x11d   : > { %v1154_v50 = vadd.f32 %v1153_v47, %v1140_v46 }
 0x123   : > { %v1166_v52 = vpop.f32.mrf.mxu2  ;;  %v1142_v56 = vpop.f32.mrf.mxu0 }
 0x124   : > { %v1167_v54 = vadd.f32 %v1166_v52, %v1154_v50  ;;  %v1179_v55 = vpop.f32.mrf.mxu3  ;;  %v1155_v57 = vpop.f32.mrf.mxu1 }
 0x126   : > { %v1180_v59 = vadd.f32 %v1179_v55, %v1167_v54 }
 0x128   : > { %v1189_v61 = vrot.slane %v1180_v59, 2 }
 0x12a   : > { %v1193_v63 = vsel %vm1192_vm1, %v1188_v60, %v1189_v61 }
 0x12b   : > { %v1195_v0 = vsel %vm1194_vm2, %v1191_v62, %v1193_v63  ;;  %v1168_v1 = vpop.f32.mrf.mxu2 }
 0x12c   : > { %v1181_v2 = vpop.f32.mrf.mxu3  ;;  %1198 = vst [vmem:[%s184_s23] sm:$0xff] %v1195_v0 }
 0x12d PF: > { %s15_s14 = sadd.s32 1, %s2072_s14   ;;  %s2469_s9 = smov %s2056_s10 }
 0x12e   : > { %p12_p0 = scmp.ge.s32.totalorder %s15_s14, 4   ;;  %s2470_s10 = smov %s2060_s11 }
 0x12f   : > { %s2471_s11 = smov %s2141_s21  ;;  %s2472_s12 = smov %s2068_s13 }
 0x130   : > { %s2473_s13 = smov %s2475_s16  ;;  %14 = sbr.rel (!%p12_p0) target bundleno = 4 (0x4), region = 73 }
 0x135   :  { %1221 = vsyncpa [#allocation3], 1 }
 0x136   :  { %1223 = vsyncpa [#allocation3 + $0x1], 1 }

</bundles_post_ra>
